<compile_context>
chip_gen: v7x
topology: tpu7x:2x2x1
jax: 0.10.0
libtpu: 0.0.40
codegen_flags: <defaults>
</compile_context>

<pallas_src>
import numpy as np
import jax
import jax.numpy as jnp
from jax.experimental import pallas as pl
from jax.experimental.pallas import tpu as pltpu

D = 116          # ROI count hard-coded in the PyTorch module (116 x 116 connectome)
P = 128          # lane-padded size (116 -> 128) for dense (8,128) tiles
SLOPE = 0.33     # LeakyReLU negative slope used everywhere in the model


def _leaky(x):
    return jnp.where(x >= 0, x, SLOPE * x)


def _pick_tb(batch, cap=8):
    """Largest divisor of `batch` <= cap that keeps the grid at >= 2 steps (megacore)."""
    best = 1
    for t in range(1, min(cap, batch) + 1):
        if batch % t == 0 and (batch // t >= 2 or batch == 1):
            best = t
    return best


# ----------------------------- fused Pallas kernel -----------------------------

def fused_model_kernel(x_ref, w11t_ref, w21_ref, b1_ref,
                       w22_ref, w12cm_ref, b2_ref,
                       wen_ref, ben_ref,
                       wnt_ref, bn_ref,
                       l1t_ref, bl1_ref, w23t_ref, b23_ref,
                       l4t_ref, b4_ref,
                       o_ref, e_all):
    """One grid step = TB batch elements.

    Per element: E2E(1->8) -> LeakyReLU -> E2E(8->8) -> LeakyReLU -> e2n(8->48) ->
    LeakyReLU, with every per-channel (128,128) slab consumed immediately (accumulated
    into col2 / rowT2 / e) so no large inter-layer scratch exists.  The e2n result
    (48, 128) is parked in the small e_all scratch; the n2g contraction and the linear
    head then run once per grid step, batched over TB (lane-dense (TB, 128) store).
    Padded lanes/sublanes (index >= 116) carry finite garbage that is killed by the
    zero-padded weight entries downstream.
    """
    f32 = jnp.float32
    TB = x_ref.shape[0]

    w11t = w11t_ref[...]            # (P, 8)   [h, o]
    w21 = w21_ref[...]              # (8, P)   [o, w]
    b1 = b1_ref[...]                # (8, 1)
    b2 = b2_ref[...]                # (8, 1)
    ben = ben_ref[...]              # (48, 1)

    @pl.loop(0, TB)
    def _(b):
        # In-kernel transpose (XLU): At[w, h] = x[h, w]; padded region is exact zeros.
        At = jnp.transpose(x_ref[b])                                        # (P, P)

        # ---- E2E layer 1 (1 -> 8 channels) ----
        rowT1 = jnp.dot(At, w11t, preferred_element_type=f32)               # (P, 8) [w, o]
        col1 = jnp.dot(w21, At, preferred_element_type=f32) + b1            # (8, P) [o, h]

        # ---- E2E layer 2 (8 -> 8): consume each layer-1 channel slab immediately ----
        col2 = jnp.zeros((8, P), f32)
        rowT2 = jnp.zeros((P, 8), f32)
        for c in range(8):
            slab = _leaky(rowT1[:, c:c + 1] + col1[c:c + 1, :])             # (P, P) [w, h]
            col2 = col2 + jnp.dot(w22_ref[c], slab, preferred_element_type=f32)
            rowT2 = rowT2 + jnp.dot(slab, w12cm_ref[c], preferred_element_type=f32)
        col2 = col2 + b2

        # ---- e2n Conv2d(8, 48, (1, D)): consume each layer-2 channel slab immediately ----
        e = jnp.zeros((48, P), f32)
        for c in range(8):
            slab2 = _leaky(rowT2[:, c:c + 1] + col2[c:c + 1, :])            # (P, P) [w, h]
            e = e + jnp.dot(wen_ref[c], slab2, preferred_element_type=f32)
        e_all[b] = _leaky(e + ben)                                          # (48, P) [k, h]

    # ---- n2g Conv2d(48, D, (D, 1)) + linear head, batched over the TB block ----
    g = jnp.zeros((TB, P), f32)
    for k in range(48):
        g = g + jnp.dot(e_all[:, k, :], wnt_ref[k], preferred_element_type=f32)
    g = _leaky(g + bn_ref[...])                                             # (TB, P)
    h = _leaky(jnp.dot(g, l1t_ref[...], preferred_element_type=f32) + bl1_ref[...])   # Dropout -> id (eval)
    # l2 and l3 have no activation between them -> pre-composed into one matmul.
    h = _leaky(jnp.dot(h, w23t_ref[...], preferred_element_type=f32) + b23_ref[...])  # Dropout -> id (eval)
    out = jnp.dot(h, l4t_ref[...], preferred_element_type=f32) + b4_ref[...]          # (TB, P), col 0 = logit
    # F.softmax(...) in Model.Line is computed but its result is discarded by PyTorch.
    o_ref[0] = out.astype(o_ref.dtype)


# ----------------------------- one-time weight preparation -----------------------------

def prepare_params(p):
    """One-time weight preprocessing (padding / transposes / l2@l3 composition).

    Every pad is a ZERO pad -- this is what makes the in-kernel padded-lane garbage
    provably vanish.  Call once, outside the per-call jitted forward.
    """
    pad = P - D
    q = {}
    q['w11t'] = jnp.pad(p['e2e1_w1'][:, 0, :].T, ((0, pad), (0, 0)))                          # (P, 8)  [h, o]
    q['w21'] = jnp.pad(p['e2e1_w2'][:, 0, :], ((0, 0), (0, pad)))                             # (8, P)  [o, w]
    q['b1'] = (p['e2e1_b1'] + p['e2e1_b2']).reshape(8, 1)
    q['w22'] = jnp.pad(jnp.transpose(p['e2e2_w2'], (1, 0, 2)), ((0, 0), (0, 0), (0, pad)))    # (8, 8, P)  [c, o, w]
    q['w12cm'] = jnp.pad(jnp.transpose(p['e2e2_w1'], (1, 2, 0)), ((0, 0), (0, pad), (0, 0)))  # (8, P, 8)  [c, h, o]
    q['b2'] = (p['e2e2_b1'] + p['e2e2_b2']).reshape(8, 1)
    q['wen'] = jnp.pad(jnp.transpose(p['e2n_w'], (1, 0, 2)), ((0, 0), (0, 0), (0, pad)))      # (8, 48, P) [c, k, w]
    q['ben'] = p['e2n_b'].reshape(48, 1)
    q['wnt'] = jnp.pad(jnp.transpose(p['n2g_w'], (1, 2, 0)), ((0, 0), (0, pad), (0, pad)))    # (48, P, P) [k, h, j]
    q['bn'] = jnp.pad(p['n2g_b'].reshape(1, D), ((0, 0), (0, pad)))                           # (1, P)
    q['l1t'] = jnp.pad(p['l1_w'].T, ((0, pad), (0, 0)))                                       # (P, 64)
    q['bl1'] = p['l1_b'].reshape(1, 64)
    w23 = p['l3_w'] @ p['l2_w']                         # (10, 64)
    b23 = p['l3_w'] @ p['l2_b'] + p['l3_b']             # (10,)
    q['w23t'] = w23.T                                                                         # (64, 10)
    q['b23'] = b23.reshape(1, 10)
    q['l4t'] = jnp.pad(p['l4_w'].T, ((0, 0), (0, P - 1)))                                     # (10, P), col 0 real
    q['b4'] = jnp.pad(p['l4_b'].reshape(1, 1), ((0, 0), (0, P - 1)))                          # (1, P)
    return jax.tree_util.tree_map(lambda a: jnp.asarray(a, jnp.float32), q)


# ----------------------------- forward wrapper -----------------------------

def _forward_impl(x, q, num_class=1):
    B = x.shape[0]
    TB = _pick_tb(B)
    NB = B // TB
    pad = P - D
    # Only a zero-pad on the host (single cheap pass); the transpose happens in-kernel.
    x_pad = jnp.pad(x[:, 0].astype(jnp.float32), ((0, 0), (0, pad), (0, pad)))    # (B, P, P)

    c2 = lambda i: (0, 0)
    c3 = lambda i: (0, 0, 0)
    out3 = pl.pallas_call(
        fused_model_kernel,
        out_shape=jax.ShapeDtypeStruct((NB, TB, P), jnp.float32),
        grid=(NB,),
        in_specs=[
            pl.BlockSpec((TB, P, P), lambda i: (i, 0, 0)),   # x, batch-blocked
            pl.BlockSpec((P, 8), c2),        # w11t
            pl.BlockSpec((8, P), c2),        # w21
            pl.BlockSpec((8, 1), c2),        # b1
            pl.BlockSpec((8, 8, P), c3),     # w22
            pl.BlockSpec((8, P, 8), c3),     # w12cm
            pl.BlockSpec((8, 1), c2),        # b2
            pl.BlockSpec((8, 48, P), c3),    # wen
            pl.BlockSpec((48, 1), c2),       # ben
            pl.BlockSpec((48, P, P), c3),    # wnt (~3 MiB, VMEM-resident)
            pl.BlockSpec((1, P), c2),        # bn
            pl.BlockSpec((P, 64), c2),       # l1t
            pl.BlockSpec((1, 64), c2),       # bl1
            pl.BlockSpec((64, 10), c2),      # w23t
            pl.BlockSpec((1, 10), c2),       # b23
            pl.BlockSpec((10, P), c2),       # l4t
            pl.BlockSpec((1, P), c2),        # b4
        ],
        out_specs=pl.BlockSpec((1, TB, P), lambda i: (i, 0, 0)),
        scratch_shapes=[pltpu.VMEM((TB, 48, P), jnp.float32)],   # e2n activations for TB elems
        compiler_params=pltpu.CompilerParams(
            dimension_semantics=("parallel",)),   # batch blocks independent -> 2 TCs on v7x
    )(x_pad, q['w11t'], q['w21'], q['b1'],
      q['w22'], q['w12cm'], q['b2'],
      q['wen'], q['ben'],
      q['wnt'], q['bn'],
      q['l1t'], q['bl1'], q['w23t'], q['b23'],
      q['l4t'], q['b4'])
    return out3.reshape(B, P)[:, :num_class]


model_forward = jax.jit(_forward_impl)


# ----------------------------- params & pure-JAX reference -----------------------------

def init_params(key):
    ks = jax.random.split(key, 16)
    u = lambda k, shape, s=0.05: jax.random.uniform(k, shape, jnp.float32, -s, s)
    p = {}
    # E2E(1, 8, (116,116)): conv(d,1) weight (8,1,116,1) and conv(1,d) weight (8,1,1,116), squeezed.
    p['e2e1_w1'] = u(ks[0], (8, 1, D)); p['e2e1_b1'] = u(ks[1], (8,))
    p['e2e1_w2'] = u(ks[2], (8, 1, D)); p['e2e1_b2'] = u(ks[3], (8,))
    # E2E(8, 8, (116,116))
    p['e2e2_w1'] = u(ks[4], (8, 8, D)); p['e2e2_b1'] = u(ks[5], (8,))
    p['e2e2_w2'] = u(ks[6], (8, 8, D)); p['e2e2_b2'] = u(ks[7], (8,))
    # e2n: Conv2d(8, 48, (1,116)) weight (48,8,1,116), squeezed.
    p['e2n_w'] = u(ks[8], (48, 8, D)); p['e2n_b'] = u(ks[9], (48,))
    # n2g: Conv2d(48, 116, (116,1)) weight (116,48,116,1), squeezed.
    p['n2g_w'] = u(ks[10], (D, 48, D)); p['n2g_b'] = u(ks[11], (D,))
    # Linear head 116 -> 64 -> 32 -> 10 -> 1 (biases zero-init, as in the module).
    p['l1_w'] = u(ks[12], (64, D));  p['l1_b'] = jnp.zeros((64,), jnp.float32)
    p['l2_w'] = u(ks[13], (32, 64)); p['l2_b'] = jnp.zeros((32,), jnp.float32)
    p['l3_w'] = u(ks[14], (10, 32)); p['l3_b'] = jnp.zeros((10,), jnp.float32)
    p['l4_w'] = u(ks[15], (1, 10));  p['l4_b'] = jnp.zeros((1,), jnp.float32)
    return p


def ref_forward(x, p):
    """Pure-JAX reference of Model.base_net (eval-mode dropout)."""
    def e2e(A, w1, w2, b1, b2):
        a = jnp.einsum('och,bchw->bow', w1, A) + b1[None, :, None]
        c = jnp.einsum('ocw,bchw->boh', w2, A) + b2[None, :, None]
        return _leaky(a[:, :, None, :] + c[:, :, :, None])
    h = e2e(x, p['e2e1_w1'], p['e2e1_w2'], p['e2e1_b1'], p['e2e1_b2'])
    h = e2e(h, p['e2e2_w1'], p['e2e2_w2'], p['e2e2_b1'], p['e2e2_b2'])
    e = _leaky(jnp.einsum('ocw,bchw->boh', p['e2n_w'], h) + p['e2n_b'][None, :, None])
    g = _leaky(jnp.einsum('och,bch->bo', p['n2g_w'], e) + p['n2g_b'][None, :])
    z = _leaky(g @ p['l1_w'].T + p['l1_b'])
    z = z @ p['l2_w'].T + p['l2_b']
    z = z @ p['l3_w'].T + p['l3_b']
    z = _leaky(z)
    z = z @ p['l4_w'].T + p['l4_b']
    return z


if __name__ == "__main__":
    key = jax.random.PRNGKey(0)
    kx, kp = jax.random.split(key)
    B = 2
    x = jax.random.normal(kx, (B, 1, D, D), jnp.float32)   # NCHW, like the PyTorch module
    params = init_params(kp)

    prepared = prepare_params(params)      # one-time weight prep, hoisted out of the forward
    out = model_forward(x, prepared)
    jax.block_until_ready(out)
    assert out.shape == (B, 1)

    ref = ref_forward(x, params)
    np.testing.assert_allclose(np.asarray(out), np.asarray(ref), rtol=2e-3, atol=2e-3)
    print("KERNEL_OK")
</pallas_src>

<mosaic_0001>
module attributes {stable_mosaic.version = 11 : i64} {
  func.func @fused_model_kernel(%arg0: i32, %arg1: memref<1x128x128xf32, #tpu.memory_space<vmem>>, %arg2: memref<128x8xf32, #tpu.memory_space<vmem>>, %arg3: memref<8x128xf32, #tpu.memory_space<vmem>>, %arg4: memref<8x1xf32, #tpu.memory_space<vmem>>, %arg5: memref<8x8x128xf32, #tpu.memory_space<vmem>>, %arg6: memref<8x128x8xf32, #tpu.memory_space<vmem>>, %arg7: memref<8x1xf32, #tpu.memory_space<vmem>>, %arg8: memref<8x48x128xf32, #tpu.memory_space<vmem>>, %arg9: memref<48x1xf32, #tpu.memory_space<vmem>>, %arg10: memref<48x128x128xf32, #tpu.memory_space<vmem>>, %arg11: memref<1x128xf32, #tpu.memory_space<vmem>>, %arg12: memref<128x64xf32, #tpu.memory_space<vmem>>, %arg13: memref<1x64xf32, #tpu.memory_space<vmem>>, %arg14: memref<64x10xf32, #tpu.memory_space<vmem>>, %arg15: memref<1x10xf32, #tpu.memory_space<vmem>>, %arg16: memref<10x128xf32, #tpu.memory_space<vmem>>, %arg17: memref<1x128xf32, #tpu.memory_space<vmem>>, %arg18: memref<1x1x128xf32, #tpu.memory_space<vmem>>, %arg19: memref<1x48x128xf32, #tpu.memory_space<vmem>>) attributes {dimension_semantics = [#tpu.dimension_semantics<parallel>], iteration_bounds = array<i64: 2>, scalar_prefetch = 0 : i64, scratch_operands = 1 : i64, tpu.core_type = #tpu.core_type<tc>, window_params = [{transform_indices = @transform_0, window_bounds = array<i64: 1, 128, 128>}, {pipeline_mode = #tpu.pipeline_mode<synchronous>, transform_indices = @transform_1, window_bounds = array<i64: 128, 8>}, {pipeline_mode = #tpu.pipeline_mode<synchronous>, transform_indices = @transform_2, window_bounds = array<i64: 8, 128>}, {pipeline_mode = #tpu.pipeline_mode<synchronous>, transform_indices = @transform_3, window_bounds = array<i64: 8, 1>}, {pipeline_mode = #tpu.pipeline_mode<synchronous>, transform_indices = @transform_4, window_bounds = array<i64: 8, 8, 128>}, {pipeline_mode = #tpu.pipeline_mode<synchronous>, transform_indices = @transform_5, window_bounds = array<i64: 8, 128, 8>}, {pipeline_mode = #tpu.pipeline_mode<synchronous>, transform_indices = @transform_6, window_bounds = array<i64: 8, 1>}, {pipeline_mode = #tpu.pipeline_mode<synchronous>, transform_indices = @transform_7, window_bounds = array<i64: 8, 48, 128>}, {pipeline_mode = #tpu.pipeline_mode<synchronous>, transform_indices = @transform_8, window_bounds = array<i64: 48, 1>}, {pipeline_mode = #tpu.pipeline_mode<synchronous>, transform_indices = @transform_9, window_bounds = array<i64: 48, 128, 128>}, {pipeline_mode = #tpu.pipeline_mode<synchronous>, transform_indices = @transform_10, window_bounds = array<i64: 1, 128>}, {pipeline_mode = #tpu.pipeline_mode<synchronous>, transform_indices = @transform_11, window_bounds = array<i64: 128, 64>}, {pipeline_mode = #tpu.pipeline_mode<synchronous>, transform_indices = @transform_12, window_bounds = array<i64: 1, 64>}, {pipeline_mode = #tpu.pipeline_mode<synchronous>, transform_indices = @transform_13, window_bounds = array<i64: 64, 10>}, {pipeline_mode = #tpu.pipeline_mode<synchronous>, transform_indices = @transform_14, window_bounds = array<i64: 1, 10>}, {pipeline_mode = #tpu.pipeline_mode<synchronous>, transform_indices = @transform_15, window_bounds = array<i64: 10, 128>}, {pipeline_mode = #tpu.pipeline_mode<synchronous>, transform_indices = @transform_16, window_bounds = array<i64: 1, 128>}, {transform_indices = @transform_17, window_bounds = array<i64: 1, 1, 128>}]} {
    %c0 = arith.constant 0 : index
    %c0_0 = arith.constant 0 : index
    %0 = vector.load %arg2[%c0, %c0_0] : memref<128x8xf32, #tpu.memory_space<vmem>>, vector<128x8xf32>
    %c0_1 = arith.constant 0 : index
    %c0_2 = arith.constant 0 : index
    %1 = vector.load %arg3[%c0_1, %c0_2] : memref<8x128xf32, #tpu.memory_space<vmem>>, vector<8x128xf32>
    %c0_3 = arith.constant 0 : index
    %c0_4 = arith.constant 0 : index
    %2 = vector.load %arg4[%c0_3, %c0_4] : memref<8x1xf32, #tpu.memory_space<vmem>>, vector<8x1xf32>
    %c0_5 = arith.constant 0 : index
    %c0_6 = arith.constant 0 : index
    %3 = vector.load %arg7[%c0_5, %c0_6] : memref<8x1xf32, #tpu.memory_space<vmem>>, vector<8x1xf32>
    %c0_7 = arith.constant 0 : index
    %c0_8 = arith.constant 0 : index
    %4 = vector.load %arg9[%c0_7, %c0_8] : memref<48x1xf32, #tpu.memory_space<vmem>>, vector<48x1xf32>
    %c0_i32 = arith.constant 0 : i32
    %c1_i32 = arith.constant 1 : i32
    %5 = arith.muli %c0_i32, %c1_i32 : i32
    %c0_i32_9 = arith.constant 0 : i32
    %6 = arith.addi %c0_i32_9, %5 : i32
    %7 = arith.index_cast %6 : i32 to index
    %c0_10 = arith.constant 0 : index
    %c0_11 = arith.constant 0 : index
    %8 = vector.load %arg1[%7, %c0_10, %c0_11] : memref<1x128x128xf32, #tpu.memory_space<vmem>>, vector<1x128x128xf32>
    %9 = vector.shape_cast %8 : vector<1x128x128xf32> to vector<128x128xf32>
    %10 = tpu.transpose %9, [1, 0] : vector<128x128xf32> -> vector<128x128xf32>
    %cst = arith.constant dense<0.000000e+00> : vector<128x8xf32>
    %11 = tpu.matmul %10, %0, %cst {dimension_numbers = #tpu.dot_dimension_numbers<[1], [0], [0], [1], [0, 0, 1, 1], [], []>} : vector<128x128xf32>, vector<128x8xf32>, vector<128x8xf32> -> vector<128x8xf32>
    %cst_12 = arith.constant dense<0.000000e+00> : vector<8x128xf32>
    %12 = tpu.matmul %1, %10, %cst_12 {dimension_numbers = #tpu.dot_dimension_numbers<[1], [0], [0], [1], [0, 0, 1, 1], [], []>} : vector<8x128xf32>, vector<128x128xf32>, vector<8x128xf32> -> vector<8x128xf32>
    %13 = vector.broadcast %2 : vector<8x1xf32> to vector<8x128xf32>
    %14 = arith.addf %12, %13 : vector<8x128xf32>
    %cst_13 = arith.constant 0.000000e+00 : f32
    %15 = vector.broadcast %cst_13 : f32 to vector<8x128xf32>
    %cst_14 = arith.constant 0.000000e+00 : f32
    %16 = vector.broadcast %cst_14 : f32 to vector<128x8xf32>
    %17 = vector.extract_strided_slice %11 {offsets = [0, 0], sizes = [128, 1], strides = [1, 1]} : vector<128x8xf32> to vector<128x1xf32>
    %18 = vector.extract_strided_slice %14 {offsets = [0, 0], sizes = [1, 128], strides = [1, 1]} : vector<8x128xf32> to vector<1x128xf32>
    %19 = vector.broadcast %17 : vector<128x1xf32> to vector<128x128xf32>
    %20 = vector.broadcast %18 : vector<1x128xf32> to vector<128x128xf32>
    %21 = arith.addf %19, %20 : vector<128x128xf32>
    %cst_15 = arith.constant 0.000000e+00 : f32
    %22 = vector.broadcast %cst_15 : f32 to vector<128x128xf32>
    %23 = arith.cmpf oge, %21, %22 : vector<128x128xf32>
    %cst_16 = arith.constant 3.300000e-01 : f32
    %24 = vector.broadcast %cst_16 : f32 to vector<128x128xf32>
    %25 = arith.mulf %24, %21 : vector<128x128xf32>
    %26 = arith.select %23, %21, %25 : vector<128x128xi1>, vector<128x128xf32>
    %c0_17 = arith.constant 0 : index
    %c0_18 = arith.constant 0 : index
    %c0_19 = arith.constant 0 : index
    %27 = vector.load %arg5[%c0_17, %c0_18, %c0_19] : memref<8x8x128xf32, #tpu.memory_space<vmem>>, vector<1x8x128xf32>
    %28 = vector.shape_cast %27 : vector<1x8x128xf32> to vector<8x128xf32>
    %cst_20 = arith.constant dense<0.000000e+00> : vector<8x128xf32>
    %29 = tpu.matmul %28, %26, %cst_20 {dimension_numbers = #tpu.dot_dimension_numbers<[1], [0], [0], [1], [0, 0, 1, 1], [], []>} : vector<8x128xf32>, vector<128x128xf32>, vector<8x128xf32> -> vector<8x128xf32>
    %30 = arith.addf %15, %29 : vector<8x128xf32>
    %c0_21 = arith.constant 0 : index
    %c0_22 = arith.constant 0 : index
    %c0_23 = arith.constant 0 : index
    %31 = vector.load %arg6[%c0_21, %c0_22, %c0_23] : memref<8x128x8xf32, #tpu.memory_space<vmem>>, vector<1x128x8xf32>
    %32 = vector.shape_cast %31 : vector<1x128x8xf32> to vector<128x8xf32>
    %cst_24 = arith.constant dense<0.000000e+00> : vector<128x8xf32>
    %33 = tpu.matmul %26, %32, %cst_24 {dimension_numbers = #tpu.dot_dimension_numbers<[1], [0], [0], [1], [0, 0, 1, 1], [], []>} : vector<128x128xf32>, vector<128x8xf32>, vector<128x8xf32> -> vector<128x8xf32>
    %34 = arith.addf %16, %33 : vector<128x8xf32>
    %35 = vector.extract_strided_slice %11 {offsets = [0, 1], sizes = [128, 1], strides = [1, 1]} : vector<128x8xf32> to vector<128x1xf32>
    %36 = vector.extract_strided_slice %14 {offsets = [1, 0], sizes = [1, 128], strides = [1, 1]} : vector<8x128xf32> to vector<1x128xf32>
    %37 = vector.broadcast %35 : vector<128x1xf32> to vector<128x128xf32>
    %38 = vector.broadcast %36 : vector<1x128xf32> to vector<128x128xf32>
    %39 = arith.addf %37, %38 : vector<128x128xf32>
    %cst_25 = arith.constant 0.000000e+00 : f32
    %40 = vector.broadcast %cst_25 : f32 to vector<128x128xf32>
    %41 = arith.cmpf oge, %39, %40 : vector<128x128xf32>
    %cst_26 = arith.constant 3.300000e-01 : f32
    %42 = vector.broadcast %cst_26 : f32 to vector<128x128xf32>
    %43 = arith.mulf %42, %39 : vector<128x128xf32>
    %44 = arith.select %41, %39, %43 : vector<128x128xi1>, vector<128x128xf32>
    %c1 = arith.constant 1 : index
    %c0_27 = arith.constant 0 : index
    %c0_28 = arith.constant 0 : index
    %45 = vector.load %arg5[%c1, %c0_27, %c0_28] : memref<8x8x128xf32, #tpu.memory_space<vmem>>, vector<1x8x128xf32>
    %46 = vector.shape_cast %45 : vector<1x8x128xf32> to vector<8x128xf32>
    %cst_29 = arith.constant dense<0.000000e+00> : vector<8x128xf32>
    %47 = tpu.matmul %46, %44, %cst_29 {dimension_numbers = #tpu.dot_dimension_numbers<[1], [0], [0], [1], [0, 0, 1, 1], [], []>} : vector<8x128xf32>, vector<128x128xf32>, vector<8x128xf32> -> vector<8x128xf32>
    %48 = arith.addf %30, %47 : vector<8x128xf32>
    %c1_30 = arith.constant 1 : index
    %c0_31 = arith.constant 0 : index
    %c0_32 = arith.constant 0 : index
    %49 = vector.load %arg6[%c1_30, %c0_31, %c0_32] : memref<8x128x8xf32, #tpu.memory_space<vmem>>, vector<1x128x8xf32>
    %50 = vector.shape_cast %49 : vector<1x128x8xf32> to vector<128x8xf32>
    %cst_33 = arith.constant dense<0.000000e+00> : vector<128x8xf32>
    %51 = tpu.matmul %44, %50, %cst_33 {dimension_numbers = #tpu.dot_dimension_numbers<[1], [0], [0], [1], [0, 0, 1, 1], [], []>} : vector<128x128xf32>, vector<128x8xf32>, vector<128x8xf32> -> vector<128x8xf32>
    %52 = arith.addf %34, %51 : vector<128x8xf32>
    %53 = vector.extract_strided_slice %11 {offsets = [0, 2], sizes = [128, 1], strides = [1, 1]} : vector<128x8xf32> to vector<128x1xf32>
    %54 = vector.extract_strided_slice %14 {offsets = [2, 0], sizes = [1, 128], strides = [1, 1]} : vector<8x128xf32> to vector<1x128xf32>
    %55 = vector.broadcast %53 : vector<128x1xf32> to vector<128x128xf32>
    %56 = vector.broadcast %54 : vector<1x128xf32> to vector<128x128xf32>
    %57 = arith.addf %55, %56 : vector<128x128xf32>
    %cst_34 = arith.constant 0.000000e+00 : f32
    %58 = vector.broadcast %cst_34 : f32 to vector<128x128xf32>
    %59 = arith.cmpf oge, %57, %58 : vector<128x128xf32>
    %cst_35 = arith.constant 3.300000e-01 : f32
    %60 = vector.broadcast %cst_35 : f32 to vector<128x128xf32>
    %61 = arith.mulf %60, %57 : vector<128x128xf32>
    %62 = arith.select %59, %57, %61 : vector<128x128xi1>, vector<128x128xf32>
    %c2 = arith.constant 2 : index
    %c0_36 = arith.constant 0 : index
    %c0_37 = arith.constant 0 : index
    %63 = vector.load %arg5[%c2, %c0_36, %c0_37] : memref<8x8x128xf32, #tpu.memory_space<vmem>>, vector<1x8x128xf32>
    %64 = vector.shape_cast %63 : vector<1x8x128xf32> to vector<8x128xf32>
    %cst_38 = arith.constant dense<0.000000e+00> : vector<8x128xf32>
    %65 = tpu.matmul %64, %62, %cst_38 {dimension_numbers = #tpu.dot_dimension_numbers<[1], [0], [0], [1], [0, 0, 1, 1], [], []>} : vector<8x128xf32>, vector<128x128xf32>, vector<8x128xf32> -> vector<8x128xf32>
    %66 = arith.addf %48, %65 : vector<8x128xf32>
    %c2_39 = arith.constant 2 : index
    %c0_40 = arith.constant 0 : index
    %c0_41 = arith.constant 0 : index
    %67 = vector.load %arg6[%c2_39, %c0_40, %c0_41] : memref<8x128x8xf32, #tpu.memory_space<vmem>>, vector<1x128x8xf32>
    %68 = vector.shape_cast %67 : vector<1x128x8xf32> to vector<128x8xf32>
    %cst_42 = arith.constant dense<0.000000e+00> : vector<128x8xf32>
    %69 = tpu.matmul %62, %68, %cst_42 {dimension_numbers = #tpu.dot_dimension_numbers<[1], [0], [0], [1], [0, 0, 1, 1], [], []>} : vector<128x128xf32>, vector<128x8xf32>, vector<128x8xf32> -> vector<128x8xf32>
    %70 = arith.addf %52, %69 : vector<128x8xf32>
    %71 = vector.extract_strided_slice %11 {offsets = [0, 3], sizes = [128, 1], strides = [1, 1]} : vector<128x8xf32> to vector<128x1xf32>
    %72 = vector.extract_strided_slice %14 {offsets = [3, 0], sizes = [1, 128], strides = [1, 1]} : vector<8x128xf32> to vector<1x128xf32>
    %73 = vector.broadcast %71 : vector<128x1xf32> to vector<128x128xf32>
    %74 = vector.broadcast %72 : vector<1x128xf32> to vector<128x128xf32>
    %75 = arith.addf %73, %74 : vector<128x128xf32>
    %cst_43 = arith.constant 0.000000e+00 : f32
    %76 = vector.broadcast %cst_43 : f32 to vector<128x128xf32>
    %77 = arith.cmpf oge, %75, %76 : vector<128x128xf32>
    %cst_44 = arith.constant 3.300000e-01 : f32
    %78 = vector.broadcast %cst_44 : f32 to vector<128x128xf32>
    %79 = arith.mulf %78, %75 : vector<128x128xf32>
    %80 = arith.select %77, %75, %79 : vector<128x128xi1>, vector<128x128xf32>
    %c3 = arith.constant 3 : index
    %c0_45 = arith.constant 0 : index
    %c0_46 = arith.constant 0 : index
    %81 = vector.load %arg5[%c3, %c0_45, %c0_46] : memref<8x8x128xf32, #tpu.memory_space<vmem>>, vector<1x8x128xf32>
    %82 = vector.shape_cast %81 : vector<1x8x128xf32> to vector<8x128xf32>
    %cst_47 = arith.constant dense<0.000000e+00> : vector<8x128xf32>
    %83 = tpu.matmul %82, %80, %cst_47 {dimension_numbers = #tpu.dot_dimension_numbers<[1], [0], [0], [1], [0, 0, 1, 1], [], []>} : vector<8x128xf32>, vector<128x128xf32>, vector<8x128xf32> -> vector<8x128xf32>
    %84 = arith.addf %66, %83 : vector<8x128xf32>
    %c3_48 = arith.constant 3 : index
    %c0_49 = arith.constant 0 : index
    %c0_50 = arith.constant 0 : index
    %85 = vector.load %arg6[%c3_48, %c0_49, %c0_50] : memref<8x128x8xf32, #tpu.memory_space<vmem>>, vector<1x128x8xf32>
    %86 = vector.shape_cast %85 : vector<1x128x8xf32> to vector<128x8xf32>
    %cst_51 = arith.constant dense<0.000000e+00> : vector<128x8xf32>
    %87 = tpu.matmul %80, %86, %cst_51 {dimension_numbers = #tpu.dot_dimension_numbers<[1], [0], [0], [1], [0, 0, 1, 1], [], []>} : vector<128x128xf32>, vector<128x8xf32>, vector<128x8xf32> -> vector<128x8xf32>
    %88 = arith.addf %70, %87 : vector<128x8xf32>
    %89 = vector.extract_strided_slice %11 {offsets = [0, 4], sizes = [128, 1], strides = [1, 1]} : vector<128x8xf32> to vector<128x1xf32>
    %90 = vector.extract_strided_slice %14 {offsets = [4, 0], sizes = [1, 128], strides = [1, 1]} : vector<8x128xf32> to vector<1x128xf32>
    %91 = vector.broadcast %89 : vector<128x1xf32> to vector<128x128xf32>
    %92 = vector.broadcast %90 : vector<1x128xf32> to vector<128x128xf32>
    %93 = arith.addf %91, %92 : vector<128x128xf32>
    %cst_52 = arith.constant 0.000000e+00 : f32
    %94 = vector.broadcast %cst_52 : f32 to vector<128x128xf32>
    %95 = arith.cmpf oge, %93, %94 : vector<128x128xf32>
    %cst_53 = arith.constant 3.300000e-01 : f32
    %96 = vector.broadcast %cst_53 : f32 to vector<128x128xf32>
    %97 = arith.mulf %96, %93 : vector<128x128xf32>
    %98 = arith.select %95, %93, %97 : vector<128x128xi1>, vector<128x128xf32>
    %c4 = arith.constant 4 : index
    %c0_54 = arith.constant 0 : index
    %c0_55 = arith.constant 0 : index
    %99 = vector.load %arg5[%c4, %c0_54, %c0_55] : memref<8x8x128xf32, #tpu.memory_space<vmem>>, vector<1x8x128xf32>
    %100 = vector.shape_cast %99 : vector<1x8x128xf32> to vector<8x128xf32>
    %cst_56 = arith.constant dense<0.000000e+00> : vector<8x128xf32>
    %101 = tpu.matmul %100, %98, %cst_56 {dimension_numbers = #tpu.dot_dimension_numbers<[1], [0], [0], [1], [0, 0, 1, 1], [], []>} : vector<8x128xf32>, vector<128x128xf32>, vector<8x128xf32> -> vector<8x128xf32>
    %102 = arith.addf %84, %101 : vector<8x128xf32>
    %c4_57 = arith.constant 4 : index
    %c0_58 = arith.constant 0 : index
    %c0_59 = arith.constant 0 : index
    %103 = vector.load %arg6[%c4_57, %c0_58, %c0_59] : memref<8x128x8xf32, #tpu.memory_space<vmem>>, vector<1x128x8xf32>
    %104 = vector.shape_cast %103 : vector<1x128x8xf32> to vector<128x8xf32>
    %cst_60 = arith.constant dense<0.000000e+00> : vector<128x8xf32>
    %105 = tpu.matmul %98, %104, %cst_60 {dimension_numbers = #tpu.dot_dimension_numbers<[1], [0], [0], [1], [0, 0, 1, 1], [], []>} : vector<128x128xf32>, vector<128x8xf32>, vector<128x8xf32> -> vector<128x8xf32>
    %106 = arith.addf %88, %105 : vector<128x8xf32>
    %107 = vector.extract_strided_slice %11 {offsets = [0, 5], sizes = [128, 1], strides = [1, 1]} : vector<128x8xf32> to vector<128x1xf32>
    %108 = vector.extract_strided_slice %14 {offsets = [5, 0], sizes = [1, 128], strides = [1, 1]} : vector<8x128xf32> to vector<1x128xf32>
    %109 = vector.broadcast %107 : vector<128x1xf32> to vector<128x128xf32>
    %110 = vector.broadcast %108 : vector<1x128xf32> to vector<128x128xf32>
    %111 = arith.addf %109, %110 : vector<128x128xf32>
    %cst_61 = arith.constant 0.000000e+00 : f32
    %112 = vector.broadcast %cst_61 : f32 to vector<128x128xf32>
    %113 = arith.cmpf oge, %111, %112 : vector<128x128xf32>
    %cst_62 = arith.constant 3.300000e-01 : f32
    %114 = vector.broadcast %cst_62 : f32 to vector<128x128xf32>
    %115 = arith.mulf %114, %111 : vector<128x128xf32>
    %116 = arith.select %113, %111, %115 : vector<128x128xi1>, vector<128x128xf32>
    %c5 = arith.constant 5 : index
    %c0_63 = arith.constant 0 : index
    %c0_64 = arith.constant 0 : index
    %117 = vector.load %arg5[%c5, %c0_63, %c0_64] : memref<8x8x128xf32, #tpu.memory_space<vmem>>, vector<1x8x128xf32>
    %118 = vector.shape_cast %117 : vector<1x8x128xf32> to vector<8x128xf32>
    %cst_65 = arith.constant dense<0.000000e+00> : vector<8x128xf32>
    %119 = tpu.matmul %118, %116, %cst_65 {dimension_numbers = #tpu.dot_dimension_numbers<[1], [0], [0], [1], [0, 0, 1, 1], [], []>} : vector<8x128xf32>, vector<128x128xf32>, vector<8x128xf32> -> vector<8x128xf32>
    %120 = arith.addf %102, %119 : vector<8x128xf32>
    %c5_66 = arith.constant 5 : index
    %c0_67 = arith.constant 0 : index
    %c0_68 = arith.constant 0 : index
    %121 = vector.load %arg6[%c5_66, %c0_67, %c0_68] : memref<8x128x8xf32, #tpu.memory_space<vmem>>, vector<1x128x8xf32>
    %122 = vector.shape_cast %121 : vector<1x128x8xf32> to vector<128x8xf32>
    %cst_69 = arith.constant dense<0.000000e+00> : vector<128x8xf32>
    %123 = tpu.matmul %116, %122, %cst_69 {dimension_numbers = #tpu.dot_dimension_numbers<[1], [0], [0], [1], [0, 0, 1, 1], [], []>} : vector<128x128xf32>, vector<128x8xf32>, vector<128x8xf32> -> vector<128x8xf32>
    %124 = arith.addf %106, %123 : vector<128x8xf32>
    %125 = vector.extract_strided_slice %11 {offsets = [0, 6], sizes = [128, 1], strides = [1, 1]} : vector<128x8xf32> to vector<128x1xf32>
    %126 = vector.extract_strided_slice %14 {offsets = [6, 0], sizes = [1, 128], strides = [1, 1]} : vector<8x128xf32> to vector<1x128xf32>
    %127 = vector.broadcast %125 : vector<128x1xf32> to vector<128x128xf32>
    %128 = vector.broadcast %126 : vector<1x128xf32> to vector<128x128xf32>
    %129 = arith.addf %127, %128 : vector<128x128xf32>
    %cst_70 = arith.constant 0.000000e+00 : f32
    %130 = vector.broadcast %cst_70 : f32 to vector<128x128xf32>
    %131 = arith.cmpf oge, %129, %130 : vector<128x128xf32>
    %cst_71 = arith.constant 3.300000e-01 : f32
    %132 = vector.broadcast %cst_71 : f32 to vector<128x128xf32>
    %133 = arith.mulf %132, %129 : vector<128x128xf32>
    %134 = arith.select %131, %129, %133 : vector<128x128xi1>, vector<128x128xf32>
    %c6 = arith.constant 6 : index
    %c0_72 = arith.constant 0 : index
    %c0_73 = arith.constant 0 : index
    %135 = vector.load %arg5[%c6, %c0_72, %c0_73] : memref<8x8x128xf32, #tpu.memory_space<vmem>>, vector<1x8x128xf32>
    %136 = vector.shape_cast %135 : vector<1x8x128xf32> to vector<8x128xf32>
    %cst_74 = arith.constant dense<0.000000e+00> : vector<8x128xf32>
    %137 = tpu.matmul %136, %134, %cst_74 {dimension_numbers = #tpu.dot_dimension_numbers<[1], [0], [0], [1], [0, 0, 1, 1], [], []>} : vector<8x128xf32>, vector<128x128xf32>, vector<8x128xf32> -> vector<8x128xf32>
    %138 = arith.addf %120, %137 : vector<8x128xf32>
    %c6_75 = arith.constant 6 : index
    %c0_76 = arith.constant 0 : index
    %c0_77 = arith.constant 0 : index
    %139 = vector.load %arg6[%c6_75, %c0_76, %c0_77] : memref<8x128x8xf32, #tpu.memory_space<vmem>>, vector<1x128x8xf32>
    %140 = vector.shape_cast %139 : vector<1x128x8xf32> to vector<128x8xf32>
    %cst_78 = arith.constant dense<0.000000e+00> : vector<128x8xf32>
    %141 = tpu.matmul %134, %140, %cst_78 {dimension_numbers = #tpu.dot_dimension_numbers<[1], [0], [0], [1], [0, 0, 1, 1], [], []>} : vector<128x128xf32>, vector<128x8xf32>, vector<128x8xf32> -> vector<128x8xf32>
    %142 = arith.addf %124, %141 : vector<128x8xf32>
    %143 = vector.extract_strided_slice %11 {offsets = [0, 7], sizes = [128, 1], strides = [1, 1]} : vector<128x8xf32> to vector<128x1xf32>
    %144 = vector.extract_strided_slice %14 {offsets = [7, 0], sizes = [1, 128], strides = [1, 1]} : vector<8x128xf32> to vector<1x128xf32>
    %145 = vector.broadcast %143 : vector<128x1xf32> to vector<128x128xf32>
    %146 = vector.broadcast %144 : vector<1x128xf32> to vector<128x128xf32>
    %147 = arith.addf %145, %146 : vector<128x128xf32>
    %cst_79 = arith.constant 0.000000e+00 : f32
    %148 = vector.broadcast %cst_79 : f32 to vector<128x128xf32>
    %149 = arith.cmpf oge, %147, %148 : vector<128x128xf32>
    %cst_80 = arith.constant 3.300000e-01 : f32
    %150 = vector.broadcast %cst_80 : f32 to vector<128x128xf32>
    %151 = arith.mulf %150, %147 : vector<128x128xf32>
    %152 = arith.select %149, %147, %151 : vector<128x128xi1>, vector<128x128xf32>
    %c7 = arith.constant 7 : index
    %c0_81 = arith.constant 0 : index
    %c0_82 = arith.constant 0 : index
    %153 = vector.load %arg5[%c7, %c0_81, %c0_82] : memref<8x8x128xf32, #tpu.memory_space<vmem>>, vector<1x8x128xf32>
    %154 = vector.shape_cast %153 : vector<1x8x128xf32> to vector<8x128xf32>
    %cst_83 = arith.constant dense<0.000000e+00> : vector<8x128xf32>
    %155 = tpu.matmul %154, %152, %cst_83 {dimension_numbers = #tpu.dot_dimension_numbers<[1], [0], [0], [1], [0, 0, 1, 1], [], []>} : vector<8x128xf32>, vector<128x128xf32>, vector<8x128xf32> -> vector<8x128xf32>
    %156 = arith.addf %138, %155 : vector<8x128xf32>
    %c7_84 = arith.constant 7 : index
    %c0_85 = arith.constant 0 : index
    %c0_86 = arith.constant 0 : index
    %157 = vector.load %arg6[%c7_84, %c0_85, %c0_86] : memref<8x128x8xf32, #tpu.memory_space<vmem>>, vector<1x128x8xf32>
    %158 = vector.shape_cast %157 : vector<1x128x8xf32> to vector<128x8xf32>
    %cst_87 = arith.constant dense<0.000000e+00> : vector<128x8xf32>
    %159 = tpu.matmul %152, %158, %cst_87 {dimension_numbers = #tpu.dot_dimension_numbers<[1], [0], [0], [1], [0, 0, 1, 1], [], []>} : vector<128x128xf32>, vector<128x8xf32>, vector<128x8xf32> -> vector<128x8xf32>
    %160 = arith.addf %142, %159 : vector<128x8xf32>
    %161 = vector.broadcast %3 : vector<8x1xf32> to vector<8x128xf32>
    %162 = arith.addf %156, %161 : vector<8x128xf32>
    %cst_88 = arith.constant 0.000000e+00 : f32
    %163 = vector.broadcast %cst_88 : f32 to vector<48x128xf32>
    %164 = vector.extract_strided_slice %160 {offsets = [0, 0], sizes = [128, 1], strides = [1, 1]} : vector<128x8xf32> to vector<128x1xf32>
    %165 = vector.extract_strided_slice %162 {offsets = [0, 0], sizes = [1, 128], strides = [1, 1]} : vector<8x128xf32> to vector<1x128xf32>
    %166 = vector.broadcast %164 : vector<128x1xf32> to vector<128x128xf32>
    %167 = vector.broadcast %165 : vector<1x128xf32> to vector<128x128xf32>
    %168 = arith.addf %166, %167 : vector<128x128xf32>
    %cst_89 = arith.constant 0.000000e+00 : f32
    %169 = vector.broadcast %cst_89 : f32 to vector<128x128xf32>
    %170 = arith.cmpf oge, %168, %169 : vector<128x128xf32>
    %cst_90 = arith.constant 3.300000e-01 : f32
    %171 = vector.broadcast %cst_90 : f32 to vector<128x128xf32>
    %172 = arith.mulf %171, %168 : vector<128x128xf32>
    %173 = arith.select %170, %168, %172 : vector<128x128xi1>, vector<128x128xf32>
    %c0_91 = arith.constant 0 : index
    %c0_92 = arith.constant 0 : index
    %c0_93 = arith.constant 0 : index
    %174 = vector.load %arg8[%c0_91, %c0_92, %c0_93] : memref<8x48x128xf32, #tpu.memory_space<vmem>>, vector<1x48x128xf32>
    %175 = vector.shape_cast %174 : vector<1x48x128xf32> to vector<48x128xf32>
    %cst_94 = arith.constant dense<0.000000e+00> : vector<48x128xf32>
    %176 = tpu.matmul %175, %173, %cst_94 {dimension_numbers = #tpu.dot_dimension_numbers<[1], [0], [0], [1], [0, 0, 1, 1], [], []>} : vector<48x128xf32>, vector<128x128xf32>, vector<48x128xf32> -> vector<48x128xf32>
    %177 = arith.addf %163, %176 : vector<48x128xf32>
    %178 = vector.extract_strided_slice %160 {offsets = [0, 1], sizes = [128, 1], strides = [1, 1]} : vector<128x8xf32> to vector<128x1xf32>
    %179 = vector.extract_strided_slice %162 {offsets = [1, 0], sizes = [1, 128], strides = [1, 1]} : vector<8x128xf32> to vector<1x128xf32>
    %180 = vector.broadcast %178 : vector<128x1xf32> to vector<128x128xf32>
    %181 = vector.broadcast %179 : vector<1x128xf32> to vector<128x128xf32>
    %182 = arith.addf %180, %181 : vector<128x128xf32>
    %cst_95 = arith.constant 0.000000e+00 : f32
    %183 = vector.broadcast %cst_95 : f32 to vector<128x128xf32>
    %184 = arith.cmpf oge, %182, %183 : vector<128x128xf32>
    %cst_96 = arith.constant 3.300000e-01 : f32
    %185 = vector.broadcast %cst_96 : f32 to vector<128x128xf32>
    %186 = arith.mulf %185, %182 : vector<128x128xf32>
    %187 = arith.select %184, %182, %186 : vector<128x128xi1>, vector<128x128xf32>
    %c1_97 = arith.constant 1 : index
    %c0_98 = arith.constant 0 : index
    %c0_99 = arith.constant 0 : index
    %188 = vector.load %arg8[%c1_97, %c0_98, %c0_99] : memref<8x48x128xf32, #tpu.memory_space<vmem>>, vector<1x48x128xf32>
    %189 = vector.shape_cast %188 : vector<1x48x128xf32> to vector<48x128xf32>
    %cst_100 = arith.constant dense<0.000000e+00> : vector<48x128xf32>
    %190 = tpu.matmul %189, %187, %cst_100 {dimension_numbers = #tpu.dot_dimension_numbers<[1], [0], [0], [1], [0, 0, 1, 1], [], []>} : vector<48x128xf32>, vector<128x128xf32>, vector<48x128xf32> -> vector<48x128xf32>
    %191 = arith.addf %177, %190 : vector<48x128xf32>
    %192 = vector.extract_strided_slice %160 {offsets = [0, 2], sizes = [128, 1], strides = [1, 1]} : vector<128x8xf32> to vector<128x1xf32>
    %193 = vector.extract_strided_slice %162 {offsets = [2, 0], sizes = [1, 128], strides = [1, 1]} : vector<8x128xf32> to vector<1x128xf32>
    %194 = vector.broadcast %192 : vector<128x1xf32> to vector<128x128xf32>
    %195 = vector.broadcast %193 : vector<1x128xf32> to vector<128x128xf32>
    %196 = arith.addf %194, %195 : vector<128x128xf32>
    %cst_101 = arith.constant 0.000000e+00 : f32
    %197 = vector.broadcast %cst_101 : f32 to vector<128x128xf32>
    %198 = arith.cmpf oge, %196, %197 : vector<128x128xf32>
    %cst_102 = arith.constant 3.300000e-01 : f32
    %199 = vector.broadcast %cst_102 : f32 to vector<128x128xf32>
    %200 = arith.mulf %199, %196 : vector<128x128xf32>
    %201 = arith.select %198, %196, %200 : vector<128x128xi1>, vector<128x128xf32>
    %c2_103 = arith.constant 2 : index
    %c0_104 = arith.constant 0 : index
    %c0_105 = arith.constant 0 : index
    %202 = vector.load %arg8[%c2_103, %c0_104, %c0_105] : memref<8x48x128xf32, #tpu.memory_space<vmem>>, vector<1x48x128xf32>
    %203 = vector.shape_cast %202 : vector<1x48x128xf32> to vector<48x128xf32>
    %cst_106 = arith.constant dense<0.000000e+00> : vector<48x128xf32>
    %204 = tpu.matmul %203, %201, %cst_106 {dimension_numbers = #tpu.dot_dimension_numbers<[1], [0], [0], [1], [0, 0, 1, 1], [], []>} : vector<48x128xf32>, vector<128x128xf32>, vector<48x128xf32> -> vector<48x128xf32>
    %205 = arith.addf %191, %204 : vector<48x128xf32>
    %206 = vector.extract_strided_slice %160 {offsets = [0, 3], sizes = [128, 1], strides = [1, 1]} : vector<128x8xf32> to vector<128x1xf32>
    %207 = vector.extract_strided_slice %162 {offsets = [3, 0], sizes = [1, 128], strides = [1, 1]} : vector<8x128xf32> to vector<1x128xf32>
    %208 = vector.broadcast %206 : vector<128x1xf32> to vector<128x128xf32>
    %209 = vector.broadcast %207 : vector<1x128xf32> to vector<128x128xf32>
    %210 = arith.addf %208, %209 : vector<128x128xf32>
    %cst_107 = arith.constant 0.000000e+00 : f32
    %211 = vector.broadcast %cst_107 : f32 to vector<128x128xf32>
    %212 = arith.cmpf oge, %210, %211 : vector<128x128xf32>
    %cst_108 = arith.constant 3.300000e-01 : f32
    %213 = vector.broadcast %cst_108 : f32 to vector<128x128xf32>
    %214 = arith.mulf %213, %210 : vector<128x128xf32>
    %215 = arith.select %212, %210, %214 : vector<128x128xi1>, vector<128x128xf32>
    %c3_109 = arith.constant 3 : index
    %c0_110 = arith.constant 0 : index
    %c0_111 = arith.constant 0 : index
    %216 = vector.load %arg8[%c3_109, %c0_110, %c0_111] : memref<8x48x128xf32, #tpu.memory_space<vmem>>, vector<1x48x128xf32>
    %217 = vector.shape_cast %216 : vector<1x48x128xf32> to vector<48x128xf32>
    %cst_112 = arith.constant dense<0.000000e+00> : vector<48x128xf32>
    %218 = tpu.matmul %217, %215, %cst_112 {dimension_numbers = #tpu.dot_dimension_numbers<[1], [0], [0], [1], [0, 0, 1, 1], [], []>} : vector<48x128xf32>, vector<128x128xf32>, vector<48x128xf32> -> vector<48x128xf32>
    %219 = arith.addf %205, %218 : vector<48x128xf32>
    %220 = vector.extract_strided_slice %160 {offsets = [0, 4], sizes = [128, 1], strides = [1, 1]} : vector<128x8xf32> to vector<128x1xf32>
    %221 = vector.extract_strided_slice %162 {offsets = [4, 0], sizes = [1, 128], strides = [1, 1]} : vector<8x128xf32> to vector<1x128xf32>
    %222 = vector.broadcast %220 : vector<128x1xf32> to vector<128x128xf32>
    %223 = vector.broadcast %221 : vector<1x128xf32> to vector<128x128xf32>
    %224 = arith.addf %222, %223 : vector<128x128xf32>
    %cst_113 = arith.constant 0.000000e+00 : f32
    %225 = vector.broadcast %cst_113 : f32 to vector<128x128xf32>
    %226 = arith.cmpf oge, %224, %225 : vector<128x128xf32>
    %cst_114 = arith.constant 3.300000e-01 : f32
    %227 = vector.broadcast %cst_114 : f32 to vector<128x128xf32>
    %228 = arith.mulf %227, %224 : vector<128x128xf32>
    %229 = arith.select %226, %224, %228 : vector<128x128xi1>, vector<128x128xf32>
    %c4_115 = arith.constant 4 : index
    %c0_116 = arith.constant 0 : index
    %c0_117 = arith.constant 0 : index
    %230 = vector.load %arg8[%c4_115, %c0_116, %c0_117] : memref<8x48x128xf32, #tpu.memory_space<vmem>>, vector<1x48x128xf32>
    %231 = vector.shape_cast %230 : vector<1x48x128xf32> to vector<48x128xf32>
    %cst_118 = arith.constant dense<0.000000e+00> : vector<48x128xf32>
    %232 = tpu.matmul %231, %229, %cst_118 {dimension_numbers = #tpu.dot_dimension_numbers<[1], [0], [0], [1], [0, 0, 1, 1], [], []>} : vector<48x128xf32>, vector<128x128xf32>, vector<48x128xf32> -> vector<48x128xf32>
    %233 = arith.addf %219, %232 : vector<48x128xf32>
    %234 = vector.extract_strided_slice %160 {offsets = [0, 5], sizes = [128, 1], strides = [1, 1]} : vector<128x8xf32> to vector<128x1xf32>
    %235 = vector.extract_strided_slice %162 {offsets = [5, 0], sizes = [1, 128], strides = [1, 1]} : vector<8x128xf32> to vector<1x128xf32>
    %236 = vector.broadcast %234 : vector<128x1xf32> to vector<128x128xf32>
    %237 = vector.broadcast %235 : vector<1x128xf32> to vector<128x128xf32>
    %238 = arith.addf %236, %237 : vector<128x128xf32>
    %cst_119 = arith.constant 0.000000e+00 : f32
    %239 = vector.broadcast %cst_119 : f32 to vector<128x128xf32>
    %240 = arith.cmpf oge, %238, %239 : vector<128x128xf32>
    %cst_120 = arith.constant 3.300000e-01 : f32
    %241 = vector.broadcast %cst_120 : f32 to vector<128x128xf32>
    %242 = arith.mulf %241, %238 : vector<128x128xf32>
    %243 = arith.select %240, %238, %242 : vector<128x128xi1>, vector<128x128xf32>
    %c5_121 = arith.constant 5 : index
    %c0_122 = arith.constant 0 : index
    %c0_123 = arith.constant 0 : index
    %244 = vector.load %arg8[%c5_121, %c0_122, %c0_123] : memref<8x48x128xf32, #tpu.memory_space<vmem>>, vector<1x48x128xf32>
    %245 = vector.shape_cast %244 : vector<1x48x128xf32> to vector<48x128xf32>
    %cst_124 = arith.constant dense<0.000000e+00> : vector<48x128xf32>
    %246 = tpu.matmul %245, %243, %cst_124 {dimension_numbers = #tpu.dot_dimension_numbers<[1], [0], [0], [1], [0, 0, 1, 1], [], []>} : vector<48x128xf32>, vector<128x128xf32>, vector<48x128xf32> -> vector<48x128xf32>
    %247 = arith.addf %233, %246 : vector<48x128xf32>
    %248 = vector.extract_strided_slice %160 {offsets = [0, 6], sizes = [128, 1], strides = [1, 1]} : vector<128x8xf32> to vector<128x1xf32>
    %249 = vector.extract_strided_slice %162 {offsets = [6, 0], sizes = [1, 128], strides = [1, 1]} : vector<8x128xf32> to vector<1x128xf32>
    %250 = vector.broadcast %248 : vector<128x1xf32> to vector<128x128xf32>
    %251 = vector.broadcast %249 : vector<1x128xf32> to vector<128x128xf32>
    %252 = arith.addf %250, %251 : vector<128x128xf32>
    %cst_125 = arith.constant 0.000000e+00 : f32
    %253 = vector.broadcast %cst_125 : f32 to vector<128x128xf32>
    %254 = arith.cmpf oge, %252, %253 : vector<128x128xf32>
    %cst_126 = arith.constant 3.300000e-01 : f32
    %255 = vector.broadcast %cst_126 : f32 to vector<128x128xf32>
    %256 = arith.mulf %255, %252 : vector<128x128xf32>
    %257 = arith.select %254, %252, %256 : vector<128x128xi1>, vector<128x128xf32>
    %c6_127 = arith.constant 6 : index
    %c0_128 = arith.constant 0 : index
    %c0_129 = arith.constant 0 : index
    %258 = vector.load %arg8[%c6_127, %c0_128, %c0_129] : memref<8x48x128xf32, #tpu.memory_space<vmem>>, vector<1x48x128xf32>
    %259 = vector.shape_cast %258 : vector<1x48x128xf32> to vector<48x128xf32>
    %cst_130 = arith.constant dense<0.000000e+00> : vector<48x128xf32>
    %260 = tpu.matmul %259, %257, %cst_130 {dimension_numbers = #tpu.dot_dimension_numbers<[1], [0], [0], [1], [0, 0, 1, 1], [], []>} : vector<48x128xf32>, vector<128x128xf32>, vector<48x128xf32> -> vector<48x128xf32>
    %261 = arith.addf %247, %260 : vector<48x128xf32>
    %262 = vector.extract_strided_slice %160 {offsets = [0, 7], sizes = [128, 1], strides = [1, 1]} : vector<128x8xf32> to vector<128x1xf32>
    %263 = vector.extract_strided_slice %162 {offsets = [7, 0], sizes = [1, 128], strides = [1, 1]} : vector<8x128xf32> to vector<1x128xf32>
    %264 = vector.broadcast %262 : vector<128x1xf32> to vector<128x128xf32>
    %265 = vector.broadcast %263 : vector<1x128xf32> to vector<128x128xf32>
    %266 = arith.addf %264, %265 : vector<128x128xf32>
    %cst_131 = arith.constant 0.000000e+00 : f32
    %267 = vector.broadcast %cst_131 : f32 to vector<128x128xf32>
    %268 = arith.cmpf oge, %266, %267 : vector<128x128xf32>
    %cst_132 = arith.constant 3.300000e-01 : f32
    %269 = vector.broadcast %cst_132 : f32 to vector<128x128xf32>
    %270 = arith.mulf %269, %266 : vector<128x128xf32>
    %271 = arith.select %268, %266, %270 : vector<128x128xi1>, vector<128x128xf32>
    %c7_133 = arith.constant 7 : index
    %c0_134 = arith.constant 0 : index
    %c0_135 = arith.constant 0 : index
    %272 = vector.load %arg8[%c7_133, %c0_134, %c0_135] : memref<8x48x128xf32, #tpu.memory_space<vmem>>, vector<1x48x128xf32>
    %273 = vector.shape_cast %272 : vector<1x48x128xf32> to vector<48x128xf32>
    %cst_136 = arith.constant dense<0.000000e+00> : vector<48x128xf32>
    %274 = tpu.matmul %273, %271, %cst_136 {dimension_numbers = #tpu.dot_dimension_numbers<[1], [0], [0], [1], [0, 0, 1, 1], [], []>} : vector<48x128xf32>, vector<128x128xf32>, vector<48x128xf32> -> vector<48x128xf32>
    %275 = arith.addf %261, %274 : vector<48x128xf32>
    %276 = vector.broadcast %4 : vector<48x1xf32> to vector<48x128xf32>
    %277 = arith.addf %275, %276 : vector<48x128xf32>
    %cst_137 = arith.constant 0.000000e+00 : f32
    %278 = vector.broadcast %cst_137 : f32 to vector<48x128xf32>
    %279 = arith.cmpf oge, %277, %278 : vector<48x128xf32>
    %cst_138 = arith.constant 3.300000e-01 : f32
    %280 = vector.broadcast %cst_138 : f32 to vector<48x128xf32>
    %281 = arith.mulf %280, %277 : vector<48x128xf32>
    %282 = arith.select %279, %277, %281 : vector<48x128xi1>, vector<48x128xf32>
    %283 = arith.index_cast %6 : i32 to index
    %c0_139 = arith.constant 0 : index
    %c0_140 = arith.constant 0 : index
    %284 = vector.load %arg19[%283, %c0_139, %c0_140] : memref<1x48x128xf32, #tpu.memory_space<vmem>>, vector<1x48x128xf32>
    %285 = vector.shape_cast %284 : vector<1x48x128xf32> to vector<48x128xf32>
    %286 = vector.shape_cast %282 : vector<48x128xf32> to vector<1x48x128xf32>
    tpu.vector_store %arg19[%283, %c0_139, %c0_140], %286 {strides = array<i32>} : memref<1x48x128xf32, #tpu.memory_space<vmem>>, vector<1x48x128xf32>,
    %c1_i32_141 = arith.constant 1 : i32
    %cst_142 = arith.constant 0.000000e+00 : f32
    %287 = vector.broadcast %cst_142 : f32 to vector<1x128xf32>
    %c0_143 = arith.constant 0 : index
    %c0_144 = arith.constant 0 : index
    %c0_145 = arith.constant 0 : index
    %288 = vector.load %arg19[%c0_143, %c0_144, %c0_145] : memref<1x48x128xf32, #tpu.memory_space<vmem>>, vector<1x1x128xf32>
    %289 = vector.shape_cast %288 : vector<1x1x128xf32> to vector<1x128xf32>
    %c0_146 = arith.constant 0 : index
    %c0_147 = arith.constant 0 : index
    %c0_148 = arith.constant 0 : index
    %290 = vector.load %arg10[%c0_146, %c0_147, %c0_148] : memref<48x128x128xf32, #tpu.memory_space<vmem>>, vector<1x128x128xf32>
    %291 = vector.shape_cast %290 : vector<1x128x128xf32> to vector<128x128xf32>
    %cst_149 = arith.constant dense<0.000000e+00> : vector<1x128xf32>
    %292 = tpu.matmul %289, %291, %cst_149 {dimension_numbers = #tpu.dot_dimension_numbers<[1], [0], [0], [1], [0, 0, 1, 1], [], []>} : vector<1x128xf32>, vector<128x128xf32>, vector<1x128xf32> -> vector<1x128xf32>
    %293 = arith.addf %287, %292 : vector<1x128xf32>
    %c0_150 = arith.constant 0 : index
    %c1_151 = arith.constant 1 : index
    %c0_152 = arith.constant 0 : index
    %294 = vector.load %arg19[%c0_150, %c1_151, %c0_152] : memref<1x48x128xf32, #tpu.memory_space<vmem>>, vector<1x1x128xf32>
    %295 = vector.shape_cast %294 : vector<1x1x128xf32> to vector<1x128xf32>
    %c1_153 = arith.constant 1 : index
    %c0_154 = arith.constant 0 : index
    %c0_155 = arith.constant 0 : index
    %296 = vector.load %arg10[%c1_153, %c0_154, %c0_155] : memref<48x128x128xf32, #tpu.memory_space<vmem>>, vector<1x128x128xf32>
    %297 = vector.shape_cast %296 : vector<1x128x128xf32> to vector<128x128xf32>
    %cst_156 = arith.constant dense<0.000000e+00> : vector<1x128xf32>
    %298 = tpu.matmul %295, %297, %cst_156 {dimension_numbers = #tpu.dot_dimension_numbers<[1], [0], [0], [1], [0, 0, 1, 1], [], []>} : vector<1x128xf32>, vector<128x128xf32>, vector<1x128xf32> -> vector<1x128xf32>
    %299 = arith.addf %293, %298 : vector<1x128xf32>
    %c0_157 = arith.constant 0 : index
    %c2_158 = arith.constant 2 : index
    %c0_159 = arith.constant 0 : index
    %300 = vector.load %arg19[%c0_157, %c2_158, %c0_159] : memref<1x48x128xf32, #tpu.memory_space<vmem>>, vector<1x1x128xf32>
    %301 = vector.shape_cast %300 : vector<1x1x128xf32> to vector<1x128xf32>
    %c2_160 = arith.constant 2 : index
    %c0_161 = arith.constant 0 : index
    %c0_162 = arith.constant 0 : index
    %302 = vector.load %arg10[%c2_160, %c0_161, %c0_162] : memref<48x128x128xf32, #tpu.memory_space<vmem>>, vector<1x128x128xf32>
    %303 = vector.shape_cast %302 : vector<1x128x128xf32> to vector<128x128xf32>
    %cst_163 = arith.constant dense<0.000000e+00> : vector<1x128xf32>
    %304 = tpu.matmul %301, %303, %cst_163 {dimension_numbers = #tpu.dot_dimension_numbers<[1], [0], [0], [1], [0, 0, 1, 1], [], []>} : vector<1x128xf32>, vector<128x128xf32>, vector<1x128xf32> -> vector<1x128xf32>
    %305 = arith.addf %299, %304 : vector<1x128xf32>
    %c0_164 = arith.constant 0 : index
    %c3_165 = arith.constant 3 : index
    %c0_166 = arith.constant 0 : index
    %306 = vector.load %arg19[%c0_164, %c3_165, %c0_166] : memref<1x48x128xf32, #tpu.memory_space<vmem>>, vector<1x1x128xf32>
    %307 = vector.shape_cast %306 : vector<1x1x128xf32> to vector<1x128xf32>
    %c3_167 = arith.constant 3 : index
    %c0_168 = arith.constant 0 : index
    %c0_169 = arith.constant 0 : index
    %308 = vector.load %arg10[%c3_167, %c0_168, %c0_169] : memref<48x128x128xf32, #tpu.memory_space<vmem>>, vector<1x128x128xf32>
    %309 = vector.shape_cast %308 : vector<1x128x128xf32> to vector<128x128xf32>
    %cst_170 = arith.constant dense<0.000000e+00> : vector<1x128xf32>
    %310 = tpu.matmul %307, %309, %cst_170 {dimension_numbers = #tpu.dot_dimension_numbers<[1], [0], [0], [1], [0, 0, 1, 1], [], []>} : vector<1x128xf32>, vector<128x128xf32>, vector<1x128xf32> -> vector<1x128xf32>
    %311 = arith.addf %305, %310 : vector<1x128xf32>
    %c0_171 = arith.constant 0 : index
    %c4_172 = arith.constant 4 : index
    %c0_173 = arith.constant 0 : index
    %312 = vector.load %arg19[%c0_171, %c4_172, %c0_173] : memref<1x48x128xf32, #tpu.memory_space<vmem>>, vector<1x1x128xf32>
    %313 = vector.shape_cast %312 : vector<1x1x128xf32> to vector<1x128xf32>
    %c4_174 = arith.constant 4 : index
    %c0_175 = arith.constant 0 : index
    %c0_176 = arith.constant 0 : index
    %314 = vector.load %arg10[%c4_174, %c0_175, %c0_176] : memref<48x128x128xf32, #tpu.memory_space<vmem>>, vector<1x128x128xf32>
    %315 = vector.shape_cast %314 : vector<1x128x128xf32> to vector<128x128xf32>
    %cst_177 = arith.constant dense<0.000000e+00> : vector<1x128xf32>
    %316 = tpu.matmul %313, %315, %cst_177 {dimension_numbers = #tpu.dot_dimension_numbers<[1], [0], [0], [1], [0, 0, 1, 1], [], []>} : vector<1x128xf32>, vector<128x128xf32>, vector<1x128xf32> -> vector<1x128xf32>
    %317 = arith.addf %311, %316 : vector<1x128xf32>
    %c0_178 = arith.constant 0 : index
    %c5_179 = arith.constant 5 : index
    %c0_180 = arith.constant 0 : index
    %318 = vector.load %arg19[%c0_178, %c5_179, %c0_180] : memref<1x48x128xf32, #tpu.memory_space<vmem>>, vector<1x1x128xf32>
    %319 = vector.shape_cast %318 : vector<1x1x128xf32> to vector<1x128xf32>
    %c5_181 = arith.constant 5 : index
    %c0_182 = arith.constant 0 : index
    %c0_183 = arith.constant 0 : index
    %320 = vector.load %arg10[%c5_181, %c0_182, %c0_183] : memref<48x128x128xf32, #tpu.memory_space<vmem>>, vector<1x128x128xf32>
    %321 = vector.shape_cast %320 : vector<1x128x128xf32> to vector<128x128xf32>
    %cst_184 = arith.constant dense<0.000000e+00> : vector<1x128xf32>
    %322 = tpu.matmul %319, %321, %cst_184 {dimension_numbers = #tpu.dot_dimension_numbers<[1], [0], [0], [1], [0, 0, 1, 1], [], []>} : vector<1x128xf32>, vector<128x128xf32>, vector<1x128xf32> -> vector<1x128xf32>
    %323 = arith.addf %317, %322 : vector<1x128xf32>
    %c0_185 = arith.constant 0 : index
    %c6_186 = arith.constant 6 : index
    %c0_187 = arith.constant 0 : index
    %324 = vector.load %arg19[%c0_185, %c6_186, %c0_187] : memref<1x48x128xf32, #tpu.memory_space<vmem>>, vector<1x1x128xf32>
    %325 = vector.shape_cast %324 : vector<1x1x128xf32> to vector<1x128xf32>
    %c6_188 = arith.constant 6 : index
    %c0_189 = arith.constant 0 : index
    %c0_190 = arith.constant 0 : index
    %326 = vector.load %arg10[%c6_188, %c0_189, %c0_190] : memref<48x128x128xf32, #tpu.memory_space<vmem>>, vector<1x128x128xf32>
    %327 = vector.shape_cast %326 : vector<1x128x128xf32> to vector<128x128xf32>
    %cst_191 = arith.constant dense<0.000000e+00> : vector<1x128xf32>
    %328 = tpu.matmul %325, %327, %cst_191 {dimension_numbers = #tpu.dot_dimension_numbers<[1], [0], [0], [1], [0, 0, 1, 1], [], []>} : vector<1x128xf32>, vector<128x128xf32>, vector<1x128xf32> -> vector<1x128xf32>
    %329 = arith.addf %323, %328 : vector<1x128xf32>
    %c0_192 = arith.constant 0 : index
    %c7_193 = arith.constant 7 : index
    %c0_194 = arith.constant 0 : index
    %330 = vector.load %arg19[%c0_192, %c7_193, %c0_194] : memref<1x48x128xf32, #tpu.memory_space<vmem>>, vector<1x1x128xf32>
    %331 = vector.shape_cast %330 : vector<1x1x128xf32> to vector<1x128xf32>
    %c7_195 = arith.constant 7 : index
    %c0_196 = arith.constant 0 : index
    %c0_197 = arith.constant 0 : index
    %332 = vector.load %arg10[%c7_195, %c0_196, %c0_197] : memref<48x128x128xf32, #tpu.memory_space<vmem>>, vector<1x128x128xf32>
    %333 = vector.shape_cast %332 : vector<1x128x128xf32> to vector<128x128xf32>
    %cst_198 = arith.constant dense<0.000000e+00> : vector<1x128xf32>
    %334 = tpu.matmul %331, %333, %cst_198 {dimension_numbers = #tpu.dot_dimension_numbers<[1], [0], [0], [1], [0, 0, 1, 1], [], []>} : vector<1x128xf32>, vector<128x128xf32>, vector<1x128xf32> -> vector<1x128xf32>
    %335 = arith.addf %329, %334 : vector<1x128xf32>
    %c0_199 = arith.constant 0 : index
    %c8 = arith.constant 8 : index
    %c0_200 = arith.constant 0 : index
    %336 = vector.load %arg19[%c0_199, %c8, %c0_200] : memref<1x48x128xf32, #tpu.memory_space<vmem>>, vector<1x1x128xf32>
    %337 = vector.shape_cast %336 : vector<1x1x128xf32> to vector<1x128xf32>
    %c8_201 = arith.constant 8 : index
    %c0_202 = arith.constant 0 : index
    %c0_203 = arith.constant 0 : index
    %338 = vector.load %arg10[%c8_201, %c0_202, %c0_203] : memref<48x128x128xf32, #tpu.memory_space<vmem>>, vector<1x128x128xf32>
    %339 = vector.shape_cast %338 : vector<1x128x128xf32> to vector<128x128xf32>
    %cst_204 = arith.constant dense<0.000000e+00> : vector<1x128xf32>
    %340 = tpu.matmul %337, %339, %cst_204 {dimension_numbers = #tpu.dot_dimension_numbers<[1], [0], [0], [1], [0, 0, 1, 1], [], []>} : vector<1x128xf32>, vector<128x128xf32>, vector<1x128xf32> -> vector<1x128xf32>
    %341 = arith.addf %335, %340 : vector<1x128xf32>
    %c0_205 = arith.constant 0 : index
    %c9 = arith.constant 9 : index
    %c0_206 = arith.constant 0 : index
    %342 = vector.load %arg19[%c0_205, %c9, %c0_206] : memref<1x48x128xf32, #tpu.memory_space<vmem>>, vector<1x1x128xf32>
    %343 = vector.shape_cast %342 : vector<1x1x128xf32> to vector<1x128xf32>
    %c9_207 = arith.constant 9 : index
    %c0_208 = arith.constant 0 : index
    %c0_209 = arith.constant 0 : index
    %344 = vector.load %arg10[%c9_207, %c0_208, %c0_209] : memref<48x128x128xf32, #tpu.memory_space<vmem>>, vector<1x128x128xf32>
    %345 = vector.shape_cast %344 : vector<1x128x128xf32> to vector<128x128xf32>
    %cst_210 = arith.constant dense<0.000000e+00> : vector<1x128xf32>
    %346 = tpu.matmul %343, %345, %cst_210 {dimension_numbers = #tpu.dot_dimension_numbers<[1], [0], [0], [1], [0, 0, 1, 1], [], []>} : vector<1x128xf32>, vector<128x128xf32>, vector<1x128xf32> -> vector<1x128xf32>
    %347 = arith.addf %341, %346 : vector<1x128xf32>
    %c0_211 = arith.constant 0 : index
    %c10 = arith.constant 10 : index
    %c0_212 = arith.constant 0 : index
    %348 = vector.load %arg19[%c0_211, %c10, %c0_212] : memref<1x48x128xf32, #tpu.memory_space<vmem>>, vector<1x1x128xf32>
    %349 = vector.shape_cast %348 : vector<1x1x128xf32> to vector<1x128xf32>
    %c10_213 = arith.constant 10 : index
    %c0_214 = arith.constant 0 : index
    %c0_215 = arith.constant 0 : index
    %350 = vector.load %arg10[%c10_213, %c0_214, %c0_215] : memref<48x128x128xf32, #tpu.memory_space<vmem>>, vector<1x128x128xf32>
    %351 = vector.shape_cast %350 : vector<1x128x128xf32> to vector<128x128xf32>
    %cst_216 = arith.constant dense<0.000000e+00> : vector<1x128xf32>
    %352 = tpu.matmul %349, %351, %cst_216 {dimension_numbers = #tpu.dot_dimension_numbers<[1], [0], [0], [1], [0, 0, 1, 1], [], []>} : vector<1x128xf32>, vector<128x128xf32>, vector<1x128xf32> -> vector<1x128xf32>
    %353 = arith.addf %347, %352 : vector<1x128xf32>
    %c0_217 = arith.constant 0 : index
    %c11 = arith.constant 11 : index
    %c0_218 = arith.constant 0 : index
    %354 = vector.load %arg19[%c0_217, %c11, %c0_218] : memref<1x48x128xf32, #tpu.memory_space<vmem>>, vector<1x1x128xf32>
    %355 = vector.shape_cast %354 : vector<1x1x128xf32> to vector<1x128xf32>
    %c11_219 = arith.constant 11 : index
    %c0_220 = arith.constant 0 : index
    %c0_221 = arith.constant 0 : index
    %356 = vector.load %arg10[%c11_219, %c0_220, %c0_221] : memref<48x128x128xf32, #tpu.memory_space<vmem>>, vector<1x128x128xf32>
    %357 = vector.shape_cast %356 : vector<1x128x128xf32> to vector<128x128xf32>
    %cst_222 = arith.constant dense<0.000000e+00> : vector<1x128xf32>
    %358 = tpu.matmul %355, %357, %cst_222 {dimension_numbers = #tpu.dot_dimension_numbers<[1], [0], [0], [1], [0, 0, 1, 1], [], []>} : vector<1x128xf32>, vector<128x128xf32>, vector<1x128xf32> -> vector<1x128xf32>
    %359 = arith.addf %353, %358 : vector<1x128xf32>
    %c0_223 = arith.constant 0 : index
    %c12 = arith.constant 12 : index
    %c0_224 = arith.constant 0 : index
    %360 = vector.load %arg19[%c0_223, %c12, %c0_224] : memref<1x48x128xf32, #tpu.memory_space<vmem>>, vector<1x1x128xf32>
    %361 = vector.shape_cast %360 : vector<1x1x128xf32> to vector<1x128xf32>
    %c12_225 = arith.constant 12 : index
    %c0_226 = arith.constant 0 : index
    %c0_227 = arith.constant 0 : index
    %362 = vector.load %arg10[%c12_225, %c0_226, %c0_227] : memref<48x128x128xf32, #tpu.memory_space<vmem>>, vector<1x128x128xf32>
    %363 = vector.shape_cast %362 : vector<1x128x128xf32> to vector<128x128xf32>
    %cst_228 = arith.constant dense<0.000000e+00> : vector<1x128xf32>
    %364 = tpu.matmul %361, %363, %cst_228 {dimension_numbers = #tpu.dot_dimension_numbers<[1], [0], [0], [1], [0, 0, 1, 1], [], []>} : vector<1x128xf32>, vector<128x128xf32>, vector<1x128xf32> -> vector<1x128xf32>
    %365 = arith.addf %359, %364 : vector<1x128xf32>
    %c0_229 = arith.constant 0 : index
    %c13 = arith.constant 13 : index
    %c0_230 = arith.constant 0 : index
    %366 = vector.load %arg19[%c0_229, %c13, %c0_230] : memref<1x48x128xf32, #tpu.memory_space<vmem>>, vector<1x1x128xf32>
    %367 = vector.shape_cast %366 : vector<1x1x128xf32> to vector<1x128xf32>
    %c13_231 = arith.constant 13 : index
    %c0_232 = arith.constant 0 : index
    %c0_233 = arith.constant 0 : index
    %368 = vector.load %arg10[%c13_231, %c0_232, %c0_233] : memref<48x128x128xf32, #tpu.memory_space<vmem>>, vector<1x128x128xf32>
    %369 = vector.shape_cast %368 : vector<1x128x128xf32> to vector<128x128xf32>
    %cst_234 = arith.constant dense<0.000000e+00> : vector<1x128xf32>
    %370 = tpu.matmul %367, %369, %cst_234 {dimension_numbers = #tpu.dot_dimension_numbers<[1], [0], [0], [1], [0, 0, 1, 1], [], []>} : vector<1x128xf32>, vector<128x128xf32>, vector<1x128xf32> -> vector<1x128xf32>
    %371 = arith.addf %365, %370 : vector<1x128xf32>
    %c0_235 = arith.constant 0 : index
    %c14 = arith.constant 14 : index
    %c0_236 = arith.constant 0 : index
    %372 = vector.load %arg19[%c0_235, %c14, %c0_236] : memref<1x48x128xf32, #tpu.memory_space<vmem>>, vector<1x1x128xf32>
    %373 = vector.shape_cast %372 : vector<1x1x128xf32> to vector<1x128xf32>
    %c14_237 = arith.constant 14 : index
    %c0_238 = arith.constant 0 : index
    %c0_239 = arith.constant 0 : index
    %374 = vector.load %arg10[%c14_237, %c0_238, %c0_239] : memref<48x128x128xf32, #tpu.memory_space<vmem>>, vector<1x128x128xf32>
    %375 = vector.shape_cast %374 : vector<1x128x128xf32> to vector<128x128xf32>
    %cst_240 = arith.constant dense<0.000000e+00> : vector<1x128xf32>
    %376 = tpu.matmul %373, %375, %cst_240 {dimension_numbers = #tpu.dot_dimension_numbers<[1], [0], [0], [1], [0, 0, 1, 1], [], []>} : vector<1x128xf32>, vector<128x128xf32>, vector<1x128xf32> -> vector<1x128xf32>
    %377 = arith.addf %371, %376 : vector<1x128xf32>
    %c0_241 = arith.constant 0 : index
    %c15 = arith.constant 15 : index
    %c0_242 = arith.constant 0 : index
    %378 = vector.load %arg19[%c0_241, %c15, %c0_242] : memref<1x48x128xf32, #tpu.memory_space<vmem>>, vector<1x1x128xf32>
    %379 = vector.shape_cast %378 : vector<1x1x128xf32> to vector<1x128xf32>
    %c15_243 = arith.constant 15 : index
    %c0_244 = arith.constant 0 : index
    %c0_245 = arith.constant 0 : index
    %380 = vector.load %arg10[%c15_243, %c0_244, %c0_245] : memref<48x128x128xf32, #tpu.memory_space<vmem>>, vector<1x128x128xf32>
    %381 = vector.shape_cast %380 : vector<1x128x128xf32> to vector<128x128xf32>
    %cst_246 = arith.constant dense<0.000000e+00> : vector<1x128xf32>
    %382 = tpu.matmul %379, %381, %cst_246 {dimension_numbers = #tpu.dot_dimension_numbers<[1], [0], [0], [1], [0, 0, 1, 1], [], []>} : vector<1x128xf32>, vector<128x128xf32>, vector<1x128xf32> -> vector<1x128xf32>
    %383 = arith.addf %377, %382 : vector<1x128xf32>
    %c0_247 = arith.constant 0 : index
    %c16 = arith.constant 16 : index
    %c0_248 = arith.constant 0 : index
    %384 = vector.load %arg19[%c0_247, %c16, %c0_248] : memref<1x48x128xf32, #tpu.memory_space<vmem>>, vector<1x1x128xf32>
    %385 = vector.shape_cast %384 : vector<1x1x128xf32> to vector<1x128xf32>
    %c16_249 = arith.constant 16 : index
    %c0_250 = arith.constant 0 : index
    %c0_251 = arith.constant 0 : index
    %386 = vector.load %arg10[%c16_249, %c0_250, %c0_251] : memref<48x128x128xf32, #tpu.memory_space<vmem>>, vector<1x128x128xf32>
    %387 = vector.shape_cast %386 : vector<1x128x128xf32> to vector<128x128xf32>
    %cst_252 = arith.constant dense<0.000000e+00> : vector<1x128xf32>
    %388 = tpu.matmul %385, %387, %cst_252 {dimension_numbers = #tpu.dot_dimension_numbers<[1], [0], [0], [1], [0, 0, 1, 1], [], []>} : vector<1x128xf32>, vector<128x128xf32>, vector<1x128xf32> -> vector<1x128xf32>
    %389 = arith.addf %383, %388 : vector<1x128xf32>
    %c0_253 = arith.constant 0 : index
    %c17 = arith.constant 17 : index
    %c0_254 = arith.constant 0 : index
    %390 = vector.load %arg19[%c0_253, %c17, %c0_254] : memref<1x48x128xf32, #tpu.memory_space<vmem>>, vector<1x1x128xf32>
    %391 = vector.shape_cast %390 : vector<1x1x128xf32> to vector<1x128xf32>
    %c17_255 = arith.constant 17 : index
    %c0_256 = arith.constant 0 : index
    %c0_257 = arith.constant 0 : index
    %392 = vector.load %arg10[%c17_255, %c0_256, %c0_257] : memref<48x128x128xf32, #tpu.memory_space<vmem>>, vector<1x128x128xf32>
    %393 = vector.shape_cast %392 : vector<1x128x128xf32> to vector<128x128xf32>
    %cst_258 = arith.constant dense<0.000000e+00> : vector<1x128xf32>
    %394 = tpu.matmul %391, %393, %cst_258 {dimension_numbers = #tpu.dot_dimension_numbers<[1], [0], [0], [1], [0, 0, 1, 1], [], []>} : vector<1x128xf32>, vector<128x128xf32>, vector<1x128xf32> -> vector<1x128xf32>
    %395 = arith.addf %389, %394 : vector<1x128xf32>
    %c0_259 = arith.constant 0 : index
    %c18 = arith.constant 18 : index
    %c0_260 = arith.constant 0 : index
    %396 = vector.load %arg19[%c0_259, %c18, %c0_260] : memref<1x48x128xf32, #tpu.memory_space<vmem>>, vector<1x1x128xf32>
    %397 = vector.shape_cast %396 : vector<1x1x128xf32> to vector<1x128xf32>
    %c18_261 = arith.constant 18 : index
    %c0_262 = arith.constant 0 : index
    %c0_263 = arith.constant 0 : index
    %398 = vector.load %arg10[%c18_261, %c0_262, %c0_263] : memref<48x128x128xf32, #tpu.memory_space<vmem>>, vector<1x128x128xf32>
    %399 = vector.shape_cast %398 : vector<1x128x128xf32> to vector<128x128xf32>
    %cst_264 = arith.constant dense<0.000000e+00> : vector<1x128xf32>
    %400 = tpu.matmul %397, %399, %cst_264 {dimension_numbers = #tpu.dot_dimension_numbers<[1], [0], [0], [1], [0, 0, 1, 1], [], []>} : vector<1x128xf32>, vector<128x128xf32>, vector<1x128xf32> -> vector<1x128xf32>
    %401 = arith.addf %395, %400 : vector<1x128xf32>
    %c0_265 = arith.constant 0 : index
    %c19 = arith.constant 19 : index
    %c0_266 = arith.constant 0 : index
    %402 = vector.load %arg19[%c0_265, %c19, %c0_266] : memref<1x48x128xf32, #tpu.memory_space<vmem>>, vector<1x1x128xf32>
    %403 = vector.shape_cast %402 : vector<1x1x128xf32> to vector<1x128xf32>
    %c19_267 = arith.constant 19 : index
    %c0_268 = arith.constant 0 : index
    %c0_269 = arith.constant 0 : index
    %404 = vector.load %arg10[%c19_267, %c0_268, %c0_269] : memref<48x128x128xf32, #tpu.memory_space<vmem>>, vector<1x128x128xf32>
    %405 = vector.shape_cast %404 : vector<1x128x128xf32> to vector<128x128xf32>
    %cst_270 = arith.constant dense<0.000000e+00> : vector<1x128xf32>
    %406 = tpu.matmul %403, %405, %cst_270 {dimension_numbers = #tpu.dot_dimension_numbers<[1], [0], [0], [1], [0, 0, 1, 1], [], []>} : vector<1x128xf32>, vector<128x128xf32>, vector<1x128xf32> -> vector<1x128xf32>
    %407 = arith.addf %401, %406 : vector<1x128xf32>
    %c0_271 = arith.constant 0 : index
    %c20 = arith.constant 20 : index
    %c0_272 = arith.constant 0 : index
    %408 = vector.load %arg19[%c0_271, %c20, %c0_272] : memref<1x48x128xf32, #tpu.memory_space<vmem>>, vector<1x1x128xf32>
    %409 = vector.shape_cast %408 : vector<1x1x128xf32> to vector<1x128xf32>
    %c20_273 = arith.constant 20 : index
    %c0_274 = arith.constant 0 : index
    %c0_275 = arith.constant 0 : index
    %410 = vector.load %arg10[%c20_273, %c0_274, %c0_275] : memref<48x128x128xf32, #tpu.memory_space<vmem>>, vector<1x128x128xf32>
    %411 = vector.shape_cast %410 : vector<1x128x128xf32> to vector<128x128xf32>
    %cst_276 = arith.constant dense<0.000000e+00> : vector<1x128xf32>
    %412 = tpu.matmul %409, %411, %cst_276 {dimension_numbers = #tpu.dot_dimension_numbers<[1], [0], [0], [1], [0, 0, 1, 1], [], []>} : vector<1x128xf32>, vector<128x128xf32>, vector<1x128xf32> -> vector<1x128xf32>
    %413 = arith.addf %407, %412 : vector<1x128xf32>
    %c0_277 = arith.constant 0 : index
    %c21 = arith.constant 21 : index
    %c0_278 = arith.constant 0 : index
    %414 = vector.load %arg19[%c0_277, %c21, %c0_278] : memref<1x48x128xf32, #tpu.memory_space<vmem>>, vector<1x1x128xf32>
    %415 = vector.shape_cast %414 : vector<1x1x128xf32> to vector<1x128xf32>
    %c21_279 = arith.constant 21 : index
    %c0_280 = arith.constant 0 : index
    %c0_281 = arith.constant 0 : index
    %416 = vector.load %arg10[%c21_279, %c0_280, %c0_281] : memref<48x128x128xf32, #tpu.memory_space<vmem>>, vector<1x128x128xf32>
    %417 = vector.shape_cast %416 : vector<1x128x128xf32> to vector<128x128xf32>
    %cst_282 = arith.constant dense<0.000000e+00> : vector<1x128xf32>
    %418 = tpu.matmul %415, %417, %cst_282 {dimension_numbers = #tpu.dot_dimension_numbers<[1], [0], [0], [1], [0, 0, 1, 1], [], []>} : vector<1x128xf32>, vector<128x128xf32>, vector<1x128xf32> -> vector<1x128xf32>
    %419 = arith.addf %413, %418 : vector<1x128xf32>
    %c0_283 = arith.constant 0 : index
    %c22 = arith.constant 22 : index
    %c0_284 = arith.constant 0 : index
    %420 = vector.load %arg19[%c0_283, %c22, %c0_284] : memref<1x48x128xf32, #tpu.memory_space<vmem>>, vector<1x1x128xf32>
    %421 = vector.shape_cast %420 : vector<1x1x128xf32> to vector<1x128xf32>
    %c22_285 = arith.constant 22 : index
    %c0_286 = arith.constant 0 : index
    %c0_287 = arith.constant 0 : index
    %422 = vector.load %arg10[%c22_285, %c0_286, %c0_287] : memref<48x128x128xf32, #tpu.memory_space<vmem>>, vector<1x128x128xf32>
    %423 = vector.shape_cast %422 : vector<1x128x128xf32> to vector<128x128xf32>
    %cst_288 = arith.constant dense<0.000000e+00> : vector<1x128xf32>
    %424 = tpu.matmul %421, %423, %cst_288 {dimension_numbers = #tpu.dot_dimension_numbers<[1], [0], [0], [1], [0, 0, 1, 1], [], []>} : vector<1x128xf32>, vector<128x128xf32>, vector<1x128xf32> -> vector<1x128xf32>
    %425 = arith.addf %419, %424 : vector<1x128xf32>
    %c0_289 = arith.constant 0 : index
    %c23 = arith.constant 23 : index
    %c0_290 = arith.constant 0 : index
    %426 = vector.load %arg19[%c0_289, %c23, %c0_290] : memref<1x48x128xf32, #tpu.memory_space<vmem>>, vector<1x1x128xf32>
    %427 = vector.shape_cast %426 : vector<1x1x128xf32> to vector<1x128xf32>
    %c23_291 = arith.constant 23 : index
    %c0_292 = arith.constant 0 : index
    %c0_293 = arith.constant 0 : index
    %428 = vector.load %arg10[%c23_291, %c0_292, %c0_293] : memref<48x128x128xf32, #tpu.memory_space<vmem>>, vector<1x128x128xf32>
    %429 = vector.shape_cast %428 : vector<1x128x128xf32> to vector<128x128xf32>
    %cst_294 = arith.constant dense<0.000000e+00> : vector<1x128xf32>
    %430 = tpu.matmul %427, %429, %cst_294 {dimension_numbers = #tpu.dot_dimension_numbers<[1], [0], [0], [1], [0, 0, 1, 1], [], []>} : vector<1x128xf32>, vector<128x128xf32>, vector<1x128xf32> -> vector<1x128xf32>
    %431 = arith.addf %425, %430 : vector<1x128xf32>
    %c0_295 = arith.constant 0 : index
    %c24 = arith.constant 24 : index
    %c0_296 = arith.constant 0 : index
    %432 = vector.load %arg19[%c0_295, %c24, %c0_296] : memref<1x48x128xf32, #tpu.memory_space<vmem>>, vector<1x1x128xf32>
    %433 = vector.shape_cast %432 : vector<1x1x128xf32> to vector<1x128xf32>
    %c24_297 = arith.constant 24 : index
    %c0_298 = arith.constant 0 : index
    %c0_299 = arith.constant 0 : index
    %434 = vector.load %arg10[%c24_297, %c0_298, %c0_299] : memref<48x128x128xf32, #tpu.memory_space<vmem>>, vector<1x128x128xf32>
    %435 = vector.shape_cast %434 : vector<1x128x128xf32> to vector<128x128xf32>
    %cst_300 = arith.constant dense<0.000000e+00> : vector<1x128xf32>
    %436 = tpu.matmul %433, %435, %cst_300 {dimension_numbers = #tpu.dot_dimension_numbers<[1], [0], [0], [1], [0, 0, 1, 1], [], []>} : vector<1x128xf32>, vector<128x128xf32>, vector<1x128xf32> -> vector<1x128xf32>
    %437 = arith.addf %431, %436 : vector<1x128xf32>
    %c0_301 = arith.constant 0 : index
    %c25 = arith.constant 25 : index
    %c0_302 = arith.constant 0 : index
    %438 = vector.load %arg19[%c0_301, %c25, %c0_302] : memref<1x48x128xf32, #tpu.memory_space<vmem>>, vector<1x1x128xf32>
    %439 = vector.shape_cast %438 : vector<1x1x128xf32> to vector<1x128xf32>
    %c25_303 = arith.constant 25 : index
    %c0_304 = arith.constant 0 : index
    %c0_305 = arith.constant 0 : index
    %440 = vector.load %arg10[%c25_303, %c0_304, %c0_305] : memref<48x128x128xf32, #tpu.memory_space<vmem>>, vector<1x128x128xf32>
    %441 = vector.shape_cast %440 : vector<1x128x128xf32> to vector<128x128xf32>
    %cst_306 = arith.constant dense<0.000000e+00> : vector<1x128xf32>
    %442 = tpu.matmul %439, %441, %cst_306 {dimension_numbers = #tpu.dot_dimension_numbers<[1], [0], [0], [1], [0, 0, 1, 1], [], []>} : vector<1x128xf32>, vector<128x128xf32>, vector<1x128xf32> -> vector<1x128xf32>
    %443 = arith.addf %437, %442 : vector<1x128xf32>
    %c0_307 = arith.constant 0 : index
    %c26 = arith.constant 26 : index
    %c0_308 = arith.constant 0 : index
    %444 = vector.load %arg19[%c0_307, %c26, %c0_308] : memref<1x48x128xf32, #tpu.memory_space<vmem>>, vector<1x1x128xf32>
    %445 = vector.shape_cast %444 : vector<1x1x128xf32> to vector<1x128xf32>
    %c26_309 = arith.constant 26 : index
    %c0_310 = arith.constant 0 : index
    %c0_311 = arith.constant 0 : index
    %446 = vector.load %arg10[%c26_309, %c0_310, %c0_311] : memref<48x128x128xf32, #tpu.memory_space<vmem>>, vector<1x128x128xf32>
    %447 = vector.shape_cast %446 : vector<1x128x128xf32> to vector<128x128xf32>
    %cst_312 = arith.constant dense<0.000000e+00> : vector<1x128xf32>
    %448 = tpu.matmul %445, %447, %cst_312 {dimension_numbers = #tpu.dot_dimension_numbers<[1], [0], [0], [1], [0, 0, 1, 1], [], []>} : vector<1x128xf32>, vector<128x128xf32>, vector<1x128xf32> -> vector<1x128xf32>
    %449 = arith.addf %443, %448 : vector<1x128xf32>
    %c0_313 = arith.constant 0 : index
    %c27 = arith.constant 27 : index
    %c0_314 = arith.constant 0 : index
    %450 = vector.load %arg19[%c0_313, %c27, %c0_314] : memref<1x48x128xf32, #tpu.memory_space<vmem>>, vector<1x1x128xf32>
    %451 = vector.shape_cast %450 : vector<1x1x128xf32> to vector<1x128xf32>
    %c27_315 = arith.constant 27 : index
    %c0_316 = arith.constant 0 : index
    %c0_317 = arith.constant 0 : index
    %452 = vector.load %arg10[%c27_315, %c0_316, %c0_317] : memref<48x128x128xf32, #tpu.memory_space<vmem>>, vector<1x128x128xf32>
    %453 = vector.shape_cast %452 : vector<1x128x128xf32> to vector<128x128xf32>
    %cst_318 = arith.constant dense<0.000000e+00> : vector<1x128xf32>
    %454 = tpu.matmul %451, %453, %cst_318 {dimension_numbers = #tpu.dot_dimension_numbers<[1], [0], [0], [1], [0, 0, 1, 1], [], []>} : vector<1x128xf32>, vector<128x128xf32>, vector<1x128xf32> -> vector<1x128xf32>
    %455 = arith.addf %449, %454 : vector<1x128xf32>
    %c0_319 = arith.constant 0 : index
    %c28 = arith.constant 28 : index
    %c0_320 = arith.constant 0 : index
    %456 = vector.load %arg19[%c0_319, %c28, %c0_320] : memref<1x48x128xf32, #tpu.memory_space<vmem>>, vector<1x1x128xf32>
    %457 = vector.shape_cast %456 : vector<1x1x128xf32> to vector<1x128xf32>
    %c28_321 = arith.constant 28 : index
    %c0_322 = arith.constant 0 : index
    %c0_323 = arith.constant 0 : index
    %458 = vector.load %arg10[%c28_321, %c0_322, %c0_323] : memref<48x128x128xf32, #tpu.memory_space<vmem>>, vector<1x128x128xf32>
    %459 = vector.shape_cast %458 : vector<1x128x128xf32> to vector<128x128xf32>
    %cst_324 = arith.constant dense<0.000000e+00> : vector<1x128xf32>
    %460 = tpu.matmul %457, %459, %cst_324 {dimension_numbers = #tpu.dot_dimension_numbers<[1], [0], [0], [1], [0, 0, 1, 1], [], []>} : vector<1x128xf32>, vector<128x128xf32>, vector<1x128xf32> -> vector<1x128xf32>
    %461 = arith.addf %455, %460 : vector<1x128xf32>
    %c0_325 = arith.constant 0 : index
    %c29 = arith.constant 29 : index
    %c0_326 = arith.constant 0 : index
    %462 = vector.load %arg19[%c0_325, %c29, %c0_326] : memref<1x48x128xf32, #tpu.memory_space<vmem>>, vector<1x1x128xf32>
    %463 = vector.shape_cast %462 : vector<1x1x128xf32> to vector<1x128xf32>
    %c29_327 = arith.constant 29 : index
    %c0_328 = arith.constant 0 : index
    %c0_329 = arith.constant 0 : index
    %464 = vector.load %arg10[%c29_327, %c0_328, %c0_329] : memref<48x128x128xf32, #tpu.memory_space<vmem>>, vector<1x128x128xf32>
    %465 = vector.shape_cast %464 : vector<1x128x128xf32> to vector<128x128xf32>
    %cst_330 = arith.constant dense<0.000000e+00> : vector<1x128xf32>
    %466 = tpu.matmul %463, %465, %cst_330 {dimension_numbers = #tpu.dot_dimension_numbers<[1], [0], [0], [1], [0, 0, 1, 1], [], []>} : vector<1x128xf32>, vector<128x128xf32>, vector<1x128xf32> -> vector<1x128xf32>
    %467 = arith.addf %461, %466 : vector<1x128xf32>
    %c0_331 = arith.constant 0 : index
    %c30 = arith.constant 30 : index
    %c0_332 = arith.constant 0 : index
    %468 = vector.load %arg19[%c0_331, %c30, %c0_332] : memref<1x48x128xf32, #tpu.memory_space<vmem>>, vector<1x1x128xf32>
    %469 = vector.shape_cast %468 : vector<1x1x128xf32> to vector<1x128xf32>
    %c30_333 = arith.constant 30 : index
    %c0_334 = arith.constant 0 : index
    %c0_335 = arith.constant 0 : index
    %470 = vector.load %arg10[%c30_333, %c0_334, %c0_335] : memref<48x128x128xf32, #tpu.memory_space<vmem>>, vector<1x128x128xf32>
    %471 = vector.shape_cast %470 : vector<1x128x128xf32> to vector<128x128xf32>
    %cst_336 = arith.constant dense<0.000000e+00> : vector<1x128xf32>
    %472 = tpu.matmul %469, %471, %cst_336 {dimension_numbers = #tpu.dot_dimension_numbers<[1], [0], [0], [1], [0, 0, 1, 1], [], []>} : vector<1x128xf32>, vector<128x128xf32>, vector<1x128xf32> -> vector<1x128xf32>
    %473 = arith.addf %467, %472 : vector<1x128xf32>
    %c0_337 = arith.constant 0 : index
    %c31 = arith.constant 31 : index
    %c0_338 = arith.constant 0 : index
    %474 = vector.load %arg19[%c0_337, %c31, %c0_338] : memref<1x48x128xf32, #tpu.memory_space<vmem>>, vector<1x1x128xf32>
    %475 = vector.shape_cast %474 : vector<1x1x128xf32> to vector<1x128xf32>
    %c31_339 = arith.constant 31 : index
    %c0_340 = arith.constant 0 : index
    %c0_341 = arith.constant 0 : index
    %476 = vector.load %arg10[%c31_339, %c0_340, %c0_341] : memref<48x128x128xf32, #tpu.memory_space<vmem>>, vector<1x128x128xf32>
    %477 = vector.shape_cast %476 : vector<1x128x128xf32> to vector<128x128xf32>
    %cst_342 = arith.constant dense<0.000000e+00> : vector<1x128xf32>
    %478 = tpu.matmul %475, %477, %cst_342 {dimension_numbers = #tpu.dot_dimension_numbers<[1], [0], [0], [1], [0, 0, 1, 1], [], []>} : vector<1x128xf32>, vector<128x128xf32>, vector<1x128xf32> -> vector<1x128xf32>
    %479 = arith.addf %473, %478 : vector<1x128xf32>
    %c0_343 = arith.constant 0 : index
    %c32 = arith.constant 32 : index
    %c0_344 = arith.constant 0 : index
    %480 = vector.load %arg19[%c0_343, %c32, %c0_344] : memref<1x48x128xf32, #tpu.memory_space<vmem>>, vector<1x1x128xf32>
    %481 = vector.shape_cast %480 : vector<1x1x128xf32> to vector<1x128xf32>
    %c32_345 = arith.constant 32 : index
    %c0_346 = arith.constant 0 : index
    %c0_347 = arith.constant 0 : index
    %482 = vector.load %arg10[%c32_345, %c0_346, %c0_347] : memref<48x128x128xf32, #tpu.memory_space<vmem>>, vector<1x128x128xf32>
    %483 = vector.shape_cast %482 : vector<1x128x128xf32> to vector<128x128xf32>
    %cst_348 = arith.constant dense<0.000000e+00> : vector<1x128xf32>
    %484 = tpu.matmul %481, %483, %cst_348 {dimension_numbers = #tpu.dot_dimension_numbers<[1], [0], [0], [1], [0, 0, 1, 1], [], []>} : vector<1x128xf32>, vector<128x128xf32>, vector<1x128xf32> -> vector<1x128xf32>
    %485 = arith.addf %479, %484 : vector<1x128xf32>
    %c0_349 = arith.constant 0 : index
    %c33 = arith.constant 33 : index
    %c0_350 = arith.constant 0 : index
    %486 = vector.load %arg19[%c0_349, %c33, %c0_350] : memref<1x48x128xf32, #tpu.memory_space<vmem>>, vector<1x1x128xf32>
    %487 = vector.shape_cast %486 : vector<1x1x128xf32> to vector<1x128xf32>
    %c33_351 = arith.constant 33 : index
    %c0_352 = arith.constant 0 : index
    %c0_353 = arith.constant 0 : index
    %488 = vector.load %arg10[%c33_351, %c0_352, %c0_353] : memref<48x128x128xf32, #tpu.memory_space<vmem>>, vector<1x128x128xf32>
    %489 = vector.shape_cast %488 : vector<1x128x128xf32> to vector<128x128xf32>
    %cst_354 = arith.constant dense<0.000000e+00> : vector<1x128xf32>
    %490 = tpu.matmul %487, %489, %cst_354 {dimension_numbers = #tpu.dot_dimension_numbers<[1], [0], [0], [1], [0, 0, 1, 1], [], []>} : vector<1x128xf32>, vector<128x128xf32>, vector<1x128xf32> -> vector<1x128xf32>
    %491 = arith.addf %485, %490 : vector<1x128xf32>
    %c0_355 = arith.constant 0 : index
    %c34 = arith.constant 34 : index
    %c0_356 = arith.constant 0 : index
    %492 = vector.load %arg19[%c0_355, %c34, %c0_356] : memref<1x48x128xf32, #tpu.memory_space<vmem>>, vector<1x1x128xf32>
    %493 = vector.shape_cast %492 : vector<1x1x128xf32> to vector<1x128xf32>
    %c34_357 = arith.constant 34 : index
    %c0_358 = arith.constant 0 : index
    %c0_359 = arith.constant 0 : index
    %494 = vector.load %arg10[%c34_357, %c0_358, %c0_359] : memref<48x128x128xf32, #tpu.memory_space<vmem>>, vector<1x128x128xf32>
    %495 = vector.shape_cast %494 : vector<1x128x128xf32> to vector<128x128xf32>
    %cst_360 = arith.constant dense<0.000000e+00> : vector<1x128xf32>
    %496 = tpu.matmul %493, %495, %cst_360 {dimension_numbers = #tpu.dot_dimension_numbers<[1], [0], [0], [1], [0, 0, 1, 1], [], []>} : vector<1x128xf32>, vector<128x128xf32>, vector<1x128xf32> -> vector<1x128xf32>
    %497 = arith.addf %491, %496 : vector<1x128xf32>
    %c0_361 = arith.constant 0 : index
    %c35 = arith.constant 35 : index
    %c0_362 = arith.constant 0 : index
    %498 = vector.load %arg19[%c0_361, %c35, %c0_362] : memref<1x48x128xf32, #tpu.memory_space<vmem>>, vector<1x1x128xf32>
    %499 = vector.shape_cast %498 : vector<1x1x128xf32> to vector<1x128xf32>
    %c35_363 = arith.constant 35 : index
    %c0_364 = arith.constant 0 : index
    %c0_365 = arith.constant 0 : index
    %500 = vector.load %arg10[%c35_363, %c0_364, %c0_365] : memref<48x128x128xf32, #tpu.memory_space<vmem>>, vector<1x128x128xf32>
    %501 = vector.shape_cast %500 : vector<1x128x128xf32> to vector<128x128xf32>
    %cst_366 = arith.constant dense<0.000000e+00> : vector<1x128xf32>
    %502 = tpu.matmul %499, %501, %cst_366 {dimension_numbers = #tpu.dot_dimension_numbers<[1], [0], [0], [1], [0, 0, 1, 1], [], []>} : vector<1x128xf32>, vector<128x128xf32>, vector<1x128xf32> -> vector<1x128xf32>
    %503 = arith.addf %497, %502 : vector<1x128xf32>
    %c0_367 = arith.constant 0 : index
    %c36 = arith.constant 36 : index
    %c0_368 = arith.constant 0 : index
    %504 = vector.load %arg19[%c0_367, %c36, %c0_368] : memref<1x48x128xf32, #tpu.memory_space<vmem>>, vector<1x1x128xf32>
    %505 = vector.shape_cast %504 : vector<1x1x128xf32> to vector<1x128xf32>
    %c36_369 = arith.constant 36 : index
    %c0_370 = arith.constant 0 : index
    %c0_371 = arith.constant 0 : index
    %506 = vector.load %arg10[%c36_369, %c0_370, %c0_371] : memref<48x128x128xf32, #tpu.memory_space<vmem>>, vector<1x128x128xf32>
    %507 = vector.shape_cast %506 : vector<1x128x128xf32> to vector<128x128xf32>
    %cst_372 = arith.constant dense<0.000000e+00> : vector<1x128xf32>
    %508 = tpu.matmul %505, %507, %cst_372 {dimension_numbers = #tpu.dot_dimension_numbers<[1], [0], [0], [1], [0, 0, 1, 1], [], []>} : vector<1x128xf32>, vector<128x128xf32>, vector<1x128xf32> -> vector<1x128xf32>
    %509 = arith.addf %503, %508 : vector<1x128xf32>
    %c0_373 = arith.constant 0 : index
    %c37 = arith.constant 37 : index
    %c0_374 = arith.constant 0 : index
    %510 = vector.load %arg19[%c0_373, %c37, %c0_374] : memref<1x48x128xf32, #tpu.memory_space<vmem>>, vector<1x1x128xf32>
    %511 = vector.shape_cast %510 : vector<1x1x128xf32> to vector<1x128xf32>
    %c37_375 = arith.constant 37 : index
    %c0_376 = arith.constant 0 : index
    %c0_377 = arith.constant 0 : index
    %512 = vector.load %arg10[%c37_375, %c0_376, %c0_377] : memref<48x128x128xf32, #tpu.memory_space<vmem>>, vector<1x128x128xf32>
    %513 = vector.shape_cast %512 : vector<1x128x128xf32> to vector<128x128xf32>
    %cst_378 = arith.constant dense<0.000000e+00> : vector<1x128xf32>
    %514 = tpu.matmul %511, %513, %cst_378 {dimension_numbers = #tpu.dot_dimension_numbers<[1], [0], [0], [1], [0, 0, 1, 1], [], []>} : vector<1x128xf32>, vector<128x128xf32>, vector<1x128xf32> -> vector<1x128xf32>
    %515 = arith.addf %509, %514 : vector<1x128xf32>
    %c0_379 = arith.constant 0 : index
    %c38 = arith.constant 38 : index
    %c0_380 = arith.constant 0 : index
    %516 = vector.load %arg19[%c0_379, %c38, %c0_380] : memref<1x48x128xf32, #tpu.memory_space<vmem>>, vector<1x1x128xf32>
    %517 = vector.shape_cast %516 : vector<1x1x128xf32> to vector<1x128xf32>
    %c38_381 = arith.constant 38 : index
    %c0_382 = arith.constant 0 : index
    %c0_383 = arith.constant 0 : index
    %518 = vector.load %arg10[%c38_381, %c0_382, %c0_383] : memref<48x128x128xf32, #tpu.memory_space<vmem>>, vector<1x128x128xf32>
    %519 = vector.shape_cast %518 : vector<1x128x128xf32> to vector<128x128xf32>
    %cst_384 = arith.constant dense<0.000000e+00> : vector<1x128xf32>
    %520 = tpu.matmul %517, %519, %cst_384 {dimension_numbers = #tpu.dot_dimension_numbers<[1], [0], [0], [1], [0, 0, 1, 1], [], []>} : vector<1x128xf32>, vector<128x128xf32>, vector<1x128xf32> -> vector<1x128xf32>
    %521 = arith.addf %515, %520 : vector<1x128xf32>
    %c0_385 = arith.constant 0 : index
    %c39 = arith.constant 39 : index
    %c0_386 = arith.constant 0 : index
    %522 = vector.load %arg19[%c0_385, %c39, %c0_386] : memref<1x48x128xf32, #tpu.memory_space<vmem>>, vector<1x1x128xf32>
    %523 = vector.shape_cast %522 : vector<1x1x128xf32> to vector<1x128xf32>
    %c39_387 = arith.constant 39 : index
    %c0_388 = arith.constant 0 : index
    %c0_389 = arith.constant 0 : index
    %524 = vector.load %arg10[%c39_387, %c0_388, %c0_389] : memref<48x128x128xf32, #tpu.memory_space<vmem>>, vector<1x128x128xf32>
    %525 = vector.shape_cast %524 : vector<1x128x128xf32> to vector<128x128xf32>
    %cst_390 = arith.constant dense<0.000000e+00> : vector<1x128xf32>
    %526 = tpu.matmul %523, %525, %cst_390 {dimension_numbers = #tpu.dot_dimension_numbers<[1], [0], [0], [1], [0, 0, 1, 1], [], []>} : vector<1x128xf32>, vector<128x128xf32>, vector<1x128xf32> -> vector<1x128xf32>
    %527 = arith.addf %521, %526 : vector<1x128xf32>
    %c0_391 = arith.constant 0 : index
    %c40 = arith.constant 40 : index
    %c0_392 = arith.constant 0 : index
    %528 = vector.load %arg19[%c0_391, %c40, %c0_392] : memref<1x48x128xf32, #tpu.memory_space<vmem>>, vector<1x1x128xf32>
    %529 = vector.shape_cast %528 : vector<1x1x128xf32> to vector<1x128xf32>
    %c40_393 = arith.constant 40 : index
    %c0_394 = arith.constant 0 : index
    %c0_395 = arith.constant 0 : index
    %530 = vector.load %arg10[%c40_393, %c0_394, %c0_395] : memref<48x128x128xf32, #tpu.memory_space<vmem>>, vector<1x128x128xf32>
    %531 = vector.shape_cast %530 : vector<1x128x128xf32> to vector<128x128xf32>
    %cst_396 = arith.constant dense<0.000000e+00> : vector<1x128xf32>
    %532 = tpu.matmul %529, %531, %cst_396 {dimension_numbers = #tpu.dot_dimension_numbers<[1], [0], [0], [1], [0, 0, 1, 1], [], []>} : vector<1x128xf32>, vector<128x128xf32>, vector<1x128xf32> -> vector<1x128xf32>
    %533 = arith.addf %527, %532 : vector<1x128xf32>
    %c0_397 = arith.constant 0 : index
    %c41 = arith.constant 41 : index
    %c0_398 = arith.constant 0 : index
    %534 = vector.load %arg19[%c0_397, %c41, %c0_398] : memref<1x48x128xf32, #tpu.memory_space<vmem>>, vector<1x1x128xf32>
    %535 = vector.shape_cast %534 : vector<1x1x128xf32> to vector<1x128xf32>
    %c41_399 = arith.constant 41 : index
    %c0_400 = arith.constant 0 : index
    %c0_401 = arith.constant 0 : index
    %536 = vector.load %arg10[%c41_399, %c0_400, %c0_401] : memref<48x128x128xf32, #tpu.memory_space<vmem>>, vector<1x128x128xf32>
    %537 = vector.shape_cast %536 : vector<1x128x128xf32> to vector<128x128xf32>
    %cst_402 = arith.constant dense<0.000000e+00> : vector<1x128xf32>
    %538 = tpu.matmul %535, %537, %cst_402 {dimension_numbers = #tpu.dot_dimension_numbers<[1], [0], [0], [1], [0, 0, 1, 1], [], []>} : vector<1x128xf32>, vector<128x128xf32>, vector<1x128xf32> -> vector<1x128xf32>
    %539 = arith.addf %533, %538 : vector<1x128xf32>
    %c0_403 = arith.constant 0 : index
    %c42 = arith.constant 42 : index
    %c0_404 = arith.constant 0 : index
    %540 = vector.load %arg19[%c0_403, %c42, %c0_404] : memref<1x48x128xf32, #tpu.memory_space<vmem>>, vector<1x1x128xf32>
    %541 = vector.shape_cast %540 : vector<1x1x128xf32> to vector<1x128xf32>
    %c42_405 = arith.constant 42 : index
    %c0_406 = arith.constant 0 : index
    %c0_407 = arith.constant 0 : index
    %542 = vector.load %arg10[%c42_405, %c0_406, %c0_407] : memref<48x128x128xf32, #tpu.memory_space<vmem>>, vector<1x128x128xf32>
    %543 = vector.shape_cast %542 : vector<1x128x128xf32> to vector<128x128xf32>
    %cst_408 = arith.constant dense<0.000000e+00> : vector<1x128xf32>
    %544 = tpu.matmul %541, %543, %cst_408 {dimension_numbers = #tpu.dot_dimension_numbers<[1], [0], [0], [1], [0, 0, 1, 1], [], []>} : vector<1x128xf32>, vector<128x128xf32>, vector<1x128xf32> -> vector<1x128xf32>
    %545 = arith.addf %539, %544 : vector<1x128xf32>
    %c0_409 = arith.constant 0 : index
    %c43 = arith.constant 43 : index
    %c0_410 = arith.constant 0 : index
    %546 = vector.load %arg19[%c0_409, %c43, %c0_410] : memref<1x48x128xf32, #tpu.memory_space<vmem>>, vector<1x1x128xf32>
    %547 = vector.shape_cast %546 : vector<1x1x128xf32> to vector<1x128xf32>
    %c43_411 = arith.constant 43 : index
    %c0_412 = arith.constant 0 : index
    %c0_413 = arith.constant 0 : index
    %548 = vector.load %arg10[%c43_411, %c0_412, %c0_413] : memref<48x128x128xf32, #tpu.memory_space<vmem>>, vector<1x128x128xf32>
    %549 = vector.shape_cast %548 : vector<1x128x128xf32> to vector<128x128xf32>
    %cst_414 = arith.constant dense<0.000000e+00> : vector<1x128xf32>
    %550 = tpu.matmul %547, %549, %cst_414 {dimension_numbers = #tpu.dot_dimension_numbers<[1], [0], [0], [1], [0, 0, 1, 1], [], []>} : vector<1x128xf32>, vector<128x128xf32>, vector<1x128xf32> -> vector<1x128xf32>
    %551 = arith.addf %545, %550 : vector<1x128xf32>
    %c0_415 = arith.constant 0 : index
    %c44 = arith.constant 44 : index
    %c0_416 = arith.constant 0 : index
    %552 = vector.load %arg19[%c0_415, %c44, %c0_416] : memref<1x48x128xf32, #tpu.memory_space<vmem>>, vector<1x1x128xf32>
    %553 = vector.shape_cast %552 : vector<1x1x128xf32> to vector<1x128xf32>
    %c44_417 = arith.constant 44 : index
    %c0_418 = arith.constant 0 : index
    %c0_419 = arith.constant 0 : index
    %554 = vector.load %arg10[%c44_417, %c0_418, %c0_419] : memref<48x128x128xf32, #tpu.memory_space<vmem>>, vector<1x128x128xf32>
    %555 = vector.shape_cast %554 : vector<1x128x128xf32> to vector<128x128xf32>
    %cst_420 = arith.constant dense<0.000000e+00> : vector<1x128xf32>
    %556 = tpu.matmul %553, %555, %cst_420 {dimension_numbers = #tpu.dot_dimension_numbers<[1], [0], [0], [1], [0, 0, 1, 1], [], []>} : vector<1x128xf32>, vector<128x128xf32>, vector<1x128xf32> -> vector<1x128xf32>
    %557 = arith.addf %551, %556 : vector<1x128xf32>
    %c0_421 = arith.constant 0 : index
    %c45 = arith.constant 45 : index
    %c0_422 = arith.constant 0 : index
    %558 = vector.load %arg19[%c0_421, %c45, %c0_422] : memref<1x48x128xf32, #tpu.memory_space<vmem>>, vector<1x1x128xf32>
    %559 = vector.shape_cast %558 : vector<1x1x128xf32> to vector<1x128xf32>
    %c45_423 = arith.constant 45 : index
    %c0_424 = arith.constant 0 : index
    %c0_425 = arith.constant 0 : index
    %560 = vector.load %arg10[%c45_423, %c0_424, %c0_425] : memref<48x128x128xf32, #tpu.memory_space<vmem>>, vector<1x128x128xf32>
    %561 = vector.shape_cast %560 : vector<1x128x128xf32> to vector<128x128xf32>
    %cst_426 = arith.constant dense<0.000000e+00> : vector<1x128xf32>
    %562 = tpu.matmul %559, %561, %cst_426 {dimension_numbers = #tpu.dot_dimension_numbers<[1], [0], [0], [1], [0, 0, 1, 1], [], []>} : vector<1x128xf32>, vector<128x128xf32>, vector<1x128xf32> -> vector<1x128xf32>
    %563 = arith.addf %557, %562 : vector<1x128xf32>
    %c0_427 = arith.constant 0 : index
    %c46 = arith.constant 46 : index
    %c0_428 = arith.constant 0 : index
    %564 = vector.load %arg19[%c0_427, %c46, %c0_428] : memref<1x48x128xf32, #tpu.memory_space<vmem>>, vector<1x1x128xf32>
    %565 = vector.shape_cast %564 : vector<1x1x128xf32> to vector<1x128xf32>
    %c46_429 = arith.constant 46 : index
    %c0_430 = arith.constant 0 : index
    %c0_431 = arith.constant 0 : index
    %566 = vector.load %arg10[%c46_429, %c0_430, %c0_431] : memref<48x128x128xf32, #tpu.memory_space<vmem>>, vector<1x128x128xf32>
    %567 = vector.shape_cast %566 : vector<1x128x128xf32> to vector<128x128xf32>
    %cst_432 = arith.constant dense<0.000000e+00> : vector<1x128xf32>
    %568 = tpu.matmul %565, %567, %cst_432 {dimension_numbers = #tpu.dot_dimension_numbers<[1], [0], [0], [1], [0, 0, 1, 1], [], []>} : vector<1x128xf32>, vector<128x128xf32>, vector<1x128xf32> -> vector<1x128xf32>
    %569 = arith.addf %563, %568 : vector<1x128xf32>
    %c0_433 = arith.constant 0 : index
    %c47 = arith.constant 47 : index
    %c0_434 = arith.constant 0 : index
    %570 = vector.load %arg19[%c0_433, %c47, %c0_434] : memref<1x48x128xf32, #tpu.memory_space<vmem>>, vector<1x1x128xf32>
    %571 = vector.shape_cast %570 : vector<1x1x128xf32> to vector<1x128xf32>
    %c47_435 = arith.constant 47 : index
    %c0_436 = arith.constant 0 : index
    %c0_437 = arith.constant 0 : index
    %572 = vector.load %arg10[%c47_435, %c0_436, %c0_437] : memref<48x128x128xf32, #tpu.memory_space<vmem>>, vector<1x128x128xf32>
    %573 = vector.shape_cast %572 : vector<1x128x128xf32> to vector<128x128xf32>
    %cst_438 = arith.constant dense<0.000000e+00> : vector<1x128xf32>
    %574 = tpu.matmul %571, %573, %cst_438 {dimension_numbers = #tpu.dot_dimension_numbers<[1], [0], [0], [1], [0, 0, 1, 1], [], []>} : vector<1x128xf32>, vector<128x128xf32>, vector<1x128xf32> -> vector<1x128xf32>
    %575 = arith.addf %569, %574 : vector<1x128xf32>
    %c0_439 = arith.constant 0 : index
    %c0_440 = arith.constant 0 : index
    %576 = vector.load %arg11[%c0_439, %c0_440] : memref<1x128xf32, #tpu.memory_space<vmem>>, vector<1x128xf32>
    %577 = arith.addf %575, %576 : vector<1x128xf32>
    %cst_441 = arith.constant 0.000000e+00 : f32
    %578 = vector.broadcast %cst_441 : f32 to vector<1x128xf32>
    %579 = arith.cmpf oge, %577, %578 : vector<1x128xf32>
    %cst_442 = arith.constant 3.300000e-01 : f32
    %580 = vector.broadcast %cst_442 : f32 to vector<1x128xf32>
    %581 = arith.mulf %580, %577 : vector<1x128xf32>
    %582 = arith.select %579, %577, %581 : vector<1x128xi1>, vector<1x128xf32>
    %c0_443 = arith.constant 0 : index
    %c0_444 = arith.constant 0 : index
    %583 = vector.load %arg12[%c0_443, %c0_444] : memref<128x64xf32, #tpu.memory_space<vmem>>, vector<128x64xf32>
    %cst_445 = arith.constant dense<0.000000e+00> : vector<1x64xf32>
    %584 = tpu.matmul %582, %583, %cst_445 {dimension_numbers = #tpu.dot_dimension_numbers<[1], [0], [0], [1], [0, 0, 1, 1], [], []>} : vector<1x128xf32>, vector<128x64xf32>, vector<1x64xf32> -> vector<1x64xf32>
    %c0_446 = arith.constant 0 : index
    %c0_447 = arith.constant 0 : index
    %585 = vector.load %arg13[%c0_446, %c0_447] : memref<1x64xf32, #tpu.memory_space<vmem>>, vector<1x64xf32>
    %586 = arith.addf %584, %585 : vector<1x64xf32>
    %cst_448 = arith.constant 0.000000e+00 : f32
    %587 = vector.broadcast %cst_448 : f32 to vector<1x64xf32>
    %588 = arith.cmpf oge, %586, %587 : vector<1x64xf32>
    %cst_449 = arith.constant 3.300000e-01 : f32
    %589 = vector.broadcast %cst_449 : f32 to vector<1x64xf32>
    %590 = arith.mulf %589, %586 : vector<1x64xf32>
    %591 = arith.select %588, %586, %590 : vector<1x64xi1>, vector<1x64xf32>
    %c0_450 = arith.constant 0 : index
    %c0_451 = arith.constant 0 : index
    %592 = vector.load %arg14[%c0_450, %c0_451] : memref<64x10xf32, #tpu.memory_space<vmem>>, vector<64x10xf32>
    %cst_452 = arith.constant dense<0.000000e+00> : vector<1x10xf32>
    %593 = tpu.matmul %591, %592, %cst_452 {dimension_numbers = #tpu.dot_dimension_numbers<[1], [0], [0], [1], [0, 0, 1, 1], [], []>} : vector<1x64xf32>, vector<64x10xf32>, vector<1x10xf32> -> vector<1x10xf32>
    %c0_453 = arith.constant 0 : index
    %c0_454 = arith.constant 0 : index
    %594 = vector.load %arg15[%c0_453, %c0_454] : memref<1x10xf32, #tpu.memory_space<vmem>>, vector<1x10xf32>
    %595 = arith.addf %593, %594 : vector<1x10xf32>
    %cst_455 = arith.constant 0.000000e+00 : f32
    %596 = vector.broadcast %cst_455 : f32 to vector<1x10xf32>
    %597 = arith.cmpf oge, %595, %596 : vector<1x10xf32>
    %cst_456 = arith.constant 3.300000e-01 : f32
    %598 = vector.broadcast %cst_456 : f32 to vector<1x10xf32>
    %599 = arith.mulf %598, %595 : vector<1x10xf32>
    %600 = arith.select %597, %595, %599 : vector<1x10xi1>, vector<1x10xf32>
    %c0_457 = arith.constant 0 : index
    %c0_458 = arith.constant 0 : index
    %601 = vector.load %arg16[%c0_457, %c0_458] : memref<10x128xf32, #tpu.memory_space<vmem>>, vector<10x128xf32>
    %cst_459 = arith.constant dense<0.000000e+00> : vector<1x128xf32>
    %602 = tpu.matmul %600, %601, %cst_459 {dimension_numbers = #tpu.dot_dimension_numbers<[1], [0], [0], [1], [0, 0, 1, 1], [], []>} : vector<1x10xf32>, vector<10x128xf32>, vector<1x128xf32> -> vector<1x128xf32>
    %c0_460 = arith.constant 0 : index
    %c0_461 = arith.constant 0 : index
    %603 = vector.load %arg17[%c0_460, %c0_461] : memref<1x128xf32, #tpu.memory_space<vmem>>, vector<1x128xf32>
    %604 = arith.addf %602, %603 : vector<1x128xf32>
    %c0_462 = arith.constant 0 : index
    %c0_463 = arith.constant 0 : index
    %c0_464 = arith.constant 0 : index
    %605 = vector.load %arg18[%c0_462, %c0_463, %c0_464] : memref<1x1x128xf32, #tpu.memory_space<vmem>>, vector<1x1x128xf32>
    %606 = vector.shape_cast %605 : vector<1x1x128xf32> to vector<1x128xf32>
    %607 = vector.shape_cast %604 : vector<1x128xf32> to vector<1x1x128xf32>
    tpu.vector_store %arg18[%c0_462, %c0_463, %c0_464], %607 {strides = array<i32>} : memref<1x1x128xf32, #tpu.memory_space<vmem>>, vector<1x1x128xf32>,
    return
  }
  func.func @transform_0(%arg0: i32) -> (i32, i32, i32) {
    %c0_i32 = arith.constant 0 : i32
    %c0_i32_0 = arith.constant 0 : i32
    %c0_i32_1 = arith.constant 0 : i32
    return %arg0, %c0_i32, %c0_i32_0 : i32, i32, i32
  }
  func.func @transform_1(%arg0: i32) -> (i32, i32) {
    %c0_i32 = arith.constant 0 : i32
    %c0_i32_0 = arith.constant 0 : i32
    %c0_i32_1 = arith.constant 0 : i32
    return %c0_i32, %c0_i32_0 : i32, i32
  }
  func.func @transform_2(%arg0: i32) -> (i32, i32) {
    %c0_i32 = arith.constant 0 : i32
    %c0_i32_0 = arith.constant 0 : i32
    %c0_i32_1 = arith.constant 0 : i32
    return %c0_i32, %c0_i32_0 : i32, i32
  }
  func.func @transform_3(%arg0: i32) -> (i32, i32) {
    %c0_i32 = arith.constant 0 : i32
    %c0_i32_0 = arith.constant 0 : i32
    %c0_i32_1 = arith.constant 0 : i32
    return %c0_i32, %c0_i32_0 : i32, i32
  }
  func.func @transform_4(%arg0: i32) -> (i32, i32, i32) {
    %c0_i32 = arith.constant 0 : i32
    %c0_i32_0 = arith.constant 0 : i32
    %c0_i32_1 = arith.constant 0 : i32
    %c0_i32_2 = arith.constant 0 : i32
    return %c0_i32, %c0_i32_0, %c0_i32_1 : i32, i32, i32
  }
  func.func @transform_5(%arg0: i32) -> (i32, i32, i32) {
    %c0_i32 = arith.constant 0 : i32
    %c0_i32_0 = arith.constant 0 : i32
    %c0_i32_1 = arith.constant 0 : i32
    %c0_i32_2 = arith.constant 0 : i32
    return %c0_i32, %c0_i32_0, %c0_i32_1 : i32, i32, i32
  }
  func.func @transform_6(%arg0: i32) -> (i32, i32) {
    %c0_i32 = arith.constant 0 : i32
    %c0_i32_0 = arith.constant 0 : i32
    %c0_i32_1 = arith.constant 0 : i32
    return %c0_i32, %c0_i32_0 : i32, i32
  }
  func.func @transform_7(%arg0: i32) -> (i32, i32, i32) {
    %c0_i32 = arith.constant 0 : i32
    %c0_i32_0 = arith.constant 0 : i32
    %c0_i32_1 = arith.constant 0 : i32
    %c0_i32_2 = arith.constant 0 : i32
    return %c0_i32, %c0_i32_0, %c0_i32_1 : i32, i32, i32
  }
  func.func @transform_8(%arg0: i32) -> (i32, i32) {
    %c0_i32 = arith.constant 0 : i32
    %c0_i32_0 = arith.constant 0 : i32
    %c0_i32_1 = arith.constant 0 : i32
    return %c0_i32, %c0_i32_0 : i32, i32
  }
  func.func @transform_9(%arg0: i32) -> (i32, i32, i32) {
    %c0_i32 = arith.constant 0 : i32
    %c0_i32_0 = arith.constant 0 : i32
    %c0_i32_1 = arith.constant 0 : i32
    %c0_i32_2 = arith.constant 0 : i32
    return %c0_i32, %c0_i32_0, %c0_i32_1 : i32, i32, i32
  }
  func.func @transform_10(%arg0: i32) -> (i32, i32) {
    %c0_i32 = arith.constant 0 : i32
    %c0_i32_0 = arith.constant 0 : i32
    %c0_i32_1 = arith.constant 0 : i32
    return %c0_i32, %c0_i32_0 : i32, i32
  }
  func.func @transform_11(%arg0: i32) -> (i32, i32) {
    %c0_i32 = arith.constant 0 : i32
    %c0_i32_0 = arith.constant 0 : i32
    %c0_i32_1 = arith.constant 0 : i32
    return %c0_i32, %c0_i32_0 : i32, i32
  }
  func.func @transform_12(%arg0: i32) -> (i32, i32) {
    %c0_i32 = arith.constant 0 : i32
    %c0_i32_0 = arith.constant 0 : i32
    %c0_i32_1 = arith.constant 0 : i32
    return %c0_i32, %c0_i32_0 : i32, i32
  }
  func.func @transform_13(%arg0: i32) -> (i32, i32) {
    %c0_i32 = arith.constant 0 : i32
    %c0_i32_0 = arith.constant 0 : i32
    %c0_i32_1 = arith.constant 0 : i32
    return %c0_i32, %c0_i32_0 : i32, i32
  }
  func.func @transform_14(%arg0: i32) -> (i32, i32) {
    %c0_i32 = arith.constant 0 : i32
    %c0_i32_0 = arith.constant 0 : i32
    %c0_i32_1 = arith.constant 0 : i32
    return %c0_i32, %c0_i32_0 : i32, i32
  }
  func.func @transform_15(%arg0: i32) -> (i32, i32) {
    %c0_i32 = arith.constant 0 : i32
    %c0_i32_0 = arith.constant 0 : i32
    %c0_i32_1 = arith.constant 0 : i32
    return %c0_i32, %c0_i32_0 : i32, i32
  }
  func.func @transform_16(%arg0: i32) -> (i32, i32) {
    %c0_i32 = arith.constant 0 : i32
    %c0_i32_0 = arith.constant 0 : i32
    %c0_i32_1 = arith.constant 0 : i32
    return %c0_i32, %c0_i32_0 : i32, i32
  }
  func.func @transform_17(%arg0: i32) -> (i32, i32, i32) {
    %c0_i32 = arith.constant 0 : i32
    %c0_i32_0 = arith.constant 0 : i32
    %c0_i32_1 = arith.constant 0 : i32
    return %arg0, %c0_i32, %c0_i32_0 : i32, i32, i32
  }
}

</mosaic_0001>

<bundles_post_ra>
// kernel: _forward_impl.1
= control target key start
LH: loop header
LB: loop body
LE: loop exit
PB: predicated region body
PF: predicated region fallthrough
CT: control target
= control target key end

     0   :  { %s20777_s0 = inlined_call_operand.vmem [shape: f32[2,128,128], index: 0, kind: input, shape index: {}]   ;;  %s20778_s1 = inlined_call_operand.vmem [shape: f32[128,8], index: 1, kind: input, shape index: {}]   ;;  %s20779_s2 = inlined_call_operand.hbm [shape: f32[8,128], index: 2, kind: input, shape index: {}]   ;;  %s20780_s3 = inlined_call_operand.vmem [shape: f32[8,1], index: 3, kind: input, shape index: {}]   ;;  %s20781_s4 = inlined_call_operand.hbm [shape: f32[8,8,128], index: 4, kind: input, shape index: {}]   ;;  %s20782_s5 = inlined_call_operand.vmem [shape: f32[8,128,8], index: 5, kind: input, shape index: {}]   ;;  %s20783_s6 = inlined_call_operand.vmem [shape: f32[8,1], index: 6, kind: input, shape index: {}]   ;;  %s20784_s7 = inlined_call_operand.hbm [shape: f32[8,48,128], index: 7, kind: input, shape index: {}]   ;;  %s20785_s8 = inlined_call_operand.vmem [shape: f32[48,1], index: 8, kind: input, shape index: {}]   ;;  %s20786_s9 = inlined_call_operand.hbm [shape: f32[48,128,128], index: 9, kind: input, shape index: {}]   ;;  %s20787_s10 = inlined_call_operand.hbm [shape: f32[1,128], index: 10, kind: input, shape index: {}]   ;;  %s20788_s11 = inlined_call_operand.vmem [shape: f32[128,64], index: 11, kind: input, shape index: {}]   ;;  %s20789_s12 = inlined_call_operand.hbm [shape: f32[1,64], index: 12, kind: input, shape index: {}]   ;;  %s20790_s13 = inlined_call_operand.vmem [shape: f32[64,10], index: 13, kind: input, shape index: {}]   ;;  %s20791_s14 = inlined_call_operand.hbm [shape: f32[1,10], index: 14, kind: input, shape index: {}]   ;;  %s20792_s15 = inlined_call_operand.hbm [shape: f32[10,128], index: 15, kind: input, shape index: {}]   ;;  %s20793_s16 = inlined_call_operand.hbm [shape: f32[1,128], index: 16, kind: input, shape index: {}]   ;;  %s20794_s17 = inlined_call_operand.vmem [shape: f32[2,1,128], index: 17, kind: output, shape index: {}]  }
   0x1   :  { %20829 = sst [smem:[#allocation29_spill]] %s20777_s0 }
   0x2   :  { %20830 = sst [smem:[#allocation30_spill]] %s20778_s1 }
   0x3   :  { %20831 = sst [smem:[#allocation31_spill]] %s20785_s8 }
   0x4   :  { %20832 = sst [smem:[#allocation32_spill]] %s20788_s11 }
   0x5   :  { %20833 = sst [smem:[#allocation33_spill]] %s20790_s13 }
   0x6   :  { %20834 = sst [smem:[#allocation34_spill]] %s20794_s17 }
   0x7   :  { %22 = vsyncpa [#allocation4], 0 }
   0x8   :  { %23 = vsyncpa [#allocation6], 0 }
   0x9   :  { %24 = vsyncpa [#allocation9], 0 }
   0xa   :  { %25 = vsyncpa [#allocation12], 0 }
   0xb   :  { %26 = vsyncpa [#allocation15], 0  ;;  %s17822_s24 = smov 0  }
   0xc LB: > { %20835 = sst [smem:[#allocation22_spill]] %s17707_s24  ;;  %s17709_s25 = smov [#allocation5]   ;;  %s17707_s24 = sphi %s17822_s24, %s32_s24  }
   0xd   : > { %s454_s26 = sshll.u32 %s17709_s25, 4  ;;  %s17828_s27 = sadd.s32 4294967295, %s17707_s24   ;;  %s17833_s26 = int_to_ptr.vmem [resolvable:$true] %s454_s26 }
   0xe   : > { %p10661_p0 = scmp.ge.s32.totalorder %s17707_s24, 1  ;;  %p425_p1 = scmp.lt.s32.totalorder %s17707_s24, 3 }
   0xf   : > { %p20800_p2 = scmp.eq.s32.totalorder %s17828_s27, 0  ;;  %s17710_s29 = smov [#allocation8]  }
  0x10   : > { %p17835_p3 = pnand %p10661_p0, %p425_p1  ;;  %s489_s0 = sshll.u32 %s17710_s29, 4  ;;  %s17841_s0 = int_to_ptr.vmem [resolvable:$true] %s489_s0 }
  0x11   : > { %s17711_s18 = smov [#allocation11]   ;;  %s17712_s1 = smov [#allocation14]  }
  0x12   : > { %s20836_s28 = scalar_select %p17835_p3, 1, 0 }
  0x13   : > { %p17294_p4 = pneg %p17835_p3  ;;  %s517_s19 = sshll.u32 %s17711_s18, 4  ;;  %s17849_s19 = int_to_ptr.vmem [resolvable:$true] %s517_s19 }
  0x14   : > { %s17851_s20 = sshll.u32 %s17712_s1, 4  ;;  %s17429_s23 = scalar_lea.hbm %s20781_s4, 1024  ;;  %s542_s20 = int_to_ptr.vmem [resolvable:$true] %s17851_s20 }
  0x15   : > { %p17845_p5 = pnand %p20800_p2, %p17294_p4  ;;  %p17430_p6 = scmp.ne.s32.totalorder %s20781_s4, %s17429_s23 }
  0x16   : > { %p17436_p10 = scmp.lt.u32.totalorder %s17429_s23, %s20781_s4 }
  0x17   : > { %p17861_p7 = pneg %p17845_p5 }
  0x19   : > { %p17432_p8 = pnand %p17861_p7, %p17430_p6 }
  0x1b   : > { %p17433_p9 = pneg %p17432_p8 }
  0x1d   : > { %p17438_p11 = pnand %p17436_p10, %p17433_p9 }
  0x1f   : > { %17441 = shalt.err (!%p17438_p11)
}
  0x20   : > { %s17442_s21 = scalar_lea.vmem %s17833_s26, 1024  ;;  %p17450_p1 = scmp.lt.s32.totalorder %s17833_s26, %s17833_s26 }
  0x21   : > { %p17443_p12 = scmp.ne.s32.totalorder %s17833_s26, %s17442_s21  ;;  %p17451_p4 = scmp.lt.s32.totalorder %s17442_s21, %s17442_s21 }
  0x23   : > { %p17445_p13 = pnand %p17443_p12, %p17861_p7  ;;  %p17452_p6 = por %p17451_p4, %p17450_p1 }
  0x25   : > { %p17446_p0 = pneg %p17445_p13 }
  0x27   : > { %p17453_p8 = pnand %p17452_p6, %p17446_p0 }
  0x29   : > { %17456 = shalt.err (!%p17453_p8)
}
  0x2a   : > { %s17713_s22 = smov 128   ;;  %s17714_s23 = smov 8  }
  0x2b   : > { %17300 = dma.hbm_to_vmem [thread:$0]  (!%p17845_p5), %s20781_s4, 1024, %s17833_s26, [#allocation6], %s17713_s22, %s17713_s22, %s17714_s23  }
  0x2c   : > { %s17457_s21 = scalar_lea.hbm %s20786_s9, 98304 }
  0x2d   : > { %p17458_p9 = scmp.ne.s32.totalorder %s20786_s9, %s17457_s21  ;;  %p17464_p12 = scmp.lt.u32.totalorder %s17457_s21, %s20786_s9 }
  0x2f   : > { %p17460_p10 = pnand %p17458_p9, %p17861_p7 }
  0x31   : > { %p17461_p11 = pneg %p17460_p10 }
  0x33   : > { %p17466_p13 = pnand %p17464_p12, %p17461_p11 }
  0x35   : > { %17469 = shalt.err (!%p17466_p13)
}
  0x36   : > { %s17470_s26 = scalar_lea.vmem %s17841_s0, 98304  ;;  %p17478_p6 = scmp.lt.s32.totalorder %s17841_s0, %s17841_s0 }
  0x37   : > { %p17471_p0 = scmp.ne.s32.totalorder %s17841_s0, %s17470_s26  ;;  %p17479_p8 = scmp.lt.s32.totalorder %s17470_s26, %s17470_s26 }
  0x39   : > { %p17473_p1 = pnand %p17471_p0, %p17861_p7  ;;  %p17480_p9 = por %p17479_p8, %p17478_p6 }
  0x3b   : > { %p17474_p4 = pneg %p17473_p1 }
  0x3d   : > { %p17481_p10 = pnand %p17480_p9, %p17474_p4 }
  0x3f   : > { %17484 = shalt.err (!%p17481_p10)
}
  0x40   : > { %17306 = dma.hbm_to_vmem [thread:$0]  (!%p17845_p5), %s20786_s9, 98304, %s17841_s0, [#allocation9], %s17713_s22, %s17713_s22, %s17714_s23  }
  0x41   : > { %s17485_s25 = scalar_lea.hbm %s20789_s12, 16 }
  0x42   : > { %p17486_p11 = scmp.ne.s32.totalorder %s20789_s12, %s17485_s25  ;;  %p17492_p0 = scmp.lt.u32.totalorder %s17485_s25, %s20789_s12 }
  0x44   : > { %p17488_p12 = pnand %p17486_p11, %p17861_p7 }
  0x46   : > { %p17489_p13 = pneg %p17488_p12 }
  0x48   : > { %p17494_p1 = pnand %p17492_p0, %p17489_p13 }
  0x4a   : > { %17497 = shalt.err (!%p17494_p1)
}
  0x4b   : > { %s17498_s0 = scalar_lea.vmem %s17849_s19, 16  ;;  %s17505_s26 = scalar_lea.vmem %s17849_s19, 32 }
  0x4c   : > { %p17499_p4 = scmp.ne.s32.totalorder %s17849_s19, %s17498_s0  ;;  %p17506_p9 = scmp.lt.s32.totalorder %s17849_s19, %s17849_s19 }
  0x4d   : > { %p17507_p10 = scmp.lt.s32.totalorder %s17505_s26, %s17498_s0 }
  0x4e   : > { %p17501_p6 = pnand %p17499_p4, %p17861_p7 }
  0x4f   : > { %p17508_p11 = por %p17507_p10, %p17506_p9 }
  0x50   : > { %p17502_p8 = pneg %p17501_p6 }
  0x52   : > { %p17509_p12 = pnand %p17508_p11, %p17502_p8 }
  0x54   : > { %17512 = shalt.err (!%p17509_p12)
}
  0x55   : > { %17312 = dma.hbm_to_vmem [thread:$0]  (!%p17845_p5), %s20789_s12, 16, %s17849_s19, [#allocation12]  }
  0x56   : > { %s17513_s25 = scalar_lea.hbm %s20792_s15, 256 }
  0x57   : > { %p17514_p13 = scmp.ne.s32.totalorder %s20792_s15, %s17513_s25  ;;  %p17520_p4 = scmp.lt.u32.totalorder %s17513_s25, %s20792_s15 }
  0x59   : > { %p17516_p0 = pnand %p17514_p13, %p17861_p7 }
  0x5b   : > { %p17517_p1 = pneg %p17516_p0 }
  0x5d   : > { %p17522_p6 = pnand %p17520_p4, %p17517_p1 }
  0x5f   : > { %17525 = shalt.err (!%p17522_p6)
}
  0x60   : > { %s17526_s0 = scalar_lea.vmem %s542_s20, 256  ;;  %p17534_p11 = scmp.lt.s32.totalorder %s542_s20, %s542_s20 }
  0x61   : > { %p17527_p8 = scmp.ne.s32.totalorder %s542_s20, %s17526_s0  ;;  %p17535_p12 = scmp.lt.s32.totalorder %s17526_s0, %s17526_s0 }
  0x63   : > { %p17529_p9 = pnand %p17527_p8, %p17861_p7  ;;  %p17536_p2 = por %p17535_p12, %p17534_p11 }
  0x65   : > { %p17530_p10 = pneg %p17529_p9 }
  0x67   : > { %p17537_p3 = pnand %p17536_p2, %p17530_p10 }
  0x69   : > { %17540 = shalt.err (!%p17537_p3)
}
  0x6a   : > { %17318 = dma.hbm_to_vmem [thread:$0]  (!%p17845_p5), %s20792_s15, 256, %s542_s20, [#allocation15], %s17713_s22, %s17713_s22, %s17714_s23  }
  0x6b   : > { %s17715_s8 = smov [#allocation3]   ;;  %s17716_s13 = smov [#allocation7]  }
  0x6c   : > { %s441_s11 = sshll.u32 %s17715_s8, 4  ;;  %s473_s17 = sshll.u32 %s17716_s13, 4  ;;  %s442_s11 = int_to_ptr.vmem [resolvable:$true] %s441_s11  ;;  %s474_s17 = int_to_ptr.vmem [resolvable:$true] %s473_s17 }
  0x6d   : > { %s17541_s18 = scalar_lea.hbm %s20779_s2, 128 }
  0x6e   : > { %p17542_p2 = scmp.ne.s32.totalorder %s20779_s2, %s17541_s18  ;;  %p17548_p0 = scmp.lt.u32.totalorder %s17541_s18, %s20779_s2 }
  0x70   : > { %p17544_p3 = pnand %p17542_p2, %p17861_p7 }
  0x72   : > { %p17545_p13 = pneg %p17544_p3 }
  0x74   : > { %p17550_p1 = pnand %p17548_p0, %p17545_p13 }
  0x76   : > { %17553 = shalt.err (!%p17550_p1)
}
  0x77   : > { %s17554_s20 = scalar_lea.vmem %s442_s11, 128  ;;  %p17562_p9 = scmp.lt.s32.totalorder %s442_s11, %s442_s11 }
  0x78   : > { %p17555_p4 = scmp.ne.s32.totalorder %s442_s11, %s17554_s20  ;;  %p17563_p10 = scmp.lt.s32.totalorder %s17554_s20, %s17554_s20 }
  0x7a   : > { %p17557_p6 = pnand %p17555_p4, %p17861_p7  ;;  %p17564_p11 = por %p17563_p10, %p17562_p9 }
  0x7c   : > { %p17558_p8 = pneg %p17557_p6 }
  0x7e   : > { %p17565_p12 = pnand %p17564_p11, %p17558_p8 }
  0x80   : > { %17568 = shalt.err (!%p17565_p12)
}
  0x81   : > { %17297 = dma.hbm_to_vmem [thread:$0]  (!%p17845_p5), %s20779_s2, 128, %s442_s11, [#allocation4]  }
  0x82   : > { %s17569_s29 = scalar_lea.hbm %s20784_s7, 6144 }
  0x83   : > { %p17570_p2 = scmp.ne.s32.totalorder %s20784_s7, %s17569_s29  ;;  %p17576_p0 = scmp.lt.u32.totalorder %s17569_s29, %s20784_s7 }
  0x85   : > { %p17572_p3 = pnand %p17570_p2, %p17861_p7 }
  0x87   : > { %p17573_p13 = pneg %p17572_p3 }
  0x89   : > { %p17578_p1 = pnand %p17576_p0, %p17573_p13 }
  0x8b   : > { %17581 = shalt.err (!%p17578_p1)
}
  0x8c   : > { %s17582_s19 = scalar_lea.vmem %s474_s17, 6144  ;;  %p17590_p9 = scmp.lt.s32.totalorder %s474_s17, %s474_s17 }
  0x8d   : > { %p17583_p4 = scmp.ne.s32.totalorder %s474_s17, %s17582_s19  ;;  %p17591_p10 = scmp.lt.s32.totalorder %s17582_s19, %s17582_s19 }
  0x8f   : > { %p17585_p6 = pnand %p17583_p4, %p17861_p7  ;;  %p17592_p11 = por %p17591_p10, %p17590_p9 }
  0x91   : > { %p17586_p8 = pneg %p17585_p6 }
  0x93   : > { %p17593_p12 = pnand %p17592_p11, %p17586_p8 }
  0x95   : > { %17596 = shalt.err (!%p17593_p12)
}
  0x96   : > { %17303 = dma.hbm_to_vmem [thread:$0]  (!%p17845_p5), %s20784_s7, 6144, %s474_s17, [#allocation6], %s17713_s22, %s17713_s22, %s17714_s23  }
  0x97   : > { %s17717_s26 = smov [#allocation10]   ;;  %s17718_s13 = smov [#allocation13]  }
  0x98   : > { %s503_s8 = sshll.u32 %s17717_s26, 4  ;;  %s531_s25 = sshll.u32 %s17718_s13, 4  ;;  %s504_s8 = int_to_ptr.vmem [resolvable:$true] %s503_s8  ;;  %s532_s25 = int_to_ptr.vmem [resolvable:$true] %s531_s25 }
  0x99   : > { %s17597_s1 = scalar_lea.hbm %s20787_s10, 16 }
  0x9a   : > { %p17598_p2 = scmp.ne.s32.totalorder %s20787_s10, %s17597_s1  ;;  %p17604_p0 = scmp.lt.u32.totalorder %s17597_s1, %s20787_s10 }
  0x9c   : > { %p17600_p3 = pnand %p17598_p2, %p17861_p7 }
  0x9e   : > { %p17601_p13 = pneg %p17600_p3 }
  0xa0   : > { %p17606_p1 = pnand %p17604_p0, %p17601_p13 }
  0xa2   : > { %17609 = shalt.err (!%p17606_p1)
}
  0xa3   : > { %s17610_s22 = scalar_lea.vmem %s504_s8, 16  ;;  %s17617_s23 = scalar_lea.vmem %s504_s8, 32 }
  0xa4   : > { %p17611_p4 = scmp.ne.s32.totalorder %s504_s8, %s17610_s22  ;;  %p17618_p9 = scmp.lt.s32.totalorder %s504_s8, %s504_s8 }
  0xa5   : > { %p17619_p10 = scmp.lt.s32.totalorder %s17617_s23, %s17610_s22 }
  0xa6   : > { %p17613_p6 = pnand %p17611_p4, %p17861_p7 }
  0xa7   : > { %p17620_p11 = por %p17619_p10, %p17618_p9 }
  0xa8   : > { %p17614_p8 = pneg %p17613_p6 }
  0xaa   : > { %p17621_p12 = pnand %p17620_p11, %p17614_p8 }
  0xac   : > { %17624 = shalt.err (!%p17621_p12)
}
  0xad   : > { %17309 = dma.hbm_to_vmem [thread:$0]  (!%p17845_p5), %s20787_s10, 16, %s504_s8, [#allocation9]  }
  0xae   : > { %s17625_s29 = scalar_lea.hbm %s20791_s14, 16 }
  0xaf   : > { %p17626_p2 = scmp.ne.s32.totalorder %s20791_s14, %s17625_s29  ;;  %p17632_p0 = scmp.lt.u32.totalorder %s17625_s29, %s20791_s14 }
  0xb1   : > { %p17628_p3 = pnand %p17626_p2, %p17861_p7 }
  0xb3   : > { %p17629_p13 = pneg %p17628_p3 }
  0xb5   : > { %p17634_p1 = pnand %p17632_p0, %p17629_p13 }
  0xb7   : > { %17637 = shalt.err (!%p17634_p1)
}
  0xb8   : > { %s17638_s19 = scalar_lea.vmem %s532_s25, 16  ;;  %s17645_s8 = scalar_lea.vmem %s532_s25, 32 }
  0xb9   : > { %p17639_p4 = scmp.ne.s32.totalorder %s532_s25, %s17638_s19  ;;  %p17646_p9 = scmp.lt.s32.totalorder %s532_s25, %s532_s25 }
  0xba   : > { %p17647_p10 = scmp.lt.s32.totalorder %s17645_s8, %s17638_s19 }
  0xbb   : > { %p17641_p6 = pnand %p17639_p4, %p17861_p7 }
  0xbc   : > { %p17648_p11 = por %p17647_p10, %p17646_p9 }
  0xbd   : > { %p17642_p8 = pneg %p17641_p6 }
  0xbf   : > { %p17649_p12 = pnand %p17648_p11, %p17642_p8 }
  0xc1   : > { %17652 = shalt.err (!%p17649_p12)
}
  0xc2   : > { %17315 = dma.hbm_to_vmem [thread:$0]  (!%p17845_p5), %s20791_s14, 16, %s532_s25, [#allocation12]  }
  0xc3   : > { %s17719_s23 = smov [#allocation16]   ;;  %s17653_s13 = scalar_lea.hbm %s20793_s16, 16 }
  0xc4   : > { %s555_s17 = sshll.u32 %s17719_s23, 4  ;;  %p17654_p2 = scmp.ne.s32.totalorder %s20793_s16, %s17653_s13  ;;  %s556_s17 = int_to_ptr.vmem [resolvable:$true] %s555_s17 }
  0xc5   : > { %p17660_p0 = scmp.lt.u32.totalorder %s17653_s13, %s20793_s16 }
  0xc6   : > { %p17656_p3 = pnand %p17654_p2, %p17861_p7 }
  0xc8   : > { %p17657_p13 = pneg %p17656_p3 }
  0xca   : > { %p17662_p1 = pnand %p17660_p0, %p17657_p13 }
  0xcc   : > { %17665 = shalt.err (!%p17662_p1)
}
  0xcd   : > { %s17666_s25 = scalar_lea.vmem %s556_s17, 16  ;;  %s17673_s0 = scalar_lea.vmem %s556_s17, 32 }
  0xce   : > { %p17667_p4 = scmp.ne.s32.totalorder %s556_s17, %s17666_s25  ;;  %p17674_p9 = scmp.lt.s32.totalorder %s556_s17, %s556_s17 }
  0xcf   : > { %p17675_p10 = scmp.lt.s32.totalorder %s17673_s0, %s17666_s25 }
  0xd0   : > { %p17669_p6 = pnand %p17667_p4, %p17861_p7 }
  0xd1   : > { %p17676_p11 = por %p17675_p10, %p17674_p9 }
  0xd2   : > { %p17670_p8 = pneg %p17669_p6 }
  0xd4   : > { %p17677_p12 = pnand %p17676_p11, %p17670_p8 }
  0xd6   : > { %17680 = shalt.err (!%p17677_p12)
}
  0xd7   : > { %17321 = dma.hbm_to_vmem [thread:$0]  (!%p17845_p5), %s20793_s16, 16, %s556_s17, [#allocation15]  }
  0xd8   : > { %p20839_p2 = scmp.ne.s32.totalorder %s20836_s28, 0 }
  0xda   : > { %576 = sbr.rel (%p20839_p2) target bundleno = 3615 (0xe1f), region = 88 }
  0xe1   : > { %p20840_p3 = scmp.eq.s32.totalorder %s17828_s27, 0 }
  0xe3   : > { %17686 = dma.done.wait (%p20840_p3), [#allocation4], 128   ;;  %p20841_p7 = pmov %p20840_p3 }
  0xe4   : > { %p20842_p13 = pmov %p20840_p3 }
  0xe5   : > { %17688 = vsyncadd (%p20841_p7), [#allocation4], 4294967168 }
  0xe6   : > { %17690 = dma.done.wait (%p20842_p13), [#allocation6], 7168   ;;  %p20843_p0 = pmov %p20840_p3 }
  0xe8   : > { %17692 = vsyncadd (%p20843_p0), [#allocation6], 4294960128  ;;  %p20844_p1 = pmov %p20843_p0 }
  0xe9   : > { %p20845_p5 = pmov %p20843_p0 }
  0xea   : > { %17694 = dma.done.wait (%p20844_p1), [#allocation9], 98320  }
  0xeb   : > { %17696 = vsyncadd (%p20845_p5), [#allocation9], 4294868976  ;;  %p20846_p4 = pmov %p20843_p0 }
  0xec   : > { %p20847_p6 = pmov %p20843_p0 }
  0xed   : > { %17698 = dma.done.wait (%p20846_p4), [#allocation12], 32  }
  0xee   : > { %17700 = vsyncadd (%p20847_p6), [#allocation12], 4294967264  ;;  %p20848_p8 = pmov %p20843_p0 }
  0xef   : > { %p20849_p9 = pmov %p20843_p0 }
  0xf0   : > { %17702 = dma.done.wait (%p20848_p8), [#allocation15], 272  }
  0xf1   : > { %17704 = vsyncadd (%p20849_p9), [#allocation15], 4294967024  ;;  %p658_p10 = scmp.lt.s32.totalorder %s17828_s27, 1  ;;  %s20850_s11 = sld [smem:[#allocation29_spill]]  ;;  %v20818_v11 = vmov 0.0|0.0   ;;  %vm17721_vm0 = vmmov 0  }
  0xf2   : > { %s20851_s20 = sld [smem:[#allocation30_spill]]  ;;  %15184 = vmatprep.subr.bf16.mxu1 %v20818_v11  ;;  %v20814_v41 = vmov 0.0   ;;  %v683_v42 = vld [vmem:[%s20780_s3] sm:$0xff]  ;;  %v20812_v43 = vmov 0   ;;  %v20808_v44 = vmov 1   ;;  %s20878_s1 = sld [smem:[#allocation31_spill]] }
  0xf3   : > { %s20884_s27 = smov (!%p658_p10, %s17828_s27), 1  ;;  %12352 = vmatprep.mubr.msk.f32.mxu1 %vm17721_vm0, %v20814_v41  ;;  %17371 = vset.pattern.permute.xlu1 %v20812_v43  ;;  %s20879_s26 = sld [smem:[#allocation32_spill]] }
  0xf4   : > { %s10801_s24 = sshll.u32 %s20884_s27, 7  ;;  %886 = vperm.xlu1 %17371, %v683_v42   ;;  %s20880_s18 = sld [smem:[#allocation33_spill]] }
  0xf5   : > { %s20881_s0 = sld [smem:[#allocation34_spill]] }
  0xf7   : > { %s18080_s22 = scalar_lea.vmem %s20850_s11, %s10801_s24 }
  0xf8   : > { %v691_v0 = vld [vmem:[%s18080_s22] sm:$0xff]  ;;  %v692_v1 = vld [vmem:[%s18080_s22 + $0x8] sm:$0xff]  ;;  %v693_v4 = vld [vmem:[%s18080_s22 + $0x10] sm:$0xff]  ;;  %17372 = vset.pattern.permute.xlu1 %v20808_v44 }
  0xf9   : > { %707 = vxpose.xlu0.b32.start [1/16] %v691_v0, 128  ;;  %v666_v2 = vld [vmem:[%s20851_s20] sm:$0xff]  ;;  %v667_v3 = vld [vmem:[%s20851_s20 + $0x8] sm:$0xff]  ;;  %v668_v6 = vld [vmem:[%s20851_s20 + $0x10] sm:$0xff] }
  0xfa   : > { %v15152_v5 = vpack.c.bf16 %v667_v3, %v666_v2  ;;  %v669_v7 = vld [vmem:[%s20851_s20 + $0x18] sm:$0xff]  ;;  %v670_v9 = vld [vmem:[%s20851_s20 + $0x20] sm:$0xff]  ;;  %v671_v10 = vld [vmem:[%s20851_s20 + $0x28] sm:$0xff] }
  0xfb   : > { %v15156_v8 = vpack.c.bf16 %v669_v7, %v668_v6  ;;  %v694_v12 = vld [vmem:[%s18080_s22 + $0x18] sm:$0xff]  ;;  %v15160_v13 = vpack.c.bf16 %v671_v10, %v670_v9  ;;  %v672_v14 = vld [vmem:[%s20851_s20 + $0x30] sm:$0xff]  ;;  %v695_v16 = vld [vmem:[%s18080_s22 + $0x20] sm:$0xff]  ;;  %s665_s19 = scalar_lea.vmem %s20881_s0, %s20884_s27 }
  0xfc   : > { %15153 = vmatprep.subr.bf16.mxu0 %v15152_v5  ;;  %v673_v15 = vld [vmem:[%s20851_s20 + $0x38] sm:$0xff]  ;;  %v674_v18 = vld [vmem:[%s20851_s20 + $0x40] sm:$0xff]  ;;  %v675_v19 = vld [vmem:[%s20851_s20 + $0x48] sm:$0xff] }
  0xfd   : > { %708 = vxpose.xlu0.b32.cont [2/16] %v692_v1, 128  ;;  %15155 = vmatpush3.bf16.msra.mxu0 %v15152_v5  ;;  %v15164_v17 = vpack.c.bf16 %v673_v15, %v672_v14  ;;  %v696_v20 = vld [vmem:[%s18080_s22 + $0x28] sm:$0xff]  ;;  %v15168_v21 = vpack.c.bf16 %v675_v19, %v674_v18  ;;  %v676_v22 = vld [vmem:[%s20851_s20 + $0x50] sm:$0xff]  ;;  %v677_v23 = vld [vmem:[%s20851_s20 + $0x58] sm:$0xff] }
  0xfe   : > { %15157 = vmatprep.subr.bf16.mxu0 %v15156_v8  ;;  %v697_v24 = vld [vmem:[%s18080_s22 + $0x30] sm:$0xff]  ;;  %v15172_v25 = vpack.c.bf16 %v677_v23, %v676_v22  ;;  %v678_v26 = vld [vmem:[%s20851_s20 + $0x60] sm:$0xff]  ;;  %v679_v27 = vld [vmem:[%s20851_s20 + $0x68] sm:$0xff]  ;;  %v20806_v23 = vmov 2  }
  0xff   : > { %v698_v28 = vld [vmem:[%s18080_s22 + $0x38] sm:$0xff]  ;;  %v15176_v29 = vpack.c.bf16 %v679_v27, %v678_v26  ;;  %v680_v30 = vld [vmem:[%s20851_s20 + $0x70] sm:$0xff]  ;;  %v699_v32 = vld [vmem:[%s18080_s22 + $0x40] sm:$0xff]  ;;  %v20820_v26 = vmov 4   ;;  %v1039_v27 = vlaneseq }
 0x100   : > { %v681_v31 = vld [vmem:[%s20851_s20 + $0x78] sm:$0xff]  ;;  %v700_v34 = vld [vmem:[%s18080_s22 + $0x48] sm:$0xff]  ;;  %v701_v35 = vld [vmem:[%s18080_s22 + $0x50] sm:$0xff] }
 0x101   : > { %709 = vxpose.xlu0.b32.cont [3/16] %v693_v4, 128  ;;  %15159 = vmatpush3.bf16.msra.mxu0 %v15156_v8  ;;  %v15180_v33 = vpack.c.bf16 %v681_v31, %v680_v30  ;;  %v702_v36 = vld [vmem:[%s18080_s22 + $0x58] sm:$0xff]  ;;  %v703_v37 = vld [vmem:[%s18080_s22 + $0x60] sm:$0xff]  ;;  %v704_v38 = vld [vmem:[%s18080_s22 + $0x68] sm:$0xff] }
 0x102   : > { %15161 = vmatprep.subr.bf16.mxu0 %v15160_v13  ;;  %v705_v39 = vld [vmem:[%s18080_s22 + $0x70] sm:$0xff]  ;;  %v706_v40 = vld [vmem:[%s18080_s22 + $0x78] sm:$0xff] }
 0x103   : > { %v682_v5 = vld [vmem:[#allocation3] sm:$0xff] }
 0x105   : > { %710 = vxpose.xlu0.b32.cont [4/16] %v694_v12, 128  ;;  %15163 = vmatpush3.bf16.msra.mxu0 %v15160_v13 }
 0x106   : > { %15165 = vmatprep.subr.bf16.mxu0 %v15164_v17 }
 0x109   : > { %711 = vxpose.xlu0.b32.cont [5/16] %v695_v16, 128  ;;  %15167 = vmatpush3.bf16.msra.mxu0 %v15164_v17 }
 0x10a   : > { %15169 = vmatprep.subr.bf16.mxu0 %v15168_v21 }
 0x10d   : > { %712 = vxpose.xlu0.b32.cont [6/16] %v696_v20, 128  ;;  %15171 = vmatpush3.bf16.msra.mxu0 %v15168_v21 }
 0x10e   : > { %15173 = vmatprep.subr.bf16.mxu0 %v15172_v25 }
 0x111   : > { %713 = vxpose.xlu0.b32.cont [7/16] %v697_v24, 128  ;;  %15175 = vmatpush3.bf16.msra.mxu0 %v15172_v25 }
 0x112   : > { %15177 = vmatprep.subr.bf16.mxu0 %v15176_v29 }
 0x115   : > { %714 = vxpose.xlu0.b32.cont [8/16] %v698_v28, 128  ;;  %15179 = vmatpush3.bf16.msra.mxu0 %v15176_v29  ;;  %v20804_v28 = vmov 3   ;;  %v18249_v29 = vshrl.u32 %v1039_v27, 7 }
 0x116   : > { %15181 = vmatprep.subr.bf16.mxu0 %v15180_v33 }
 0x119   : > { %715 = vxpose.xlu0.b32.cont [9/16] %v699_v32, 128  ;;  %15183 = vmatpush3.bf16.msra.mxu0 %v15180_v33  ;;  %v20803_v32 = vsub.s32 1, %v18249_v29 }
 0x11a   : > { %15208 = vmatprep.subr.bf16.mxu0 %v20818_v11 }
 0x11d   : > { %716 = vxpose.xlu0.b32.cont [10/16] %v700_v34, 128 }
 0x121   : > { %717 = vxpose.xlu0.b32.cont [11/16] %v701_v35, 128 }
 0x125   : > { %718 = vxpose.xlu0.b32.cont [12/16] %v702_v36, 128 }
 0x129   : > { %719 = vxpose.xlu0.b32.cont [13/16] %v703_v37, 128 }
 0x12d   : > { %720 = vxpose.xlu0.b32.cont [14/16] %v704_v38, 128 }
 0x131   : > { %721 = vxpose.xlu0.b32.cont [15/16] %v705_v39, 128 }
 0x135   : > { %722 = vxpose.xlu0.b32.end [16/16] %v706_v40, 128 }
 0x15e   : > { %17373 = vset.pattern.permute.xlu0 %v20808_v44 }
 0x173   : > { %v887_v30 = vpop.permute.xlu1 %886 }
 0x179   : > { %v723_v45 = vpop.trf.xlu0 }
 0x17a   : > { %12296 = vmatprep.mubr.f32.mxu0 %v723_v45 }
 0x17d   : > { %v724_v46 = vpop.trf.xlu0 }
 0x17e   : > { %12297 = vmatmul.mubr.f32.vlgmr.msra.gmra.mrb[0].mxu0 %v724_v46  ;;  %v15185_v47 = vpack.c.bf16 %v724_v46, %v723_v45 }
 0x180   : > { %15186 = vmatpush3.bf16.msra.mxu1 %v15185_v47 }
 0x181   : > { %v725_v48 = vpop.trf.xlu0  ;;  %15187 = vmatprep.subr.bf16.mxu1 %v20818_v11 }
 0x182   : > { %12299 = vmatprep.mubr.f32.mxu0 %v725_v48 }
 0x185   : > { %v726_v49 = vpop.trf.xlu0 }
 0x186   : > { %v15188_v50 = vpack.c.bf16 %v726_v49, %v725_v48  ;;  %12300 = vmatmul.mubr.f32.gmra.mrb[2].mxu0 %v726_v49 }
 0x188   : > { %15189 = vmatpush3.bf16.msra.mxu1 %v15188_v50 }
 0x189   : > { %v727_v51 = vpop.trf.xlu0  ;;  %15190 = vmatprep.subr.bf16.mxu1 %v20818_v11 }
 0x18a   : > { %12302 = vmatprep.mubr.f32.mxu0 %v727_v51 }
 0x18d   : > { %v728_v52 = vpop.trf.xlu0 }
 0x18e   : > { %v15191_v53 = vpack.c.bf16 %v728_v52, %v727_v51  ;;  %12303 = vmatmul.mubr.f32.gmra.mrb[4].mxu0 %v728_v52 }
 0x190   : > { %15192 = vmatpush3.bf16.msra.mxu1 %v15191_v53 }
 0x191   : > { %v729_v54 = vpop.trf.xlu0  ;;  %15193 = vmatprep.subr.bf16.mxu1 %v20818_v11 }
 0x192   : > { %12305 = vmatprep.mubr.f32.mxu0 %v729_v54 }
 0x195   : > { %v730_v55 = vpop.trf.xlu0 }
 0x196   : > { %v15194_v56 = vpack.c.bf16 %v730_v55, %v729_v54  ;;  %12306 = vmatmul.mubr.f32.gmra.mrb[6].mxu0 %v730_v55 }
 0x198   : > { %15195 = vmatpush3.bf16.msra.mxu1 %v15194_v56 }
 0x199   : > { %v731_v57 = vpop.trf.xlu0  ;;  %15196 = vmatprep.subr.bf16.mxu1 %v20818_v11 }
 0x19a   : > { %12308 = vmatprep.mubr.f32.mxu0 %v731_v57 }
 0x19d   : > { %v732_v58 = vpop.trf.xlu0 }
 0x19e   : > { %v15197_v59 = vpack.c.bf16 %v732_v58, %v731_v57  ;;  %12309 = vmatmul.mubr.f32.gmra.mrb[8].mxu0 %v732_v58 }
 0x1a0   : > { %15198 = vmatpush3.bf16.msra.mxu1 %v15197_v59 }
 0x1a1   : > { %v733_v60 = vpop.trf.xlu0  ;;  %15199 = vmatprep.subr.bf16.mxu1 %v20818_v11 }
 0x1a2   : > { %12311 = vmatprep.mubr.f32.mxu0 %v733_v60 }
 0x1a5   : > { %v734_v61 = vpop.trf.xlu0 }
 0x1a6   : > { %v15200_v62 = vpack.c.bf16 %v734_v61, %v733_v60  ;;  %12312 = vmatmul.mubr.f32.gmra.mrb[10].mxu0 %v734_v61 }
 0x1a8   : > { %15201 = vmatpush3.bf16.msra.mxu1 %v15200_v62 }
 0x1a9   : > { %v735_v63 = vpop.trf.xlu0  ;;  %15202 = vmatprep.subr.bf16.mxu1 %v20818_v11 }
 0x1aa   : > { %12314 = vmatprep.mubr.f32.mxu0 %v735_v63 }
 0x1ad   : > { %v736_v0 = vpop.trf.xlu0 }
 0x1ae   : > { %v15203_v1 = vpack.c.bf16 %v736_v0, %v735_v63  ;;  %12315 = vmatmul.mubr.f32.gmra.mrb[12].mxu0 %v736_v0 }
 0x1b0   : > { %15204 = vmatpush3.bf16.msra.mxu1 %v15203_v1 }
 0x1b1   : > { %v737_v2 = vpop.trf.xlu0  ;;  %15205 = vmatprep.subr.bf16.mxu1 %v20818_v11 }
 0x1b2   : > { %12317 = vmatprep.mubr.f32.mxu0 %v737_v2 }
 0x1b5   : > { %v738_v3 = vpop.trf.xlu0 }
 0x1b6   : > { %v15206_v4 = vpack.c.bf16 %v738_v3, %v737_v2  ;;  %12318 = vmatmul.mubr.f32.gmra.mrb[14].mxu0 %v738_v3 }
 0x1b7   : > { %12387 = vmatprep.mubr.msk.f32.mxu0 %vm17721_vm0, %v20814_v41 }
 0x1b8   : > { %15207 = vmatpush3.bf16.msra.mxu1 %v15206_v4 }
 0x1b9   : > { %15232 = vmatprep.subr.bf16.mxu1 %v20818_v11 }
 0x1bb   : > { %12353 = vmatmul.mubr.f32.vlgmr.msra.gmra.mrb[0].mxu1 %v682_v5 }
 0x1bc   : > { %12422 = vmatprep.mubr.msk.f32.mxu1 %vm17721_vm0, %v20814_v41 }
 0x251   : > { %v18168_v6 = vpop.f32.mrb[0].mxu0 }
 0x252   : > { %1129 = vperm.xlu1 %17372, %v18168_v6   ;;  %v18171_v7 = vpop.f32.mrb[1].mxu0 }
 0x253   : > { %20852 = vst [vmem:[#allocation23_spill] sm:$0xff] %v18171_v7 }
 0x256   : > { %1125 = vperm.xlu1 %17372, %v18171_v7  }
 0x259   : > { %v18174_v8 = vpop.f32.mrb[2].mxu0 }
 0x25a   : > { %1137 = vperm.xlu1 %17372, %v18174_v8   ;;  %v18177_v9 = vpop.f32.mrb[3].mxu0 }
 0x25e   : > { %1133 = vperm.xlu1 %17372, %v18177_v9  }
 0x261   : > { %v18180_v10 = vpop.f32.mrb[4].mxu0 }
 0x262   : > { %1145 = vperm.xlu1 %17372, %v18180_v10   ;;  %v18183_v12 = vpop.f32.mrb[5].mxu0 }
 0x266   : > { %1141 = vperm.xlu1 %17372, %v18183_v12  }
 0x269   : > { %v18186_v13 = vpop.f32.mrb[6].mxu0 }
 0x26a   : > { %1153 = vperm.xlu1 %17372, %v18186_v13   ;;  %v18189_v14 = vpop.f32.mrb[7].mxu0 }
 0x26e   : > { %1149 = vperm.xlu1 %17372, %v18189_v14  }
 0x271   : > { %v18192_v15 = vpop.f32.mrb[8].mxu0 }
 0x272   : > { %1161 = vperm.xlu1 %17372, %v18192_v15   ;;  %v18195_v16 = vpop.f32.mrb[9].mxu0 }
 0x276   : > { %1157 = vperm.xlu1 %17372, %v18195_v16  }
 0x279   : > { %v18198_v17 = vpop.f32.mrb[10].mxu0 }
 0x27a   : > { %1169 = vperm.xlu1 %17372, %v18198_v17   ;;  %v18201_v18 = vpop.f32.mrb[11].mxu0 }
 0x27e   : > { %1165 = vperm.xlu1 %17372, %v18201_v18  }
 0x281   : > { %v18204_v19 = vpop.f32.mrb[12].mxu0 }
 0x282   : > { %1177 = vperm.xlu1 %17372, %v18204_v19   ;;  %v18207_v20 = vpop.f32.mrb[13].mxu0 }
 0x286   : > { %1173 = vperm.xlu1 %17372, %v18207_v20  }
 0x289   : > { %v18210_v21 = vpop.f32.mrb[14].mxu0 }
 0x28a   : > { %1185 = vperm.xlu0 %17373, %v18210_v21   ;;  %v18213_v22 = vpop.f32.mrb[15].mxu0 }
 0x28b   : > { %1181 = vperm.xlu1 %17372, %v18213_v22  }
 0x28e   : > { %17375 = vset.pattern.permute.xlu0 %v20806_v23  ;;  %v955_v24 = vpop.f32.mrb[0].mxu1 }
 0x28f   : > { %1706 = vperm.xlu0 %17375, %v18171_v7   ;;  %17374 = vset.pattern.permute.xlu1 %v20812_v43  ;;  %v12354_v25 = vpop.f32.mrb[1].mxu1  ;;  %v18254_v31 = vadd.f32 %v955_v24, %v887_v30 }
 0x290   : > { %961 = vperm.xlu1 %17374, %v18171_v7  }
 0x291   : > { %v18262_v33 = vrot.slane %v18254_v31, %v20803_v32  ;;  %v10694_v32 = vld [vmem:[%s20782_s5 + $0xd0] sm:$0xff] }
 0x293   : > { %1718 = vperm.xlu0 %17375, %v18174_v8  }
 0x294   : > { %966 = vperm.xlu1 %17374, %v18168_v6  }
 0x297   : > { %1726 = vperm.xlu0 %17375, %v18180_v10  }
 0x298   : > { %971 = vperm.xlu1 %17374, %v18177_v9  }
 0x29b   : > { %1734 = vperm.xlu0 %17375, %v18186_v13  }
 0x29c   : > { %976 = vperm.xlu1 %17374, %v18174_v8  }
 0x29f   : > { %1742 = vperm.xlu0 %17375, %v18192_v15  }
 0x2a0   : > { %981 = vperm.xlu1 %17374, %v18183_v12  }
 0x2a3   : > { %17377 = vset.pattern.permute.xlu0 %v20812_v43 }
 0x2a4   : > { %1016 = vperm.xlu0 %17377, %v18198_v17   ;;  %986 = vperm.xlu1 %17374, %v18180_v10  }
 0x2a8   : > { %1031 = vperm.xlu0 %17377, %v18213_v22   ;;  %991 = vperm.xlu1 %17374, %v18189_v14  }
 0x2ac   : > { %17378 = vset.pattern.permute.xlu0 %v20806_v23  ;;  %996 = vperm.xlu1 %17374, %v18186_v13  }
 0x2ad   : > { %1750 = vperm.xlu0 %17378, %v18198_v17  }
 0x2b0   : > { %1001 = vperm.xlu1 %17374, %v18195_v16  }
 0x2b1   : > { %1758 = vperm.xlu0 %17378, %v18204_v19  }
 0x2b4   : > { %1006 = vperm.xlu1 %17374, %v18192_v15  }
 0x2b5   : > { %1766 = vperm.xlu0 %17378, %v18210_v21  }
 0x2b8   : > { %1011 = vperm.xlu1 %17374, %v18201_v18  }
 0x2b9   : > { %17382 = vset.pattern.permute.xlu0 %v20820_v26 }
 0x2ba   : > { %2472 = vperm.xlu0 %17382, %v18171_v7  }
 0x2bc   : > { %1021 = vperm.xlu1 %17374, %v18207_v20  }
 0x2be   : > { %2484 = vperm.xlu0 %17382, %v18174_v8  }
 0x2c0   : > { %1026 = vperm.xlu1 %17374, %v18204_v19  }
 0x2c2   : > { %2492 = vperm.xlu0 %17382, %v18180_v10  }
 0x2c4   : > { %1036 = vperm.xlu1 %17374, %v18210_v21  }
 0x2c6   : > { %17384 = vset.pattern.permute.xlu0 %v20804_v28 }
 0x2c7   : > { %2093 = vperm.xlu0 %17384, %v18168_v6  }
 0x2c8   : > { %17376 = vset.pattern.permute.xlu1 %v20806_v23 }
 0x2c9   : > { %1710 = vperm.xlu1 %17376, %v18168_v6  }
 0x2cb   : > { %2105 = vperm.xlu0 %17384, %v18183_v12  }
 0x2cd   : > { %1714 = vperm.xlu1 %17376, %v18177_v9  }
 0x2cf   : > { %2113 = vperm.xlu0 %17384, %v18189_v14  }
 0x2d1   : > { %v1130_v34 = vpop.permute.xlu1 %1129  ;;  %1722 = vperm.xlu1 %17376, %v18183_v12  }
 0x2d2   : > { %v1193_v35 = vadd.f32 %v18262_v33, %v1130_v34 }
 0x2d3   : > { %2121 = vperm.xlu0 %17384, %v18195_v16  }
 0x2d4   : > { %v1225_v37 = vmul.f32 0.33, %v1193_v35  ;;  %vm1209_vm1 = vcmp.ge.f32.partialorder %v1193_v35, 0.0 }
 0x2d5   : > { %v1126_v36 = vpop.permute.xlu1 %1125  ;;  %1730 = vperm.xlu1 %17376, %v18189_v14  }
 0x2d6   : > { %v1192_v38 = vadd.f32 %v18262_v33, %v1126_v36  ;;  %v18272_v42 = vsel %vm1209_vm1, %v1193_v35, %v1225_v37 }
 0x2d7   : > { %2129 = vperm.xlu0 %17384, %v18201_v18  }
 0x2d8   : > { %vm1208_vm2 = vcmp.ge.f32.partialorder %v1192_v38, 0.0  ;;  %v1224_v39 = vmul.f32 0.33, %v1192_v38 }
 0x2d9   : > { %v1138_v40 = vpop.permute.xlu1 %1137  ;;  %1738 = vperm.xlu1 %17376, %v18195_v16  }
 0x2da   : > { %v18274_v45 = vsel %vm1208_vm2, %v1192_v38, %v1224_v39  ;;  %v1195_v46 = vadd.f32 %v18262_v33, %v1138_v40  ;;  %v20810_v39 = vmov 6  }
 0x2db   : > { %v15209_v47 = vpack.c.bf16 %v18272_v42, %v18274_v45  ;;  %2137 = vperm.xlu0 %17384, %v18207_v20  }
 0x2dc   : > { %v1227_v49 = vmul.f32 0.33, %v1195_v46  ;;  %vm1211_vm3 = vcmp.ge.f32.partialorder %v1195_v46, 0.0 }
 0x2dd   : > { %15210 = vmatpush3.bf16.msra.mxu0 %v15209_v47  ;;  %v1134_v48 = vpop.permute.xlu1 %1133  ;;  %1746 = vperm.xlu1 %17376, %v18201_v18  }
 0x2de   : > { %v1194_v50 = vadd.f32 %v18262_v33, %v1134_v48  ;;  %15211 = vmatprep.subr.bf16.mxu0 %v20818_v11  ;;  %v18285_v53 = vsel %vm1211_vm3, %v1195_v46, %v1227_v49 }
 0x2df   : > { %2145 = vperm.xlu0 %17384, %v18213_v22  }
 0x2e0   : > { %vm1210_vm4 = vcmp.ge.f32.partialorder %v1194_v50, 0.0  ;;  %v1226_v51 = vmul.f32 0.33, %v1194_v50 }
 0x2e1   : > { %v1146_v52 = vpop.permute.xlu1 %1145  ;;  %1754 = vperm.xlu1 %17376, %v18207_v20  }
 0x2e2   : > { %v18287_v54 = vsel %vm1210_vm4, %v1194_v50, %v1226_v51  ;;  %v1197_v55 = vadd.f32 %v18262_v33, %v1146_v52  ;;  %v20816_v51 = vmov 5  }
 0x2e3   : > { %v15212_v56 = vpack.c.bf16 %v18285_v53, %v18287_v54  ;;  %17385 = vset.pattern.permute.xlu0 %v20820_v26 }
 0x2e4   : > { %2500 = vperm.xlu0 %17385, %v18186_v13   ;;  %v1229_v58 = vmul.f32 0.33, %v1197_v55  ;;  %vm1213_vm5 = vcmp.ge.f32.partialorder %v1197_v55, 0.0 }
 0x2e5   : > { %15213 = vmatpush3.bf16.msra.mxu0 %v15212_v56  ;;  %v1142_v57 = vpop.permute.xlu1 %1141  ;;  %17379 = vset.pattern.permute.xlu1 %v20804_v28 }
 0x2e6   : > { %v1196_v59 = vadd.f32 %v18262_v33, %v1142_v57  ;;  %2089 = vperm.xlu1 %17379, %v18171_v7   ;;  %15214 = vmatprep.subr.bf16.mxu0 %v20818_v11  ;;  %v18299_v62 = vsel %vm1213_vm5, %v1197_v55, %v1229_v58 }
 0x2e8   : > { %vm1212_vm6 = vcmp.ge.f32.partialorder %v1196_v59, 0.0  ;;  %v1228_v60 = vmul.f32 0.33, %v1196_v59  ;;  %2508 = vperm.xlu0 %17385, %v18192_v15  }
 0x2e9   : > { %v1154_v61 = vpop.permute.xlu1 %1153 }
 0x2ea   : > { %v18301_v63 = vsel %vm1212_vm6, %v1196_v59, %v1228_v60  ;;  %v1199_v0 = vadd.f32 %v18262_v33, %v1154_v61  ;;  %2097 = vperm.xlu1 %17379, %v18177_v9  }
 0x2eb   : > { %v15215_v1 = vpack.c.bf16 %v18299_v62, %v18301_v63 }
 0x2ec   : > { %2516 = vperm.xlu0 %17385, %v18198_v17   ;;  %v1231_v3 = vmul.f32 0.33, %v1199_v0  ;;  %vm1215_vm7 = vcmp.ge.f32.partialorder %v1199_v0, 0.0 }
 0x2ed   : > { %15216 = vmatpush3.bf16.msra.mxu0 %v15215_v1  ;;  %v1150_v2 = vpop.permute.xlu1 %1149 }
 0x2ee   : > { %v1198_v4 = vadd.f32 %v18262_v33, %v1150_v2  ;;  %17380 = vset.pattern.permute.xlu1 %v20806_v23  ;;  %15217 = vmatprep.subr.bf16.mxu0 %v20818_v11  ;;  %v18313_v25 = vsel %vm1215_vm7, %v1199_v0, %v1231_v3 }
 0x2ef   : > { %1762 = vperm.xlu1 %17380, %v18213_v22  }
 0x2f0   : > { %vm1214_vm8 = vcmp.ge.f32.partialorder %v1198_v4, 0.0  ;;  %v1230_v5 = vmul.f32 0.33, %v1198_v4  ;;  %2524 = vperm.xlu0 %17385, %v18204_v19  }
 0x2f1   : > { %v1162_v24 = vpop.permute.xlu1 %1161 }
 0x2f2   : > { %v18315_v27 = vsel %vm1214_vm8, %v1198_v4, %v1230_v5  ;;  %v1201_v30 = vadd.f32 %v18262_v33, %v1162_v24  ;;  %v20802_v5 = vsub.s32 0, %v18249_v29 }
 0x2f3   : > { %v15218_v34 = vpack.c.bf16 %v18313_v25, %v18315_v27  ;;  %17381 = vset.pattern.permute.xlu1 %v20804_v28  ;;  %v10695_v28 = vld [vmem:[%s20782_s5 + $0xd8] sm:$0xff] }
 0x2f4   : > { %2532 = vperm.xlu0 %17385, %v18210_v21   ;;  %2101 = vperm.xlu1 %17381, %v18174_v8   ;;  %v1233_v36 = vmul.f32 0.33, %v1201_v30  ;;  %vm1217_vm9 = vcmp.ge.f32.partialorder %v1201_v30, 0.0 }
 0x2f5   : > { %15219 = vmatpush3.bf16.msra.mxu0 %v15218_v34  ;;  %v1158_v35 = vpop.permute.xlu1 %1157 }
 0x2f6   : > { %v1200_v37 = vadd.f32 %v18262_v33, %v1158_v35  ;;  %15220 = vmatprep.subr.bf16.mxu0 %v20818_v11  ;;  %v18328_v46 = vsel %vm1217_vm9, %v1201_v30, %v1233_v36 }
 0x2f8   : > { %vm1216_vm10 = vcmp.ge.f32.partialorder %v1200_v37, 0.0  ;;  %v1232_v38 = vmul.f32 0.33, %v1200_v37  ;;  %17389 = vset.pattern.permute.xlu0 %v20810_v39  ;;  %2109 = vperm.xlu1 %17381, %v18180_v10  }
 0x2f9   : > { %v1170_v40 = vpop.permute.xlu1 %1169  ;;  %3238 = vperm.xlu0 %17389, %v18171_v7  }
 0x2fa   : > { %v18330_v47 = vsel %vm1216_vm10, %v1200_v37, %v1232_v38  ;;  %v1203_v48 = vadd.f32 %v18262_v33, %v1170_v40  ;;  %v10684_v40 = vld [vmem:[%s20782_s5 + $0x80] sm:$0xff] }
 0x2fb   : > { %v15221_v49 = vpack.c.bf16 %v18328_v46, %v18330_v47 }
 0x2fc   : > { %2117 = vperm.xlu1 %17381, %v18186_v13   ;;  %v1235_v52 = vmul.f32 0.33, %v1203_v48  ;;  %vm1219_vm11 = vcmp.ge.f32.partialorder %v1203_v48, 0.0 }
 0x2fd   : > { %15222 = vmatpush3.bf16.msra.mxu0 %v15221_v49  ;;  %v1166_v50 = vpop.permute.xlu1 %1165  ;;  %17390 = vset.pattern.permute.xlu0 %v20816_v51 }
 0x2fe   : > { %v1202_v55 = vadd.f32 %v18262_v33, %v1166_v50  ;;  %2859 = vperm.xlu0 %17390, %v18168_v6   ;;  %15223 = vmatprep.subr.bf16.mxu0 %v20818_v11  ;;  %v18341_v58 = vsel %vm1219_vm11, %v1203_v48, %v1235_v52  ;;  %v10685_v48 = vld [vmem:[%s20782_s5 + $0x88] sm:$0xff]  ;;  %v18374_v50 = vrot.slane %v18254_v31, %v20802_v5 }
 0x300   : > { %vm1218_vm12 = vcmp.ge.f32.partialorder %v1202_v55, 0.0  ;;  %v1234_v56 = vmul.f32 0.33, %v1202_v55  ;;  %2125 = vperm.xlu1 %17381, %v18192_v15  }
 0x301   : > { %v1178_v57 = vpop.permute.xlu1 %1177 }
 0x302   : > { %v18343_v59 = vsel %vm1218_vm12, %v1202_v55, %v1234_v56  ;;  %v1205_v60 = vadd.f32 %v18262_v33, %v1178_v57  ;;  %2871 = vperm.xlu0 %17390, %v18183_v12   ;;  %v15256_v57 = vpack.c.bf16 %v10685_v48, %v10684_v40 }
 0x303   : > { %v15224_v61 = vpack.c.bf16 %v18341_v58, %v18343_v59 }
 0x304   : > { %2133 = vperm.xlu1 %17381, %v18198_v17   ;;  %v1237_v1 = vmul.f32 0.33, %v1205_v60  ;;  %vm1221_vm13 = vcmp.ge.f32.partialorder %v1205_v60, 0.0 }
 0x305   : > { %15225 = vmatpush3.bf16.msra.mxu0 %v15224_v61  ;;  %v1174_v0 = vpop.permute.xlu1 %1173 }
 0x306   : > { %v1204_v2 = vadd.f32 %v18262_v33, %v1174_v0  ;;  %2879 = vperm.xlu0 %17390, %v18189_v14   ;;  %15226 = vmatprep.subr.bf16.mxu0 %v20818_v11  ;;  %v18355_v24 = vsel %vm1221_vm13, %v1205_v60, %v1237_v1  ;;  %v10686_v0 = vld [vmem:[%s20782_s5 + $0x90] sm:$0xff]  ;;  %v10687_v1 = vld [vmem:[%s20782_s5 + $0x98] sm:$0xff] }
 0x308   : > { %vm1220_vm14 = vcmp.ge.f32.partialorder %v1204_v2, 0.0  ;;  %v1236_v3 = vmul.f32 0.33, %v1204_v2  ;;  %2141 = vperm.xlu1 %17381, %v18204_v19  }
 0x309   : > { %v1186_v4 = vpop.permute.xlu0 %1185 }
 0x30a   : > { %v18357_v30 = vsel %vm1220_vm14, %v1204_v2, %v1236_v3  ;;  %v1207_v34 = vadd.f32 %v18262_v33, %v1186_v4  ;;  %2887 = vperm.xlu0 %17390, %v18195_v16   ;;  %v1182_v35 = vpop.permute.xlu1 %1181  ;;  %v1257_v3 = vld [vmem:[#allocation5 + $0x8] sm:$0xff] }
 0x30b   : > { %v15227_v36 = vpack.c.bf16 %v18355_v24, %v18357_v30  ;;  %v1206_v37 = vadd.f32 %v18262_v33, %v1182_v35 }
 0x30c   : > { %vm1223_vm15 = vcmp.ge.f32.partialorder %v1207_v34, 0.0  ;;  %v1239_v38 = vmul.f32 0.33, %v1207_v34  ;;  %2149 = vperm.xlu1 %17381, %v18210_v21  }
 0x30d   : > { %vm1222_vm1 = vcmp.ge.f32.partialorder %v1206_v37, 0.0  ;;  %v1238_v49 = vmul.f32 0.33, %v1206_v37  ;;  %15228 = vmatpush3.bf16.msra.mxu0 %v15227_v36 }
 0x30e   : > { %v18376_v33 = vsel %vm1223_vm15, %v1207_v34, %v1239_v38  ;;  %v18378_v52 = vpop.permute.xlu0 %1706  ;;  %2895 = vperm.xlu0 %17390, %v18201_v18   ;;  %15229 = vmatprep.subr.bf16.mxu0 %v20818_v11  ;;  %v15260_v34 = vpack.c.bf16 %v10687_v1, %v10686_v0  ;;  %v10689_v38 = vld [vmem:[%s20782_s5 + $0xa8] sm:$0xff] }
 0x30f   : > { %v18382_v55 = vsel %vm1222_vm1, %v1206_v37, %v1238_v49  ;;  %v962_v56 = vpop.permute.xlu1 %961  ;;  %v10688_v37 = vld [vmem:[%s20782_s5 + $0xa0] sm:$0xff] }
 0x310   : > { %v15230_v60 = vpack.c.bf16 %v18376_v33, %v18382_v55  ;;  %v1043_v61 = vadd.f32 %v18374_v50, %v962_v56  ;;  %17383 = vset.pattern.permute.xlu1 %v20820_v26  ;;  %v15264_v1 = vpack.c.bf16 %v10689_v38, %v10688_v37  ;;  %v10692_v38 = vld [vmem:[%s20782_s5 + $0xc0] sm:$0xff] }
 0x311   : > { %2476 = vperm.xlu1 %17383, %v18168_v6  }
 0x312   : > { %v18395_v2 = vpop.permute.xlu0 %1718  ;;  %2903 = vperm.xlu0 %17390, %v18207_v20   ;;  %15231 = vmatpush3.bf16.msra.mxu0 %v15230_v60  ;;  %v1075_v35 = vmul.f32 0.33, %v1043_v61  ;;  %vm1059_vm2 = vcmp.ge.f32.partialorder %v1043_v61, 0.0 }
 0x313   : > { %v967_v4 = vpop.permute.xlu1 %966  ;;  %15257 = vmatprep.subr.bf16.mxu0 %v15256_v57 }
 0x314   : > { %v1044_v36 = vadd.f32 %v18374_v50, %v967_v4  ;;  %v18410_v56 = vsel %vm1059_vm2, %v1043_v61, %v1075_v35  ;;  %v10691_v4 = vld [vmem:[%s20782_s5 + $0xb8] sm:$0xff] }
 0x315   : > { %2480 = vperm.xlu1 %17383, %v18177_v9   ;;  %12388 = vmatmul.mubr.f32.vlgmr.msra.gmra.mrb[16].mxu0 %v1257_v3  ;;  %v10690_v3 = vld [vmem:[%s20782_s5 + $0xb0] sm:$0xff] }
 0x316   : > { %vm1060_vm3 = vcmp.ge.f32.partialorder %v1044_v36, 0.0  ;;  %v1076_v40 = vmul.f32 0.33, %v1044_v36  ;;  %v18406_v48 = vpop.permute.xlu0 %1726  ;;  %2911 = vperm.xlu0 %17390, %v18213_v22   ;;  %15259 = vmatpush3.bf16.msra.mxu0 %v15256_v57  ;;  %v15268_v35 = vpack.c.bf16 %v10691_v4, %v10690_v3 }
 0x317   : > { %12457 = vmatprep.mubr.f32.mxu0 %v18274_v45  ;;  %v972_v49 = vpop.permute.xlu1 %971  ;;  %15261 = vmatprep.subr.bf16.mxu0 %v15260_v34 }
 0x318   : > { %v18412_v60 = vsel %vm1060_vm3, %v1044_v36, %v1076_v40  ;;  %v1045_v0 = vadd.f32 %v18374_v50, %v972_v49 }
 0x319   : > { %v15233_v45 = vpack.c.bf16 %v18412_v60, %v18410_v56  ;;  %2488 = vperm.xlu1 %17383, %v18183_v12  }
 0x31a   : > { %v18424_v57 = vpop.permute.xlu0 %1734  ;;  %17392 = vset.pattern.permute.xlu0 %v20810_v39  ;;  %15263 = vmatpush3.bf16.msra.mxu0 %v15260_v34  ;;  %v1077_v36 = vmul.f32 0.33, %v1045_v0  ;;  %vm1061_vm4 = vcmp.ge.f32.partialorder %v1045_v0, 0.0  ;;  %v10693_v34 = vld [vmem:[%s20782_s5 + $0xc8] sm:$0xff]  ;;  %v10698_v39 = vld [vmem:[%s20782_s5 + $0xf0] sm:$0xff] }
 0x31b   : > { %3250 = vperm.xlu0 %17392, %v18174_v8   ;;  %15234 = vmatpush3.bf16.msra.mxu1 %v15233_v45  ;;  %v977_v61 = vpop.permute.xlu1 %976  ;;  %v15272_v5 = vpack.c.bf16 %v10693_v34, %v10692_v38 }
 0x31c   : > { %v1046_v37 = vadd.f32 %v18374_v50, %v977_v61  ;;  %15265 = vmatprep.subr.bf16.mxu0 %v15264_v1  ;;  %15235 = vmatprep.subr.bf16.mxu1 %v20818_v11  ;;  %v18440_v4 = vsel %vm1061_vm4, %v1045_v0, %v1077_v36 }
 0x31d   : > { %2496 = vperm.xlu1 %17383, %v18189_v14  }
 0x31e   : > { %vm1062_vm5 = vcmp.ge.f32.partialorder %v1046_v37, 0.0  ;;  %v1078_v40 = vmul.f32 0.33, %v1046_v37  ;;  %v18437_v49 = vpop.permute.xlu0 %1742  ;;  %15267 = vmatpush3.bf16.msra.mxu0 %v15264_v1 }
 0x31f   : > { %3258 = vperm.xlu0 %17392, %v18180_v10   ;;  %v982_v3 = vpop.permute.xlu1 %981  ;;  %15269 = vmatprep.subr.bf16.mxu0 %v15268_v35 }
 0x320   : > { %v18442_v45 = vsel %vm1062_vm5, %v1046_v37, %v1078_v40  ;;  %v1047_v61 = vadd.f32 %v18374_v50, %v982_v3  ;;  %v15276_v37 = vpack.c.bf16 %v10695_v28, %v10694_v32  ;;  %v10696_v40 = vld [vmem:[%s20782_s5 + $0xe0] sm:$0xff] }
 0x321   : > { %v15236_v1 = vpack.c.bf16 %v18442_v45, %v18440_v4  ;;  %2504 = vperm.xlu1 %17383, %v18195_v16  }
 0x322   : > { %15271 = vmatpush3.bf16.msra.mxu0 %v15268_v35  ;;  %v1079_v38 = vmul.f32 0.33, %v1047_v61  ;;  %vm1063_vm6 = vcmp.ge.f32.partialorder %v1047_v61, 0.0  ;;  %v10697_v35 = vld [vmem:[%s20782_s5 + $0xe8] sm:$0xff] }
 0x323   : > { %v1017_v0 = vpop.permute.xlu0 %1016  ;;  %3266 = vperm.xlu0 %17392, %v18186_v13   ;;  %15237 = vmatpush3.bf16.msra.mxu1 %v15236_v1  ;;  %v987_v36 = vpop.permute.xlu1 %986  ;;  %v15280_v44 = vpack.c.bf16 %v10697_v35, %v10696_v40 }
 0x324   : > { %v1048_v34 = vadd.f32 %v18374_v50, %v987_v36  ;;  %15273 = vmatprep.subr.bf16.mxu0 %v15272_v5  ;;  %15238 = vmatprep.subr.bf16.mxu1 %v20818_v11  ;;  %v18467_v1 = vsel %vm1063_vm6, %v1047_v61, %v1079_v38 }
 0x325   : > { %2512 = vperm.xlu1 %17383, %v18201_v18  }
 0x326   : > { %vm1064_vm7 = vcmp.ge.f32.partialorder %v1048_v34, 0.0  ;;  %v1080_v3 = vmul.f32 0.33, %v1048_v34  ;;  %15275 = vmatpush3.bf16.msra.mxu0 %v15272_v5  ;;  %v10699_v5 = vld [vmem:[%s20782_s5 + $0xf8] sm:$0xff] }
 0x327   : > { %3274 = vperm.xlu0 %17392, %v18192_v15   ;;  %v18465_v28 = vpop.permute.xlu0 %1031  ;;  %v992_v32 = vpop.permute.xlu1 %991  ;;  %15277 = vmatprep.subr.bf16.mxu0 %v15276_v37  ;;  %v15284_v38 = vpack.c.bf16 %v10699_v5, %v10698_v39 }
 0x328   : > { %v18469_v36 = vsel %vm1064_vm7, %v1048_v34, %v1080_v3  ;;  %v1049_v23 = vadd.f32 %v18374_v50, %v992_v32 }
 0x329   : > { %20853 = vst [vmem:[#allocation24_spill] sm:$0xff] %v18469_v36  ;;  %v15239_v43 = vpack.c.bf16 %v18469_v36, %v18467_v1  ;;  %2520 = vperm.xlu1 %17383, %v18207_v20  }
 0x32a   : > { %15279 = vmatpush3.bf16.msra.mxu0 %v15276_v37  ;;  %v1081_v34 = vmul.f32 0.33, %v1049_v23  ;;  %vm1065_vm8 = vcmp.ge.f32.partialorder %v1049_v23, 0.0  ;;  %v1108_v37 = vld [vmem:[%s20782_s5] sm:$0xff] }
 0x32b   : > { %3282 = vperm.xlu0 %17392, %v18198_v17   ;;  %15240 = vmatpush3.bf16.msra.mxu1 %v15239_v43  ;;  %v997_v61 = vpop.permute.xlu1 %996  ;;  %v1109_v43 = vld [vmem:[%s20782_s5 + $0x8] sm:$0xff] }
 0x32c   : > { %v1050_v40 = vadd.f32 %v18374_v50, %v997_v61  ;;  %v18483_v35 = vpop.permute.xlu0 %1750  ;;  %15281 = vmatprep.subr.bf16.mxu0 %v15280_v44  ;;  %15241 = vmatprep.subr.bf16.mxu1 %v20818_v11  ;;  %v18495_v32 = vsel %vm1065_vm8, %v1049_v23, %v1081_v34  ;;  %v1111_v23 = vld [vmem:[%s20782_s5 + $0x18] sm:$0xff] }
 0x32d   : > { %17386 = vset.pattern.permute.xlu1 %v20816_v51  ;;  %20854 = vst [vmem:[#allocation25_spill] sm:$0xff] %v18495_v32  ;;  %v15288_v51 = vpack.c.bf16 %v1109_v43, %v1108_v37 }
 0x32e   : > { %vm1066_vm9 = vcmp.ge.f32.partialorder %v1050_v40, 0.0  ;;  %v1082_v39 = vmul.f32 0.33, %v1050_v40  ;;  %2855 = vperm.xlu1 %17386, %v18171_v7   ;;  %15283 = vmatpush3.bf16.msra.mxu0 %v15280_v44  ;;  %v1110_v44 = vld [vmem:[%s20782_s5 + $0x10] sm:$0xff]  ;;  %v20859_v7 = vmov 5  }
 0x32f   : > { %3290 = vperm.xlu0 %17392, %v18204_v19   ;;  %v1002_v3 = vpop.permute.xlu1 %1001  ;;  %15285 = vmatprep.subr.bf16.mxu0 %v15284_v38 }
 0x330   : > { %v18497_v5 = vsel %vm1066_vm9, %v1050_v40, %v1082_v39  ;;  %v1051_v61 = vadd.f32 %v18374_v50, %v1002_v3  ;;  %v18500_v41 = vpop.permute.xlu0 %1758  ;;  %v1054_v40 = vadd.f32 %v18374_v50, %v1017_v0  ;;  %v1113_v39 = vld [vmem:[%s20782_s5 + $0x28] sm:$0xff]  ;;  %v20858_v0 = vmov 0.0|0.0  }
 0x331   : > { %20855 = vst [vmem:[#allocation26_spill] sm:$0xff] %v18497_v5  ;;  %20856 = vst [vmem:[#allocation27_spill] sm:$0xff] %v18500_v41  ;;  %v15242_v11 = vpack.c.bf16 %v18497_v5, %v18495_v32 }
 0x332   : > { %17387 = vset.pattern.permute.xlu1 %v20820_v26  ;;  %15287 = vmatpush3.bf16.msra.mxu0 %v15284_v38  ;;  %v1083_v37 = vmul.f32 0.33, %v1051_v61  ;;  %v1112_v38 = vld [vmem:[%s20782_s5 + $0x20] sm:$0xff]  ;;  %vm1067_vm10 = vcmp.ge.f32.partialorder %v1051_v61, 0.0  ;;  %v15292_v26 = vpack.c.bf16 %v1111_v23, %v1110_v44  ;;  %v1086_v36 = vmul.f32 0.33, %v1054_v40 }
 0x333   : > { %3298 = vperm.xlu0 %17392, %v18210_v21   ;;  %2528 = vperm.xlu1 %17387, %v18213_v22   ;;  %v1007_v34 = vpop.permute.xlu1 %1006  ;;  %v15296_v32 = vpack.c.bf16 %v1113_v39, %v1112_v38  ;;  %vm1070_vm12 = vcmp.ge.f32.partialorder %v1054_v40, 0.0 }
 0x334   : > { %15243 = vmatpush3.bf16.msra.mxu1 %v15242_v11  ;;  %v1052_v43 = vadd.f32 %v18374_v50, %v1007_v34  ;;  %15289 = vmatprep.subr.bf16.mxu0 %v15288_v51  ;;  %v18521_v3 = vpop.permute.xlu0 %1766  ;;  %v20827_v34 = vmov 7   ;;  %v18528_v41 = vsel %vm1067_vm10, %v1051_v61, %v1083_v37 }
 0x335   : > { %20857 = vst [vmem:[#allocation28_spill] sm:$0xff] %v18521_v3  ;;  %12458 = vmatmul.mubr.f32.vlgmr.msra.gmra.mrb[18].mxu0 %v18272_v42  ;;  %15244 = vmatprep.subr.bf16.mxu1 %v20858_v0 }
 0x336   : > { %vm1068_vm11 = vcmp.ge.f32.partialorder %v1052_v43, 0.0  ;;  %v1084_v11 = vmul.f32 0.33, %v1052_v43  ;;  %12460 = vmatprep.mubr.f32.mxu0 %v18287_v54  ;;  %15291 = vmatpush3.bf16.msra.mxu0 %v15288_v51  ;;  %v1114_v54 = vld [vmem:[%s20782_s5 + $0x30] sm:$0xff]  ;;  %v1115_v51 = vld [vmem:[%s20782_s5 + $0x38] sm:$0xff] }
 0x337   : > { %17394 = vset.pattern.permute.xlu0 %v20827_v34  ;;  %17388 = vset.pattern.permute.xlu1 %v20859_v7  ;;  %v1012_v5 = vpop.permute.xlu1 %1011  ;;  %v15300_v37 = vpack.c.bf16 %v1115_v51, %v1114_v54 }
 0x338   : > { %v18530_v3 = vsel %vm1068_vm11, %v1052_v43, %v1084_v11  ;;  %v1053_v42 = vadd.f32 %v18374_v50, %v1012_v5  ;;  %3625 = vperm.xlu0 %17394, %v18168_v6   ;;  %2863 = vperm.xlu1 %17388, %v18177_v9   ;;  %v18547_v43 = vsel %vm1070_vm12, %v1054_v40, %v1086_v36 }
 0x339   : > { %v15245_v61 = vpack.c.bf16 %v18530_v3, %v18528_v41  ;;  %12461 = vmatmul.mubr.f32.gmra.mrb[20].mxu0 %v18285_v53  ;;  %15293 = vmatprep.subr.bf16.mxu0 %v15292_v26  ;;  %v18545_v44 = vpop.permute.xlu0 %2472  ;;  %v1117_v53 = vld [vmem:[%s20782_s5 + $0x48] sm:$0xff] }
 0x33a   : > { %vm1069_vm13 = vcmp.ge.f32.partialorder %v1053_v42, 0.0  ;;  %v1085_v5 = vmul.f32 0.33, %v1053_v42  ;;  %12463 = vmatprep.mubr.f32.mxu0 %v18301_v63  ;;  %15295 = vmatpush3.bf16.msra.mxu0 %v15292_v26  ;;  %v1116_v26 = vld [vmem:[%s20782_s5 + $0x40] sm:$0xff]  ;;  %v20826_v63 = vsub.s32 2, %v18249_v29 }
 0x33b   : > { %15246 = vmatpush3.bf16.msra.mxu1 %v15245_v61  ;;  %v1022_v23 = vpop.permute.xlu1 %1021  ;;  %15297 = vmatprep.subr.bf16.mxu0 %v15296_v32  ;;  %v15304_v11 = vpack.c.bf16 %v1117_v53, %v1116_v26 }
 0x33c   : > { %v18549_v38 = vsel %vm1069_vm13, %v1053_v42, %v1085_v5  ;;  %v1055_v39 = vadd.f32 %v18374_v50, %v1022_v23  ;;  %3637 = vperm.xlu0 %17394, %v18183_v12   ;;  %2867 = vperm.xlu1 %17388, %v18174_v8   ;;  %v1057_v42 = vadd.f32 %v18374_v50, %v18465_v28 }
 0x33d   : > { %v15248_v36 = vpack.c.bf16 %v18547_v43, %v18549_v38  ;;  %12464 = vmatmul.mubr.f32.gmra.mrb[22].mxu0 %v18299_v62  ;;  %15247 = vmatprep.subr.bf16.mxu1 %v20858_v0  ;;  %v1118_v62 = vld [vmem:[%s20782_s5 + $0x50] sm:$0xff]  ;;  %v18582_v28 = vpop.permute.xlu0 %2484 }
 0x33e   : > { %12466 = vmatprep.mubr.f32.mxu0 %v18315_v27  ;;  %15299 = vmatpush3.bf16.msra.mxu0 %v15296_v32  ;;  %v1087_v54 = vmul.f32 0.33, %v1055_v39  ;;  %v1119_v27 = vld [vmem:[%s20782_s5 + $0x58] sm:$0xff]  ;;  %v18580_v32 = vrot.slane %v18254_v31, %v20826_v63  ;;  %vm1071_vm14 = vcmp.ge.f32.partialorder %v1055_v39, 0.0  ;;  %v1089_v53 = vmul.f32 0.33, %v1057_v42 }
 0x33f   : > { %15249 = vmatpush3.bf16.msra.mxu1 %v15248_v36  ;;  %v1027_v40 = vpop.permute.xlu1 %1026  ;;  %15301 = vmatprep.subr.bf16.mxu0 %v15300_v37  ;;  %v15308_v26 = vpack.c.bf16 %v1119_v27, %v1118_v62  ;;  %vm1073_vm1 = vcmp.ge.f32.partialorder %v1057_v42, 0.0 }
 0x340   : > { %v1056_v51 = vadd.f32 %v18374_v50, %v1027_v40  ;;  %3645 = vperm.xlu0 %17394, %v18189_v14   ;;  %2875 = vperm.xlu1 %17388, %v18180_v10   ;;  %v1773_v5 = vadd.f32 %v18580_v32, %v18378_v52  ;;  %v18589_v36 = vsel %vm1071_vm14, %v1055_v39, %v1087_v54  ;;  %v1121_v52 = vld [vmem:[%s20782_s5 + $0x68] sm:$0xff] }
 0x341   : > { %12467 = vmatmul.mubr.f32.gmra.mrb[24].mxu0 %v18313_v25  ;;  %15250 = vmatprep.subr.bf16.mxu1 %v20858_v0  ;;  %v18606_v39 = vpop.permute.xlu0 %2492  ;;  %v18608_v62 = vsel %vm1073_vm1, %v1057_v42, %v1089_v53  ;;  %v1123_v53 = vld [vmem:[%s20782_s5 + $0x78] sm:$0xff] }
 0x342   : > { %vm1072_vm15 = vcmp.ge.f32.partialorder %v1056_v51, 0.0  ;;  %v1088_v61 = vmul.f32 0.33, %v1056_v51  ;;  %12469 = vmatprep.mubr.f32.mxu0 %v18330_v47  ;;  %15303 = vmatpush3.bf16.msra.mxu0 %v15300_v37  ;;  %v1120_v47 = vld [vmem:[%s20782_s5 + $0x60] sm:$0xff]  ;;  %vm1789_vm3 = vcmp.ge.f32.partialorder %v1773_v5, 0.0 }
 0x343   : > { %v1037_v23 = vpop.permute.xlu1 %1036  ;;  %15305 = vmatprep.subr.bf16.mxu0 %v15304_v11  ;;  %v15312_v54 = vpack.c.bf16 %v1121_v52, %v1120_v47 }
 0x344   : > { %v18591_v40 = vsel %vm1072_vm15, %v1056_v51, %v1088_v61  ;;  %v1058_v25 = vadd.f32 %v18374_v50, %v1037_v23  ;;  %3653 = vperm.xlu0 %17394, %v18195_v16   ;;  %2883 = vperm.xlu1 %17388, %v18186_v13   ;;  %v1805_v51 = vmul.f32 0.33, %v1773_v5  ;;  %v1107_v23 = vld [vmem:[#allocation5] sm:$0xff] }
 0x345   : > { %v15251_v37 = vpack.c.bf16 %v18591_v40, %v18589_v36  ;;  %12470 = vmatmul.mubr.f32.gmra.mrb[26].mxu0 %v18328_v46 }
 0x346   : > { %vm1074_vm2 = vcmp.ge.f32.partialorder %v1058_v25, 0.0  ;;  %v1090_v50 = vmul.f32 0.33, %v1058_v25  ;;  %12472 = vmatprep.mubr.f32.mxu0 %v18343_v59  ;;  %15307 = vmatpush3.bf16.msra.mxu0 %v15304_v11  ;;  %v1776_v59 = vadd.f32 %v18580_v32, %v18395_v2  ;;  %v1122_v2 = vld [vmem:[%s20782_s5 + $0x70] sm:$0xff]  ;;  %v18634_v47 = vpop.permute.xlu0 %2093 }
 0x347   : > { %15252 = vmatpush3.bf16.msra.mxu1 %v15251_v37  ;;  %15309 = vmatprep.subr.bf16.mxu0 %v15308_v26 }
 0x348   : > { %v18610_v27 = vsel %vm1074_vm2, %v1058_v25, %v1090_v50  ;;  %3661 = vperm.xlu0 %17394, %v18201_v18   ;;  %2891 = vperm.xlu1 %17388, %v18192_v15   ;;  %v1711_v46 = vpop.permute.xlu1 %1710  ;;  %v18628_v25 = vsel %vm1789_vm3, %v1773_v5, %v1805_v51  ;;  %v10700_v5 = vld [vmem:[%s20782_s5 + $0x100] sm:$0xff]  ;;  %v10701_v50 = vld [vmem:[%s20782_s5 + $0x108] sm:$0xff]  ;;  %vm1792_vm5 = vcmp.ge.f32.partialorder %v1776_v59, 0.0  ;;  %v15316_v51 = vpack.c.bf16 %v1123_v53, %v1122_v2  ;;  %v10703_v2 = vld [vmem:[%s20782_s5 + $0x118] sm:$0xff] }
 0x349   : > { %v15254_v11 = vpack.c.bf16 %v18610_v27, %v18608_v62  ;;  %v1774_v61 = vadd.f32 %v18580_v32, %v1711_v46  ;;  %12473 = vmatmul.mubr.f32.gmra.mrb[28].mxu0 %v18341_v58  ;;  %15253 = vmatprep.subr.bf16.mxu1 %v20858_v0  ;;  %v20860_v46 = vmov 0.0  }
 0x34a   : > { %12475 = vmatprep.mubr.f32.mxu0 %v18357_v30  ;;  %15311 = vmatpush3.bf16.msra.mxu0 %v15308_v26  ;;  %v1808_v30 = vmul.f32 0.33, %v1776_v59  ;;  %v1778_v26 = vadd.f32 %v18580_v32, %v18406_v48  ;;  %v18671_v53 = vpop.permute.xlu0 %2105 }
 0x34b   : > { %vm1790_vm4 = vcmp.ge.f32.partialorder %v1774_v61, 0.0  ;;  %v1806_v42 = vmul.f32 0.33, %v1774_v61  ;;  %15255 = vmatpush3.bf16.msra.mxu1 %v15254_v11  ;;  %15313 = vmatprep.subr.bf16.mxu0 %v15312_v54  ;;  %v1780_v11 = vadd.f32 %v18580_v32, %v18424_v57  ;;  %v10702_v57 = vld [vmem:[%s20782_s5 + $0x110] sm:$0xff] }
 0x34c   : > { %3669 = vperm.xlu0 %17394, %v18207_v20   ;;  %2899 = vperm.xlu1 %17388, %v18198_v17   ;;  %v1715_v58 = vpop.permute.xlu1 %1714  ;;  %vm1794_vm7 = vcmp.ge.f32.partialorder %v1778_v26, 0.0 }
 0x34d   : > { %v18636_v52 = vsel %vm1790_vm4, %v1774_v61, %v1806_v42  ;;  %v1775_v37 = vadd.f32 %v18580_v32, %v1715_v58  ;;  %12476 = vmatmul.mubr.f32.gmra.mrb[30].mxu0 %v18355_v24  ;;  %15320 = vmatprep.subr.bf16.mxu1 %v20858_v0  ;;  %v15344_v42 = vpack.c.bf16 %v10701_v50, %v10700_v5  ;;  %vm1796_vm9 = vcmp.ge.f32.partialorder %v1780_v11, 0.0 }
 0x34e   : > { %v15321_v48 = vpack.c.bf16 %v18636_v52, %v18628_v25  ;;  %12423 = vmatmul.mubr.f32.vlgmr.msra.gmra.mrb[2].mxu1 %v1107_v23  ;;  %12478 = vmatprep.mubr.f32.mxu0 %v18382_v55  ;;  %v18656_v58 = vsel %vm1792_vm5, %v1776_v59, %v1808_v30  ;;  %v1810_v23 = vmul.f32 0.33, %v1778_v26  ;;  %v15348_v50 = vpack.c.bf16 %v10703_v2, %v10702_v57 }
 0x34f   : > { %vm1791_vm6 = vcmp.ge.f32.partialorder %v1775_v37, 0.0  ;;  %v1807_v24 = vmul.f32 0.33, %v1775_v37  ;;  %15315 = vmatpush3.bf16.msra.mxu0 %v15312_v54  ;;  %12569 = vmatprep.mubr.msk.f32.mxu1 %vm17721_vm0, %v20860_v46  ;;  %v20862_v2 = vmov 6  }
 0x350   : > { %3677 = vperm.xlu0 %17394, %v18213_v22   ;;  %2907 = vperm.xlu1 %17388, %v18204_v19   ;;  %v1723_v61 = vpop.permute.xlu1 %1722 }
 0x351   : > { %v18658_v55 = vsel %vm1791_vm6, %v1775_v37, %v1807_v24  ;;  %15322 = vmatpush3.bf16.msra.mxu1 %v15321_v48  ;;  %v1777_v54 = vadd.f32 %v18580_v32, %v1723_v61  ;;  %12479 = vmatmul.mubr.f32.gmra.mrb[32].mxu0 %v18376_v33  ;;  %v1812_v33 = vmul.f32 0.33, %v1780_v11  ;;  %v1782_v37 = vadd.f32 %v18580_v32, %v18437_v49  ;;  %v10705_v49 = vld [vmem:[%s20782_s5 + $0x128] sm:$0xff] }
 0x352   : > { %v15324_v59 = vpack.c.bf16 %v18656_v58, %v18658_v55  ;;  %15317 = vmatprep.subr.bf16.mxu0 %v15316_v51  ;;  %12513 = vmatprep.mubr.f32.mxu0 %v18410_v56  ;;  %v18677_v48 = vsel %vm1794_vm7, %v1778_v26, %v1810_v23  ;;  %v20861_v61 = vmov 0  }
 0x353   : > { %vm1793_vm8 = vcmp.ge.f32.partialorder %v1777_v54, 0.0  ;;  %v1809_v30 = vmul.f32 0.33, %v1777_v54  ;;  %15319 = vmatpush3.bf16.msra.mxu0 %v15316_v51  ;;  %15323 = vmatprep.subr.bf16.mxu1 %v20858_v0  ;;  %v10704_v51 = vld [vmem:[%s20782_s5 + $0x120] sm:$0xff]  ;;  %v1814_v57 = vmul.f32 0.33, %v1782_v37 }
 0x354   : > { %2915 = vperm.xlu1 %17388, %v18210_v21   ;;  %v1731_v5 = vpop.permute.xlu1 %1730  ;;  %15345 = vmatprep.subr.bf16.mxu0 %v15344_v42  ;;  %vm1798_vm11 = vcmp.ge.f32.partialorder %v1782_v37, 0.0 }
 0x355   : > { %v18679_v56 = vsel %vm1793_vm8, %v1777_v54, %v1809_v30  ;;  %15325 = vmatpush3.bf16.msra.mxu1 %v15324_v59  ;;  %v1779_v24 = vadd.f32 %v18580_v32, %v1731_v5  ;;  %17395 = vset.pattern.permute.xlu0 %v20861_v61  ;;  %v18694_v54 = vsel %vm1796_vm9, %v1780_v11, %v1812_v33  ;;  %v10706_v11 = vld [vmem:[%s20782_s5 + $0x130] sm:$0xff] }
 0x356   : > { %v15327_v26 = vpack.c.bf16 %v18677_v48, %v18679_v56  ;;  %12514 = vmatmul.mubr.f32.vlgmr.msra.gmra.mrb[18].mxu0 %v18412_v60  ;;  %15326 = vmatprep.subr.bf16.mxu1 %v20858_v0  ;;  %v15352_v30 = vpack.c.bf16 %v10705_v49, %v10704_v51  ;;  %v1784_v5 = vadd.f32 %v18580_v32, %v18483_v35  ;;  %v18699_v60 = vpop.permute.xlu0 %2113 }
 0x357   : > { %vm1795_vm10 = vcmp.ge.f32.partialorder %v1779_v24, 0.0  ;;  %v1811_v23 = vmul.f32 0.33, %v1779_v24  ;;  %12516 = vmatprep.mubr.f32.mxu0 %v18440_v4  ;;  %15347 = vmatpush3.bf16.msra.mxu0 %v15344_v42  ;;  %v10707_v42 = vld [vmem:[%s20782_s5 + $0x138] sm:$0xff] }
 0x358   : > { %17391 = vset.pattern.permute.xlu1 %v20862_v2  ;;  %v1739_v59 = vpop.permute.xlu1 %1738  ;;  %15349 = vmatprep.subr.bf16.mxu0 %v15348_v50  ;;  %v15356_v51 = vpack.c.bf16 %v10707_v42, %v10706_v11  ;;  %v1816_v49 = vmul.f32 0.33, %v1784_v5  ;;  %vm1800_vm13 = vcmp.ge.f32.partialorder %v1784_v5, 0.0  ;;  %v20865_v42 = vld [vmem:[#allocation25_spill] sm:$0xff]  ;;  %v10710_v2 = vld [vmem:[%s20782_s5 + $0x150] sm:$0xff] }
 0x359   : > { %v18701_v63 = vsel %vm1795_vm10, %v1779_v24, %v1811_v23  ;;  %15328 = vmatpush3.bf16.msra.mxu1 %v15327_v26  ;;  %v1781_v4 = vadd.f32 %v18580_v32, %v1739_v59  ;;  %3242 = vperm.xlu1 %17391, %v18168_v6   ;;  %v18717_v6 = vsel %vm1798_vm11, %v1782_v37, %v1814_v57  ;;  %v20863_v26 = vld [vmem:[#allocation27_spill] sm:$0xff]  ;;  %v10709_v37 = vld [vmem:[%s20782_s5 + $0x148] sm:$0xff]  ;;  %v20864_v57 = vld [vmem:[#allocation24_spill] sm:$0xff] }
 0x35a   : > { %v15330_v35 = vpack.c.bf16 %v18694_v54, %v18701_v63  ;;  %12517 = vmatmul.mubr.f32.gmra.mrb[20].mxu0 %v18442_v45  ;;  %15329 = vmatprep.subr.bf16.mxu1 %v20858_v0  ;;  %v1786_v23 = vadd.f32 %v18580_v32, %v20863_v26 }
 0x35b   : > { %vm1797_vm12 = vcmp.ge.f32.partialorder %v1781_v4, 0.0  ;;  %v1813_v33 = vmul.f32 0.33, %v1781_v4  ;;  %12519 = vmatprep.mubr.f32.mxu0 %v18467_v1  ;;  %15351 = vmatpush3.bf16.msra.mxu0 %v15348_v50  ;;  %v10708_v1 = vld [vmem:[%s20782_s5 + $0x140] sm:$0xff] }
 0x35c   : > { %v1747_v24 = vpop.permute.xlu1 %1746  ;;  %15353 = vmatprep.subr.bf16.mxu0 %v15352_v30  ;;  %v1818_v26 = vmul.f32 0.33, %v1786_v23  ;;  %vm1802_vm15 = vcmp.ge.f32.partialorder %v1786_v23, 0.0 }
 0x35d   : > { %v18721_v59 = vsel %vm1797_vm12, %v1781_v4, %v1813_v33  ;;  %15331 = vmatpush3.bf16.msra.mxu1 %v15330_v35  ;;  %v1783_v45 = vadd.f32 %v18580_v32, %v1747_v24  ;;  %3246 = vperm.xlu1 %17391, %v18177_v9   ;;  %v18735_v4 = vpop.permute.xlu0 %2121  ;;  %v15360_v33 = vpack.c.bf16 %v10709_v37, %v10708_v1 }
 0x35e   : > { %v15333_v50 = vpack.c.bf16 %v18717_v6, %v18721_v59  ;;  %12520 = vmatmul.mubr.f32.gmra.mrb[22].mxu0 %v20864_v57  ;;  %15332 = vmatprep.subr.bf16.mxu1 %v20858_v0  ;;  %v18738_v24 = vsel %vm1800_vm13, %v1784_v5, %v1816_v49  ;;  %v20866_v49 = vld [vmem:[#allocation26_spill] sm:$0xff]  ;;  %v18755_v1 = vsel %vm1802_vm15, %v1786_v23, %v1818_v26 }
 0x35f   : > { %vm1799_vm14 = vcmp.ge.f32.partialorder %v1783_v45, 0.0  ;;  %v1815_v11 = vmul.f32 0.33, %v1783_v45  ;;  %12522 = vmatprep.mubr.f32.mxu0 %v20865_v42  ;;  %15355 = vmatpush3.bf16.msra.mxu0 %v15352_v30  ;;  %v10711_v30 = vld [vmem:[%s20782_s5 + $0x158] sm:$0xff]  ;;  %v10712_v42 = vld [vmem:[%s20782_s5 + $0x160] sm:$0xff] }
 0x360   : > { %v1755_v35 = vpop.permute.xlu1 %1754  ;;  %15357 = vmatprep.subr.bf16.mxu0 %v15356_v51 }
 0x361   : > { %v18740_v34 = vsel %vm1799_vm14, %v1783_v45, %v1815_v11  ;;  %15334 = vmatpush3.bf16.msra.mxu1 %v15333_v50  ;;  %v1785_v57 = vadd.f32 %v18580_v32, %v1755_v35  ;;  %3254 = vperm.xlu1 %17391, %v18183_v12   ;;  %v15364_v12 = vpack.c.bf16 %v10711_v30, %v10710_v2  ;;  %v18757_v37 = vpop.permute.xlu0 %2129  ;;  %v10714_v35 = vld [vmem:[%s20782_s5 + $0x170] sm:$0xff]  ;;  %v10717_v30 = vld [vmem:[%s20782_s5 + $0x188] sm:$0xff] }
 0x362   : > { %v15336_v5 = vpack.c.bf16 %v18738_v24, %v18740_v34  ;;  %12523 = vmatmul.mubr.f32.gmra.mrb[24].mxu0 %v20866_v49  ;;  %15335 = vmatprep.subr.bf16.mxu1 %v20858_v0 }
 0x363   : > { %vm1801_vm1 = vcmp.ge.f32.partialorder %v1785_v57, 0.0  ;;  %v1817_v45 = vmul.f32 0.33, %v1785_v57  ;;  %12525 = vmatprep.mubr.f32.mxu0 %v18528_v41  ;;  %15359 = vmatpush3.bf16.msra.mxu0 %v15356_v51  ;;  %v10713_v41 = vld [vmem:[%s20782_s5 + $0x168] sm:$0xff] }
 0x364   : > { %15361 = vmatprep.subr.bf16.mxu0 %v15360_v33  ;;  %v15368_v51 = vpack.c.bf16 %v10713_v41, %v10712_v42  ;;  %v10718_v42 = vld [vmem:[%s20782_s5 + $0x190] sm:$0xff] }
 0x365   : > { %v18759_v50 = vsel %vm1801_vm1, %v1785_v57, %v1817_v45  ;;  %15337 = vmatpush3.bf16.msra.mxu1 %v15336_v5  ;;  %3262 = vperm.xlu1 %17391, %v18189_v14   ;;  %v2090_v11 = vpop.permute.xlu1 %2089  ;;  %v2154_v14 = vsub.s32 3, %v18249_v29  ;;  %v18785_v26 = vpop.permute.xlu0 %2137 }
 0x366   : > { %v15339_v2 = vpack.c.bf16 %v18755_v1, %v18759_v50  ;;  %12526 = vmatmul.mubr.f32.gmra.mrb[26].mxu0 %v18530_v3  ;;  %15338 = vmatprep.subr.bf16.mxu1 %v20858_v0  ;;  %v10715_v3 = vld [vmem:[%s20782_s5 + $0x178] sm:$0xff] }
 0x367   : > { %12528 = vmatprep.mubr.f32.mxu0 %v18549_v38  ;;  %15363 = vmatpush3.bf16.msra.mxu0 %v15360_v33  ;;  %v20867_v38 = vld [vmem:[#allocation28_spill] sm:$0xff]  ;;  %v15372_v57 = vpack.c.bf16 %v10715_v3, %v10714_v35 }
 0x368   : > { %15365 = vmatprep.subr.bf16.mxu0 %v15364_v12  ;;  %v1788_v33 = vadd.f32 %v18580_v32, %v20867_v38 }
 0x369   : > { %15340 = vmatpush3.bf16.msra.mxu1 %v15339_v2  ;;  %3270 = vperm.xlu1 %17391, %v18195_v16   ;;  %v2098_v23 = vpop.permute.xlu1 %2097  ;;  %v18791_v16 = vrot.slane %v18254_v31, %v2154_v14 }
 0x36a   : > { %12529 = vmatmul.mubr.f32.gmra.mrb[28].mxu0 %v18547_v43  ;;  %15341 = vmatprep.subr.bf16.mxu1 %v20858_v0  ;;  %v10716_v43 = vld [vmem:[%s20782_s5 + $0x180] sm:$0xff]  ;;  %v1820_v49 = vmul.f32 0.33, %v1788_v33  ;;  %vm1804_vm2 = vcmp.ge.f32.partialorder %v1788_v33, 0.0 }
 0x36b   : > { %12531 = vmatprep.mubr.f32.mxu0 %v18589_v36  ;;  %15367 = vmatpush3.bf16.msra.mxu0 %v15364_v12  ;;  %v2156_v36 = vadd.f32 %v18791_v16, %v2090_v11  ;;  %v15400_v12 = vpack.c.bf16 %v10717_v30, %v10716_v43  ;;  %v18812_v11 = vpop.permute.xlu0 %2145  ;;  %v2158_v3 = vadd.f32 %v18791_v16, %v2098_v23  ;;  %v10720_v23 = vld [vmem:[%s20782_s5 + $0x1a0] sm:$0xff] }
 0x36c   : > { %15369 = vmatprep.subr.bf16.mxu0 %v15368_v51 }
 0x36d   : > { %3278 = vperm.xlu1 %17391, %v18201_v18   ;;  %v2157_v18 = vadd.f32 %v18791_v16, %v18634_v47  ;;  %v18816_v47 = vsel %vm1804_vm2, %v1788_v33, %v1820_v49  ;;  %vm2172_vm4 = vcmp.ge.f32.partialorder %v2156_v36, 0.0  ;;  %vm2174_vm7 = vcmp.ge.f32.partialorder %v2158_v3, 0.0 }
 0x36e   : > { %12532 = vmatmul.mubr.f32.gmra.mrb[30].mxu0 %v18591_v40  ;;  %v1763_v5 = vpop.permute.xlu1 %1762  ;;  %v10719_v40 = vld [vmem:[%s20782_s5 + $0x198] sm:$0xff] }
 0x36f   : > { %12534 = vmatprep.mubr.f32.mxu0 %v18608_v62  ;;  %15371 = vmatpush3.bf16.msra.mxu0 %v15368_v51  ;;  %v1787_v45 = vadd.f32 %v18580_v32, %v1763_v5  ;;  %v2188_v32 = vmul.f32 0.33, %v2156_v36  ;;  %v15404_v51 = vpack.c.bf16 %v10719_v40, %v10718_v42  ;;  %v2189_v35 = vmul.f32 0.33, %v2157_v18  ;;  %v18835_v43 = vpop.permute.xlu0 %2500  ;;  %v10722_v42 = vld [vmem:[%s20782_s5 + $0x1b0] sm:$0xff]  ;;  %v10723_v40 = vld [vmem:[%s20782_s5 + $0x1b8] sm:$0xff] }
 0x370   : > { %15373 = vmatprep.subr.bf16.mxu0 %v15372_v57  ;;  %vm2173_vm5 = vcmp.ge.f32.partialorder %v2157_v18, 0.0 }
 0x371   : > { %vm1803_vm3 = vcmp.ge.f32.partialorder %v1787_v45, 0.0  ;;  %v1819_v62 = vmul.f32 0.33, %v1787_v45  ;;  %3286 = vperm.xlu1 %17391, %v18207_v20   ;;  %v18838_v30 = vsel %vm2173_vm5, %v2157_v18, %v2189_v35 }
 0x372   : > { %12535 = vmatmul.mubr.f32.gmra.mrb[32].mxu0 %v18610_v27  ;;  %v18826_v27 = vsel %vm2172_vm4, %v2156_v36, %v2188_v32  ;;  %v2190_v36 = vmul.f32 0.33, %v2158_v3 }
 0x373   : > { %v18818_v41 = vsel %vm1803_vm3, %v1787_v45, %v1819_v62  ;;  %15375 = vmatpush3.bf16.msra.mxu0 %v15372_v57  ;;  %12604 = vmatprep.mubr.f32.mxu0 %v18628_v25  ;;  %v2102_v2 = vpop.permute.xlu1 %2101  ;;  %v1838_v25 = vld [vmem:[#allocation5 + $0x10] sm:$0xff]  ;;  %v15377_v49 = vpack.c.bf16 %v18838_v30, %v18826_v27  ;;  %v20868_v45 = vmov 7  }
 0x374   : > { %v15342_v38 = vpack.c.bf16 %v18816_v47, %v18818_v41  ;;  %v2159_v20 = vadd.f32 %v18791_v16, %v2102_v2  ;;  %15401 = vmatprep.subr.bf16.mxu0 %v15400_v12  ;;  %v10721_v57 = vld [vmem:[%s20782_s5 + $0x1a8] sm:$0xff]  ;;  %v2162_v2 = vadd.f32 %v18791_v16, %v18699_v60 }
 0x375   : > { %3294 = vperm.xlu1 %17391, %v18213_v22  }
 0x376   : > { %v2191_v33 = vmul.f32 0.33, %v2159_v20  ;;  %12605 = vmatmul.mubr.f32.vlgmr.msra.gmra.mrb[18].mxu0 %v18636_v52  ;;  %15343 = vmatpush3.bf16.msra.mxu1 %v15342_v38  ;;  %vm2175_vm6 = vcmp.ge.f32.partialorder %v2159_v20, 0.0  ;;  %v2160_v52 = vadd.f32 %v18791_v16, %v18671_v53  ;;  %v20869_v53 = vld [vmem:[#allocation23_spill] sm:$0xff]  ;;  %v18865_v38 = vpop.permute.xlu0 %2508  ;;  %vm2178_vm11 = vcmp.ge.f32.partialorder %v2162_v2, 0.0 }
 0x377   : > { %12607 = vmatprep.mubr.f32.mxu0 %v18658_v55  ;;  %15403 = vmatpush3.bf16.msra.mxu0 %v15400_v12  ;;  %v2110_v22 = vpop.permute.xlu1 %2109  ;;  %v15408_v55 = vpack.c.bf16 %v10721_v57, %v10720_v23  ;;  %v2194_v57 = vmul.f32 0.33, %v2162_v2 }
 0x378   : > { %v2161_v5 = vadd.f32 %v18791_v16, %v2110_v22  ;;  %15376 = vmatprep.subr.bf16.mxu1 %v20858_v0  ;;  %15405 = vmatprep.subr.bf16.mxu0 %v15404_v51  ;;  %v18847_v12 = vsel %vm2175_vm6, %v2159_v20, %v2191_v33  ;;  %v2192_v32 = vmul.f32 0.33, %v2160_v52  ;;  %vm2176_vm9 = vcmp.ge.f32.partialorder %v2160_v52, 0.0  ;;  %v10725_v33 = vld [vmem:[%s20782_s5 + $0x1c8] sm:$0xff] }
 0x379   : > { %17393 = vset.pattern.permute.xlu1 %v20868_v45  ;;  %12570 = vmatmul.mubr.f32.vlgmr.msra.gmra.mrb[4].mxu1 %v1838_v25  ;;  %v15412_v20 = vpack.c.bf16 %v10723_v40, %v10722_v42 }
 0x37a   : > { %v2193_v18 = vmul.f32 0.33, %v2161_v5  ;;  %12608 = vmatmul.mubr.f32.gmra.mrb[20].mxu0 %v18656_v58  ;;  %3621 = vperm.xlu1 %17393, %v20869_v53   ;;  %vm2177_vm8 = vcmp.ge.f32.partialorder %v2161_v5, 0.0  ;;  %v18861_v58 = vsel %vm2174_vm7, %v2158_v3, %v2190_v36  ;;  %v18884_v23 = vsel %vm2176_vm9, %v2160_v52, %v2192_v32  ;;  %v10727_v52 = vld [vmem:[%s20782_s5 + $0x1d8] sm:$0xff]  ;;  %v10729_v32 = vld [vmem:[%s20782_s5 + $0x1e8] sm:$0xff] }
 0x37b   : > { %12610 = vmatprep.mubr.f32.mxu0 %v18679_v56  ;;  %15378 = vmatpush3.bf16.msra.mxu1 %v15377_v49  ;;  %v2118_v62 = vpop.permute.xlu1 %2117  ;;  %v15380_v56 = vpack.c.bf16 %v18847_v12, %v18861_v58  ;;  %v18902_v49 = vpop.permute.xlu0 %2516 }
 0x37c   : > { %15407 = vmatpush3.bf16.msra.mxu0 %v15404_v51  ;;  %v2163_v35 = vadd.f32 %v18791_v16, %v2118_v62  ;;  %15379 = vmatprep.subr.bf16.mxu1 %v20858_v0  ;;  %v18872_v60 = vsel %vm2177_vm8, %v2161_v5, %v2193_v18  ;;  %v10724_v51 = vld [vmem:[%s20782_s5 + $0x1c0] sm:$0xff]  ;;  %v18905_v18 = vsel %vm2178_vm11, %v2162_v2, %v2194_v57  ;;  %v10731_v57 = vld [vmem:[%s20782_s5 + $0x1f8] sm:$0xff] }
 0x37d   : > { %15409 = vmatprep.subr.bf16.mxu0 %v15408_v55  ;;  %12660 = vmatprep.mubr.msk.f32.mxu1 %vm17721_vm0, %v20860_v46  ;;  %v15383_v22 = vpack.c.bf16 %v18872_v60, %v18884_v23 }
 0x37e   : > { %v2195_v3 = vmul.f32 0.33, %v2163_v35  ;;  %12611 = vmatmul.mubr.f32.gmra.mrb[22].mxu0 %v18677_v48  ;;  %3629 = vperm.xlu1 %17393, %v18177_v9   ;;  %vm2179_vm10 = vcmp.ge.f32.partialorder %v2163_v35, 0.0  ;;  %v2164_v9 = vadd.f32 %v18791_v16, %v18735_v4  ;;  %v10726_v4 = vld [vmem:[%s20782_s5 + $0x1d0] sm:$0xff] }
 0x37f   : > { %12613 = vmatprep.mubr.f32.mxu0 %v18701_v63  ;;  %15381 = vmatpush3.bf16.msra.mxu1 %v15380_v56  ;;  %v2126_v25 = vpop.permute.xlu1 %2125  ;;  %v15416_v63 = vpack.c.bf16 %v10725_v33, %v10724_v51  ;;  %v15420_v40 = vpack.c.bf16 %v10727_v52, %v10726_v4  ;;  %v2537_v51 = vsub.s32 4, %v18249_v29 }
 0x380   : > { %15411 = vmatpush3.bf16.msra.mxu0 %v15408_v55  ;;  %v2165_v48 = vadd.f32 %v18791_v16, %v2126_v25  ;;  %15382 = vmatprep.subr.bf16.mxu1 %v20858_v0  ;;  %v18892_v36 = vsel %vm2179_vm10, %v2163_v35, %v2195_v3  ;;  %vm2180_vm13 = vcmp.ge.f32.partialorder %v2164_v9, 0.0 }
 0x381   : > { %15413 = vmatprep.subr.bf16.mxu0 %v15412_v20  ;;  %v15386_v42 = vpack.c.bf16 %v18892_v36, %v18905_v18 }
 0x382   : > { %v2197_v5 = vmul.f32 0.33, %v2165_v48  ;;  %12614 = vmatmul.mubr.f32.gmra.mrb[24].mxu0 %v18694_v54  ;;  %3633 = vperm.xlu1 %17393, %v18174_v8   ;;  %vm2181_vm12 = vcmp.ge.f32.partialorder %v2165_v48, 0.0  ;;  %v2196_v54 = vmul.f32 0.33, %v2164_v9  ;;  %v2166_v8 = vadd.f32 %v18791_v16, %v18757_v37  ;;  %v10728_v37 = vld [vmem:[%s20782_s5 + $0x1e0] sm:$0xff] }
 0x383   : > { %12616 = vmatprep.mubr.f32.mxu0 %v18721_v59  ;;  %15384 = vmatpush3.bf16.msra.mxu1 %v15383_v22  ;;  %v2134_v55 = vpop.permute.xlu1 %2133 }
 0x384   : > { %15415 = vmatpush3.bf16.msra.mxu0 %v15412_v20  ;;  %v2167_v53 = vadd.f32 %v18791_v16, %v2134_v55  ;;  %15385 = vmatprep.subr.bf16.mxu1 %v20858_v0  ;;  %v18913_v59 = vsel %vm2181_vm12, %v2165_v48, %v2197_v5  ;;  %v18924_v35 = vsel %vm2180_vm13, %v2164_v9, %v2196_v54  ;;  %v2198_v56 = vmul.f32 0.33, %v2166_v8  ;;  %v18930_v20 = vpop.permute.xlu0 %2524 }
 0x385   : > { %15417 = vmatprep.subr.bf16.mxu0 %v15416_v63  ;;  %vm2182_vm15 = vcmp.ge.f32.partialorder %v2166_v8, 0.0  ;;  %v15389_v3 = vpack.c.bf16 %v18913_v59, %v18924_v35  ;;  %v18959_v5 = vrot.slane %v18254_v31, %v2537_v51 }
 0x386   : > { %v2199_v62 = vmul.f32 0.33, %v2167_v53  ;;  %12617 = vmatmul.mubr.f32.gmra.mrb[26].mxu0 %v18717_v6  ;;  %3641 = vperm.xlu1 %17393, %v18180_v10   ;;  %vm2183_vm14 = vcmp.ge.f32.partialorder %v2167_v53, 0.0  ;;  %v2168_v6 = vadd.f32 %v18791_v16, %v18785_v26  ;;  %v10730_v26 = vld [vmem:[%s20782_s5 + $0x1f0] sm:$0xff]  ;;  %v18948_v48 = vsel %vm2182_vm15, %v2166_v8, %v2198_v56 }
 0x387   : > { %12619 = vmatprep.mubr.f32.mxu0 %v18740_v34  ;;  %15387 = vmatpush3.bf16.msra.mxu1 %v15386_v42  ;;  %v2142_v2 = vpop.permute.xlu1 %2141  ;;  %v15424_v34 = vpack.c.bf16 %v10729_v32, %v10728_v37  ;;  %v2539_v54 = vadd.f32 %v18959_v5, %v18545_v44  ;;  %v10734_v44 = vld [vmem:[%s20782_s5 + $0x210] sm:$0xff] }
 0x388   : > { %15419 = vmatpush3.bf16.msra.mxu0 %v15416_v63  ;;  %v2169_v10 = vadd.f32 %v18791_v16, %v2142_v2  ;;  %15388 = vmatprep.subr.bf16.mxu1 %v20858_v0  ;;  %v18936_v33 = vsel %vm2183_vm14, %v2167_v53, %v2199_v62  ;;  %v2200_v22 = vmul.f32 0.33, %v2168_v6  ;;  %vm2184_vm2 = vcmp.ge.f32.partialorder %v2168_v6, 0.0  ;;  %v18971_v55 = vpop.permute.xlu0 %2532  ;;  %v10735_v62 = vld [vmem:[%s20782_s5 + $0x218] sm:$0xff] }
 0x389   : > { %15421 = vmatprep.subr.bf16.mxu0 %v15420_v40  ;;  %v15392_v63 = vpack.c.bf16 %v18936_v33, %v18948_v48  ;;  %v2571_v32 = vmul.f32 0.33, %v2539_v54  ;;  %v2542_v2 = vadd.f32 %v18959_v5, %v18582_v28  ;;  %vm2555_vm6 = vcmp.ge.f32.partialorder %v2539_v54, 0.0  ;;  %v10736_v28 = vld [vmem:[%s20782_s5 + $0x220] sm:$0xff] }
 0x38a   : > { %v2201_v25 = vmul.f32 0.33, %v2169_v10  ;;  %12620 = vmatmul.mubr.f32.gmra.mrb[28].mxu0 %v18738_v24  ;;  %3649 = vperm.xlu1 %17393, %v18186_v13   ;;  %vm2185_vm1 = vcmp.ge.f32.partialorder %v2169_v10, 0.0  ;;  %v2170_v13 = vadd.f32 %v18791_v16, %v18812_v11  ;;  %v10733_v11 = vld [vmem:[%s20782_s5 + $0x208] sm:$0xff] }
 0x38b   : > { %12622 = vmatprep.mubr.f32.mxu0 %v18759_v50  ;;  %15390 = vmatpush3.bf16.msra.mxu1 %v15389_v3  ;;  %v2150_v9 = vpop.permute.xlu1 %2149  ;;  %v15428_v50 = vpack.c.bf16 %v10731_v57, %v10730_v26  ;;  %v2221_v26 = vld [vmem:[#allocation5 + $0x18] sm:$0xff]  ;;  %v19016_v57 = vsel %vm2555_vm6, %v2539_v54, %v2571_v32  ;;  %vm2558_vm8 = vcmp.ge.f32.partialorder %v2542_v2, 0.0 }
 0x38c   : > { %15423 = vmatpush3.bf16.msra.mxu0 %v15420_v40  ;;  %v2171_v24 = vadd.f32 %v18791_v16, %v2150_v9  ;;  %15391 = vmatprep.subr.bf16.mxu1 %v20858_v0  ;;  %v18961_v4 = vsel %vm2185_vm1, %v2169_v10, %v2201_v25  ;;  %v10732_v16 = vld [vmem:[%s20782_s5 + $0x200] sm:$0xff]  ;;  %vm2186_vm4 = vcmp.ge.f32.partialorder %v2170_v13, 0.0  ;;  %v19000_v56 = vpop.permute.xlu0 %3238  ;;  %v2574_v9 = vmul.f32 0.33, %v2542_v2 }
 0x38d   : > { %15425 = vmatprep.subr.bf16.mxu0 %v15424_v34 }
 0x38e   : > { %v2203_v52 = vmul.f32 0.33, %v2171_v24  ;;  %12623 = vmatmul.mubr.f32.gmra.mrb[30].mxu0 %v18755_v1  ;;  %3657 = vperm.xlu1 %17393, %v18192_v15   ;;  %vm2187_vm3 = vcmp.ge.f32.partialorder %v2171_v24, 0.0  ;;  %v18977_v1 = vsel %vm2184_vm2, %v2168_v6, %v2200_v22  ;;  %v2202_v15 = vmul.f32 0.33, %v2170_v13 }
 0x38f   : > { %12625 = vmatprep.mubr.f32.mxu0 %v18818_v41  ;;  %15393 = vmatpush3.bf16.msra.mxu1 %v15392_v63  ;;  %v15395_v53 = vpack.c.bf16 %v18961_v4, %v18977_v1  ;;  %v15456_v41 = vpack.c.bf16 %v10733_v11, %v10732_v16  ;;  %v19039_v16 = vsel %vm2558_vm8, %v2542_v2, %v2574_v9 }
 0x390   : > { %15427 = vmatpush3.bf16.msra.mxu0 %v15424_v34  ;;  %v2477_v8 = vpop.permute.xlu1 %2476  ;;  %15394 = vmatprep.subr.bf16.mxu1 %v20858_v0  ;;  %v18983_v40 = vsel %vm2187_vm3, %v2171_v24, %v2203_v52  ;;  %v10737_v34 = vld [vmem:[%s20782_s5 + $0x228] sm:$0xff] }
 0x391   : > { %v2540_v42 = vadd.f32 %v18959_v5, %v2477_v8  ;;  %15429 = vmatprep.subr.bf16.mxu0 %v15428_v50 }
 0x392   : > { %12626 = vmatmul.mubr.f32.gmra.mrb[32].mxu0 %v18816_v47  ;;  %3665 = vperm.xlu1 %17393, %v18198_v17   ;;  %v18997_v47 = vsel %vm2186_vm4, %v2170_v13, %v2202_v15 }
 0x393   : > { %vm2556_vm5 = vcmp.ge.f32.partialorder %v2540_v42, 0.0  ;;  %v2572_v37 = vmul.f32 0.33, %v2540_v42  ;;  %15396 = vmatpush3.bf16.msra.mxu1 %v15395_v53  ;;  %12695 = vmatprep.mubr.f32.mxu0 %v18826_v27  ;;  %v15398_v6 = vpack.c.bf16 %v18983_v40, %v18997_v47  ;;  %v15460_v27 = vpack.c.bf16 %v10735_v62, %v10734_v44 }
 0x394   : > { %15431 = vmatpush3.bf16.msra.mxu0 %v15428_v50  ;;  %v2481_v17 = vpop.permute.xlu1 %2480  ;;  %15397 = vmatprep.subr.bf16.mxu1 %v20858_v0  ;;  %v19035_v50 = vpop.permute.xlu0 %2859 }
 0x395   : > { %v2541_v10 = vadd.f32 %v18959_v5, %v2481_v17  ;;  %15457 = vmatprep.subr.bf16.mxu0 %v15456_v41  ;;  %v19006_v3 = vsel %vm2556_vm5, %v2540_v42, %v2572_v37  ;;  %v20870_v42 = vmov 1   ;;  %v2548_v37 = vadd.f32 %v18959_v5, %v18865_v38  ;;  %v10742_v38 = vld [vmem:[%s20782_s5 + $0x250] sm:$0xff] }
 0x396   : > { %3673 = vperm.xlu1 %17393, %v18204_v19   ;;  %v2544_v19 = vadd.f32 %v18959_v5, %v18606_v39  ;;  %v15433_v13 = vpack.c.bf16 %v19006_v3, %v19016_v57  ;;  %v10738_v39 = vld [vmem:[%s20782_s5 + $0x230] sm:$0xff] }
 0x397   : > { %vm2557_vm7 = vcmp.ge.f32.partialorder %v2541_v10, 0.0  ;;  %v2573_v25 = vmul.f32 0.33, %v2541_v10  ;;  %12696 = vmatmul.mubr.f32.vlgmr.msra.gmra.mrb[18].mxu0 %v18838_v30  ;;  %15399 = vmatpush3.bf16.msra.mxu1 %v15398_v6  ;;  %v15464_v30 = vpack.c.bf16 %v10737_v34, %v10736_v28  ;;  %v2580_v34 = vmul.f32 0.33, %v2548_v37 }
 0x398   : > { %12698 = vmatprep.mubr.f32.mxu0 %v18861_v58  ;;  %15459 = vmatpush3.bf16.msra.mxu0 %v15456_v41  ;;  %v2489_v22 = vpop.permute.xlu1 %2488  ;;  %v10739_v58 = vld [vmem:[%s20782_s5 + $0x238] sm:$0xff]  ;;  %v2576_v11 = vmul.f32 0.33, %v2544_v19  ;;  %vm2560_vm10 = vcmp.ge.f32.partialorder %v2544_v19, 0.0  ;;  %v19066_v2 = vpop.permute.xlu0 %2871  ;;  %vm2564_vm14 = vcmp.ge.f32.partialorder %v2548_v37, 0.0 }
 0x399   : > { %v2543_v24 = vadd.f32 %v18959_v5, %v2489_v22  ;;  %15432 = vmatprep.subr.bf16.mxu1 %v20858_v0  ;;  %15461 = vmatprep.subr.bf16.mxu0 %v15460_v27  ;;  %v19026_v63 = vsel %vm2557_vm7, %v2541_v10, %v2573_v25  ;;  %v2550_v25 = vadd.f32 %v18959_v5, %v18902_v49  ;;  %v10744_v49 = vld [vmem:[%s20782_s5 + $0x260] sm:$0xff] }
 0x39a   : > { %12661 = vmatmul.mubr.f32.vlgmr.msra.gmra.mrb[6].mxu1 %v2221_v26  ;;  %3681 = vperm.xlu1 %17393, %v18210_v21   ;;  %v2546_v21 = vadd.f32 %v18959_v5, %v18835_v43  ;;  %v15436_v15 = vpack.c.bf16 %v19039_v16, %v19026_v63  ;;  %v10740_v43 = vld [vmem:[%s20782_s5 + $0x240] sm:$0xff]  ;;  %v19061_v44 = vsel %vm2560_vm10, %v2544_v19, %v2576_v11 }
 0x39b   : > { %vm2559_vm9 = vcmp.ge.f32.partialorder %v2543_v24, 0.0  ;;  %v2575_v52 = vmul.f32 0.33, %v2543_v24  ;;  %12699 = vmatmul.mubr.f32.gmra.mrb[20].mxu0 %v18847_v12  ;;  %15434 = vmatpush3.bf16.msra.mxu1 %v15433_v13  ;;  %v15468_v12 = vpack.c.bf16 %v10739_v58, %v10738_v39  ;;  %v2582_v39 = vmul.f32 0.33, %v2550_v25 }
 0x39c   : > { %12701 = vmatprep.mubr.f32.mxu0 %v18884_v23  ;;  %15463 = vmatpush3.bf16.msra.mxu0 %v15460_v27  ;;  %v2497_v54 = vpop.permute.xlu1 %2496  ;;  %v10741_v23 = vld [vmem:[%s20782_s5 + $0x248] sm:$0xff]  ;;  %v2578_v62 = vmul.f32 0.33, %v2546_v21  ;;  %vm2562_vm12 = vcmp.ge.f32.partialorder %v2546_v21, 0.0  ;;  %v19100_v13 = vpop.permute.xlu0 %2879  ;;  %v2552_v58 = vadd.f32 %v18959_v5, %v18930_v20  ;;  %vm2566_vm1 = vcmp.ge.f32.partialorder %v2550_v25, 0.0  ;;  %v10746_v20 = vld [vmem:[%s20782_s5 + $0x270] sm:$0xff] }
 0x39d   : > { %v2545_v8 = vadd.f32 %v18959_v5, %v2497_v54  ;;  %15435 = vmatprep.subr.bf16.mxu1 %v20858_v0  ;;  %15465 = vmatprep.subr.bf16.mxu0 %v15464_v30  ;;  %v19049_v53 = vsel %vm2559_vm9, %v2543_v24, %v2575_v52 }
 0x39e   : > { %12751 = vmatprep.mubr.msk.f32.mxu1 %vm17721_vm0, %v20860_v46  ;;  %17396 = vset.pattern.permute.xlu1 %v20870_v42  ;;  %v15439_v17 = vpack.c.bf16 %v19061_v44, %v19049_v53  ;;  %v19082_v28 = vsel %vm2562_vm12, %v2546_v21, %v2578_v62  ;;  %vm2568_vm3 = vcmp.ge.f32.partialorder %v2552_v58, 0.0 }
 0x39f   : > { %vm2561_vm11 = vcmp.ge.f32.partialorder %v2545_v8, 0.0  ;;  %v2577_v41 = vmul.f32 0.33, %v2545_v8  ;;  %12702 = vmatmul.mubr.f32.gmra.mrb[22].mxu0 %v18872_v60  ;;  %15437 = vmatpush3.bf16.msra.mxu1 %v15436_v15  ;;  %v15472_v60 = vpack.c.bf16 %v10741_v23, %v10740_v43  ;;  %v2584_v43 = vmul.f32 0.33, %v2552_v58 }
 0x3a0   : > { %12704 = vmatprep.mubr.f32.mxu0 %v18905_v18  ;;  %15467 = vmatpush3.bf16.msra.mxu0 %v15464_v30  ;;  %v2505_v32 = vpop.permute.xlu1 %2504  ;;  %v10743_v18 = vld [vmem:[%s20782_s5 + $0x258] sm:$0xff]  ;;  %v19103_v30 = vsel %vm2564_vm14, %v2548_v37, %v2580_v34  ;;  %v19126_v23 = vpop.permute.xlu0 %2887  ;;  %v10750_v34 = vld [vmem:[%s20782_s5 + $0x290] sm:$0xff] }
 0x3a1   : > { %v2547_v6 = vadd.f32 %v18959_v5, %v2505_v32  ;;  %15438 = vmatprep.subr.bf16.mxu1 %v20858_v0  ;;  %15469 = vmatprep.subr.bf16.mxu0 %v15468_v12  ;;  %v19073_v10 = vsel %vm2561_vm11, %v2545_v8, %v2577_v41  ;;  %v2920_v8 = vsub.s32 5, %v18249_v29  ;;  %v10748_v32 = vld [vmem:[%s20782_s5 + $0x280] sm:$0xff] }
 0x3a2   : > { %v15442_v9 = vpack.c.bf16 %v19082_v28, %v19073_v10 }
 0x3a3   : > { %vm2563_vm13 = vcmp.ge.f32.partialorder %v2547_v6, 0.0  ;;  %v2579_v27 = vmul.f32 0.33, %v2547_v6  ;;  %12705 = vmatmul.mubr.f32.gmra.mrb[24].mxu0 %v18892_v36  ;;  %15440 = vmatpush3.bf16.msra.mxu1 %v15439_v17  ;;  %v15476_v36 = vpack.c.bf16 %v10743_v18, %v10742_v38  ;;  %v19144_v17 = vrot.slane %v18254_v31, %v2920_v8 }
 0x3a4   : > { %12707 = vmatprep.mubr.f32.mxu0 %v18924_v35  ;;  %15471 = vmatpush3.bf16.msra.mxu0 %v15468_v12  ;;  %v2513_v26 = vpop.permute.xlu1 %2512  ;;  %v10745_v35 = vld [vmem:[%s20782_s5 + $0x268] sm:$0xff]  ;;  %v19123_v12 = vsel %vm2566_vm1, %v2550_v25, %v2582_v39 }
 0x3a5   : > { %v2549_v19 = vadd.f32 %v18959_v5, %v2513_v26  ;;  %15441 = vmatprep.subr.bf16.mxu1 %v20858_v0  ;;  %15473 = vmatprep.subr.bf16.mxu0 %v15472_v60  ;;  %v19092_v22 = vsel %vm2563_vm13, %v2547_v6, %v2579_v27  ;;  %v19146_v6 = vsel %vm2568_vm3, %v2552_v58, %v2584_v43 }
 0x3a6   : > { %v15445_v11 = vpack.c.bf16 %v19103_v30, %v19092_v22  ;;  %v2923_v26 = vadd.f32 %v19144_v17, %v19035_v50  ;;  %v10753_v50 = vld [vmem:[%s20782_s5 + $0x2a8] sm:$0xff]  ;;  %v2926_v43 = vadd.f32 %v19144_v17, %v19066_v2 }
 0x3a7   : > { %vm2565_vm15 = vcmp.ge.f32.partialorder %v2549_v19, 0.0  ;;  %v2581_v24 = vmul.f32 0.33, %v2549_v19  ;;  %12708 = vmatmul.mubr.f32.gmra.mrb[26].mxu0 %v18913_v59  ;;  %15443 = vmatpush3.bf16.msra.mxu1 %v15442_v9  ;;  %v15480_v59 = vpack.c.bf16 %v10745_v35, %v10744_v49 }
 0x3a8   : > { %12710 = vmatprep.mubr.f32.mxu0 %v18948_v48  ;;  %15475 = vmatpush3.bf16.msra.mxu0 %v15472_v60  ;;  %v2521_v52 = vpop.permute.xlu1 %2520  ;;  %v10747_v48 = vld [vmem:[%s20782_s5 + $0x278] sm:$0xff]  ;;  %v2554_v60 = vadd.f32 %v18959_v5, %v18971_v55  ;;  %v2955_v35 = vmul.f32 0.33, %v2923_v26  ;;  %vm2939_vm7 = vcmp.ge.f32.partialorder %v2923_v26, 0.0  ;;  %vm2942_vm10 = vcmp.ge.f32.partialorder %v2926_v43, 0.0 }
 0x3a9   : > { %v2551_v21 = vadd.f32 %v18959_v5, %v2521_v52  ;;  %15444 = vmatprep.subr.bf16.mxu1 %v20858_v0  ;;  %15477 = vmatprep.subr.bf16.mxu0 %v15476_v36  ;;  %v19113_v54 = vsel %vm2565_vm15, %v2549_v19, %v2581_v24  ;;  %v10751_v55 = vld [vmem:[%s20782_s5 + $0x298] sm:$0xff] }
 0x3aa   : > { %v15448_v41 = vpack.c.bf16 %v19123_v12, %v19113_v54  ;;  %v2586_v25 = vmul.f32 0.33, %v2554_v60  ;;  %vm2570_vm4 = vcmp.ge.f32.partialorder %v2554_v60, 0.0  ;;  %v15516_v19 = vpack.c.bf16 %v10751_v55, %v10750_v34 }
 0x3ab   : > { %vm2567_vm2 = vcmp.ge.f32.partialorder %v2551_v21, 0.0  ;;  %v2583_v15 = vmul.f32 0.33, %v2551_v21  ;;  %12711 = vmatmul.mubr.f32.gmra.mrb[28].mxu0 %v18936_v33  ;;  %15446 = vmatpush3.bf16.msra.mxu1 %v15445_v11  ;;  %v15484_v33 = vpack.c.bf16 %v10747_v48, %v10746_v20  ;;  %v2604_v20 = vld [vmem:[#allocation5 + $0x20] sm:$0xff]  ;;  %v19196_v48 = vsel %vm2939_vm7, %v2923_v26, %v2955_v35 }
 0x3ac   : > { %12713 = vmatprep.mubr.f32.mxu0 %v18977_v1  ;;  %15479 = vmatpush3.bf16.msra.mxu0 %v15476_v36  ;;  %v10749_v1 = vld [vmem:[%s20782_s5 + $0x288] sm:$0xff]  ;;  %v10752_v36 = vld [vmem:[%s20782_s5 + $0x2a0] sm:$0xff] }
 0x3ad   : > { %15447 = vmatprep.subr.bf16.mxu1 %v20858_v0  ;;  %15481 = vmatprep.subr.bf16.mxu0 %v15480_v59  ;;  %v2856_v62 = vpop.permute.xlu1 %2855  ;;  %v19132_v37 = vsel %vm2567_vm2, %v2551_v21, %v2583_v15  ;;  %v15520_v11 = vpack.c.bf16 %v10753_v50, %v10752_v36  ;;  %v10755_v21 = vld [vmem:[%s20782_s5 + $0x2b8] sm:$0xff] }
 0x3ae   : > { %v15451_v38 = vpack.c.bf16 %v19146_v6, %v19132_v37  ;;  %v2922_v18 = vadd.f32 %v19144_v17, %v2856_v62 }
 0x3af   : > { %12714 = vmatmul.mubr.f32.gmra.mrb[30].mxu0 %v18961_v4  ;;  %15449 = vmatpush3.bf16.msra.mxu1 %v15448_v41  ;;  %v15512_v4 = vpack.c.bf16 %v10749_v1, %v10748_v32 }
 0x3b0   : > { %12716 = vmatprep.mubr.f32.mxu0 %v18997_v47  ;;  %15483 = vmatpush3.bf16.msra.mxu0 %v15480_v59  ;;  %v19161_v47 = vpop.permute.xlu0 %2895  ;;  %vm2938_vm6 = vcmp.ge.f32.partialorder %v2922_v18, 0.0 }
 0x3b1   : > { %15450 = vmatprep.subr.bf16.mxu1 %v20858_v0  ;;  %15485 = vmatprep.subr.bf16.mxu0 %v15484_v33 }
 0x3b2   : > { %v2529_v27 = vpop.permute.xlu1 %2528 }
 0x3b3   : > { %12717 = vmatmul.mubr.f32.gmra.mrb[32].mxu0 %v18983_v40  ;;  %15452 = vmatpush3.bf16.msra.mxu1 %v15451_v38  ;;  %v2553_v9 = vadd.f32 %v18959_v5, %v2529_v27  ;;  %v2954_v40 = vmul.f32 0.33, %v2922_v18 }
 0x3b4   : > { %15487 = vmatpush3.bf16.msra.mxu0 %v15484_v33  ;;  %12786 = vmatprep.mubr.f32.mxu0 %v19016_v57  ;;  %v19176_v57 = vsel %vm2570_vm4, %v2554_v60, %v2586_v25  ;;  %v19181_v39 = vpop.permute.xlu0 %2903 }
 0x3b5   : > { %15513 = vmatprep.subr.bf16.mxu0 %v15512_v4  ;;  %15453 = vmatprep.subr.bf16.mxu1 %v20858_v0  ;;  %vm2569_vm5 = vcmp.ge.f32.partialorder %v2553_v9, 0.0  ;;  %v2585_v49 = vmul.f32 0.33, %v2553_v9 }
 0x3b7   : > { %12787 = vmatmul.mubr.f32.vlgmr.msra.gmra.mrb[18].mxu0 %v19006_v3  ;;  %v2864_v5 = vpop.permute.xlu1 %2863  ;;  %v19178_v24 = vsel %vm2569_vm5, %v2553_v9, %v2585_v49  ;;  %v10754_v3 = vld [vmem:[%s20782_s5 + $0x2b0] sm:$0xff] }
 0x3b8   : > { %12789 = vmatprep.mubr.f32.mxu0 %v19026_v63  ;;  %15515 = vmatpush3.bf16.msra.mxu0 %v15512_v4  ;;  %v15454_v58 = vpack.c.bf16 %v19176_v57, %v19178_v24  ;;  %v2924_v52 = vadd.f32 %v19144_v17, %v2864_v5  ;;  %v19193_v63 = vsel %vm2938_vm6, %v2922_v18, %v2954_v40  ;;  %v19211_v2 = vpop.permute.xlu0 %2911  ;;  %v2958_v4 = vmul.f32 0.33, %v2926_v43 }
 0x3b9   : > { %15517 = vmatprep.subr.bf16.mxu0 %v15516_v19  ;;  %v15524_v15 = vpack.c.bf16 %v10755_v21, %v10754_v3  ;;  %v15489_v41 = vpack.c.bf16 %v19196_v48, %v19193_v63  ;;  %v2928_v18 = vadd.f32 %v19144_v17, %v19100_v13  ;;  %v2930_v40 = vadd.f32 %v19144_v17, %v19126_v23 }
 0x3ba   : > { %15455 = vmatpush3.bf16.msra.mxu1 %v15454_v58  ;;  %v2956_v62 = vmul.f32 0.33, %v2924_v52  ;;  %vm2940_vm8 = vcmp.ge.f32.partialorder %v2924_v52, 0.0  ;;  %v2932_v21 = vadd.f32 %v19144_v17, %v19161_v47 }
 0x3bb   : > { %12790 = vmatmul.mubr.f32.gmra.mrb[20].mxu0 %v19039_v16  ;;  %v2868_v59 = vpop.permute.xlu1 %2867  ;;  %15488 = vmatprep.subr.bf16.mxu1 %v20858_v0  ;;  %v10756_v16 = vld [vmem:[%s20782_s5 + $0x2c0] sm:$0xff]  ;;  %v2960_v36 = vmul.f32 0.33, %v2928_v18  ;;  %vm2944_vm12 = vcmp.ge.f32.partialorder %v2928_v18, 0.0  ;;  %v2962_v3 = vmul.f32 0.33, %v2930_v40 }
 0x3bc   : > { %12792 = vmatprep.mubr.f32.mxu0 %v19049_v53  ;;  %15519 = vmatpush3.bf16.msra.mxu0 %v15516_v19  ;;  %v2925_v33 = vadd.f32 %v19144_v17, %v2868_v59  ;;  %v10757_v53 = vld [vmem:[%s20782_s5 + $0x2c8] sm:$0xff]  ;;  %v19218_v27 = vsel %vm2940_vm8, %v2924_v52, %v2956_v62  ;;  %v19236_v19 = vsel %vm2942_vm10, %v2926_v43, %v2958_v4  ;;  %v19240_v49 = vpop.permute.xlu0 %3250  ;;  %vm2946_vm14 = vcmp.ge.f32.partialorder %v2930_v40, 0.0 }
 0x3bd   : > { %15521 = vmatprep.subr.bf16.mxu0 %v15520_v11  ;;  %12752 = vmatmul.mubr.f32.vlgmr.msra.gmra.mrb[8].mxu1 %v2604_v20  ;;  %v15528_v38 = vpack.c.bf16 %v10757_v53, %v10756_v16  ;;  %v2964_v16 = vmul.f32 0.33, %v2932_v21  ;;  %v2934_v53 = vadd.f32 %v19144_v17, %v19181_v39  ;;  %vm2948_vm1 = vcmp.ge.f32.partialorder %v2932_v21, 0.0  ;;  %v10765_v39 = vld [vmem:[%s20782_s5 + $0x308] sm:$0xff] }
 0x3be   : > { %vm2941_vm9 = vcmp.ge.f32.partialorder %v2925_v33, 0.0  ;;  %v2957_v32 = vmul.f32 0.33, %v2925_v33  ;;  %15490 = vmatpush3.bf16.msra.mxu1 %v15489_v41  ;;  %12842 = vmatprep.mubr.msk.f32.mxu1 %vm17721_vm0, %v20860_v46  ;;  %v2936_v4 = vadd.f32 %v19144_v17, %v19211_v2  ;;  %v10766_v2 = vld [vmem:[%s20782_s5 + $0x310] sm:$0xff] }
 0x3bf   : > { %12793 = vmatmul.mubr.f32.gmra.mrb[22].mxu0 %v19061_v44  ;;  %v2876_v1 = vpop.permute.xlu1 %2875  ;;  %15491 = vmatprep.subr.bf16.mxu1 %v20858_v0  ;;  %v10758_v44 = vld [vmem:[%s20782_s5 + $0x2d0] sm:$0xff]  ;;  %vm2950_vm3 = vcmp.ge.f32.partialorder %v2934_v53, 0.0 }
 0x3c0   : > { %12795 = vmatprep.mubr.f32.mxu0 %v19073_v10  ;;  %15523 = vmatpush3.bf16.msra.mxu0 %v15520_v11  ;;  %v2927_v60 = vadd.f32 %v19144_v17, %v2876_v1  ;;  %v19220_v34 = vsel %vm2941_vm9, %v2925_v33, %v2957_v32  ;;  %v10759_v10 = vld [vmem:[%s20782_s5 + $0x2d8] sm:$0xff]  ;;  %v19256_v11 = vsel %vm2944_vm12, %v2928_v18, %v2960_v36  ;;  %v19271_v47 = vpop.permute.xlu0 %3258  ;;  %v3303_v1 = vsub.s32 6, %v18249_v29 }
 0x3c1   : > { %15525 = vmatprep.subr.bf16.mxu0 %v15524_v15  ;;  %v15492_v55 = vpack.c.bf16 %v19220_v34, %v19218_v27  ;;  %v15532_v9 = vpack.c.bf16 %v10759_v10, %v10758_v44  ;;  %v19276_v33 = vsel %vm2946_vm14, %v2930_v40, %v2962_v3  ;;  %v19297_v44 = vsel %vm2948_vm1, %v2932_v21, %v2964_v16 }
 0x3c2   : > { %vm2943_vm11 = vcmp.ge.f32.partialorder %v2927_v60, 0.0  ;;  %v2959_v13 = vmul.f32 0.33, %v2927_v60  ;;  %v2966_v10 = vmul.f32 0.33, %v2934_v53  ;;  %vm2952_vm5 = vcmp.ge.f32.partialorder %v2936_v4, 0.0 }
 0x3c3   : > { %12796 = vmatmul.mubr.f32.gmra.mrb[24].mxu0 %v19082_v28  ;;  %v2884_v25 = vpop.permute.xlu1 %2883  ;;  %15493 = vmatpush3.bf16.msra.mxu1 %v15492_v55  ;;  %v10760_v28 = vld [vmem:[%s20782_s5 + $0x2e0] sm:$0xff] }
 0x3c4   : > { %12798 = vmatprep.mubr.f32.mxu0 %v19092_v22  ;;  %15527 = vmatpush3.bf16.msra.mxu0 %v15524_v15  ;;  %v2929_v26 = vadd.f32 %v19144_v17, %v2884_v25  ;;  %v19242_v50 = vsel %vm2943_vm11, %v2927_v60, %v2959_v13  ;;  %v10761_v22 = vld [vmem:[%s20782_s5 + $0x2e8] sm:$0xff]  ;;  %v19299_v55 = vpop.permute.xlu0 %3266 }
 0x3c5   : > { %15529 = vmatprep.subr.bf16.mxu0 %v15528_v38  ;;  %v15495_v5 = vpack.c.bf16 %v19242_v50, %v19236_v19  ;;  %15494 = vmatprep.subr.bf16.mxu1 %v20858_v0  ;;  %v15536_v52 = vpack.c.bf16 %v10761_v22, %v10760_v28  ;;  %v2968_v28 = vmul.f32 0.33, %v2936_v4 }
 0x3c6   : > { %vm2945_vm13 = vcmp.ge.f32.partialorder %v2929_v26, 0.0  ;;  %v2961_v23 = vmul.f32 0.33, %v2929_v26 }
 0x3c7   : > { %12799 = vmatmul.mubr.f32.gmra.mrb[26].mxu0 %v19103_v30  ;;  %v2892_v35 = vpop.permute.xlu1 %2891  ;;  %15496 = vmatpush3.bf16.msra.mxu1 %v15495_v5  ;;  %v10762_v30 = vld [vmem:[%s20782_s5 + $0x2f0] sm:$0xff]  ;;  %v19322_v5 = vsel %vm2950_vm3, %v2934_v53, %v2966_v10  ;;  %v19338_v3 = vsel %vm2952_vm5, %v2936_v4, %v2968_v28  ;;  %v10773_v4 = vld [vmem:[%s20782_s5 + $0x348] sm:$0xff] }
 0x3c8   : > { %12801 = vmatprep.mubr.f32.mxu0 %v19113_v54  ;;  %15531 = vmatpush3.bf16.msra.mxu0 %v15528_v38  ;;  %v2931_v58 = vadd.f32 %v19144_v17, %v2892_v35  ;;  %v19260_v59 = vsel %vm2945_vm13, %v2929_v26, %v2961_v23  ;;  %v10763_v54 = vld [vmem:[%s20782_s5 + $0x2f8] sm:$0xff] }
 0x3c9   : > { %15533 = vmatprep.subr.bf16.mxu0 %v15532_v9  ;;  %v15498_v20 = vpack.c.bf16 %v19260_v59, %v19256_v11  ;;  %15497 = vmatprep.subr.bf16.mxu1 %v20858_v0  ;;  %v15540_v62 = vpack.c.bf16 %v10763_v54, %v10762_v30  ;;  %v10767_v26 = vld [vmem:[%s20782_s5 + $0x318] sm:$0xff] }
 0x3ca   : > { %vm2947_vm15 = vcmp.ge.f32.partialorder %v2931_v58, 0.0  ;;  %v2963_v15 = vmul.f32 0.33, %v2931_v58  ;;  %v15572_v35 = vpack.c.bf16 %v10767_v26, %v10766_v2 }
 0x3cb   : > { %12802 = vmatmul.mubr.f32.gmra.mrb[28].mxu0 %v19123_v12  ;;  %v2900_v43 = vpop.permute.xlu1 %2899  ;;  %15499 = vmatpush3.bf16.msra.mxu1 %v15498_v20 }
 0x3cc   : > { %12804 = vmatprep.mubr.f32.mxu0 %v19132_v37  ;;  %15535 = vmatpush3.bf16.msra.mxu0 %v15532_v9  ;;  %v2933_v41 = vadd.f32 %v19144_v17, %v2900_v43  ;;  %v19280_v32 = vsel %vm2947_vm15, %v2931_v58, %v2963_v15  ;;  %v10764_v37 = vld [vmem:[%s20782_s5 + $0x300] sm:$0xff] }
 0x3cd   : > { %15537 = vmatprep.subr.bf16.mxu0 %v15536_v52  ;;  %v15501_v12 = vpack.c.bf16 %v19280_v32, %v19276_v33  ;;  %15500 = vmatprep.subr.bf16.mxu1 %v20858_v0  ;;  %v15568_v25 = vpack.c.bf16 %v10765_v39, %v10764_v37  ;;  %v2987_v39 = vld [vmem:[#allocation5 + $0x28] sm:$0xff] }
 0x3ce   : > { %vm2949_vm2 = vcmp.ge.f32.partialorder %v2933_v41, 0.0  ;;  %v2965_v60 = vmul.f32 0.33, %v2933_v41 }
 0x3cf   : > { %12805 = vmatmul.mubr.f32.gmra.mrb[30].mxu0 %v19146_v6  ;;  %v2908_v38 = vpop.permute.xlu1 %2907  ;;  %15502 = vmatpush3.bf16.msra.mxu1 %v15501_v12  ;;  %v19306_v6 = vrot.slane %v18254_v31, %v3303_v1 }
 0x3d0   : > { %12807 = vmatprep.mubr.f32.mxu0 %v19178_v24  ;;  %15539 = vmatpush3.bf16.msra.mxu0 %v15536_v52  ;;  %v2935_v18 = vadd.f32 %v19144_v17, %v2908_v38  ;;  %v19301_v13 = vsel %vm2949_vm2, %v2933_v41, %v2965_v60 }
 0x3d1   : > { %15541 = vmatprep.subr.bf16.mxu0 %v15540_v62  ;;  %v15504_v24 = vpack.c.bf16 %v19301_v13, %v19297_v44  ;;  %15503 = vmatprep.subr.bf16.mxu1 %v20858_v0  ;;  %v3305_v40 = vadd.f32 %v19306_v6, %v19000_v56  ;;  %v10768_v56 = vld [vmem:[%s20782_s5 + $0x320] sm:$0xff]  ;;  %v3308_v21 = vadd.f32 %v19306_v6, %v19240_v49  ;;  %v10771_v49 = vld [vmem:[%s20782_s5 + $0x338] sm:$0xff] }
 0x3d2   : > { %vm2951_vm4 = vcmp.ge.f32.partialorder %v2935_v18, 0.0  ;;  %v2967_v9 = vmul.f32 0.33, %v2935_v18  ;;  %v3310_v53 = vadd.f32 %v19306_v6, %v19271_v47  ;;  %v10772_v47 = vld [vmem:[%s20782_s5 + $0x340] sm:$0xff] }
 0x3d3   : > { %12808 = vmatmul.mubr.f32.gmra.mrb[32].mxu0 %v19176_v57  ;;  %v2916_v36 = vpop.permute.xlu1 %2915  ;;  %15505 = vmatpush3.bf16.msra.mxu1 %v15504_v24  ;;  %v3337_v52 = vmul.f32 0.33, %v3305_v40  ;;  %vm3321_vm7 = vcmp.ge.f32.partialorder %v3305_v40, 0.0  ;;  %vm3324_vm9 = vcmp.ge.f32.partialorder %v3308_v21, 0.0  ;;  %v3312_v24 = vadd.f32 %v19306_v6, %v19299_v55  ;;  %v10774_v55 = vld [vmem:[%s20782_s5 + $0x350] sm:$0xff] }
 0x3d4   : > { %15543 = vmatpush3.bf16.msra.mxu0 %v15540_v62  ;;  %12877 = vmatprep.mubr.f32.mxu0 %v19193_v63  ;;  %v2937_v22 = vadd.f32 %v19144_v17, %v2916_v36  ;;  %v19324_v23 = vsel %vm2951_vm4, %v2935_v18, %v2967_v9  ;;  %v10769_v17 = vld [vmem:[%s20782_s5 + $0x328] sm:$0xff]  ;;  %v19335_v63 = vpop.permute.xlu0 %3274  ;;  %v3340_v62 = vmul.f32 0.33, %v3308_v21  ;;  %vm3326_vm11 = vcmp.ge.f32.partialorder %v3310_v53, 0.0 }
 0x3d5   : > { %15569 = vmatprep.subr.bf16.mxu0 %v15568_v25  ;;  %v15507_v57 = vpack.c.bf16 %v19324_v23, %v19322_v5  ;;  %15506 = vmatprep.subr.bf16.mxu1 %v20858_v0  ;;  %v19356_v41 = vsel %vm3321_vm7, %v3305_v40, %v3337_v52  ;;  %v15584_v9 = vpack.c.bf16 %v10773_v4, %v10772_v47  ;;  %v10775_v40 = vld [vmem:[%s20782_s5 + $0x358] sm:$0xff]  ;;  %vm3328_vm13 = vcmp.ge.f32.partialorder %v3312_v24, 0.0  ;;  %v10777_v52 = vld [vmem:[%s20782_s5 + $0x368] sm:$0xff] }
 0x3d6   : > { %vm2953_vm6 = vcmp.ge.f32.partialorder %v2937_v22, 0.0  ;;  %v2969_v58 = vmul.f32 0.33, %v2937_v22  ;;  %v19375_v18 = vsel %vm3324_vm9, %v3308_v21, %v3340_v62  ;;  %v3314_v28 = vadd.f32 %v19306_v6, %v19335_v63  ;;  %v10776_v63 = vld [vmem:[%s20782_s5 + $0x360] sm:$0xff] }
 0x3d7   : > { %12878 = vmatmul.mubr.f32.vlgmr.msra.gmra.mrb[18].mxu0 %v19196_v48  ;;  %15508 = vmatpush3.bf16.msra.mxu1 %v15507_v57  ;;  %v15576_v48 = vpack.c.bf16 %v10769_v17, %v10768_v56  ;;  %v15588_v17 = vpack.c.bf16 %v10775_v40, %v10774_v55 }
 0x3d8   : > { %v19342_v30 = vsel %vm2953_vm6, %v2937_v22, %v2969_v58  ;;  %12880 = vmatprep.mubr.f32.mxu0 %v19218_v27  ;;  %15571 = vmatpush3.bf16.msra.mxu0 %v15568_v25  ;;  %v3243_v54 = vpop.permute.xlu1 %3242  ;;  %v10770_v27 = vld [vmem:[%s20782_s5 + $0x330] sm:$0xff]  ;;  %v3342_v25 = vmul.f32 0.33, %v3310_v53  ;;  %v3346_v21 = vmul.f32 0.33, %v3314_v28  ;;  %vm3330_vm15 = vcmp.ge.f32.partialorder %v3314_v28, 0.0 }
 0x3d9   : > { %v15510_v20 = vpack.c.bf16 %v19342_v30, %v19338_v3  ;;  %v3306_v15 = vadd.f32 %v19306_v6, %v3243_v54  ;;  %15573 = vmatprep.subr.bf16.mxu0 %v15572_v35  ;;  %15509 = vmatprep.subr.bf16.mxu1 %v20858_v0 }
 0x3db   : > { %vm3322_vm8 = vcmp.ge.f32.partialorder %v3306_v15, 0.0  ;;  %v3338_v43 = vmul.f32 0.33, %v3306_v15  ;;  %12881 = vmatmul.mubr.f32.gmra.mrb[20].mxu0 %v19220_v34  ;;  %v3283_v34 = vpop.permute.xlu0 %3282  ;;  %15511 = vmatpush3.bf16.msra.mxu1 %v15510_v20 }
 0x3dc   : > { %12883 = vmatprep.mubr.f32.mxu0 %v19236_v19  ;;  %15575 = vmatpush3.bf16.msra.mxu0 %v15572_v35  ;;  %v3247_v16 = vpop.permute.xlu1 %3246  ;;  %v15580_v19 = vpack.c.bf16 %v10771_v49, %v10770_v27  ;;  %v19398_v35 = vsel %vm3326_vm11, %v3310_v53, %v3342_v25  ;;  %v3316_v54 = vadd.f32 %v19306_v6, %v3283_v34  ;;  %v10778_v53 = vld [vmem:[%s20782_s5 + $0x370] sm:$0xff]  ;;  %v10779_v34 = vld [vmem:[%s20782_s5 + $0x378] sm:$0xff] }
 0x3dd   : > { %v19361_v12 = vsel %vm3322_vm8, %v3306_v15, %v3338_v43  ;;  %v3307_v37 = vadd.f32 %v19306_v6, %v3247_v16  ;;  %15577 = vmatprep.subr.bf16.mxu0 %v15576_v48  ;;  %15544 = vmatprep.subr.bf16.mxu1 %v20858_v0  ;;  %v15596_v4 = vpack.c.bf16 %v10779_v34, %v10778_v53 }
 0x3de   : > { %v15545_v60 = vpack.c.bf16 %v19361_v12, %v19356_v41  ;;  %12843 = vmatmul.mubr.f32.vlgmr.msra.gmra.mrb[10].mxu1 %v2987_v39  ;;  %v3348_v39 = vmul.f32 0.33, %v3316_v54  ;;  %vm3332_vm2 = vcmp.ge.f32.partialorder %v3316_v54, 0.0 }
 0x3df   : > { %vm3323_vm10 = vcmp.ge.f32.partialorder %v3307_v37, 0.0  ;;  %v3339_v38 = vmul.f32 0.33, %v3307_v37  ;;  %12884 = vmatmul.mubr.f32.gmra.mrb[22].mxu0 %v19242_v50  ;;  %12933 = vmatprep.mubr.msk.f32.mxu1 %vm17721_vm0, %v20860_v46 }
 0x3e0   : > { %12886 = vmatprep.mubr.f32.mxu0 %v19256_v11  ;;  %v3255_v10 = vpop.permute.xlu1 %3254  ;;  %15579 = vmatpush3.bf16.msra.mxu0 %v15576_v48  ;;  %v3291_v11 = vpop.permute.xlu0 %3290 }
 0x3e1   : > { %v19380_v50 = vsel %vm3323_vm10, %v3307_v37, %v3339_v38  ;;  %15546 = vmatpush3.bf16.msra.mxu1 %v15545_v60  ;;  %v3309_v2 = vadd.f32 %v19306_v6, %v3255_v10  ;;  %15581 = vmatprep.subr.bf16.mxu0 %v15580_v19  ;;  %v19433_v37 = vsel %vm3330_vm15, %v3314_v28, %v3346_v21 }
 0x3e2   : > { %v15548_v26 = vpack.c.bf16 %v19375_v18, %v19380_v50  ;;  %15547 = vmatprep.subr.bf16.mxu1 %v20858_v0 }
 0x3e3   : > { %vm3325_vm12 = vcmp.ge.f32.partialorder %v3309_v2, 0.0  ;;  %v3341_v36 = vmul.f32 0.33, %v3309_v2  ;;  %12887 = vmatmul.mubr.f32.gmra.mrb[24].mxu0 %v19260_v59  ;;  %v3344_v59 = vmul.f32 0.33, %v3312_v24 }
 0x3e4   : > { %12889 = vmatprep.mubr.f32.mxu0 %v19276_v33  ;;  %v3263_v22 = vpop.permute.xlu1 %3262  ;;  %15583 = vmatpush3.bf16.msra.mxu0 %v15580_v19  ;;  %v3318_v19 = vadd.f32 %v19306_v6, %v3291_v11 }
 0x3e5   : > { %v19400_v57 = vsel %vm3325_vm12, %v3309_v2, %v3341_v36  ;;  %15549 = vmatpush3.bf16.msra.mxu1 %v15548_v26  ;;  %v3311_v58 = vadd.f32 %v19306_v6, %v3263_v22  ;;  %15585 = vmatprep.subr.bf16.mxu0 %v15584_v9  ;;  %v19417_v48 = vsel %vm3328_vm13, %v3312_v24, %v3344_v59  ;;  %v10780_v24 = vld [vmem:[%s20782_s5 + $0x380] sm:$0xff]  ;;  %v10781_v2 = vld [vmem:[%s20782_s5 + $0x388] sm:$0xff]  ;;  %v3686_v26 = vsub.s32 7, %v18249_v29  ;;  %v10782_v59 = vld [vmem:[%s20782_s5 + $0x390] sm:$0xff] }
 0x3e6   : > { %v15551_v56 = vpack.c.bf16 %v19398_v35, %v19400_v57  ;;  %15550 = vmatprep.subr.bf16.mxu1 %v20858_v0  ;;  %v3350_v36 = vmul.f32 0.33, %v3318_v19  ;;  %vm3334_vm4 = vcmp.ge.f32.partialorder %v3318_v19, 0.0  ;;  %v15624_v22 = vpack.c.bf16 %v10781_v2, %v10780_v24 }
 0x3e7   : > { %vm3327_vm14 = vcmp.ge.f32.partialorder %v3311_v58, 0.0  ;;  %v3343_v33 = vmul.f32 0.33, %v3311_v58  ;;  %12890 = vmatmul.mubr.f32.gmra.mrb[26].mxu0 %v19280_v32  ;;  %v3299_v32 = vpop.permute.xlu0 %3298 }
 0x3e8   : > { %12892 = vmatprep.mubr.f32.mxu0 %v19297_v44  ;;  %v19415_v20 = vpop.f32.mrb[16].mxu0  ;;  %v3271_v15 = vpop.permute.xlu1 %3270  ;;  %15587 = vmatpush3.bf16.msra.mxu0 %v15584_v9  ;;  %v15592_v44 = vpack.c.bf16 %v10777_v52, %v10776_v63  ;;  %v19455_v9 = vsel %vm3332_vm2, %v3316_v54, %v3348_v39  ;;  %v10787_v39 = vld [vmem:[%s20782_s5 + $0x3b8] sm:$0xff] }
 0x3e9   : > { %v19419_v43 = vsel %vm3327_vm14, %v3311_v58, %v3343_v33  ;;  %15552 = vmatpush3.bf16.msra.mxu1 %v15551_v56  ;;  %v3313_v27 = vadd.f32 %v19306_v6, %v3271_v15  ;;  %v12389_v49 = vpop.f32.mrb[17].mxu0  ;;  %15589 = vmatprep.subr.bf16.mxu0 %v15588_v17  ;;  %v10783_v58 = vld [vmem:[%s20782_s5 + $0x398] sm:$0xff]  ;;  %v19476_v56 = vrot.slane %v18254_v31, %v3686_v26 }
 0x3ea   : > { %v15554_v62 = vpack.c.bf16 %v19417_v48, %v19419_v43  ;;  %15553 = vmatprep.subr.bf16.mxu1 %v20858_v0  ;;  %v19479_v33 = vsel %vm3334_vm4, %v3318_v19, %v3350_v36 }
 0x3eb   : > { %vm3329_vm1 = vcmp.ge.f32.partialorder %v3313_v27, 0.0  ;;  %v3345_v16 = vmul.f32 0.33, %v3313_v27  ;;  %12893 = vmatmul.mubr.f32.gmra.mrb[28].mxu0 %v19301_v13  ;;  %v3626_v10 = vpop.permute.xlu0 %3625 }
 0x3ec   : > { %12895 = vmatprep.mubr.f32.mxu0 %v19322_v5  ;;  %v3279_v60 = vpop.permute.xlu1 %3278  ;;  %15591 = vmatpush3.bf16.msra.mxu0 %v15588_v17  ;;  %v684_v5 = vld [vmem:[%s20783_s6] sm:$0xff]  ;;  %v3689_v54 = vadd.f32 %v19476_v56, %v3626_v10 }
 0x3ed   : > { %v19437_v38 = vsel %vm3329_vm1, %v3313_v27, %v3345_v16  ;;  %15555 = vmatpush3.bf16.msra.mxu1 %v15554_v62  ;;  %v3315_v13 = vadd.f32 %v19306_v6, %v3279_v60  ;;  %15593 = vmatprep.subr.bf16.mxu0 %v15592_v44 }
 0x3ee   : > { %v15557_v47 = vpack.c.bf16 %v19433_v37, %v19437_v38  ;;  %15556 = vmatprep.subr.bf16.mxu1 %v20858_v0  ;;  %4005 = vperm.xlu0 %17395, %v684_v5   ;;  %vm3705_vm8 = vcmp.ge.f32.partialorder %v3689_v54, 0.0 }
 0x3ef   : > { %vm3331_vm3 = vcmp.ge.f32.partialorder %v3315_v13, 0.0  ;;  %v3347_v25 = vmul.f32 0.33, %v3315_v13  ;;  %12896 = vmatmul.mubr.f32.gmra.mrb[30].mxu0 %v19324_v23  ;;  %v3320_v23 = vadd.f32 %v19306_v6, %v3299_v32  ;;  %v3638_v63 = vpop.permute.xlu0 %3637  ;;  %v10784_v32 = vld [vmem:[%s20782_s5 + $0x3a0] sm:$0xff] }
 0x3f0   : > { %12898 = vmatprep.mubr.f32.mxu0 %v19338_v3  ;;  %v3287_v11 = vpop.permute.xlu1 %3286  ;;  %15595 = vmatpush3.bf16.msra.mxu0 %v15592_v44  ;;  %v3721_v44 = vmul.f32 0.33, %v3689_v54  ;;  %v3692_v24 = vadd.f32 %v19476_v56, %v3638_v63 }
 0x3f1   : > { %v19459_v55 = vsel %vm3331_vm3, %v3315_v13, %v3347_v25  ;;  %15558 = vmatpush3.bf16.msra.mxu1 %v15557_v47  ;;  %v3317_v40 = vadd.f32 %v19306_v6, %v3287_v11  ;;  %15597 = vmatprep.subr.bf16.mxu0 %v15596_v4  ;;  %vm3336_vm6 = vcmp.ge.f32.partialorder %v3320_v23, 0.0  ;;  %v3370_v25 = vld [vmem:[#allocation5 + $0x30] sm:$0xff] }
 0x3f2   : > { %v15560_v28 = vpack.c.bf16 %v19455_v9, %v19459_v55  ;;  %15559 = vmatprep.subr.bf16.mxu1 %v20858_v0  ;;  %17400 = vset.pattern.permute.xlu0 %v20870_v42  ;;  %v19512_v47 = vsel %vm3705_vm8, %v3689_v54, %v3721_v44  ;;  %vm3708_vm12 = vcmp.ge.f32.partialorder %v3692_v24, 0.0 }
 0x3f3   : > { %vm3333_vm5 = vcmp.ge.f32.partialorder %v3317_v40, 0.0  ;;  %v3349_v3 = vmul.f32 0.33, %v3317_v40  ;;  %12899 = vmatmul.mubr.f32.gmra.mrb[32].mxu0 %v19342_v30  ;;  %v3352_v30 = vmul.f32 0.33, %v3320_v23 }
 0x3f4   : > { %12968 = vmatprep.mubr.f32.mxu0 %v19356_v41  ;;  %v3295_v17 = vpop.permute.xlu1 %3294  ;;  %15599 = vmatpush3.bf16.msra.mxu0 %v15596_v4  ;;  %v15628_v41 = vpack.c.bf16 %v10783_v58, %v10782_v59 }
 0x3f5   : > { %v19481_v52 = vsel %vm3333_vm5, %v3317_v40, %v3349_v3  ;;  %15561 = vmatpush3.bf16.msra.mxu1 %v15560_v28  ;;  %v3319_v21 = vadd.f32 %v19306_v6, %v3295_v17  ;;  %15625 = vmatprep.subr.bf16.mxu0 %v15624_v22  ;;  %v10785_v6 = vld [vmem:[%s20782_s5 + $0x3a8] sm:$0xff]  ;;  %v19495_v27 = vsel %vm3336_vm6, %v3320_v23, %v3352_v30  ;;  %v10790_v28 = vld [vmem:[%s20782_s5 + $0x3d0] sm:$0xff] }
 0x3f6   : > { %v15563_v31 = vpack.c.bf16 %v19479_v33, %v19481_v52  ;;  %15562 = vmatprep.subr.bf16.mxu1 %v20858_v0  ;;  %v15632_v34 = vpack.c.bf16 %v10785_v6, %v10784_v32 }
 0x3f7   : > { %vm3335_vm7 = vcmp.ge.f32.partialorder %v3319_v21, 0.0  ;;  %v3351_v15 = vmul.f32 0.33, %v3319_v21  ;;  %12969 = vmatmul.mubr.f32.vlgmr.msra.gmra.mrb[18].mxu0 %v19361_v12  ;;  %v10786_v12 = vld [vmem:[%s20782_s5 + $0x3b0] sm:$0xff] }
 0x3f8   : > { %12971 = vmatprep.mubr.f32.mxu0 %v19380_v50  ;;  %15627 = vmatpush3.bf16.msra.mxu0 %v15624_v22  ;;  %v3646_v50 = vpop.permute.xlu0 %3645  ;;  %v15636_v13 = vpack.c.bf16 %v10787_v39, %v10786_v12  ;;  %v3724_v22 = vmul.f32 0.33, %v3692_v24 }
 0x3f9   : > { %v19497_v49 = vsel %vm3335_vm7, %v3319_v21, %v3351_v15  ;;  %v3622_v62 = vpop.permute.xlu1 %3621  ;;  %15564 = vmatpush3.bf16.msra.mxu1 %v15563_v31  ;;  %15629 = vmatprep.subr.bf16.mxu0 %v15628_v41  ;;  %v3694_v58 = vadd.f32 %v19476_v56, %v3646_v50 }
 0x3fa   : > { %v15566_v16 = vpack.c.bf16 %v19495_v27, %v19497_v49  ;;  %v3688_v53 = vadd.f32 %v19476_v56, %v3622_v62  ;;  %15565 = vmatprep.subr.bf16.mxu1 %v20858_v0  ;;  %v19558_v6 = vsel %vm3708_vm12, %v3692_v24, %v3724_v22 }
 0x3fb   : > { %12972 = vmatmul.mubr.f32.gmra.mrb[20].mxu0 %v19375_v18  ;;  %v10788_v18 = vld [vmem:[%s20782_s5 + $0x3c0] sm:$0xff]  ;;  %v3726_v62 = vmul.f32 0.33, %v3694_v58  ;;  %vm3710_vm14 = vcmp.ge.f32.partialorder %v3694_v58, 0.0 }
 0x3fc   : > { %vm3704_vm9 = vcmp.ge.f32.partialorder %v3688_v53, 0.0  ;;  %v3720_v60 = vmul.f32 0.33, %v3688_v53  ;;  %12974 = vmatprep.mubr.f32.mxu0 %v19400_v57  ;;  %15631 = vmatpush3.bf16.msra.mxu0 %v15628_v41  ;;  %v10789_v57 = vld [vmem:[%s20782_s5 + $0x3c8] sm:$0xff]  ;;  %v3654_v2 = vpop.permute.xlu0 %3653 }
 0x3fd   : > { %v3630_v19 = vpop.permute.xlu1 %3629  ;;  %15567 = vmatpush3.bf16.msra.mxu1 %v15566_v16  ;;  %15633 = vmatprep.subr.bf16.mxu0 %v15632_v34  ;;  %v15640_v40 = vpack.c.bf16 %v10789_v57, %v10788_v18  ;;  %v3696_v41 = vadd.f32 %v19476_v56, %v3654_v2 }
 0x3fe   : > { %v19514_v4 = vsel %vm3704_vm9, %v3688_v53, %v3720_v60  ;;  %v3690_v5 = vadd.f32 %v19476_v56, %v3630_v19  ;;  %15600 = vmatprep.subr.bf16.mxu1 %v20858_v0 }
 0x3ff   : > { %v15601_v10 = vpack.c.bf16 %v19512_v47, %v19514_v4  ;;  %12975 = vmatmul.mubr.f32.gmra.mrb[22].mxu0 %v19398_v35  ;;  %v10791_v35 = vld [vmem:[%s20782_s5 + $0x3d8] sm:$0xff]  ;;  %v3728_v12 = vmul.f32 0.33, %v3696_v41  ;;  %vm3712_vm1 = vcmp.ge.f32.partialorder %v3696_v41, 0.0 }
 0x400   : > { %12977 = vmatprep.mubr.f32.mxu0 %v19419_v43  ;;  %15635 = vmatpush3.bf16.msra.mxu0 %v15632_v34  ;;  %v3722_v36 = vmul.f32 0.33, %v3690_v5  ;;  %vm3706_vm10 = vcmp.ge.f32.partialorder %v3690_v5, 0.0  ;;  %v15644_v59 = vpack.c.bf16 %v10791_v35, %v10790_v28  ;;  %v3662_v21 = vpop.permute.xlu0 %3661 }
 0x401   : > { %v3634_v11 = vpop.permute.xlu1 %3633  ;;  %12934 = vmatmul.mubr.f32.vlgmr.msra.gmra.mrb[12].mxu1 %v3370_v25  ;;  %15637 = vmatprep.subr.bf16.mxu0 %v15636_v13  ;;  %v3698_v39 = vadd.f32 %v19476_v56, %v3662_v21  ;;  %v3744_v25 = vsel %vm3712_vm1, %v3696_v41, %v3728_v12  ;;  %v3753_v41 = vld [vmem:[#allocation5 + $0x38] sm:$0xff] }
 0x402   : > { %v3691_v23 = vadd.f32 %v19476_v56, %v3634_v11  ;;  %15602 = vmatpush3.bf16.msra.mxu1 %v15601_v10  ;;  %13024 = vmatprep.mubr.msk.f32.mxu1 %vm17721_vm0, %v20860_v46  ;;  %v19542_v17 = vsel %vm3706_vm10, %v3690_v5, %v3722_v36 }
 0x403   : > { %12978 = vmatmul.mubr.f32.gmra.mrb[24].mxu0 %v19417_v48  ;;  %15603 = vmatprep.subr.bf16.mxu1 %v20858_v0  ;;  %v10792_v48 = vld [vmem:[%s20782_s5 + $0x3e0] sm:$0xff]  ;;  %v3730_v18 = vmul.f32 0.33, %v3698_v39  ;;  %vm3714_vm3 = vcmp.ge.f32.partialorder %v3698_v39, 0.0 }
 0x404   : > { %vm3707_vm11 = vcmp.ge.f32.partialorder %v3691_v23, 0.0  ;;  %v3723_v43 = vmul.f32 0.33, %v3691_v23  ;;  %12980 = vmatprep.mubr.f32.mxu0 %v19437_v38  ;;  %15639 = vmatpush3.bf16.msra.mxu0 %v15636_v13  ;;  %v10793_v38 = vld [vmem:[%s20782_s5 + $0x3e8] sm:$0xff]  ;;  %v3670_v50 = vpop.permute.xlu0 %3669  ;;  %v19575_v13 = vsel %vm3710_vm14, %v3694_v58, %v3726_v62 }
 0x405   : > { %v3642_v3 = vpop.permute.xlu1 %3641  ;;  %15641 = vmatprep.subr.bf16.mxu0 %v15640_v40  ;;  %v15648_v32 = vpack.c.bf16 %v10793_v38, %v10792_v48  ;;  %v3700_v24 = vadd.f32 %v19476_v56, %v3670_v50 }
 0x406   : > { %v19544_v30 = vsel %vm3707_vm11, %v3691_v23, %v3723_v43  ;;  %v3693_v63 = vadd.f32 %v19476_v56, %v3642_v3 }
 0x407   : > { %v15604_v54 = vpack.c.bf16 %v19544_v30, %v19542_v17  ;;  %12981 = vmatmul.mubr.f32.gmra.mrb[26].mxu0 %v19433_v37  ;;  %v10794_v37 = vld [vmem:[%s20782_s5 + $0x3f0] sm:$0xff]  ;;  %v3732_v28 = vmul.f32 0.33, %v3700_v24  ;;  %vm3716_vm5 = vcmp.ge.f32.partialorder %v3700_v24, 0.0 }
 0x408   : > { %vm3709_vm13 = vcmp.ge.f32.partialorder %v3693_v63, 0.0  ;;  %v3725_v31 = vmul.f32 0.33, %v3693_v63  ;;  %12983 = vmatprep.mubr.f32.mxu0 %v19459_v55  ;;  %15643 = vmatpush3.bf16.msra.mxu0 %v15640_v40  ;;  %v10795_v55 = vld [vmem:[%s20782_s5 + $0x3f8] sm:$0xff]  ;;  %v3678_v36 = vpop.permute.xlu0 %3677  ;;  %v3746_v40 = vsel %vm3714_vm3, %v3698_v39, %v3730_v18 }
 0x409   : > { %v3650_v15 = vpop.permute.xlu1 %3649  ;;  %15605 = vmatpush3.bf16.msra.mxu1 %v15604_v54  ;;  %15645 = vmatprep.subr.bf16.mxu0 %v15644_v59  ;;  %v15652_v19 = vpack.c.bf16 %v10795_v55, %v10794_v37  ;;  %v3702_v35 = vadd.f32 %v19476_v56, %v3678_v36 }
 0x40a   : > { %v19560_v44 = vsel %vm3709_vm13, %v3693_v63, %v3725_v31  ;;  %v3695_v16 = vadd.f32 %v19476_v56, %v3650_v15  ;;  %15606 = vmatprep.subr.bf16.mxu1 %v20858_v0 }
 0x40b   : > { %v15607_v53 = vpack.c.bf16 %v19560_v44, %v19558_v6  ;;  %12984 = vmatmul.mubr.f32.gmra.mrb[28].mxu0 %v19455_v9  ;;  %v3734_v58 = vmul.f32 0.33, %v3702_v35  ;;  %vm3718_vm7 = vcmp.ge.f32.partialorder %v3702_v35, 0.0 }
 0x40c   : > { %vm3711_vm15 = vcmp.ge.f32.partialorder %v3695_v16, 0.0  ;;  %v3727_v34 = vmul.f32 0.33, %v3695_v16  ;;  %12986 = vmatprep.mubr.f32.mxu0 %v19481_v52  ;;  %15647 = vmatpush3.bf16.msra.mxu0 %v15644_v59  ;;  %v3748_v59 = vsel %vm3716_vm5, %v3700_v24, %v3732_v28 }
 0x40d   : > { %v3658_v60 = vpop.permute.xlu1 %3657  ;;  %15608 = vmatpush3.bf16.msra.mxu1 %v15607_v53  ;;  %15649 = vmatprep.subr.bf16.mxu0 %v15648_v32 }
 0x40e   : > { %v19577_v5 = vsel %vm3711_vm15, %v3695_v16, %v3727_v34  ;;  %v3697_v9 = vadd.f32 %v19476_v56, %v3658_v60  ;;  %15609 = vmatprep.subr.bf16.mxu1 %v20858_v0 }
 0x40f   : > { %v15610_v10 = vpack.c.bf16 %v19577_v5, %v19575_v13  ;;  %12987 = vmatmul.mubr.f32.gmra.mrb[30].mxu0 %v19479_v33 }
 0x410   : > { %vm3713_vm2 = vcmp.ge.f32.partialorder %v3697_v9, 0.0  ;;  %v3729_v52 = vmul.f32 0.33, %v3697_v9  ;;  %12989 = vmatprep.mubr.f32.mxu0 %v19497_v49  ;;  %15651 = vmatpush3.bf16.msra.mxu0 %v15648_v32 }
 0x411   : > { %v3666_v57 = vpop.permute.xlu1 %3665  ;;  %15611 = vmatpush3.bf16.msra.mxu1 %v15610_v10  ;;  %15653 = vmatprep.subr.bf16.mxu0 %v15652_v19 }
 0x412   : > { %v3745_v2 = vsel %vm3713_vm2, %v3697_v9, %v3729_v52  ;;  %v3699_v11 = vadd.f32 %v19476_v56, %v3666_v57  ;;  %15612 = vmatprep.subr.bf16.mxu1 %v20858_v0 }
 0x413   : > { %v15613_v23 = vpack.c.bf16 %v3745_v2, %v3744_v25  ;;  %12990 = vmatmul.mubr.f32.gmra.mrb[32].mxu0 %v19495_v27 }
 0x414   : > { %vm3715_vm4 = vcmp.ge.f32.partialorder %v3699_v11, 0.0  ;;  %v3731_v33 = vmul.f32 0.33, %v3699_v11  ;;  %15655 = vmatpush3.bf16.msra.mxu0 %v15652_v19  ;;  %13059 = vmatprep.mubr.f32.mxu0 %v19514_v4 }
 0x415   : > { %v3674_v49 = vpop.permute.xlu1 %3673  ;;  %15614 = vmatpush3.bf16.msra.mxu1 %v15613_v23  ;;  %15912 = vmatprep.subr.bf16.mxu0 %v20858_v0 }
 0x416   : > { %v3747_v43 = vsel %vm3715_vm4, %v3699_v11, %v3731_v33  ;;  %v3701_v22 = vadd.f32 %v19476_v56, %v3674_v49  ;;  %15615 = vmatprep.subr.bf16.mxu1 %v20858_v0 }
 0x417   : > { %v15616_v3 = vpack.c.bf16 %v3747_v43, %v3746_v40  ;;  %13060 = vmatmul.mubr.f32.vlgmr.msra.gmra.mrb[18].mxu0 %v19512_v47  ;;  %v3750_v47 = vsel %vm3718_vm7, %v3702_v35, %v3734_v58 }
 0x418   : > { %vm3717_vm6 = vcmp.ge.f32.partialorder %v3701_v22, 0.0  ;;  %v3733_v27 = vmul.f32 0.33, %v3701_v22  ;;  %13062 = vmatprep.mubr.f32.mxu0 %v19542_v17 }
 0x419   : > { %v3682_v4 = vpop.permute.xlu1 %3681  ;;  %15617 = vmatpush3.bf16.msra.mxu1 %v15616_v3  ;;  %v20873_v3 = vmov 4  }
 0x41a   : > { %v3749_v63 = vsel %vm3717_vm6, %v3701_v22, %v3733_v27  ;;  %v3703_v48 = vadd.f32 %v19476_v56, %v3682_v4  ;;  %15618 = vmatprep.subr.bf16.mxu1 %v20858_v0  ;;  %v20872_v22 = vmov 3  }
 0x41b   : > { %v15619_v38 = vpack.c.bf16 %v3749_v63, %v3748_v59  ;;  %13063 = vmatmul.mubr.f32.gmra.mrb[20].mxu0 %v19544_v30 }
 0x41c   : > { %vm3719_vm8 = vcmp.ge.f32.partialorder %v3703_v48, 0.0  ;;  %v3735_v21 = vmul.f32 0.33, %v3703_v48  ;;  %13065 = vmatprep.mubr.f32.mxu0 %v19558_v6 }
 0x41d   : > { %15620 = vmatpush3.bf16.msra.mxu1 %v15619_v38 }
 0x41e   : > { %v3751_v54 = vsel %vm3719_vm8, %v3703_v48, %v3735_v21  ;;  %15621 = vmatprep.subr.bf16.mxu1 %v20858_v0 }
 0x41f   : > { %v15622_v17 = vpack.c.bf16 %v3751_v54, %v3750_v47  ;;  %13066 = vmatmul.mubr.f32.gmra.mrb[22].mxu0 %v19560_v44 }
 0x420   : > { %13068 = vmatprep.mubr.f32.mxu0 %v19575_v13 }
 0x421   : > { %v1394_v56 = vpop.f32.mrb[2].mxu1  ;;  %15623 = vmatpush3.bf16.msra.mxu1 %v15622_v17 }
 0x422   : > { %v1395_v31 = vadd.f32 %v1394_v56, %v19415_v20  ;;  %v12424_v30 = vpop.f32.mrb[3].mxu1 }
 0x423   : > { %13069 = vmatmul.mubr.f32.gmra.mrb[24].mxu0 %v19577_v5 }
 0x424   : > { %13071 = vmatprep.mubr.f32.mxu0 %v3744_v25  ;;  %13025 = vmatmul.mubr.f32.vlgmr.msra.gmra.mrb[14].mxu1 %v3753_v41 }
 0x427   : > { %13072 = vmatmul.mubr.f32.gmra.mrb[26].mxu0 %v3745_v2 }
 0x428   : > { %13074 = vmatprep.mubr.f32.mxu0 %v3746_v40 }
 0x42b   : > { %13075 = vmatmul.mubr.f32.gmra.mrb[28].mxu0 %v3747_v43  ;;  %v20871_v43 = vmov 2  }
 0x42c   : > { %13077 = vmatprep.mubr.f32.mxu0 %v3748_v59  ;;  %v20874_v59 = vsub.s32 1, %v18249_v29 }
 0x42f   : > { %13078 = vmatmul.mubr.f32.gmra.mrb[30].mxu0 %v3749_v63 }
 0x430   : > { %13080 = vmatprep.mubr.f32.mxu0 %v3750_v47 }
 0x433   : > { %13081 = vmatmul.mubr.f32.gmra.mrb[32].mxu0 %v3751_v54 }
 0x434   : > { %13443 = vmatprep.mubr.msk.f32.mxu0 %vm17721_vm0, %v20860_v46 }
 0x44c   : > { %v1905_v15 = vpop.f32.mrb[4].mxu1 }
 0x44d   : > { %v1909_v32 = vadd.f32 %v1905_v15, %v1395_v31  ;;  %v12571_v20 = vpop.f32.mrb[5].mxu1 }
 0x46d   : > { %v2288_v6 = vpop.f32.mrb[6].mxu1  ;;  %v4006_v27 = vpop.permute.xlu0 %4005 }
 0x46e   : > { %v2292_v62 = vadd.f32 %v2288_v6, %v1909_v32  ;;  %v12662_v44 = vpop.f32.mrb[7].mxu1 }
 0x490   : > { %v2671_v16 = vpop.f32.mrb[8].mxu1 }
 0x491   : > { %v2675_v37 = vadd.f32 %v2671_v16, %v2292_v62  ;;  %v12753_v55 = vpop.f32.mrb[9].mxu1 }
 0x4b1   : > { %v3054_v53 = vpop.f32.mrb[10].mxu1 }
 0x4b2   : > { %v3058_v34 = vadd.f32 %v3054_v53, %v2675_v37  ;;  %v12844_v12 = vpop.f32.mrb[11].mxu1 }
 0x4d4   : > { %v3437_v39 = vpop.f32.mrb[12].mxu1 }
 0x4d5   : > { %v3441_v50 = vadd.f32 %v3437_v39, %v3058_v34  ;;  %v12935_v60 = vpop.f32.mrb[13].mxu1 }
 0x4ea   : > { %v19607_v19 = vpop.f32.mrb[18].mxu0 }
 0x4eb   : > { %4168 = vperm.xlu1 %17396, %v19607_v19   ;;  %v19610_v13 = vpop.f32.mrb[19].mxu0 }
 0x4ee   : > { %v19612_v5 = vpop.f32.mrb[20].mxu0 }
 0x4ef   : > { %4164 = vperm.xlu1 %17396, %v19610_v13   ;;  %v19615_v9 = vpop.f32.mrb[21].mxu0 }
 0x4f0   : > { %4172 = vperm.xlu0 %17400, %v19615_v9  }
 0x4f2   : > { %v19618_v10 = vpop.f32.mrb[22].mxu0 }
 0x4f3   : > { %17397 = vset.pattern.permute.xlu1 %v20861_v61  ;;  %v19621_v52 = vpop.f32.mrb[23].mxu0 }
 0x4f4   : > { %4011 = vperm.xlu1 %17397, %v19610_v13   ;;  %4184 = vperm.xlu0 %17400, %v19618_v10  }
 0x4f6   : > { %v19625_v25 = vpop.f32.mrb[24].mxu0 }
 0x4f7   : > { %v19627_v18 = vpop.f32.mrb[25].mxu0  ;;  %v3820_v57 = vpop.f32.mrb[14].mxu1 }
 0x4f8   : > { %17398 = vset.pattern.permute.xlu1 %v20870_v42  ;;  %4192 = vperm.xlu0 %17400, %v19625_v25   ;;  %v19631_v24 = vadd.f32 %v3820_v57, %v3441_v50  ;;  %v13026_v2 = vpop.f32.mrb[15].mxu1 }
 0x4f9   : > { %4176 = vperm.xlu1 %17398, %v19612_v5  }
 0x4fa   : > { %v19634_v11 = vpop.f32.mrb[26].mxu0  ;;  %v19712_v4 = vadd.f32 %v4006_v27, %v19631_v24 }
 0x4fb   : > { %v19636_v36 = vpop.f32.mrb[27].mxu0 }
 0x4fc   : > { %4200 = vperm.xlu0 %17400, %v19634_v11   ;;  %v19721_v58 = vrot.slane %v19712_v4, %v20874_v59 }
 0x4fd   : > { %17399 = vset.pattern.permute.xlu1 %v20861_v61 }
 0x4fe   : > { %4026 = vperm.xlu1 %17399, %v19612_v5   ;;  %v19641_v23 = vpop.f32.mrb[28].mxu0 }
 0x4ff   : > { %v19643_v33 = vpop.f32.mrb[29].mxu0 }
 0x500   : > { %4208 = vperm.xlu0 %17400, %v19641_v23  }
 0x502   : > { %4021 = vperm.xlu1 %17399, %v19615_v9   ;;  %v19647_v40 = vpop.f32.mrb[30].mxu0 }
 0x503   : > { %v19649_v49 = vpop.f32.mrb[31].mxu0 }
 0x504   : > { %4216 = vperm.xlu0 %17400, %v19647_v40  }
 0x506   : > { %4036 = vperm.xlu1 %17399, %v19618_v10   ;;  %v19653_v28 = vpop.f32.mrb[32].mxu0 }
 0x507   : > { %v19655_v35 = vpop.f32.mrb[33].mxu0 }
 0x508   : > { %4224 = vperm.xlu0 %17400, %v19653_v28  }
 0x50a   : > { %17401 = vset.pattern.permute.xlu1 %v20870_v42  ;;  %v4296_v42 = vld [vmem:[#allocation7 + $0x30] sm:$0xff] }
 0x50b   : > { %4180 = vperm.xlu1 %17401, %v19621_v52   ;;  %13115 = vmatprep.mubr.f32.mxu1 %v4296_v42 }
 0x50c   : > { %17403 = vset.pattern.permute.xlu0 %v20871_v43 }
 0x50d   : > { %4493 = vperm.xlu0 %17403, %v19610_v13  }
 0x50f   : > { %4188 = vperm.xlu1 %17401, %v19627_v18  }
 0x511   : > { %4505 = vperm.xlu0 %17403, %v19612_v5  }
 0x513   : > { %4196 = vperm.xlu1 %17401, %v19636_v36  }
 0x515   : > { %4513 = vperm.xlu0 %17403, %v19618_v10  }
 0x517   : > { %4204 = vperm.xlu1 %17401, %v19643_v33  }
 0x519   : > { %4521 = vperm.xlu0 %17403, %v19625_v25  }
 0x51b   : > { %4212 = vperm.xlu1 %17401, %v19649_v49  }
 0x51d   : > { %4529 = vperm.xlu0 %17403, %v19634_v11  }
 0x51f   : > { %4220 = vperm.xlu1 %17401, %v19655_v35  }
 0x521   : > { %4537 = vperm.xlu0 %17403, %v19641_v23  }
 0x523   : > { %17402 = vset.pattern.permute.xlu1 %v20861_v61 }
 0x524   : > { %4046 = vperm.xlu1 %17402, %v19625_v25  }
 0x525   : > { %4545 = vperm.xlu0 %17403, %v19647_v40  }
 0x528   : > { %4056 = vperm.xlu1 %17402, %v19634_v11  }
 0x529   : > { %17405 = vset.pattern.permute.xlu0 %v20861_v61 }
 0x52a   : > { %4016 = vperm.xlu0 %17405, %v19607_v19  }
 0x52c   : > { %4066 = vperm.xlu1 %17402, %v19641_v23  }
 0x52e   : > { %4031 = vperm.xlu0 %17405, %v19621_v52  }
 0x530   : > { %4076 = vperm.xlu1 %17402, %v19647_v40  }
 0x532   : > { %4041 = vperm.xlu0 %17405, %v19627_v18  }
 0x534   : > { %4086 = vperm.xlu1 %17402, %v19653_v28  }
 0x536   : > { %4051 = vperm.xlu0 %17405, %v19636_v36  }
 0x538   : > { %17404 = vset.pattern.permute.xlu1 %v20871_v43 }
 0x539   : > { %4497 = vperm.xlu1 %17404, %v19607_v19  }
 0x53a   : > { %4061 = vperm.xlu0 %17405, %v19643_v33  }
 0x53d   : > { %4501 = vperm.xlu1 %17404, %v19615_v9  }
 0x53e   : > { %4071 = vperm.xlu0 %17405, %v19649_v49  }
 0x541   : > { %4509 = vperm.xlu1 %17404, %v19621_v52  }
 0x542   : > { %4081 = vperm.xlu0 %17405, %v19655_v35  }
 0x545   : > { %4517 = vperm.xlu1 %17404, %v19627_v18  }
 0x546   : > { %17406 = vset.pattern.permute.xlu0 %v20871_v43 }
 0x547   : > { %4553 = vperm.xlu0 %17406, %v19653_v28  }
 0x549   : > { %4525 = vperm.xlu1 %17404, %v19636_v36  }
 0x54b   : > { %17408 = vset.pattern.permute.xlu0 %v20872_v22 }
 0x54c   : > { %4737 = vperm.xlu0 %17408, %v19607_v19  }
 0x54d   : > { %4533 = vperm.xlu1 %17404, %v19643_v33  }
 0x550   : > { %17411 = vset.pattern.permute.xlu0 %v20873_v3 }
 0x551   : > { %4973 = vperm.xlu0 %17411, %v19610_v13   ;;  %4541 = vperm.xlu1 %17404, %v19649_v49  }
 0x555   : > { %4985 = vperm.xlu0 %17411, %v19612_v5   ;;  %17407 = vset.pattern.permute.xlu1 %v20872_v22 }
 0x556   : > { %4733 = vperm.xlu1 %17407, %v19610_v13  }
 0x559   : > { %4993 = vperm.xlu0 %17411, %v19618_v10  }
 0x55a   : > { %4741 = vperm.xlu1 %17407, %v19615_v9  }
 0x55d   : > { %5001 = vperm.xlu0 %17411, %v19625_v25  }
 0x55e   : > { %4745 = vperm.xlu1 %17407, %v19612_v5  }
 0x561   : > { %5009 = vperm.xlu0 %17411, %v19634_v11  }
 0x562   : > { %17409 = vset.pattern.permute.xlu1 %v20871_v43 }
 0x563   : > { %4549 = vperm.xlu1 %17409, %v19655_v35  }
 0x565   : > { %17413 = vset.pattern.permute.xlu0 %v20872_v22 }
 0x566   : > { %4749 = vperm.xlu0 %17413, %v19621_v52  }
 0x567   : > { %17410 = vset.pattern.permute.xlu1 %v20872_v22 }
 0x568   : > { %4753 = vperm.xlu1 %17410, %v19618_v10  }
 0x56a   : > { %4757 = vperm.xlu0 %17413, %v19627_v18   ;;  %v4169_v63 = vpop.permute.xlu1 %4168 }
 0x56b   : > { %v4232_v48 = vadd.f32 %v19721_v58, %v4169_v63 }
 0x56c   : > { %4761 = vperm.xlu1 %17410, %v19625_v25  }
 0x56d   : > { %v4264_v21 = vmul.f32 0.33, %v4232_v48  ;;  %vm4248_vm9 = vcmp.ge.f32.partialorder %v4232_v48, 0.0 }
 0x56e   : > { %4765 = vperm.xlu0 %17413, %v19636_v36   ;;  %v4165_v38 = vpop.permute.xlu1 %4164 }
 0x56f   : > { %v4231_v47 = vadd.f32 %v19721_v58, %v4165_v38  ;;  %v4173_v54 = vpop.permute.xlu0 %4172  ;;  %v4280_v30 = vsel %vm4248_vm9, %v4232_v48, %v4264_v21 }
 0x570   : > { %4769 = vperm.xlu1 %17410, %v19634_v11   ;;  %v4233_v32 = vadd.f32 %v19721_v58, %v4173_v54 }
 0x571   : > { %vm4247_vm10 = vcmp.ge.f32.partialorder %v4231_v47, 0.0  ;;  %v4263_v17 = vmul.f32 0.33, %v4231_v47 }
 0x572   : > { %4773 = vperm.xlu0 %17413, %v19643_v33   ;;  %v4265_v62 = vmul.f32 0.33, %v4233_v32  ;;  %vm4249_vm11 = vcmp.ge.f32.partialorder %v4233_v32, 0.0 }
 0x573   : > { %v4185_v56 = vpop.permute.xlu0 %4184  ;;  %v19730_v31 = vpop.permute.xlu1 %4011  ;;  %v4279_v41 = vsel %vm4247_vm10, %v4231_v47, %v4263_v17 }
 0x574   : > { %4777 = vperm.xlu1 %17410, %v19641_v23   ;;  %v15656_v15 = vpack.c.bf16 %v4280_v30, %v4279_v41  ;;  %v4281_v53 = vsel %vm4249_vm11, %v4233_v32, %v4265_v62  ;;  %v4236_v24 = vadd.f32 %v19721_v58, %v4185_v56  ;;  %v20875_v41 = vmov 6  }
 0x576   : > { %4781 = vperm.xlu0 %17413, %v19649_v49   ;;  %15657 = vmatprep.subr.bf16.mxu1 %v15656_v15  ;;  %v4268_v42 = vmul.f32 0.33, %v4236_v24  ;;  %vm4252_vm13 = vcmp.ge.f32.partialorder %v4236_v24, 0.0 }
 0x577   : > { %v4193_v20 = vpop.permute.xlu0 %4192  ;;  %15659 = vmatpush3.bf16.msra.mxu1 %v15656_v15 }
 0x578   : > { %4785 = vperm.xlu1 %17410, %v19647_v40   ;;  %v4177_v6 = vpop.permute.xlu1 %4176  ;;  %v4238_v22 = vadd.f32 %v19721_v58, %v4193_v20  ;;  %v4284_v17 = vsel %vm4252_vm13, %v4236_v24, %v4268_v42 }
 0x579   : > { %v4234_v44 = vadd.f32 %v19721_v58, %v4177_v6 }
 0x57a   : > { %4789 = vperm.xlu0 %17413, %v19655_v35   ;;  %v4270_v21 = vmul.f32 0.33, %v4238_v22  ;;  %vm4254_vm15 = vcmp.ge.f32.partialorder %v4238_v22, 0.0 }
 0x57b   : > { %vm4250_vm12 = vcmp.ge.f32.partialorder %v4234_v44, 0.0  ;;  %v4266_v16 = vmul.f32 0.33, %v4234_v44  ;;  %v4201_v37 = vpop.permute.xlu0 %4200 }
 0x57c   : > { %4793 = vperm.xlu1 %17410, %v19653_v28   ;;  %v4240_v48 = vadd.f32 %v19721_v58, %v4201_v37 }
 0x57d   : > { %v19739_v55 = vpop.permute.xlu1 %4026  ;;  %v4282_v34 = vsel %vm4250_vm12, %v4234_v44, %v4266_v16  ;;  %v4286_v16 = vsel %vm4254_vm15, %v4238_v22, %v4270_v21 }
 0x57e   : > { %17414 = vset.pattern.permute.xlu0 %v20873_v3  ;;  %v15660_v12 = vpack.c.bf16 %v4282_v34, %v4281_v53  ;;  %v4272_v32 = vmul.f32 0.33, %v4240_v48  ;;  %vm4256_vm2 = vcmp.ge.f32.partialorder %v4240_v48, 0.0 }
 0x57f   : > { %v4209_v39 = vpop.permute.xlu0 %4208  ;;  %5017 = vperm.xlu0 %17414, %v19641_v23  }
 0x580   : > { %17412 = vset.pattern.permute.xlu1 %v20873_v3  ;;  %15661 = vmatprep.subr.bf16.mxu1 %v15660_v12  ;;  %v4242_v20 = vadd.f32 %v19721_v58, %v4209_v39  ;;  %v4288_v24 = vsel %vm4256_vm2, %v4240_v48, %v4272_v32 }
 0x581   : > { %4977 = vperm.xlu1 %17412, %v19607_v19   ;;  %15663 = vmatpush3.bf16.msra.mxu1 %v15660_v12  ;;  %v19745_v50 = vpop.permute.xlu1 %4021 }
 0x582   : > { %v4274_v12 = vmul.f32 0.33, %v4242_v20  ;;  %vm4258_vm4 = vcmp.ge.f32.partialorder %v4242_v20, 0.0 }
 0x583   : > { %v4217_v60 = vpop.permute.xlu0 %4216  ;;  %5025 = vperm.xlu0 %17414, %v19647_v40  }
 0x584   : > { %v4290_v21 = vsel %vm4258_vm4, %v4242_v20, %v4274_v12 }
 0x585   : > { %4981 = vperm.xlu1 %17412, %v19615_v9   ;;  %v19749_v57 = vpop.permute.xlu1 %4036 }
 0x587   : > { %v19752_v2 = vpop.permute.xlu0 %4224  ;;  %5033 = vperm.xlu0 %17414, %v19653_v28  }
 0x589   : > { %4989 = vperm.xlu1 %17412, %v19621_v52  }
 0x58a   : > { %v4181_v43 = vpop.permute.xlu1 %4180 }
 0x58b   : > { %v4235_v27 = vadd.f32 %v19721_v58, %v4181_v43  ;;  %17416 = vset.pattern.permute.xlu0 %v20859_v7  ;;  %v4244_v43 = vadd.f32 %v19721_v58, %v4217_v60  ;;  %v4246_v60 = vadd.f32 %v19721_v58, %v19752_v2 }
 0x58c   : > { %v19759_v59 = vpop.permute.xlu0 %4493  ;;  %5217 = vperm.xlu0 %17416, %v19607_v19  }
 0x58d   : > { %vm4251_vm14 = vcmp.ge.f32.partialorder %v4235_v27, 0.0  ;;  %v4267_v63 = vmul.f32 0.33, %v4235_v27  ;;  %4997 = vperm.xlu1 %17412, %v19627_v18   ;;  %vm4260_vm6 = vcmp.ge.f32.partialorder %v4244_v43, 0.0  ;;  %vm4262_vm8 = vcmp.ge.f32.partialorder %v4246_v60, 0.0 }
 0x58e   : > { %v4189_v38 = vpop.permute.xlu1 %4188 }
 0x58f   : > { %v4237_v47 = vadd.f32 %v19721_v58, %v4189_v38  ;;  %v4283_v54 = vsel %vm4251_vm14, %v4235_v27, %v4267_v63 }
 0x590   : > { %v19765_v56 = vpop.permute.xlu0 %4505  ;;  %17419 = vset.pattern.permute.xlu0 %v20875_v41  ;;  %v15664_v30 = vpack.c.bf16 %v4284_v17, %v4283_v54 }
 0x591   : > { %vm4253_vm1 = vcmp.ge.f32.partialorder %v4237_v47, 0.0  ;;  %v4269_v15 = vmul.f32 0.33, %v4237_v47  ;;  %5453 = vperm.xlu0 %17419, %v19610_v13   ;;  %5005 = vperm.xlu1 %17412, %v19636_v36  }
 0x592   : > { %15665 = vmatprep.subr.bf16.mxu1 %v15664_v30  ;;  %v4197_v6 = vpop.permute.xlu1 %4196 }
 0x593   : > { %v4239_v62 = vadd.f32 %v19721_v58, %v4197_v6  ;;  %15667 = vmatpush3.bf16.msra.mxu1 %v15664_v30  ;;  %v4285_v44 = vsel %vm4253_vm1, %v4237_v47, %v4269_v15  ;;  %v4276_v47 = vmul.f32 0.33, %v4244_v43  ;;  %v4278_v6 = vmul.f32 0.33, %v4246_v60 }
 0x594   : > { %v19773_v37 = vpop.permute.xlu0 %4513  ;;  %v15668_v53 = vpack.c.bf16 %v4286_v16, %v4285_v44 }
 0x595   : > { %vm4255_vm3 = vcmp.ge.f32.partialorder %v4239_v62, 0.0  ;;  %v4271_v34 = vmul.f32 0.33, %v4239_v62  ;;  %5465 = vperm.xlu0 %17419, %v19612_v5   ;;  %5013 = vperm.xlu1 %17412, %v19643_v33   ;;  %v4292_v44 = vsel %vm4260_vm6, %v4244_v43, %v4276_v47  ;;  %v4297_v47 = vld [vmem:[#allocation7 + $0x38] sm:$0xff] }
 0x596   : > { %15669 = vmatprep.subr.bf16.mxu1 %v15668_v53  ;;  %v4205_v39 = vpop.permute.xlu1 %4204 }
 0x597   : > { %v4241_v42 = vadd.f32 %v19721_v58, %v4205_v39  ;;  %15671 = vmatpush3.bf16.msra.mxu1 %v15668_v53  ;;  %v4287_v22 = vsel %vm4255_vm3, %v4239_v62, %v4271_v34 }
 0x598   : > { %v19779_v27 = vpop.permute.xlu0 %4521  ;;  %v15672_v63 = vpack.c.bf16 %v4288_v24, %v4287_v22  ;;  %v4294_v24 = vsel %vm4262_vm8, %v4246_v60, %v4278_v6 }
 0x599   : > { %vm4257_vm5 = vcmp.ge.f32.partialorder %v4241_v42, 0.0  ;;  %v4273_v38 = vmul.f32 0.33, %v4241_v42  ;;  %17421 = vset.pattern.permute.xlu0 %v20859_v7  ;;  %5021 = vperm.xlu1 %17412, %v19649_v49  }
 0x59a   : > { %5229 = vperm.xlu0 %17421, %v19621_v52   ;;  %15673 = vmatprep.subr.bf16.mxu1 %v15672_v63  ;;  %v4213_v48 = vpop.permute.xlu1 %4212 }
 0x59b   : > { %v4243_v54 = vadd.f32 %v19721_v58, %v4213_v48  ;;  %15675 = vmatpush3.bf16.msra.mxu1 %v15672_v63  ;;  %v4289_v17 = vsel %vm4257_vm5, %v4241_v42, %v4273_v38  ;;  %v20876_v42 = vsub.s32 0, %v18249_v29 }
 0x59c   : > { %v19787_v30 = vpop.permute.xlu0 %4529  ;;  %v15676_v15 = vpack.c.bf16 %v4290_v21, %v4289_v17 }
 0x59d   : > { %vm4259_vm7 = vcmp.ge.f32.partialorder %v4243_v54, 0.0  ;;  %v4275_v32 = vmul.f32 0.33, %v4243_v54  ;;  %17415 = vset.pattern.permute.xlu1 %v20859_v7 }
 0x59e   : > { %5237 = vperm.xlu0 %17421, %v19627_v18   ;;  %5213 = vperm.xlu1 %17415, %v19610_v13   ;;  %v4221_v20 = vpop.permute.xlu1 %4220 }
 0x59f   : > { %15677 = vmatprep.subr.bf16.mxu1 %v15676_v15  ;;  %v4245_v2 = vadd.f32 %v19721_v58, %v4221_v20  ;;  %v4291_v62 = vsel %vm4259_vm7, %v4243_v54, %v4275_v32  ;;  %v19800_v58 = vrot.slane %v19712_v4, %v20876_v42  ;;  %v4298_v54 = vld [vmem:[#allocation7 + $0x40] sm:$0xff]  ;;  %v4299_v20 = vld [vmem:[#allocation7 + $0x48] sm:$0xff] }
 0x5a0   : > { %15679 = vmatpush3.bf16.msra.mxu1 %v15676_v15  ;;  %v19793_v16 = vpop.permute.xlu0 %4537  ;;  %v15680_v53 = vpack.c.bf16 %v4292_v44, %v4291_v62 }
 0x5a1   : > { %vm4261_vm9 = vcmp.ge.f32.partialorder %v4245_v2, 0.0  ;;  %v4277_v34 = vmul.f32 0.33, %v4245_v2  ;;  %v4093_v63 = vadd.f32 %v19800_v58, %v19730_v31  ;;  %v4095_v38 = vadd.f32 %v19800_v58, %v19745_v50 }
 0x5a2   : > { %5245 = vperm.xlu0 %17421, %v19636_v36   ;;  %5221 = vperm.xlu1 %17415, %v19615_v9   ;;  %v4096_v48 = vadd.f32 %v19800_v58, %v19739_v55  ;;  %v4098_v55 = vadd.f32 %v19800_v58, %v19749_v57 }
 0x5a3   : > { %15681 = vmatprep.subr.bf16.mxu1 %v15680_v53  ;;  %v4047_v12 = vpop.permute.xlu1 %4046  ;;  %v4293_v39 = vsel %vm4261_vm9, %v4245_v2, %v4277_v34  ;;  %v4125_v17 = vmul.f32 0.33, %v4093_v63  ;;  %v4127_v31 = vmul.f32 0.33, %v4095_v38  ;;  %vm4109_vm10 = vcmp.ge.f32.partialorder %v4093_v63, 0.0  ;;  %v4300_v2 = vld [vmem:[#allocation7 + $0x50] sm:$0xff] }
 0x5a4   : > { %15683 = vmatpush3.bf16.msra.mxu1 %v15680_v53  ;;  %v19802_v43 = vpop.permute.xlu0 %4545  ;;  %v15684_v22 = vpack.c.bf16 %v4294_v24, %v4293_v39  ;;  %v4128_v50 = vmul.f32 0.33, %v4096_v48  ;;  %vm4111_vm11 = vcmp.ge.f32.partialorder %v4095_v38, 0.0  ;;  %vm4112_vm12 = vcmp.ge.f32.partialorder %v4096_v48, 0.0 }
 0x5a5   : > { %v4143_v53 = vsel %vm4111_vm11, %v4095_v38, %v4127_v31  ;;  %v4130_v24 = vmul.f32 0.33, %v4098_v55  ;;  %v4100_v42 = vadd.f32 %v19800_v58, %v4047_v12  ;;  %vm4114_vm15 = vcmp.ge.f32.partialorder %v4098_v55, 0.0 }
 0x5a6   : > { %5253 = vperm.xlu0 %17421, %v19643_v33   ;;  %17417 = vset.pattern.permute.xlu1 %v20873_v3  ;;  %v4144_v57 = vsel %vm4112_vm12, %v4096_v48, %v4128_v50 }
 0x5a7   : > { %15685 = vmatprep.subr.bf16.mxu1 %v15684_v22  ;;  %5029 = vperm.xlu1 %17417, %v19655_v35   ;;  %v4057_v21 = vpop.permute.xlu1 %4056  ;;  %v4132_v31 = vmul.f32 0.33, %v4100_v42  ;;  %v4146_v50 = vsel %vm4114_vm15, %v4098_v55, %v4130_v24  ;;  %vm4116_vm2 = vcmp.ge.f32.partialorder %v4100_v42, 0.0 }
 0x5a8   : > { %15687 = vmatpush3.bf16.msra.mxu1 %v15684_v22 }
 0x5a9   : > { %v4017_v60 = vpop.permute.xlu0 %4016 }
 0x5aa   : > { %v4094_v15 = vadd.f32 %v19800_v58, %v4017_v60  ;;  %5261 = vperm.xlu0 %17421, %v19649_v49   ;;  %v4301_v60 = vld [vmem:[#allocation7 + $0x58] sm:$0xff] }
 0x5ab   : > { %17418 = vset.pattern.permute.xlu1 %v20859_v7  ;;  %v4067_v3 = vpop.permute.xlu1 %4066  ;;  %13116 = vmatmul.mubr.f32.vlgmr.msra.gmra.mrb[16].mxu1 %v4297_v47  ;;  %v4141_v7 = vsel %vm4109_vm10, %v4093_v63, %v4125_v17  ;;  %v15692_v63 = vpack.c.bf16 %v4144_v57, %v4143_v53  ;;  %v4102_v17 = vadd.f32 %v19800_v58, %v4057_v21 }
 0x5ac   : > { %vm4110_vm13 = vcmp.ge.f32.partialorder %v4094_v15, 0.0  ;;  %v4126_v32 = vmul.f32 0.33, %v4094_v15  ;;  %5225 = vperm.xlu1 %17418, %v19612_v5   ;;  %13118 = vmatprep.mubr.f32.mxu1 %v4298_v54  ;;  %v4157_v54 = vld [vmem:[#allocation7] sm:$0xff] }
 0x5ad   : > { %v4032_v6 = vpop.permute.xlu0 %4031  ;;  %vm4118_vm3 = vcmp.ge.f32.partialorder %v4102_v17, 0.0 }
 0x5ae   : > { %v4097_v62 = vadd.f32 %v19800_v58, %v4032_v6  ;;  %5269 = vperm.xlu0 %17421, %v19655_v35   ;;  %v4142_v44 = vsel %vm4110_vm13, %v4094_v15, %v4126_v32 }
 0x5af   : > { %v4077_v34 = vpop.permute.xlu1 %4076  ;;  %v15688_v39 = vpack.c.bf16 %v4142_v44, %v4141_v7  ;;  %13119 = vmatmul.mubr.f32.gmra.mrb[18].mxu1 %v4299_v20  ;;  %v4148_v44 = vsel %vm4116_vm2, %v4100_v42, %v4132_v31  ;;  %v20877_v31 = vsub.s32 2, %v18249_v29 }
 0x5b0   : > { %vm4113_vm14 = vcmp.ge.f32.partialorder %v4097_v62, 0.0  ;;  %v4129_v22 = vmul.f32 0.33, %v4097_v62  ;;  %5233 = vperm.xlu1 %17418, %v19618_v10   ;;  %13121 = vmatprep.mubr.f32.mxu1 %v4300_v2  ;;  %v4134_v2 = vmul.f32 0.33, %v4102_v17 }
 0x5b1   : > { %v4042_v47 = vpop.permute.xlu0 %4041  ;;  %15689 = vmatprep.subr.bf16.mxu1 %v15688_v39 }
 0x5b2   : > { %v4099_v38 = vadd.f32 %v19800_v58, %v4042_v47  ;;  %17422 = vset.pattern.permute.xlu0 %v20875_v41  ;;  %15691 = vmatpush3.bf16.msra.mxu1 %v15688_v39  ;;  %v4145_v48 = vsel %vm4113_vm14, %v4097_v62, %v4129_v22  ;;  %v4104_v62 = vadd.f32 %v19800_v58, %v4067_v3 }
 0x5b3   : > { %5473 = vperm.xlu0 %17422, %v19618_v10   ;;  %15693 = vmatprep.subr.bf16.mxu1 %v15692_v63  ;;  %v4087_v12 = vpop.permute.xlu1 %4086  ;;  %v15696_v20 = vpack.c.bf16 %v4146_v50, %v4145_v48  ;;  %v4150_v3 = vsel %vm4118_vm3, %v4102_v17, %v4134_v2  ;;  %v4106_v47 = vadd.f32 %v19800_v58, %v4077_v34 }
 0x5b4   : > { %vm4115_vm1 = vcmp.ge.f32.partialorder %v4099_v38, 0.0  ;;  %v4131_v15 = vmul.f32 0.33, %v4099_v38  ;;  %5241 = vperm.xlu1 %17418, %v19625_v25   ;;  %13122 = vmatmul.mubr.f32.gmra.mrb[20].mxu1 %v4301_v60  ;;  %v4136_v22 = vmul.f32 0.33, %v4104_v62  ;;  %vm4120_vm5 = vcmp.ge.f32.partialorder %v4104_v62, 0.0 }
 0x5b5   : > { %v4052_v32 = vpop.permute.xlu0 %4051  ;;  %13156 = vmatprep.mubr.f32.mxu1 %v4157_v54  ;;  %v4138_v17 = vmul.f32 0.33, %v4106_v47  ;;  %v4108_v50 = vadd.f32 %v19800_v58, %v4087_v12  ;;  %vm4122_vm8 = vcmp.ge.f32.partialorder %v4106_v47, 0.0 }
 0x5b6   : > { %v4101_v6 = vadd.f32 %v19800_v58, %v4052_v32  ;;  %15695 = vmatpush3.bf16.msra.mxu1 %v15692_v63  ;;  %v4147_v21 = vsel %vm4115_vm1, %v4099_v38, %v4131_v15  ;;  %v19845_v15 = vrot.slane %v19712_v4, %v20877_v31  ;;  %v4152_v34 = vsel %vm4120_vm5, %v4104_v62, %v4136_v22 }
 0x5b7   : > { %5481 = vperm.xlu0 %17422, %v19625_v25   ;;  %15697 = vmatprep.subr.bf16.mxu1 %v15696_v20  ;;  %v15700_v39 = vpack.c.bf16 %v4148_v44, %v4147_v21  ;;  %v4140_v12 = vmul.f32 0.33, %v4108_v50  ;;  %vm4124_vm10 = vcmp.ge.f32.partialorder %v4108_v50, 0.0 }
 0x5b8   : > { %vm4117_vm4 = vcmp.ge.f32.partialorder %v4101_v6, 0.0  ;;  %v4133_v7 = vmul.f32 0.33, %v4101_v6  ;;  %5249 = vperm.xlu1 %17418, %v19634_v11   ;;  %v4498_v55 = vpop.permute.xlu1 %4497  ;;  %v4560_v62 = vadd.f32 %v19845_v15, %v19759_v59 }
 0x5b9   : > { %v4062_v53 = vpop.permute.xlu0 %4061  ;;  %v4561_v2 = vadd.f32 %v19845_v15, %v4498_v55 }
 0x5ba   : > { %v4103_v57 = vadd.f32 %v19800_v58, %v4062_v53  ;;  %15699 = vmatpush3.bf16.msra.mxu1 %v15696_v20  ;;  %v4149_v24 = vsel %vm4117_vm4, %v4101_v6, %v4133_v7  ;;  %v4592_v59 = vmul.f32 0.33, %v4560_v62  ;;  %vm4576_vm12 = vcmp.ge.f32.partialorder %v4560_v62, 0.0 }
 0x5bb   : > { %5489 = vperm.xlu0 %17422, %v19634_v11   ;;  %15701 = vmatprep.subr.bf16.mxu1 %v15700_v39  ;;  %v15704_v38 = vpack.c.bf16 %v4150_v3, %v4149_v24  ;;  %v4593_v55 = vmul.f32 0.33, %v4561_v2  ;;  %vm4577_vm11 = vcmp.ge.f32.partialorder %v4561_v2, 0.0 }
 0x5bc   : > { %vm4119_vm6 = vcmp.ge.f32.partialorder %v4103_v57, 0.0  ;;  %v4135_v63 = vmul.f32 0.33, %v4103_v57  ;;  %5257 = vperm.xlu1 %17418, %v19641_v23   ;;  %v4502_v60 = vpop.permute.xlu1 %4501 }
 0x5bd   : > { %v4072_v42 = vpop.permute.xlu0 %4071 }
 0x5be   : > { %v4105_v48 = vadd.f32 %v19800_v58, %v4072_v42  ;;  %15703 = vmatpush3.bf16.msra.mxu1 %v15700_v39  ;;  %v4151_v54 = vsel %vm4119_vm6, %v4103_v57, %v4135_v63  ;;  %v4154_v57 = vsel %vm4122_vm8, %v4106_v47, %v4138_v17  ;;  %v4563_v63 = vadd.f32 %v19845_v15, %v19765_v56 }
 0x5bf   : > { %5497 = vperm.xlu0 %17422, %v19641_v23   ;;  %15705 = vmatprep.subr.bf16.mxu1 %v15704_v38  ;;  %v15708_v21 = vpack.c.bf16 %v4152_v34, %v4151_v54  ;;  %v4156_v42 = vsel %vm4124_vm10, %v4108_v50, %v4140_v12  ;;  %v4609_v54 = vsel %vm4577_vm11, %v4561_v2, %v4593_v55  ;;  %v4161_v55 = vld [vmem:[#allocation7 + $0x20] sm:$0xff] }
 0x5c0   : > { %vm4121_vm7 = vcmp.ge.f32.partialorder %v4105_v48, 0.0  ;;  %v4137_v32 = vmul.f32 0.33, %v4105_v48  ;;  %5265 = vperm.xlu1 %17418, %v19647_v40   ;;  %v4510_v20 = vpop.permute.xlu1 %4509  ;;  %v4595_v56 = vmul.f32 0.33, %v4563_v63  ;;  %v4565_v34 = vadd.f32 %v19845_v15, %v19773_v37 }
 0x5c1   : > { %v4082_v6 = vpop.permute.xlu0 %4081  ;;  %v4608_v50 = vsel %vm4576_vm12, %v4560_v62, %v4592_v59  ;;  %vm4579_vm14 = vcmp.ge.f32.partialorder %v4563_v63, 0.0 }
 0x5c2   : > { %v4107_v7 = vadd.f32 %v19800_v58, %v4082_v6  ;;  %15707 = vmatpush3.bf16.msra.mxu1 %v15704_v38  ;;  %v4153_v44 = vsel %vm4121_vm7, %v4105_v48, %v4137_v32  ;;  %v4562_v58 = vadd.f32 %v19845_v15, %v4502_v60  ;;  %v4564_v48 = vadd.f32 %v19845_v15, %v4510_v20 }
 0x5c3   : > { %5505 = vperm.xlu0 %17422, %v19647_v40   ;;  %15709 = vmatprep.subr.bf16.mxu1 %v15708_v21  ;;  %v15712_v24 = vpack.c.bf16 %v4154_v57, %v4153_v44  ;;  %v15720_v32 = vpack.c.bf16 %v4609_v54, %v4608_v50  ;;  %v4597_v44 = vmul.f32 0.33, %v4565_v34  ;;  %v4611_v12 = vsel %vm4579_vm14, %v4563_v63, %v4595_v56 }
 0x5c4   : > { %vm4123_vm9 = vcmp.ge.f32.partialorder %v4107_v7, 0.0  ;;  %v4139_v53 = vmul.f32 0.33, %v4107_v7  ;;  %5273 = vperm.xlu1 %17418, %v19653_v28   ;;  %v4518_v39 = vpop.permute.xlu1 %4517  ;;  %v4594_v38 = vmul.f32 0.33, %v4562_v58  ;;  %vm4578_vm13 = vcmp.ge.f32.partialorder %v4562_v58, 0.0 }
 0x5c5   : > { %v4596_v20 = vmul.f32 0.33, %v4564_v48  ;;  %v4566_v6 = vadd.f32 %v19845_v15, %v4518_v39  ;;  %vm4580_vm15 = vcmp.ge.f32.partialorder %v4564_v48, 0.0  ;;  %vm4581_vm1 = vcmp.ge.f32.partialorder %v4565_v34, 0.0 }
 0x5c6   : > { %v19857_v22 = vpop.permute.xlu0 %4553  ;;  %15711 = vmatpush3.bf16.msra.mxu1 %v15708_v21  ;;  %v4155_v3 = vsel %vm4123_vm9, %v4107_v7, %v4139_v53  ;;  %v4158_v21 = vld [vmem:[#allocation7 + $0x8] sm:$0xff]  ;;  %v4610_v2 = vsel %vm4578_vm13, %v4562_v58, %v4594_v38  ;;  %v4159_v7 = vld [vmem:[#allocation7 + $0x10] sm:$0xff]  ;;  %v4613_v59 = vsel %vm4581_vm1, %v4565_v34, %v4597_v44  ;;  %v4571_v56 = vadd.f32 %v19845_v15, %v19793_v16 }
 0x5c7   : > { %5513 = vperm.xlu0 %17422, %v19653_v28   ;;  %15713 = vmatprep.subr.bf16.mxu1 %v15712_v24  ;;  %v15716_v60 = vpack.c.bf16 %v4156_v42, %v4155_v3  ;;  %v15724_v53 = vpack.c.bf16 %v4611_v12, %v4610_v2  ;;  %v4598_v39 = vmul.f32 0.33, %v4566_v6  ;;  %vm4582_vm2 = vcmp.ge.f32.partialorder %v4566_v6, 0.0 }
 0x5c8   : > { %17420 = vset.pattern.permute.xlu1 %v20875_v41  ;;  %v4526_v47 = vpop.permute.xlu1 %4525  ;;  %v4569_v3 = vadd.f32 %v19845_v15, %v19787_v30  ;;  %v4162_v30 = vld [vmem:[#allocation7 + $0x28] sm:$0xff]  ;;  %v4603_v16 = vmul.f32 0.33, %v4571_v56  ;;  %vm4587_vm7 = vcmp.ge.f32.partialorder %v4571_v56, 0.0  ;;  %v4575_v12 = vadd.f32 %v19845_v15, %v19857_v22 }
 0x5c9   : > { %5457 = vperm.xlu1 %17420, %v19607_v19   ;;  %v4568_v57 = vadd.f32 %v19845_v15, %v4526_v47  ;;  %v4614_v38 = vsel %vm4582_vm2, %v4566_v6, %v4598_v39 }
 0x5ca   : > { %15715 = vmatpush3.bf16.msra.mxu1 %v15712_v24  ;;  %v4612_v24 = vsel %vm4580_vm15, %v4564_v48, %v4596_v20  ;;  %v4625_v48 = vld [vmem:[#allocation7 + $0x60] sm:$0xff]  ;;  %v4601_v54 = vmul.f32 0.33, %v4569_v3  ;;  %vm4585_vm5 = vcmp.ge.f32.partialorder %v4569_v3, 0.0  ;;  %vm4591_vm10 = vcmp.ge.f32.partialorder %v4575_v12, 0.0 }
 0x5cb   : > { %17424 = vset.pattern.permute.xlu0 %v20868_v45  ;;  %v19866_v31 = vpop.permute.xlu0 %4737  ;;  %15717 = vmatprep.subr.bf16.mxu1 %v15716_v60  ;;  %v15728_v47 = vpack.c.bf16 %v4613_v59, %v4612_v24  ;;  %v4600_v42 = vmul.f32 0.33, %v4568_v57  ;;  %vm4584_vm4 = vcmp.ge.f32.partialorder %v4568_v57, 0.0 }
 0x5cc   : > { %5697 = vperm.xlu0 %17424, %v19607_v19   ;;  %v4534_v17 = vpop.permute.xlu1 %4533  ;;  %v4567_v19 = vadd.f32 %v19845_v15, %v19779_v27  ;;  %v4160_v27 = vld [vmem:[#allocation7 + $0x18] sm:$0xff] }
 0x5cd   : > { %5461 = vperm.xlu1 %17420, %v19615_v9   ;;  %v4616_v6 = vsel %vm4584_vm4, %v4568_v57, %v4600_v42 }
 0x5ce   : > { %15719 = vmatpush3.bf16.msra.mxu1 %v15716_v60  ;;  %v4599_v58 = vmul.f32 0.33, %v4567_v19  ;;  %vm4583_vm3 = vcmp.ge.f32.partialorder %v4567_v19, 0.0  ;;  %v4570_v60 = vadd.f32 %v19845_v15, %v4534_v17 }
 0x5cf   : > { %15721 = vmatprep.subr.bf16.mxu1 %v15720_v32 }
 0x5d0   : > { %5709 = vperm.xlu0 %17424, %v19621_v52   ;;  %v19877_v37 = vpop.permute.xlu0 %4973  ;;  %v4542_v62 = vpop.permute.xlu1 %4541  ;;  %v4615_v34 = vsel %vm4583_vm3, %v4567_v19, %v4599_v58  ;;  %vm4586_vm6 = vcmp.ge.f32.partialorder %v4570_v60, 0.0 }
 0x5d1   : > { %5469 = vperm.xlu1 %17420, %v19621_v52   ;;  %13157 = vmatmul.mubr.f32.vlgmr.msra.gmra.mrb[16].mxu1 %v4158_v21  ;;  %v15732_v50 = vpack.c.bf16 %v4615_v34, %v4614_v38  ;;  %v4572_v20 = vadd.f32 %v19845_v15, %v4542_v62  ;;  %v4573_v21 = vadd.f32 %v19845_v15, %v19802_v43 }
 0x5d2   : > { %15723 = vmatpush3.bf16.msra.mxu1 %v15720_v32  ;;  %13159 = vmatprep.mubr.f32.mxu1 %v4159_v7  ;;  %v4602_v32 = vmul.f32 0.33, %v4570_v60  ;;  %v19913_v43 = vrot.slane %v19712_v4, %v2154_v14 }
 0x5d3   : > { %15725 = vmatprep.subr.bf16.mxu1 %v15724_v53  ;;  %v4604_v19 = vmul.f32 0.33, %v4572_v20  ;;  %vm4588_vm8 = vcmp.ge.f32.partialorder %v4572_v20, 0.0  ;;  %vm4589_vm9 = vcmp.ge.f32.partialorder %v4573_v21, 0.0 }
 0x5d4   : > { %5717 = vperm.xlu0 %17424, %v19627_v18   ;;  %v19886_v52 = vpop.permute.xlu0 %4985  ;;  %v4618_v62 = vsel %vm4586_vm6, %v4570_v60, %v4602_v32  ;;  %v4801_v14 = vadd.f32 %v19913_v43, %v19866_v31 }
 0x5d5   : > { %5477 = vperm.xlu1 %17420, %v19627_v18   ;;  %v4734_v63 = vpop.permute.xlu1 %4733  ;;  %13160 = vmatmul.mubr.f32.gmra.mrb[18].mxu1 %v4160_v27  ;;  %v4620_v27 = vsel %vm4588_vm8, %v4572_v20, %v4604_v19 }
 0x5d6   : > { %15727 = vmatpush3.bf16.msra.mxu1 %v15724_v53  ;;  %13162 = vmatprep.mubr.f32.mxu1 %v4161_v55  ;;  %v4605_v53 = vmul.f32 0.33, %v4573_v21  ;;  %v4800_v24 = vadd.f32 %v19913_v43, %v4734_v63  ;;  %v4607_v55 = vmul.f32 0.33, %v4575_v12  ;;  %v4833_v38 = vmul.f32 0.33, %v4801_v14 }
 0x5d7   : > { %15729 = vmatprep.subr.bf16.mxu1 %v15728_v47  ;;  %vm4817_vm13 = vcmp.ge.f32.partialorder %v4801_v14, 0.0 }
 0x5d8   : > { %5725 = vperm.xlu0 %17424, %v19636_v36   ;;  %v19895_v18 = vpop.permute.xlu0 %4993  ;;  %vm4816_vm12 = vcmp.ge.f32.partialorder %v4800_v24, 0.0  ;;  %v4623_v31 = vsel %vm4591_vm10, %v4575_v12, %v4607_v55  ;;  %v4849_v20 = vsel %vm4817_vm13, %v4801_v14, %v4833_v38  ;;  %v4629_v55 = vld [vmem:[#allocation7 + $0x80] sm:$0xff] }
 0x5d9   : > { %5485 = vperm.xlu1 %17420, %v19636_v36   ;;  %v4742_v17 = vpop.permute.xlu1 %4741  ;;  %13163 = vmatmul.mubr.f32.gmra.mrb[20].mxu1 %v4162_v30  ;;  %v4617_v36 = vsel %vm4585_vm5, %v4569_v3, %v4601_v54  ;;  %v4621_v3 = vsel %vm4589_vm9, %v4573_v21, %v4605_v53 }
 0x5da   : > { %15731 = vmatpush3.bf16.msra.mxu1 %v15728_v47  ;;  %13197 = vmatprep.mubr.f32.mxu1 %v4625_v48  ;;  %v15736_v44 = vpack.c.bf16 %v4617_v36, %v4616_v6  ;;  %v15744_v63 = vpack.c.bf16 %v4621_v3, %v4620_v27  ;;  %v4832_v47 = vmul.f32 0.33, %v4800_v24  ;;  %v4802_v30 = vadd.f32 %v19913_v43, %v4742_v17 }
 0x5db   : > { %15733 = vmatprep.subr.bf16.mxu1 %v15732_v50 }
 0x5dc   : > { %5733 = vperm.xlu0 %17424, %v19643_v33   ;;  %v19904_v2 = vpop.permute.xlu0 %5001  ;;  %v4834_v32 = vmul.f32 0.33, %v4802_v30  ;;  %vm4818_vm15 = vcmp.ge.f32.partialorder %v4802_v30, 0.0 }
 0x5dd   : > { %5493 = vperm.xlu1 %17420, %v19643_v33   ;;  %v4746_v7 = vpop.permute.xlu1 %4745  ;;  %v4619_v33 = vsel %vm4587_vm7, %v4571_v56, %v4603_v16 }
 0x5de   : > { %15735 = vmatpush3.bf16.msra.mxu1 %v15732_v50  ;;  %v15740_v57 = vpack.c.bf16 %v4619_v33, %v4618_v62  ;;  %v4803_v42 = vadd.f32 %v19913_v43, %v4746_v7  ;;  %v4626_v7 = vld [vmem:[#allocation7 + $0x68] sm:$0xff]  ;;  %v4850_v12 = vsel %vm4818_vm15, %v4802_v30, %v4834_v32 }
 0x5df   : > { %15737 = vmatprep.subr.bf16.mxu1 %v15736_v44 }
 0x5e0   : > { %5741 = vperm.xlu0 %17424, %v19649_v49   ;;  %v19916_v39 = vpop.permute.xlu0 %5009  ;;  %v4835_v56 = vmul.f32 0.33, %v4803_v42  ;;  %vm4819_vm14 = vcmp.ge.f32.partialorder %v4803_v42, 0.0 }
 0x5e1   : > { %5501 = vperm.xlu1 %17420, %v19649_v49  }
 0x5e2   : > { %15739 = vmatpush3.bf16.msra.mxu1 %v15736_v44  ;;  %v4550_v22 = vpop.permute.xlu1 %4549  ;;  %v4627_v44 = vld [vmem:[#allocation7 + $0x70] sm:$0xff] }
 0x5e3   : > { %v4574_v58 = vadd.f32 %v19845_v15, %v4550_v22  ;;  %15741 = vmatprep.subr.bf16.mxu1 %v15740_v57  ;;  %v4628_v22 = vld [vmem:[#allocation7 + $0x78] sm:$0xff] }
 0x5e4   : > { %5749 = vperm.xlu0 %17424, %v19655_v35  }
 0x5e5   : > { %vm4590_vm11 = vcmp.ge.f32.partialorder %v4574_v58, 0.0  ;;  %v4606_v59 = vmul.f32 0.33, %v4574_v58  ;;  %v4750_v49 = vpop.permute.xlu0 %4749  ;;  %17423 = vset.pattern.permute.xlu1 %v20868_v45 }
 0x5e6   : > { %5693 = vperm.xlu1 %17423, %v19610_v13   ;;  %15743 = vmatpush3.bf16.msra.mxu1 %v15740_v57  ;;  %v4848_v13 = vsel %vm4816_vm12, %v4800_v24, %v4832_v47  ;;  %v4804_v17 = vadd.f32 %v19913_v43, %v4750_v49 }
 0x5e7   : > { %15745 = vmatprep.subr.bf16.mxu1 %v15744_v63  ;;  %v4754_v15 = vpop.permute.xlu1 %4753  ;;  %v4622_v60 = vsel %vm4590_vm11, %v4574_v58, %v4606_v59  ;;  %v15752_v16 = vpack.c.bf16 %v4849_v20, %v4848_v13 }
 0x5e8   : > { %v15748_v48 = vpack.c.bf16 %v4623_v31, %v4622_v60  ;;  %17427 = vset.pattern.permute.xlu0 %v20861_v61  ;;  %v4805_v34 = vadd.f32 %v19913_v43, %v4754_v15  ;;  %v4836_v19 = vmul.f32 0.33, %v4804_v17  ;;  %vm4820_vm2 = vcmp.ge.f32.partialorder %v4804_v17, 0.0  ;;  %v4865_v60 = vld [vmem:[#allocation7 + $0x90] sm:$0xff] }
 0x5e9   : > { %v4758_v54 = vpop.permute.xlu0 %4757 }
 0x5ea   : > { %17425 = vset.pattern.permute.xlu1 %v20875_v41  ;;  %15747 = vmatpush3.bf16.msra.mxu1 %v15744_v63  ;;  %v4837_v21 = vmul.f32 0.33, %v4805_v34  ;;  %v4851_v41 = vsel %vm4819_vm14, %v4803_v42, %v4835_v56  ;;  %vm4821_vm1 = vcmp.ge.f32.partialorder %v4805_v34, 0.0  ;;  %v4806_v62 = vadd.f32 %v19913_v43, %v4758_v54  ;;  %v4630_v42 = vld [vmem:[#allocation7 + $0x88] sm:$0xff] }
 0x5eb   : > { %5509 = vperm.xlu1 %17425, %v19655_v35   ;;  %15749 = vmatprep.subr.bf16.mxu1 %v15748_v48  ;;  %v4762_v50 = vpop.permute.xlu1 %4761  ;;  %v15756_v33 = vpack.c.bf16 %v4851_v41, %v4850_v12  ;;  %v4852_v14 = vsel %vm4820_vm2, %v4804_v17, %v4836_v19 }
 0x5ec   : > { %v4807_v36 = vadd.f32 %v19913_v43, %v4762_v50  ;;  %v4838_v58 = vmul.f32 0.33, %v4806_v62  ;;  %vm4822_vm4 = vcmp.ge.f32.partialorder %v4806_v62, 0.0 }
 0x5ed   : > { %v4766_v6 = vpop.permute.xlu0 %4765 }
 0x5ee   : > { %15751 = vmatpush3.bf16.msra.mxu1 %v15748_v48  ;;  %v4839_v57 = vmul.f32 0.33, %v4807_v36  ;;  %vm4823_vm3 = vcmp.ge.f32.partialorder %v4807_v36, 0.0  ;;  %v4854_v38 = vsel %vm4822_vm4, %v4806_v62, %v4838_v58 }
 0x5ef   : > { %17426 = vset.pattern.permute.xlu1 %v20868_v45  ;;  %15753 = vmatprep.subr.bf16.mxu1 %v15752_v16  ;;  %v4770_v35 = vpop.permute.xlu1 %4769  ;;  %v4853_v45 = vsel %vm4821_vm1, %v4805_v34, %v4837_v21 }
 0x5f0   : > { %5701 = vperm.xlu1 %17426, %v19615_v9   ;;  %v4809_v24 = vadd.f32 %v19913_v43, %v4770_v35  ;;  %v4808_v9 = vadd.f32 %v19913_v43, %v4766_v6  ;;  %v15760_v59 = vpack.c.bf16 %v4853_v45, %v4852_v14  ;;  %v4855_v47 = vsel %vm4823_vm3, %v4807_v36, %v4839_v57 }
 0x5f1   : > { %v4774_v53 = vpop.permute.xlu0 %4773  ;;  %13198 = vmatmul.mubr.f32.vlgmr.msra.gmra.mrb[16].mxu1 %v4626_v7  ;;  %v15764_v48 = vpack.c.bf16 %v4855_v47, %v4854_v38  ;;  %v19957_v36 = vrot.slane %v19712_v4, %v2537_v51  ;;  %v4867_v38 = vld [vmem:[#allocation7 + $0xa0] sm:$0xff] }
 0x5f2   : > { %15755 = vmatpush3.bf16.msra.mxu1 %v15752_v16  ;;  %13200 = vmatprep.mubr.f32.mxu1 %v4627_v44  ;;  %v4841_v49 = vmul.f32 0.33, %v4809_v24  ;;  %vm4825_vm5 = vcmp.ge.f32.partialorder %v4809_v24, 0.0  ;;  %v4840_v31 = vmul.f32 0.33, %v4808_v9  ;;  %vm4824_vm6 = vcmp.ge.f32.partialorder %v4808_v9, 0.0 }
 0x5f3   : > { %15757 = vmatprep.subr.bf16.mxu1 %v15756_v33  ;;  %v4778_v27 = vpop.permute.xlu1 %4777  ;;  %v5040_v51 = vadd.f32 %v19957_v36, %v19877_v37  ;;  %v5043_v37 = vadd.f32 %v19957_v36, %v19886_v52  ;;  %v5045_v47 = vadd.f32 %v19957_v36, %v19895_v18 }
 0x5f4   : > { %5705 = vperm.xlu1 %17426, %v19612_v5   ;;  %v4811_v63 = vadd.f32 %v19913_v43, %v4778_v27  ;;  %v4810_v5 = vadd.f32 %v19913_v43, %v4774_v53  ;;  %v4857_v34 = vsel %vm4825_vm5, %v4809_v24, %v4841_v49 }
 0x5f5   : > { %v4782_v3 = vpop.permute.xlu0 %4781  ;;  %13201 = vmatmul.mubr.f32.gmra.mrb[18].mxu1 %v4628_v22  ;;  %vm5056_vm14 = vcmp.ge.f32.partialorder %v5040_v51, 0.0  ;;  %vm5059_vm1 = vcmp.ge.f32.partialorder %v5043_v37, 0.0  ;;  %vm5061_vm3 = vcmp.ge.f32.partialorder %v5045_v47, 0.0 }
 0x5f6   : > { %15759 = vmatpush3.bf16.msra.mxu1 %v15756_v33  ;;  %13203 = vmatprep.mubr.f32.mxu1 %v4629_v55  ;;  %v4843_v54 = vmul.f32 0.33, %v4811_v63  ;;  %vm4827_vm7 = vcmp.ge.f32.partialorder %v4811_v63, 0.0  ;;  %v4842_v50 = vmul.f32 0.33, %v4810_v5  ;;  %v4812_v32 = vadd.f32 %v19913_v43, %v4782_v3 }
 0x5f7   : > { %15761 = vmatprep.subr.bf16.mxu1 %v15760_v59  ;;  %v4786_v15 = vpop.permute.xlu1 %4785  ;;  %vm4826_vm8 = vcmp.ge.f32.partialorder %v4810_v5, 0.0  ;;  %v5072_v55 = vmul.f32 0.33, %v5040_v51 }
 0x5f8   : > { %5713 = vperm.xlu1 %17426, %v19618_v10   ;;  %v4813_v56 = vadd.f32 %v19913_v43, %v4786_v15  ;;  %v4856_v10 = vsel %vm4824_vm6, %v4808_v9, %v4840_v31  ;;  %v4859_v21 = vsel %vm4827_vm7, %v4811_v63, %v4843_v54  ;;  %v4844_v7 = vmul.f32 0.33, %v4812_v32  ;;  %v4866_v31 = vld [vmem:[#allocation7 + $0x98] sm:$0xff] }
 0x5f9   : > { %v4790_v30 = vpop.permute.xlu0 %4789  ;;  %13204 = vmatmul.mubr.f32.gmra.mrb[20].mxu1 %v4630_v42  ;;  %v15768_v17 = vpack.c.bf16 %v4857_v34, %v4856_v10  ;;  %v4858_v35 = vsel %vm4826_vm8, %v4810_v5, %v4842_v50  ;;  %vm4828_vm10 = vcmp.ge.f32.partialorder %v4812_v32, 0.0  ;;  %v5075_v63 = vmul.f32 0.33, %v5043_v37  ;;  %v4869_v10 = vld [vmem:[#allocation7 + $0xb0] sm:$0xff] }
 0x5fa   : > { %15763 = vmatpush3.bf16.msra.mxu1 %v15760_v59  ;;  %13238 = vmatprep.mubr.f32.mxu1 %v4865_v60  ;;  %v4845_v20 = vmul.f32 0.33, %v4813_v56  ;;  %vm4829_vm9 = vcmp.ge.f32.partialorder %v4813_v56, 0.0  ;;  %v15772_v44 = vpack.c.bf16 %v4859_v21, %v4858_v35  ;;  %v5088_v52 = vsel %vm5056_vm14, %v5040_v51, %v5072_v55  ;;  %v4870_v35 = vld [vmem:[#allocation7 + $0xb8] sm:$0xff] }
 0x5fb   : > { %15765 = vmatprep.subr.bf16.mxu1 %v15764_v48  ;;  %v4794_v13 = vpop.permute.xlu1 %4793  ;;  %v5091_v54 = vsel %vm5059_vm1, %v5043_v37, %v5075_v63 }
 0x5fc   : > { %5721 = vperm.xlu1 %17426, %v19625_v25   ;;  %v4815_v6 = vadd.f32 %v19913_v43, %v4794_v13  ;;  %v4814_v25 = vadd.f32 %v19913_v43, %v4790_v30  ;;  %v4861_v53 = vsel %vm4829_vm9, %v4813_v56, %v4845_v20  ;;  %v4860_v43 = vsel %vm4828_vm10, %v4812_v32, %v4844_v7  ;;  %v4868_v32 = vld [vmem:[#allocation7 + $0xa8] sm:$0xff] }
 0x5fd   : > { %v15776_v57 = vpack.c.bf16 %v4861_v53, %v4860_v43  ;;  %v5077_v30 = vmul.f32 0.33, %v5045_v47 }
 0x5fe   : > { %v19952_v16 = vpop.permute.xlu0 %5017  ;;  %15767 = vmatpush3.bf16.msra.mxu1 %v15764_v48  ;;  %v4847_v19 = vmul.f32 0.33, %v4815_v6  ;;  %vm4831_vm11 = vcmp.ge.f32.partialorder %v4815_v6, 0.0  ;;  %v4846_v33 = vmul.f32 0.33, %v4814_v25  ;;  %vm4830_vm12 = vcmp.ge.f32.partialorder %v4814_v25, 0.0 }
 0x5ff   : > { %15769 = vmatprep.subr.bf16.mxu1 %v15768_v17  ;;  %v5047_v48 = vadd.f32 %v19957_v36, %v19904_v2 }
 0x600   : > { %5729 = vperm.xlu1 %17426, %v19634_v11   ;;  %v4978_v41 = vpop.permute.xlu1 %4977  ;;  %v4863_v27 = vsel %vm4831_vm11, %v4815_v6, %v4847_v19  ;;  %v4862_v58 = vsel %vm4830_vm12, %v4814_v25, %v4846_v33  ;;  %v5093_v6 = vsel %vm5061_vm3, %v5045_v47, %v5077_v30  ;;  %v6014_v30 = vld [vmem:[#allocation8 + $0x98] sm:$0xff] }
 0x601   : > { %v5041_v62 = vadd.f32 %v19957_v36, %v4978_v41  ;;  %v15780_v9 = vpack.c.bf16 %v4863_v27, %v4862_v58  ;;  %v5079_v2 = vmul.f32 0.33, %v5047_v48  ;;  %vm5063_vm5 = vcmp.ge.f32.partialorder %v5047_v48, 0.0 }
 0x602   : > { %v19962_v12 = vpop.permute.xlu0 %5025  ;;  %15771 = vmatpush3.bf16.msra.mxu1 %v15768_v17  ;;  %v5049_v17 = vadd.f32 %v19957_v36, %v19916_v39  ;;  %v5051_v39 = vadd.f32 %v19957_v36, %v19952_v16 }
 0x603   : > { %15773 = vmatprep.subr.bf16.mxu1 %v15772_v44  ;;  %v5073_v24 = vmul.f32 0.33, %v5041_v62  ;;  %vm5057_vm13 = vcmp.ge.f32.partialorder %v5041_v62, 0.0  ;;  %v5095_v53 = vsel %vm5063_vm5, %v5047_v48, %v5079_v2 }
 0x604   : > { %5737 = vperm.xlu1 %17426, %v19641_v23   ;;  %v4982_v11 = vpop.permute.xlu1 %4981  ;;  %v5081_v19 = vmul.f32 0.33, %v5049_v17  ;;  %vm5065_vm7 = vcmp.ge.f32.partialorder %v5049_v17, 0.0  ;;  %vm5067_vm9 = vcmp.ge.f32.partialorder %v5051_v39, 0.0 }
 0x605   : > { %v5042_v45 = vadd.f32 %v19957_v36, %v4982_v11  ;;  %v5089_v59 = vsel %vm5057_vm13, %v5041_v62, %v5073_v24  ;;  %v5083_v24 = vmul.f32 0.33, %v5051_v39 }
 0x606   : > { %v19968_v22 = vpop.permute.xlu0 %5033  ;;  %15775 = vmatpush3.bf16.msra.mxu1 %v15772_v44  ;;  %v15784_v42 = vpack.c.bf16 %v5089_v59, %v5088_v52  ;;  %v5105_v44 = vld [vmem:[#allocation7 + $0xc0] sm:$0xff]  ;;  %v5097_v16 = vsel %vm5065_vm7, %v5049_v17, %v5081_v19  ;;  %v20010_v59 = vrot.slane %v19712_v4, %v2920_v8  ;;  %v687_v52 = vld [vmem:[%s20878_s1 + $0x10] sm:$0xff] }
 0x607   : > { %15777 = vmatprep.subr.bf16.mxu1 %v15776_v57  ;;  %v5074_v14 = vmul.f32 0.33, %v5042_v45  ;;  %vm5058_vm15 = vcmp.ge.f32.partialorder %v5042_v45, 0.0  ;;  %v5055_v8 = vadd.f32 %v19957_v36, %v19968_v22  ;;  %v689_v22 = vld [vmem:[%s20878_s1 + $0x20] sm:$0xff] }
 0x608   : > { %5745 = vperm.xlu1 %17426, %v19647_v40   ;;  %v4990_v23 = vpop.permute.xlu1 %4989 }
 0x609   : > { %v5044_v3 = vadd.f32 %v19957_v36, %v4990_v23  ;;  %v5090_v5 = vsel %vm5058_vm15, %v5042_v45, %v5074_v14  ;;  %v5053_v45 = vadd.f32 %v19957_v36, %v19962_v12  ;;  %v686_v14 = vld [vmem:[%s20878_s1 + $0x8] sm:$0xff]  ;;  %vm5071_vm12 = vcmp.ge.f32.partialorder %v5055_v8, 0.0 }
 0x60a   : > { %15779 = vmatpush3.bf16.msra.mxu1 %v15776_v57  ;;  %v15788_v56 = vpack.c.bf16 %v5091_v54, %v5090_v5 }
 0x60b   : > { %v19974_v49 = vpop.permute.xlu0 %5217  ;;  %15781 = vmatprep.subr.bf16.mxu1 %v15780_v9  ;;  %v5076_v15 = vmul.f32 0.33, %v5044_v3  ;;  %vm5060_vm2 = vcmp.ge.f32.partialorder %v5044_v3, 0.0  ;;  %v5085_v12 = vmul.f32 0.33, %v5053_v45  ;;  %vm5069_vm11 = vcmp.ge.f32.partialorder %v5053_v45, 0.0 }
 0x60c   : > { %5753 = vperm.xlu1 %17426, %v19653_v28   ;;  %v4998_v40 = vpop.permute.xlu1 %4997 }
 0x60d   : > { %v5046_v60 = vadd.f32 %v19957_v36, %v4998_v40  ;;  %v5092_v50 = vsel %vm5060_vm2, %v5044_v3, %v5076_v15  ;;  %v5099_v3 = vsel %vm5067_vm9, %v5051_v39, %v5083_v24  ;;  %v688_v40 = vld [vmem:[%s20878_s1 + $0x18] sm:$0xff]  ;;  %v5101_v48 = vsel %vm5069_vm11, %v5053_v45, %v5085_v12 }
 0x60e   : > { %15783 = vmatpush3.bf16.msra.mxu1 %v15780_v9  ;;  %v15792_v21 = vpack.c.bf16 %v5093_v6, %v5092_v50  ;;  %v685_v9 = vld [vmem:[%s20878_s1] sm:$0xff]  ;;  %v6011_v15 = vld [vmem:[#allocation8 + $0x80] sm:$0xff] }
 0x60f   : > { %15785 = vmatprep.subr.bf16.mxu1 %v15784_v42  ;;  %v5078_v34 = vmul.f32 0.33, %v5046_v60  ;;  %vm5062_vm4 = vcmp.ge.f32.partialorder %v5046_v60, 0.0  ;;  %5934 = vperm.xlu0 %17427, %v685_v9  }
 0x610   : > { %v19982_v18 = vpop.permute.xlu0 %5453  ;;  %v5006_v28 = vpop.permute.xlu1 %5005  ;;  %17428 = vset.pattern.permute.xlu1 %v20861_v61 }
 0x611   : > { %13239 = vmatmul.mubr.f32.vlgmr.msra.gmra.mrb[16].mxu1 %v4866_v31  ;;  %v5048_v13 = vadd.f32 %v19957_v36, %v5006_v28  ;;  %v5094_v41 = vsel %vm5062_vm4, %v5046_v60, %v5078_v34  ;;  %5939 = vperm.xlu1 %17428, %v686_v14   ;;  %v6012_v60 = vld [vmem:[#allocation8 + $0x88] sm:$0xff]  ;;  %v5281_v28 = vadd.f32 %v20010_v59, %v19974_v49  ;;  %v690_v34 = vld [vmem:[%s20878_s1 + $0x28] sm:$0xff]  ;;  %v5087_v49 = vmul.f32 0.33, %v5055_v8 }
 0x612   : > { %15787 = vmatpush3.bf16.msra.mxu1 %v15784_v42  ;;  %13241 = vmatprep.mubr.f32.mxu1 %v4867_v38  ;;  %v15796_v33 = vpack.c.bf16 %v5095_v53, %v5094_v41  ;;  %v15913_v5 = vpack.c.bf16 %v6012_v60, %v6011_v15  ;;  %v6013_v38 = vld [vmem:[#allocation8 + $0x90] sm:$0xff]  ;;  %v6018_v41 = vld [vmem:[#allocation8 + $0xb8] sm:$0xff] }
 0x613   : > { %15789 = vmatprep.subr.bf16.mxu1 %v15788_v56  ;;  %v5080_v7 = vmul.f32 0.33, %v5048_v13  ;;  %vm5064_vm6 = vcmp.ge.f32.partialorder %v5048_v13, 0.0  ;;  %5949 = vperm.xlu0 %17427, %v688_v40   ;;  %v5313_v6 = vmul.f32 0.33, %v5281_v28  ;;  %vm5297_vm15 = vcmp.ge.f32.partialorder %v5281_v28, 0.0 }
 0x614   : > { %v19988_v20 = vpop.permute.xlu0 %5465  ;;  %v5014_v61 = vpop.permute.xlu1 %5013  ;;  %15914 = vmatpush3.bf16.msra.mxu0 %v15913_v5  ;;  %v5103_v39 = vsel %vm5071_vm12, %v5055_v8, %v5087_v49  ;;  %v5108_v15 = vld [vmem:[#allocation7 + $0xd8] sm:$0xff] }
 0x615   : > { %13242 = vmatmul.mubr.f32.gmra.mrb[18].mxu1 %v4868_v32  ;;  %v5050_v25 = vadd.f32 %v19957_v36, %v5014_v61  ;;  %v5096_v57 = vsel %vm5064_vm6, %v5048_v13, %v5080_v7  ;;  %5944 = vperm.xlu1 %17428, %v687_v52   ;;  %v15916_v13 = vpack.c.bf16 %v6014_v30, %v6013_v38  ;;  %v6015_v32 = vld [vmem:[#allocation8 + $0xa0] sm:$0xff] }
 0x616   : > { %15791 = vmatpush3.bf16.msra.mxu1 %v15788_v56  ;;  %13244 = vmatprep.mubr.f32.mxu1 %v4869_v10  ;;  %v15800_v55 = vpack.c.bf16 %v5097_v16, %v5096_v57  ;;  %v6016_v10 = vld [vmem:[#allocation8 + $0xa8] sm:$0xff]  ;;  %v5109_v38 = vld [vmem:[#allocation7 + $0xe0] sm:$0xff] }
 0x617   : > { %15793 = vmatprep.subr.bf16.mxu1 %v15792_v21  ;;  %v5082_v11 = vmul.f32 0.33, %v5050_v25  ;;  %vm5066_vm8 = vcmp.ge.f32.partialorder %v5050_v25, 0.0  ;;  %15915 = vmatprep.subr.bf16.mxu0 %v20858_v0  ;;  %v15919_v7 = vpack.c.bf16 %v6016_v10, %v6015_v32  ;;  %v6020_v16 = vld [vmem:[#allocation8 + $0xc8] sm:$0xff]  ;;  %v5345_v10 = vld [vmem:[#allocation7 + $0xf0] sm:$0xff] }
 0x618   : > { %v5022_v62 = vpop.permute.xlu1 %5021  ;;  %5959 = vperm.xlu0 %17427, %v690_v34   ;;  %15917 = vmatpush3.bf16.msra.mxu0 %v15916_v13 }
 0x619   : > { %v19994_v51 = vpop.permute.xlu0 %5229  ;;  %13245 = vmatmul.mubr.f32.gmra.mrb[20].mxu1 %v4870_v35  ;;  %v5052_v43 = vadd.f32 %v19957_v36, %v5022_v62  ;;  %v5098_v23 = vsel %vm5066_vm8, %v5050_v25, %v5082_v11  ;;  %5954 = vperm.xlu1 %17428, %v689_v22   ;;  %v6017_v25 = vld [vmem:[#allocation8 + $0xb0] sm:$0xff]  ;;  %v5110_v22 = vld [vmem:[#allocation7 + $0xe8] sm:$0xff] }
 0x61a   : > { %15795 = vmatpush3.bf16.msra.mxu1 %v15792_v21  ;;  %13279 = vmatprep.mubr.f32.mxu1 %v5105_v44  ;;  %v15804_v47 = vpack.c.bf16 %v5099_v3, %v5098_v23  ;;  %v15922_v57 = vpack.c.bf16 %v6018_v41, %v6017_v25  ;;  %v5107_v3 = vld [vmem:[#allocation7 + $0xd0] sm:$0xff] }
 0x61b   : > { %15797 = vmatprep.subr.bf16.mxu1 %v15796_v33  ;;  %v5084_v37 = vmul.f32 0.33, %v5052_v43  ;;  %vm5068_vm10 = vcmp.ge.f32.partialorder %v5052_v43, 0.0  ;;  %15918 = vmatprep.subr.bf16.mxu0 %v20858_v0 }
 0x61c   : > { %15920 = vmatpush3.bf16.msra.mxu0 %v15919_v7 }
 0x61d   : > { %v5214_v27 = vpop.permute.xlu1 %5213  ;;  %v19999_v58 = vpop.permute.xlu0 %5237  ;;  %v5100_v42 = vsel %vm5068_vm10, %v5052_v43, %v5084_v37  ;;  %v5329_v43 = vsel %vm5297_vm15, %v5281_v28, %v5313_v6  ;;  %15921 = vmatprep.subr.bf16.mxu0 %v20858_v0  ;;  %v5106_v37 = vld [vmem:[#allocation7 + $0xc8] sm:$0xff] }
 0x61e   : > { %15799 = vmatpush3.bf16.msra.mxu1 %v15796_v33  ;;  %v5280_v31 = vadd.f32 %v20010_v59, %v5214_v27  ;;  %v15808_v56 = vpack.c.bf16 %v5101_v48, %v5100_v42  ;;  %v5286_v23 = vadd.f32 %v20010_v59, %v19999_v58 }
 0x61f   : > { %15801 = vmatprep.subr.bf16.mxu1 %v15800_v55 }
 0x620   : > { %v5312_v2 = vmul.f32 0.33, %v5280_v31  ;;  %vm5296_vm13 = vcmp.ge.f32.partialorder %v5280_v31, 0.0  ;;  %15923 = vmatpush3.bf16.msra.mxu0 %v15922_v57  ;;  %v5318_v60 = vmul.f32 0.33, %v5286_v23  ;;  %vm5302_vm5 = vcmp.ge.f32.partialorder %v5286_v23, 0.0 }
 0x621   : > { %v5222_v63 = vpop.permute.xlu1 %5221  ;;  %v20024_v54 = vpop.permute.xlu0 %5245  ;;  %15924 = vmatprep.subr.bf16.mxu0 %v20858_v0 }
 0x622   : > { %15803 = vmatpush3.bf16.msra.mxu1 %v15800_v55  ;;  %v5282_v61 = vadd.f32 %v20010_v59, %v5222_v63  ;;  %v5328_v62 = vsel %vm5296_vm13, %v5280_v31, %v5312_v2  ;;  %v5288_v58 = vadd.f32 %v20010_v59, %v20024_v54 }
 0x623   : > { %15805 = vmatprep.subr.bf16.mxu1 %v15804_v47  ;;  %v15816_v45 = vpack.c.bf16 %v5329_v43, %v5328_v62 }
 0x624   : > { %v5314_v53 = vmul.f32 0.33, %v5282_v61  ;;  %vm5298_vm1 = vcmp.ge.f32.partialorder %v5282_v61, 0.0  ;;  %v5320_v28 = vmul.f32 0.33, %v5288_v58  ;;  %vm5304_vm7 = vcmp.ge.f32.partialorder %v5288_v58, 0.0 }
 0x625   : > { %v5254_v35 = vpop.permute.xlu0 %5253 }
 0x626   : > { %15807 = vmatpush3.bf16.msra.mxu1 %v15804_v47  ;;  %v5030_v50 = vpop.permute.xlu1 %5029  ;;  %v5330_v14 = vsel %vm5298_vm1, %v5282_v61, %v5314_v53  ;;  %v5290_v54 = vadd.f32 %v20010_v59, %v5254_v35  ;;  %v5336_v6 = vsel %vm5304_vm7, %v5288_v58, %v5320_v28  ;;  %v5347_v28 = vld [vmem:[#allocation7 + $0x100] sm:$0xff] }
 0x627   : > { %v5054_v17 = vadd.f32 %v19957_v36, %v5030_v50  ;;  %15809 = vmatprep.subr.bf16.mxu1 %v15808_v56  ;;  %v5284_v36 = vadd.f32 %v20010_v59, %v19994_v51  ;;  %v6019_v51 = vld [vmem:[#allocation8 + $0xc0] sm:$0xff]  ;;  %v5334_v50 = vsel %vm5302_vm5, %v5286_v23, %v5318_v60 }
 0x628   : > { %v15925_v40 = vpack.c.bf16 %v6020_v16, %v6019_v51  ;;  %vm5306_vm9 = vcmp.ge.f32.partialorder %v5290_v54, 0.0 }
 0x629   : > { %vm5070_vm14 = vcmp.ge.f32.partialorder %v5054_v17, 0.0  ;;  %v5086_v21 = vmul.f32 0.33, %v5054_v17  ;;  %v5316_v27 = vmul.f32 0.33, %v5284_v36  ;;  %vm5300_vm3 = vcmp.ge.f32.partialorder %v5284_v36, 0.0  ;;  %v5262_v63 = vpop.permute.xlu0 %5261 }
 0x62a   : > { %15811 = vmatpush3.bf16.msra.mxu1 %v15808_v56  ;;  %15926 = vmatpush3.bf16.msra.mxu0 %v15925_v40 }
 0x62b   : > { %v5226_v44 = vpop.permute.xlu1 %5225  ;;  %v5102_v19 = vsel %vm5070_vm14, %v5054_v17, %v5086_v21  ;;  %v5332_v31 = vsel %vm5300_vm3, %v5284_v36, %v5316_v27  ;;  %15927 = vmatprep.subr.bf16.mxu0 %v20858_v0  ;;  %v5322_v17 = vmul.f32 0.33, %v5290_v54  ;;  %v5292_v21 = vadd.f32 %v20010_v59, %v5262_v63 }
 0x62c   : > { %v5283_v33 = vadd.f32 %v20010_v59, %v5226_v44  ;;  %v15812_v11 = vpack.c.bf16 %v5103_v39, %v5102_v19 }
 0x62d   : > { %v5270_v56 = vpop.permute.xlu0 %5269  ;;  %v5338_v19 = vsel %vm5306_vm9, %v5290_v54, %v5322_v17  ;;  %v5324_v39 = vmul.f32 0.33, %v5292_v21  ;;  %vm5308_vm11 = vcmp.ge.f32.partialorder %v5292_v21, 0.0  ;;  %v5349_v17 = vld [vmem:[#allocation7 + $0x110] sm:$0xff] }
 0x62e   : > { %vm5299_vm2 = vcmp.ge.f32.partialorder %v5283_v33, 0.0  ;;  %v5315_v24 = vmul.f32 0.33, %v5283_v33  ;;  %15813 = vmatprep.subr.bf16.mxu1 %v15812_v11  ;;  %v5294_v62 = vadd.f32 %v20010_v59, %v5270_v56 }
 0x62f   : > { %15815 = vmatpush3.bf16.msra.mxu1 %v15812_v11  ;;  %v5234_v55 = vpop.permute.xlu1 %5233  ;;  %v20062_v11 = vrot.slane %v19712_v4, %v3303_v1 }
 0x630   : > { %v5285_v9 = vadd.f32 %v20010_v59, %v5234_v55  ;;  %15817 = vmatprep.subr.bf16.mxu1 %v15816_v45  ;;  %v5331_v12 = vsel %vm5299_vm2, %v5283_v33, %v5315_v24  ;;  %v5326_v16 = vmul.f32 0.33, %v5294_v62  ;;  %v5340_v55 = vsel %vm5308_vm11, %v5292_v21, %v5324_v39  ;;  %v5585_v39 = vld [vmem:[#allocation7 + $0x120] sm:$0xff] }
 0x631   : > { %v15820_v47 = vpack.c.bf16 %v5331_v12, %v5330_v14  ;;  %v5520_v24 = vadd.f32 %v20062_v11, %v19982_v18  ;;  %vm5310_vm13 = vcmp.ge.f32.partialorder %v5294_v62, 0.0  ;;  %v5523_v18 = vadd.f32 %v20062_v11, %v19988_v20 }
 0x632   : > { %vm5301_vm4 = vcmp.ge.f32.partialorder %v5285_v9, 0.0  ;;  %v5317_v52 = vmul.f32 0.33, %v5285_v9  ;;  %13280 = vmatmul.mubr.f32.vlgmr.msra.gmra.mrb[16].mxu1 %v5106_v37  ;;  %v5474_v41 = vpop.permute.xlu0 %5473  ;;  %v5342_v12 = vsel %vm5310_vm13, %v5294_v62, %v5326_v16 }
 0x633   : > { %15819 = vmatpush3.bf16.msra.mxu1 %v15816_v45  ;;  %v5242_v42 = vpop.permute.xlu1 %5241  ;;  %13282 = vmatprep.mubr.f32.mxu1 %v5107_v3  ;;  %vm5536_vm15 = vcmp.ge.f32.partialorder %v5520_v24, 0.0  ;;  %vm5539_vm2 = vcmp.ge.f32.partialorder %v5523_v18, 0.0 }
 0x634   : > { %v5287_v8 = vadd.f32 %v20010_v59, %v5242_v42  ;;  %15821 = vmatprep.subr.bf16.mxu1 %v15820_v47  ;;  %v5333_v5 = vsel %vm5301_vm4, %v5285_v9, %v5317_v52  ;;  %v5552_v9 = vmul.f32 0.33, %v5520_v24  ;;  %v5555_v42 = vmul.f32 0.33, %v5523_v18 }
 0x635   : > { %v15824_v30 = vpack.c.bf16 %v5333_v5, %v5332_v31 }
 0x636   : > { %vm5303_vm6 = vcmp.ge.f32.partialorder %v5287_v8, 0.0  ;;  %v5319_v48 = vmul.f32 0.33, %v5287_v8  ;;  %13283 = vmatmul.mubr.f32.gmra.mrb[18].mxu1 %v5108_v15  ;;  %v5482_v45 = vpop.permute.xlu0 %5481  ;;  %v5568_v58 = vsel %vm5536_vm15, %v5520_v24, %v5552_v9  ;;  %v5525_v15 = vadd.f32 %v20062_v11, %v5474_v41 }
 0x637   : > { %15823 = vmatpush3.bf16.msra.mxu1 %v15820_v47  ;;  %v5250_v34 = vpop.permute.xlu1 %5249  ;;  %13285 = vmatprep.mubr.f32.mxu1 %v5109_v38  ;;  %v5346_v38 = vld [vmem:[#allocation7 + $0xf8] sm:$0xff] }
 0x638   : > { %v5289_v13 = vadd.f32 %v20010_v59, %v5250_v34  ;;  %15825 = vmatprep.subr.bf16.mxu1 %v15824_v30  ;;  %v5335_v32 = vsel %vm5303_vm6, %v5287_v8, %v5319_v48  ;;  %v5557_v54 = vmul.f32 0.33, %v5525_v15  ;;  %vm5541_vm4 = vcmp.ge.f32.partialorder %v5525_v15, 0.0 }
 0x639   : > { %v15828_v49 = vpack.c.bf16 %v5335_v32, %v5334_v50  ;;  %v5348_v32 = vld [vmem:[#allocation7 + $0x108] sm:$0xff] }
 0x63a   : > { %vm5305_vm8 = vcmp.ge.f32.partialorder %v5289_v13, 0.0  ;;  %v5321_v2 = vmul.f32 0.33, %v5289_v13  ;;  %13286 = vmatmul.mubr.f32.gmra.mrb[20].mxu1 %v5110_v22  ;;  %v5490_v63 = vpop.permute.xlu0 %5489  ;;  %v5571_v22 = vsel %vm5539_vm2, %v5523_v18, %v5555_v42 }
 0x63b   : > { %15827 = vmatpush3.bf16.msra.mxu1 %v15824_v30  ;;  %v5258_v61 = vpop.permute.xlu1 %5257  ;;  %13320 = vmatprep.mubr.f32.mxu1 %v5345_v10  ;;  %v5527_v30 = vadd.f32 %v20062_v11, %v5482_v45 }
 0x63c   : > { %v5291_v7 = vadd.f32 %v20010_v59, %v5258_v61  ;;  %15829 = vmatprep.subr.bf16.mxu1 %v15828_v49  ;;  %v5337_v25 = vsel %vm5305_vm8, %v5289_v13, %v5321_v2 }
 0x63d   : > { %v15832_v36 = vpack.c.bf16 %v5337_v25, %v5336_v6  ;;  %v5559_v10 = vmul.f32 0.33, %v5527_v30  ;;  %vm5543_vm6 = vcmp.ge.f32.partialorder %v5527_v30, 0.0 }
 0x63e   : > { %vm5307_vm10 = vcmp.ge.f32.partialorder %v5291_v7, 0.0  ;;  %v5323_v35 = vmul.f32 0.33, %v5291_v7  ;;  %v5498_v5 = vpop.permute.xlu0 %5497 }
 0x63f   : > { %15831 = vmatpush3.bf16.msra.mxu1 %v15828_v49  ;;  %v5266_v44 = vpop.permute.xlu1 %5265  ;;  %v5529_v49 = vadd.f32 %v20062_v11, %v5490_v63  ;;  %v5531_v62 = vadd.f32 %v20062_v11, %v5498_v5 }
 0x640   : > { %v5293_v53 = vadd.f32 %v20010_v59, %v5266_v44  ;;  %15833 = vmatprep.subr.bf16.mxu1 %v15832_v36  ;;  %v5339_v33 = vsel %vm5307_vm10, %v5291_v7, %v5323_v35  ;;  %v5573_v7 = vsel %vm5541_vm4, %v5525_v15, %v5557_v54 }
 0x641   : > { %v15836_v43 = vpack.c.bf16 %v5339_v33, %v5338_v19  ;;  %v5561_v35 = vmul.f32 0.33, %v5529_v49  ;;  %v5575_v19 = vsel %vm5543_vm6, %v5527_v30, %v5559_v10  ;;  %vm5545_vm8 = vcmp.ge.f32.partialorder %v5529_v49, 0.0 }
 0x642   : > { %vm5309_vm12 = vcmp.ge.f32.partialorder %v5293_v53, 0.0  ;;  %v5325_v57 = vmul.f32 0.33, %v5293_v53  ;;  %v5506_v61 = vpop.permute.xlu0 %5505  ;;  %v5563_v16 = vmul.f32 0.33, %v5531_v62  ;;  %vm5547_vm10 = vcmp.ge.f32.partialorder %v5531_v62, 0.0 }
 0x643   : > { %15835 = vmatpush3.bf16.msra.mxu1 %v15832_v36  ;;  %v5274_v51 = vpop.permute.xlu1 %5273  ;;  %v5350_v36 = vld [vmem:[#allocation7 + $0x118] sm:$0xff] }
 0x644   : > { %v5295_v27 = vadd.f32 %v20010_v59, %v5274_v51  ;;  %15837 = vmatprep.subr.bf16.mxu1 %v15836_v43  ;;  %v5341_v37 = vsel %vm5309_vm12, %v5293_v53, %v5325_v57  ;;  %v5577_v51 = vsel %vm5545_vm8, %v5529_v49, %v5561_v35  ;;  %v5579_v63 = vsel %vm5547_vm10, %v5531_v62, %v5563_v16 }
 0x645   : > { %v15840_v23 = vpack.c.bf16 %v5341_v37, %v5340_v55 }
 0x646   : > { %vm5311_vm14 = vcmp.ge.f32.partialorder %v5295_v27, 0.0  ;;  %v5327_v1 = vmul.f32 0.33, %v5295_v27  ;;  %v5514_v57 = vpop.permute.xlu0 %5513 }
 0x647   : > { %15839 = vmatpush3.bf16.msra.mxu1 %v15836_v43 }
 0x648   : > { %15841 = vmatprep.subr.bf16.mxu1 %v15840_v23  ;;  %v5458_v14 = vpop.permute.xlu1 %5457  ;;  %v5343_v3 = vsel %vm5311_vm14, %v5295_v27, %v5327_v1  ;;  %v5533_v27 = vadd.f32 %v20062_v11, %v5506_v61 }
 0x649   : > { %v5521_v59 = vadd.f32 %v20062_v11, %v5458_v14  ;;  %v15844_v47 = vpack.c.bf16 %v5343_v3, %v5342_v12 }
 0x64a   : > { %v5565_v14 = vmul.f32 0.33, %v5533_v27  ;;  %vm5549_vm12 = vcmp.ge.f32.partialorder %v5533_v27, 0.0 }
 0x64b   : > { %vm5537_vm1 = vcmp.ge.f32.partialorder %v5521_v59, 0.0  ;;  %v5553_v40 = vmul.f32 0.33, %v5521_v59  ;;  %15843 = vmatpush3.bf16.msra.mxu1 %v15840_v23  ;;  %v5698_v12 = vpop.permute.xlu0 %5697 }
 0x64c   : > { %15845 = vmatprep.subr.bf16.mxu1 %v15844_v47  ;;  %v5462_v52 = vpop.permute.xlu1 %5461  ;;  %v5581_v42 = vsel %vm5549_vm12, %v5533_v27, %v5565_v14 }
 0x64d   : > { %v5522_v60 = vadd.f32 %v20062_v11, %v5462_v52  ;;  %v5569_v8 = vsel %vm5537_vm1, %v5521_v59, %v5553_v40  ;;  %v20085_v40 = vrot.slane %v19712_v4, %v3686_v26 }
 0x64e   : > { %v15848_v31 = vpack.c.bf16 %v5569_v8, %v5568_v58 }
 0x64f   : > { %vm5538_vm3 = vcmp.ge.f32.partialorder %v5522_v60, 0.0  ;;  %v5554_v20 = vmul.f32 0.33, %v5522_v60  ;;  %15847 = vmatpush3.bf16.msra.mxu1 %v15844_v47  ;;  %v5710_v8 = vpop.permute.xlu0 %5709  ;;  %v5761_v5 = vadd.f32 %v20085_v40, %v5698_v12 }
 0x650   : > { %15849 = vmatprep.subr.bf16.mxu1 %v15848_v31  ;;  %v5470_v48 = vpop.permute.xlu1 %5469 }
 0x651   : > { %v5524_v56 = vadd.f32 %v20062_v11, %v5470_v48  ;;  %v5570_v34 = vsel %vm5538_vm3, %v5522_v60, %v5554_v20  ;;  %v5535_v60 = vadd.f32 %v20062_v11, %v5514_v57  ;;  %v5793_v26 = vmul.f32 0.33, %v5761_v5 }
 0x652   : > { %13321 = vmatmul.mubr.f32.vlgmr.msra.gmra.mrb[16].mxu1 %v5346_v38  ;;  %v15852_v13 = vpack.c.bf16 %v5571_v22, %v5570_v34  ;;  %vm5777_vm2 = vcmp.ge.f32.partialorder %v5761_v5, 0.0 }
 0x653   : > { %vm5540_vm5 = vcmp.ge.f32.partialorder %v5524_v56, 0.0  ;;  %v5556_v50 = vmul.f32 0.33, %v5524_v56  ;;  %15851 = vmatpush3.bf16.msra.mxu1 %v15848_v31  ;;  %13323 = vmatprep.mubr.f32.mxu1 %v5347_v28  ;;  %v5567_v38 = vmul.f32 0.33, %v5535_v60  ;;  %vm5551_vm14 = vcmp.ge.f32.partialorder %v5535_v60, 0.0  ;;  %v5718_v4 = vpop.permute.xlu0 %5717 }
 0x654   : > { %15853 = vmatprep.subr.bf16.mxu1 %v15852_v13  ;;  %v5478_v2 = vpop.permute.xlu1 %5477 }
 0x655   : > { %v5526_v6 = vadd.f32 %v20062_v11, %v5478_v2  ;;  %v5572_v21 = vsel %vm5540_vm5, %v5524_v56, %v5556_v50  ;;  %v5583_v56 = vsel %vm5551_vm14, %v5535_v60, %v5567_v38  ;;  %v5809_v50 = vsel %vm5777_vm2, %v5761_v5, %v5793_v26  ;;  %v5586_v2 = vld [vmem:[#allocation7 + $0x128] sm:$0xff] }
 0x656   : > { %v15856_v25 = vpack.c.bf16 %v5573_v7, %v5572_v21  ;;  %13324 = vmatmul.mubr.f32.gmra.mrb[18].mxu1 %v5348_v32 }
 0x657   : > { %vm5542_vm7 = vcmp.ge.f32.partialorder %v5526_v6, 0.0  ;;  %v5558_v41 = vmul.f32 0.33, %v5526_v6  ;;  %15855 = vmatpush3.bf16.msra.mxu1 %v15852_v13  ;;  %13326 = vmatprep.mubr.f32.mxu1 %v5349_v17  ;;  %v5726_v10 = vpop.permute.xlu0 %5725 }
 0x658   : > { %15857 = vmatprep.subr.bf16.mxu1 %v15856_v25  ;;  %v5486_v44 = vpop.permute.xlu1 %5485 }
 0x659   : > { %v5528_v53 = vadd.f32 %v20062_v11, %v5486_v44  ;;  %v5574_v33 = vsel %vm5542_vm7, %v5526_v6, %v5558_v41  ;;  %v5587_v6 = vld [vmem:[#allocation7 + $0x130] sm:$0xff]  ;;  %v5588_v41 = vld [vmem:[#allocation7 + $0x138] sm:$0xff] }
 0x65a   : > { %v15860_v43 = vpack.c.bf16 %v5575_v19, %v5574_v33  ;;  %13327 = vmatmul.mubr.f32.gmra.mrb[20].mxu1 %v5350_v36  ;;  %v5766_v36 = vadd.f32 %v20085_v40, %v5718_v4 }
 0x65b   : > { %vm5544_vm9 = vcmp.ge.f32.partialorder %v5528_v53, 0.0  ;;  %v5560_v24 = vmul.f32 0.33, %v5528_v53  ;;  %15859 = vmatpush3.bf16.msra.mxu1 %v15856_v25  ;;  %13361 = vmatprep.mubr.f32.mxu1 %v5585_v39  ;;  %v5589_v39 = vld [vmem:[#allocation7 + $0x140] sm:$0xff]  ;;  %v5734_v62 = vpop.permute.xlu0 %5733 }
 0x65c   : > { %15861 = vmatprep.subr.bf16.mxu1 %v15860_v43  ;;  %v5494_v45 = vpop.permute.xlu1 %5493  ;;  %vm5782_vm7 = vcmp.ge.f32.partialorder %v5766_v36, 0.0 }
 0x65d   : > { %v5530_v55 = vadd.f32 %v20062_v11, %v5494_v45  ;;  %v5576_v37 = vsel %vm5544_vm9, %v5528_v53, %v5560_v24  ;;  %v5590_v24 = vld [vmem:[#allocation7 + $0x148] sm:$0xff]  ;;  %v5798_v45 = vmul.f32 0.33, %v5766_v36 }
 0x65e   : > { %v15864_v23 = vpack.c.bf16 %v5577_v51, %v5576_v37 }
 0x65f   : > { %vm5546_vm11 = vcmp.ge.f32.partialorder %v5530_v55, 0.0  ;;  %v5562_v1 = vmul.f32 0.33, %v5530_v55  ;;  %15863 = vmatpush3.bf16.msra.mxu1 %v15860_v43  ;;  %v5768_v43 = vadd.f32 %v20085_v40, %v5726_v10  ;;  %v5742_v14 = vpop.permute.xlu0 %5741 }
 0x660   : > { %15865 = vmatprep.subr.bf16.mxu1 %v15864_v23  ;;  %v5502_v9 = vpop.permute.xlu1 %5501 }
 0x661   : > { %v5532_v3 = vadd.f32 %v20062_v11, %v5502_v9  ;;  %v5578_v18 = vsel %vm5546_vm11, %v5530_v55, %v5562_v1  ;;  %v5825_v55 = vld [vmem:[#allocation7 + $0x150] sm:$0xff]  ;;  %v5800_v1 = vmul.f32 0.33, %v5768_v43  ;;  %v5770_v9 = vadd.f32 %v20085_v40, %v5734_v62 }
 0x662   : > { %v15868_v59 = vpack.c.bf16 %v5579_v63, %v5578_v18  ;;  %vm5784_vm9 = vcmp.ge.f32.partialorder %v5768_v43, 0.0  ;;  %v5814_v18 = vsel %vm5782_vm7, %v5766_v36, %v5798_v45 }
 0x663   : > { %vm5548_vm13 = vcmp.ge.f32.partialorder %v5532_v3, 0.0  ;;  %v5564_v47 = vmul.f32 0.33, %v5532_v3  ;;  %15867 = vmatpush3.bf16.msra.mxu1 %v15864_v23  ;;  %vm5786_vm11 = vcmp.ge.f32.partialorder %v5770_v9, 0.0 }
 0x664   : > { %15869 = vmatprep.subr.bf16.mxu1 %v15868_v59 }
 0x665   : > { %v5694_v52 = vpop.permute.xlu1 %5693  ;;  %v5580_v58 = vsel %vm5548_vm13, %v5532_v3, %v5564_v47 }
 0x666   : > { %v15872_v15 = vpack.c.bf16 %v5581_v42, %v5580_v58  ;;  %v5760_v31 = vadd.f32 %v20085_v40, %v5694_v52  ;;  %v5802_v52 = vmul.f32 0.33, %v5770_v9  ;;  %v5816_v42 = vsel %vm5784_vm9, %v5768_v43, %v5800_v1  ;;  %v6023_v1 = vld [vmem:[#allocation8 + $0xe0] sm:$0xff] }
 0x667   : > { %15871 = vmatpush3.bf16.msra.mxu1 %v15868_v59 }
 0x668   : > { %15873 = vmatprep.subr.bf16.mxu1 %v15872_v15  ;;  %v5792_v30 = vmul.f32 0.33, %v5760_v31  ;;  %vm5776_vm15 = vcmp.ge.f32.partialorder %v5760_v31, 0.0 }
 0x66a   : > { %v5510_v20 = vpop.permute.xlu1 %5509  ;;  %v5808_v34 = vsel %vm5776_vm15, %v5760_v31, %v5792_v30  ;;  %v5750_v31 = vpop.permute.xlu0 %5749  ;;  %v5818_v30 = vsel %vm5786_vm11, %v5770_v9, %v5802_v52  ;;  %v6024_v9 = vld [vmem:[#allocation8 + $0xe8] sm:$0xff]  ;;  %vm10449_vm11 = vcmask 1041408  }
 0x66b   : > { %v5534_v29 = vadd.f32 %v20062_v11, %v5510_v20  ;;  %15875 = vmatpush3.bf16.msra.mxu1 %v15872_v15  ;;  %v15880_v32 = vpack.c.bf16 %v5809_v50, %v5808_v34  ;;  %v5764_v11 = vadd.f32 %v20085_v40, %v5710_v8  ;;  %v5772_v15 = vadd.f32 %v20085_v40, %v5742_v14  ;;  %v6626_v14 = vld [vmem:[#allocation8 + $0x3e0] sm:$0xff] }
 0x66c   : > { %v5774_v26 = vadd.f32 %v20085_v40, %v5750_v31 }
 0x66d   : > { %vm5550_vm1 = vcmp.ge.f32.partialorder %v5534_v29, 0.0  ;;  %v5566_v48 = vmul.f32 0.33, %v5534_v29  ;;  %v5796_v7 = vmul.f32 0.33, %v5764_v11  ;;  %vm5780_vm5 = vcmp.ge.f32.partialorder %v5764_v11, 0.0 }
 0x66e   : > { %vm5788_vm13 = vcmp.ge.f32.partialorder %v5772_v15, 0.0  ;;  %v5806_v34 = vmul.f32 0.33, %v5774_v26  ;;  %vm5790_vm15 = vcmp.ge.f32.partialorder %v5774_v26, 0.0 }
 0x66f   : > { %v5702_v28 = vpop.permute.xlu1 %5701  ;;  %v5582_v54 = vsel %vm5550_vm1, %v5534_v29, %v5566_v48  ;;  %v5812_v16 = vsel %vm5780_vm5, %v5764_v11, %v5796_v7  ;;  %v5804_v29 = vmul.f32 0.33, %v5772_v15  ;;  %v5827_v7 = vld [vmem:[#allocation7 + $0x160] sm:$0xff] }
 0x670   : > { %v5762_v22 = vadd.f32 %v20085_v40, %v5702_v28  ;;  %v15876_v13 = vpack.c.bf16 %v5583_v56, %v5582_v54  ;;  %v5822_v10 = vsel %vm5790_vm15, %v5774_v26, %v5806_v34  ;;  %vm10445_vm15 = vcmask 80896  }
 0x672   : > { %15877 = vmatprep.subr.bf16.mxu1 %v15876_v13  ;;  %v5794_v17 = vmul.f32 0.33, %v5762_v22  ;;  %vm5778_vm3 = vcmp.ge.f32.partialorder %v5762_v22, 0.0 }
 0x673   : > { %15879 = vmatpush3.bf16.msra.mxu1 %v15876_v13  ;;  %v5706_v49 = vpop.permute.xlu1 %5705  ;;  %v5820_v13 = vsel %vm5788_vm13, %v5772_v15, %v5804_v29 }
 0x674   : > { %v5763_v61 = vadd.f32 %v20085_v40, %v5706_v49  ;;  %15881 = vmatprep.subr.bf16.mxu1 %v15880_v32  ;;  %v5810_v44 = vsel %vm5778_vm3, %v5762_v22, %v5794_v17  ;;  %v6614_v17 = vld [vmem:[#allocation8 + $0x380] sm:$0xff] }
 0x676   : > { %vm5779_vm4 = vcmp.ge.f32.partialorder %v5763_v61, 0.0  ;;  %v5795_v21 = vmul.f32 0.33, %v5763_v61  ;;  %13362 = vmatmul.mubr.f32.vlgmr.msra.gmra.mrb[16].mxu1 %v5586_v2 }
 0x677   : > { %15883 = vmatpush3.bf16.msra.mxu1 %v15880_v32  ;;  %v5714_v25 = vpop.permute.xlu1 %5713  ;;  %13364 = vmatprep.mubr.f32.mxu1 %v5587_v6  ;;  %v5826_v6 = vld [vmem:[#allocation7 + $0x158] sm:$0xff] }
 0x678   : > { %v5765_v35 = vadd.f32 %v20085_v40, %v5714_v25  ;;  %v5811_v19 = vsel %vm5779_vm4, %v5763_v61, %v5795_v21  ;;  %v6615_v61 = vld [vmem:[#allocation8 + $0x388] sm:$0xff]  ;;  %v6617_v25 = vld [vmem:[#allocation8 + $0x398] sm:$0xff] }
 0x679   : > { %v15884_v53 = vpack.c.bf16 %v5811_v19, %v5810_v44  ;;  %v16081_v21 = vpack.c.bf16 %v6615_v61, %v6614_v17  ;;  %v6618_v44 = vld [vmem:[#allocation8 + $0x3a0] sm:$0xff]  ;;  %v6619_v19 = vld [vmem:[#allocation8 + $0x3a8] sm:$0xff] }
 0x67a   : > { %vm5781_vm6 = vcmp.ge.f32.partialorder %v5765_v35, 0.0  ;;  %v5797_v33 = vmul.f32 0.33, %v5765_v35  ;;  %13365 = vmatmul.mubr.f32.gmra.mrb[18].mxu1 %v5588_v41  ;;  %v5828_v41 = vld [vmem:[#allocation7 + $0x168] sm:$0xff]  ;;  %v16087_v62 = vpack.c.bf16 %v6619_v19, %v6618_v44  ;;  %v5995_v44 = vld [vmem:[#allocation8 + $0x10] sm:$0xff] }
 0x67b   : > { %15885 = vmatprep.subr.bf16.mxu1 %v15884_v53  ;;  %v5722_v57 = vpop.permute.xlu1 %5721  ;;  %13367 = vmatprep.mubr.f32.mxu1 %v5589_v39  ;;  %v5830_v39 = vld [vmem:[#allocation7 + $0x178] sm:$0xff]  ;;  %v5994_v61 = vld [vmem:[#allocation8 + $0x8] sm:$0xff] }
 0x67c   : > { %v5767_v51 = vadd.f32 %v20085_v40, %v5722_v57  ;;  %15887 = vmatpush3.bf16.msra.mxu1 %v15884_v53  ;;  %v5813_v27 = vsel %vm5781_vm6, %v5765_v35, %v5797_v33  ;;  %v5829_v35 = vld [vmem:[#allocation7 + $0x170] sm:$0xff]  ;;  %v6621_v33 = vld [vmem:[#allocation8 + $0x3b8] sm:$0xff]  ;;  %v6622_v57 = vld [vmem:[#allocation8 + $0x3c0] sm:$0xff] }
 0x67d   : > { %v15888_v37 = vpack.c.bf16 %v5813_v27, %v5812_v16  ;;  %v6620_v53 = vld [vmem:[#allocation8 + $0x3b0] sm:$0xff]  ;;  %v6022_v16 = vld [vmem:[#allocation8 + $0xd8] sm:$0xff] }
 0x67e   : > { %vm5783_vm8 = vcmp.ge.f32.partialorder %v5767_v51, 0.0  ;;  %v5799_v23 = vmul.f32 0.33, %v5767_v51  ;;  %13368 = vmatmul.mubr.f32.gmra.mrb[20].mxu1 %v5590_v24  ;;  %v16090_v43 = vpack.c.bf16 %v6621_v33, %v6620_v53  ;;  %v6623_v24 = vld [vmem:[#allocation8 + $0x3c8] sm:$0xff]  ;;  %v6624_v27 = vld [vmem:[#allocation8 + $0x3d0] sm:$0xff]  ;;  %v6795_v53 = vld [vmem:[#allocation8 + $0x498] sm:$0xff] }
 0x67f   : > { %15889 = vmatprep.subr.bf16.mxu1 %v15888_v37  ;;  %v5730_v12 = vpop.permute.xlu1 %5729  ;;  %13402 = vmatprep.mubr.f32.mxu1 %v5825_v55  ;;  %v16093_v45 = vpack.c.bf16 %v6623_v24, %v6622_v57 }
 0x680   : > { %v5769_v3 = vadd.f32 %v20085_v40, %v5730_v12  ;;  %15891 = vmatpush3.bf16.msra.mxu1 %v15888_v37  ;;  %v5815_v63 = vsel %vm5783_vm8, %v5767_v51, %v5799_v23  ;;  %v6021_v51 = vld [vmem:[#allocation8 + $0xd0] sm:$0xff]  ;;  %v6625_v37 = vld [vmem:[#allocation8 + $0x3d8] sm:$0xff]  ;;  %v15931_v12 = vpack.c.bf16 %v6024_v9, %v6023_v1 }
 0x681   : > { %v15892_v59 = vpack.c.bf16 %v5815_v63, %v5814_v18  ;;  %v15928_v55 = vpack.c.bf16 %v6022_v16, %v6021_v51  ;;  %v16096_v23 = vpack.c.bf16 %v6625_v37, %v6624_v27  ;;  %v6025_v63 = vld [vmem:[#allocation8 + $0xf0] sm:$0xff]  ;;  %v5997_v51 = vld [vmem:[#allocation8 + $0x20] sm:$0xff]  ;;  %v5998_v16 = vld [vmem:[#allocation8 + $0x28] sm:$0xff] }
 0x682   : > { %vm5785_vm10 = vcmp.ge.f32.partialorder %v5769_v3, 0.0  ;;  %v5801_v47 = vmul.f32 0.33, %v5769_v3  ;;  %v6796_v27 = vld [vmem:[#allocation8 + $0x4a0] sm:$0xff]  ;;  %v15943_v37 = vpack.c.bf16 %v5998_v16, %v5997_v51  ;;  %v5999_v1 = vld [vmem:[#allocation8 + $0x30] sm:$0xff]  ;;  %v6000_v9 = vld [vmem:[#allocation8 + $0x38] sm:$0xff] }
 0x683   : > { %15893 = vmatprep.subr.bf16.mxu1 %v15892_v59  ;;  %v5738_v58 = vpop.permute.xlu1 %5737  ;;  %15929 = vmatpush3.bf16.msra.mxu0 %v15928_v55  ;;  %v6797_v55 = vld [vmem:[#allocation8 + $0x4a8] sm:$0xff]  ;;  %v6177_v51 = vld [vmem:[#allocation8 + $0x140] sm:$0xff] }
 0x684   : > { %v5771_v60 = vadd.f32 %v20085_v40, %v5738_v58  ;;  %15895 = vmatpush3.bf16.msra.mxu1 %v15892_v59  ;;  %v5817_v8 = vsel %vm5785_vm10, %v5769_v3, %v5801_v47  ;;  %15930 = vmatprep.subr.bf16.mxu0 %v20858_v0  ;;  %v6627_v3 = vld [vmem:[#allocation8 + $0x3e8] sm:$0xff]  ;;  %v6026_v59 = vld [vmem:[#allocation8 + $0xf8] sm:$0xff]  ;;  %v6628_v47 = vld [vmem:[#allocation8 + $0x3f0] sm:$0xff]  ;;  %vm10365_vm10 = vcmask 523264  }
 0x685   : > { %v15896_v5 = vpack.c.bf16 %v5817_v8, %v5816_v42  ;;  %v16099_v18 = vpack.c.bf16 %v6627_v3, %v6626_v14  ;;  %v15934_v52 = vpack.c.bf16 %v6026_v59, %v6025_v63  ;;  %v6629_v58 = vld [vmem:[#allocation8 + $0x3f8] sm:$0xff]  ;;  %v6798_v14 = vld [vmem:[#allocation8 + $0x4b0] sm:$0xff]  ;;  %v15946_v3 = vpack.c.bf16 %v6000_v9, %v5999_v1  ;;  %v6001_v63 = vld [vmem:[#allocation8 + $0x40] sm:$0xff] }
 0x686   : > { %vm5787_vm12 = vcmp.ge.f32.partialorder %v5771_v60, 0.0  ;;  %v5803_v20 = vmul.f32 0.33, %v5771_v60  ;;  %v16102_v42 = vpack.c.bf16 %v6629_v58, %v6628_v47  ;;  %v6002_v59 = vld [vmem:[#allocation8 + $0x48] sm:$0xff]  ;;  %v6800_v47 = vld [vmem:[#allocation8 + $0x4c0] sm:$0xff]  ;;  %v6179_v1 = vld [vmem:[#allocation8 + $0x150] sm:$0xff] }
 0x687   : > { %15897 = vmatprep.subr.bf16.mxu1 %v15896_v5  ;;  %v5746_v38 = vpop.permute.xlu1 %5745  ;;  %15932 = vmatpush3.bf16.msra.mxu0 %v15931_v12  ;;  %v6799_v12 = vld [vmem:[#allocation8 + $0x4b8] sm:$0xff]  ;;  %v15949_v58 = vpack.c.bf16 %v6002_v59, %v6001_v63  ;;  %v6178_v16 = vld [vmem:[#allocation8 + $0x148] sm:$0xff]  ;;  %v6181_v63 = vld [vmem:[#allocation8 + $0x160] sm:$0xff] }
 0x688   : > { %v5773_v4 = vadd.f32 %v20085_v40, %v5746_v38  ;;  %15899 = vmatpush3.bf16.msra.mxu1 %v15896_v5  ;;  %v5819_v48 = vsel %vm5787_vm12, %v5771_v60, %v5803_v20  ;;  %15933 = vmatprep.subr.bf16.mxu0 %v20858_v0  ;;  %v6180_v9 = vld [vmem:[#allocation8 + $0x158] sm:$0xff]  ;;  %v6182_v59 = vld [vmem:[#allocation8 + $0x168] sm:$0xff]  ;;  %vm17731_vm12 = vmmov 1  }
 0x689   : > { %v15900_v28 = vpack.c.bf16 %v5819_v48, %v5818_v30  ;;  %vm17102_vm13 = vmpackc.low %vm10449_vm11, %vm17731_vm12 }
 0x68a   : > { %vm5789_vm14 = vcmp.ge.f32.partialorder %v5773_v4, 0.0  ;;  %v5805_v54 = vmul.f32 0.33, %v5773_v4 }
 0x68b   : > { %15901 = vmatprep.subr.bf16.mxu1 %v15900_v28  ;;  %v5754_v56 = vpop.permute.xlu1 %5753  ;;  %15935 = vmatpush3.bf16.msra.mxu0 %v15934_v52  ;;  %v6801_v52 = vld [vmem:[#allocation8 + $0x4c8] sm:$0xff] }
 0x68c   : > { %v5775_v22 = vadd.f32 %v20085_v40, %v5754_v56  ;;  %15903 = vmatpush3.bf16.msra.mxu1 %v15900_v28  ;;  %v5821_v50 = vsel %vm5789_vm14, %v5773_v4, %v5805_v54  ;;  %v6616_v40 = vld [vmem:[#allocation8 + $0x390] sm:$0xff]  ;;  %15936 = vmatprep.subr.bf16.mxu0 %v20858_v0 }
 0x68d   : > { %v15904_v32 = vpack.c.bf16 %v5821_v50, %v5820_v13  ;;  %v16084_v36 = vpack.c.bf16 %v6617_v25, %v6616_v40 }
 0x68e   : > { %vm5791_vm1 = vcmp.ge.f32.partialorder %v5775_v22, 0.0  ;;  %v5807_v11 = vmul.f32 0.33, %v5775_v22  ;;  %v5935_v60 = vpop.permute.xlu0 %5934 }
 0x68f   : > { %15905 = vmatprep.subr.bf16.mxu1 %v15904_v32 }
 0x690   : > { %15907 = vmatpush3.bf16.msra.mxu1 %v15904_v32  ;;  %v5823_v49 = vsel %vm5791_vm1, %v5775_v22, %v5807_v11  ;;  %v5940_v15 = vpop.permute.xlu1 %5939 }
 0x691   : > { %v15908_v2 = vpack.c.bf16 %v5823_v49, %v5822_v10  ;;  %v5993_v10 = vld [vmem:[#allocation8] sm:$0xff] }
 0x692   : > { %v5950_v38 = vpop.permute.xlu0 %5949 }
 0x693   : > { %15909 = vmatprep.subr.bf16.mxu1 %v15908_v2 }
 0x694   : > { %15911 = vmatpush3.bf16.msra.mxu1 %v15908_v2  ;;  %v5945_v20 = vpop.permute.xlu1 %5944 }
 0x695   : > { %16080 = vmatprep.subr.bf16.mxu1 %v20858_v0 }
 0x697   : > { %13403 = vmatmul.mubr.f32.vlgmr.msra.gmra.mrb[16].mxu1 %v5826_v6  ;;  %v5960_v50 = vpop.permute.xlu0 %5959  ;;  %v6792_v6 = vld [vmem:[#allocation8 + $0x480] sm:$0xff] }
 0x698   : > { %13405 = vmatprep.mubr.f32.mxu1 %v5827_v7  ;;  %16082 = vmatpush3.bf16.msra.mxu1 %v16081_v21  ;;  %v5955_v13 = vpop.permute.xlu1 %5954  ;;  %v6793_v21 = vld [vmem:[#allocation8 + $0x488] sm:$0xff] }
 0x699   : > { %16083 = vmatprep.subr.bf16.mxu1 %v20858_v0 }
 0x69b   : > { %13406 = vmatmul.mubr.f32.gmra.mrb[18].mxu1 %v5828_v41 }
 0x69c   : > { %13408 = vmatprep.mubr.f32.mxu1 %v5829_v35  ;;  %16085 = vmatpush3.bf16.msra.mxu1 %v16084_v36  ;;  %v15937_v36 = vpack.c.bf16 %v5994_v61, %v5993_v10  ;;  %v16129_v35 = vpack.c.bf16 %v6793_v21, %v6792_v6  ;;  %v6971_v10 = vld [vmem:[#allocation8 + $0x588] sm:$0xff]  ;;  %v6172_v61 = vld [vmem:[#allocation8 + $0x118] sm:$0xff]  ;;  %v6972_v6 = vld [vmem:[#allocation8 + $0x590] sm:$0xff] }
 0x69d   : > { %16086 = vmatprep.subr.bf16.mxu1 %v20858_v0  ;;  %v6973_v21 = vld [vmem:[#allocation8 + $0x598] sm:$0xff] }
 0x69f   : > { %13409 = vmatmul.mubr.f32.gmra.mrb[20].mxu1 %v5830_v39  ;;  %v5996_v39 = vld [vmem:[#allocation8 + $0x18] sm:$0xff] }
 0x6a0   : > { %16088 = vmatpush3.bf16.msra.mxu1 %v16087_v62  ;;  %13688 = vmatprep.mubr.msk.f32.mxu1 %vm17721_vm0, %v20860_v46  ;;  %v6794_v62 = vld [vmem:[#allocation8 + $0x490] sm:$0xff]  ;;  %v15940_v24 = vpack.c.bf16 %v5996_v39, %v5995_v44  ;;  %v6974_v44 = vld [vmem:[#allocation8 + $0x5a0] sm:$0xff] }
 0x6a1   : > { %16089 = vmatprep.subr.bf16.mxu1 %v20858_v0 }
 0x6a4   : > { %16091 = vmatpush3.bf16.msra.mxu1 %v16090_v43 }
 0x6a5   : > { %16092 = vmatprep.subr.bf16.mxu1 %v20858_v0 }
 0x6a8   : > { %16094 = vmatpush3.bf16.msra.mxu1 %v16093_v45  ;;  %v16132_v45 = vpack.c.bf16 %v6795_v53, %v6794_v62  ;;  %v6175_v53 = vld [vmem:[#allocation8 + $0x130] sm:$0xff] }
 0x6a9   : > { %16095 = vmatprep.subr.bf16.mxu1 %v20858_v0 }
 0x6ac   : > { %16097 = vmatpush3.bf16.msra.mxu1 %v16096_v23  ;;  %v16135_v23 = vpack.c.bf16 %v6797_v55, %v6796_v27  ;;  %v6978_v27 = vld [vmem:[#allocation8 + $0x5c0] sm:$0xff]  ;;  %v6979_v55 = vld [vmem:[#allocation8 + $0x5c8] sm:$0xff] }
 0x6ad   : > { %16098 = vmatprep.subr.bf16.mxu1 %v20858_v0 }
 0x6b0   : > { %16100 = vmatpush3.bf16.msra.mxu1 %v16099_v18  ;;  %v16138_v18 = vpack.c.bf16 %v6799_v12, %v6798_v14  ;;  %v6980_v14 = vld [vmem:[#allocation8 + $0x5d0] sm:$0xff]  ;;  %v6981_v12 = vld [vmem:[#allocation8 + $0x5d8] sm:$0xff] }
 0x6b1   : > { %16101 = vmatprep.subr.bf16.mxu1 %v20858_v0 }
 0x6b4   : > { %16103 = vmatpush3.bf16.msra.mxu1 %v16102_v42  ;;  %v16141_v42 = vpack.c.bf16 %v6801_v52, %v6800_v47  ;;  %v6982_v47 = vld [vmem:[#allocation8 + $0x5e0] sm:$0xff]  ;;  %v6983_v52 = vld [vmem:[#allocation8 + $0x5e8] sm:$0xff] }
 0x6b5   : > { %16128 = vmatprep.subr.bf16.mxu1 %v20858_v0 }
 0x76a   : > { %v13404_v8 = vpop.f32.mrb[16].mxu1 }
 0x76b   : > { %v5963_v31 = vadd.f32 %v13404_v8, %v5940_v15  ;;  %v5897_v5 = vpop.f32.mrb[17].mxu1  ;;  %v6003_v15 = vld [vmem:[#allocation8 + $0x50] sm:$0xff] }
 0x76c   : > { %v5962_v30 = vadd.f32 %v5935_v60, %v5897_v5  ;;  %v6004_v60 = vld [vmem:[#allocation8 + $0x58] sm:$0xff]  ;;  %v6802_v8 = vld [vmem:[#allocation8 + $0x4d0] sm:$0xff] }
 0x76d   : > { %vm5969_vm2 = vcmp.ge.f32.partialorder %v5963_v31, 0.0  ;;  %v5975_v29 = vmul.f32 0.33, %v5963_v31  ;;  %v15952_v5 = vpack.c.bf16 %v6004_v60, %v6003_v15  ;;  %v6183_v15 = vld [vmem:[#allocation8 + $0x170] sm:$0xff]  ;;  %v6184_v60 = vld [vmem:[#allocation8 + $0x178] sm:$0xff] }
 0x76e   : > { %vm5968_vm3 = vcmp.ge.f32.partialorder %v5962_v30, 0.0  ;;  %v5974_v26 = vmul.f32 0.33, %v5962_v30  ;;  %v13407_v4 = vpop.f32.mrb[18].mxu1 }
 0x76f   : > { %v5981_v48 = vsel %vm5969_vm2, %v5963_v31, %v5975_v29  ;;  %v5965_v28 = vadd.f32 %v13407_v4, %v5950_v38  ;;  %v5907_v54 = vpop.f32.mrb[19].mxu1  ;;  %v6803_v31 = vld [vmem:[#allocation8 + $0x4d8] sm:$0xff]  ;;  %v6005_v38 = vld [vmem:[#allocation8 + $0x60] sm:$0xff] }
 0x770   : > { %5987 = vst [vmem:[#allocation2 + $0x8] sm:$0xff] %v5981_v48  ;;  %v5980_v56 = vsel %vm5968_vm3, %v5962_v30, %v5974_v26  ;;  %v5964_v34 = vadd.f32 %v5945_v20, %v5907_v54  ;;  %v16144_v20 = vpack.c.bf16 %v6803_v31, %v6802_v8  ;;  %v6006_v30 = vld [vmem:[#allocation8 + $0x68] sm:$0xff]  ;;  %v6804_v29 = vld [vmem:[#allocation8 + $0x4e0] sm:$0xff]  ;;  %v6008_v54 = vld [vmem:[#allocation8 + $0x78] sm:$0xff] }
 0x771   : > { %5986 = vst [vmem:[#allocation2] sm:$0xff] %v5980_v56  ;;  %vm5971_vm4 = vcmp.ge.f32.partialorder %v5965_v28, 0.0  ;;  %v5977_v22 = vmul.f32 0.33, %v5965_v28  ;;  %v6805_v26 = vld [vmem:[#allocation8 + $0x4e8] sm:$0xff]  ;;  %v15955_v4 = vpack.c.bf16 %v6006_v30, %v6005_v38  ;;  %v6806_v56 = vld [vmem:[#allocation8 + $0x4f0] sm:$0xff] }
 0x772   : > { %vm5970_vm5 = vcmp.ge.f32.partialorder %v5964_v34, 0.0  ;;  %v5976_v32 = vmul.f32 0.33, %v5964_v34  ;;  %v13410_v11 = vpop.f32.mrb[20].mxu1  ;;  %v16147_v48 = vpack.c.bf16 %v6805_v26, %v6804_v29  ;;  %v6984_v8 = vld [vmem:[#allocation8 + $0x5f0] sm:$0xff]  ;;  %v6985_v31 = vld [vmem:[#allocation8 + $0x5f8] sm:$0xff] }
 0x773   : > { %v5983_v49 = vsel %vm5971_vm4, %v5965_v28, %v5977_v22  ;;  %v5967_v2 = vadd.f32 %v13410_v11, %v5960_v50  ;;  %v5917_v17 = vpop.f32.mrb[21].mxu1  ;;  %v6007_v28 = vld [vmem:[#allocation8 + $0x70] sm:$0xff]  ;;  %v6169_v50 = vld [vmem:[#allocation8 + $0x100] sm:$0xff]  ;;  %v6259_v30 = vld [vmem:[#allocation8 + $0x188] sm:$0xff] }
 0x774   : > { %5989 = vst [vmem:[#allocation2 + $0x18] sm:$0xff] %v5983_v49  ;;  %v5982_v7 = vsel %vm5970_vm5, %v5964_v34, %v5976_v32  ;;  %v5966_v40 = vadd.f32 %v5955_v13, %v5917_v17  ;;  %v6807_v34 = vld [vmem:[#allocation8 + $0x4f8] sm:$0xff]  ;;  %v15958_v22 = vpack.c.bf16 %v6008_v54, %v6007_v28  ;;  %v6170_v32 = vld [vmem:[#allocation8 + $0x108] sm:$0xff]  ;;  %v6970_v11 = vld [vmem:[#allocation8 + $0x580] sm:$0xff] }
 0x775   : > { %5988 = vst [vmem:[#allocation2 + $0x10] sm:$0xff] %v5982_v7  ;;  %vm5973_vm6 = vcmp.ge.f32.partialorder %v5967_v2, 0.0  ;;  %v5979_v25 = vmul.f32 0.33, %v5967_v2  ;;  %v16150_v13 = vpack.c.bf16 %v6807_v34, %v6806_v56  ;;  %v15961_v49 = vpack.c.bf16 %v6170_v32, %v6169_v50  ;;  %v6171_v17 = vld [vmem:[#allocation8 + $0x110] sm:$0xff]  ;;  %v6258_v38 = vld [vmem:[#allocation8 + $0x180] sm:$0xff] }
 0x776   : > { %vm5972_vm7 = vcmp.ge.f32.partialorder %v5966_v40, 0.0  ;;  %v5978_v41 = vmul.f32 0.33, %v5966_v40  ;;  %v7148_v29 = vld [vmem:[#allocation8 + $0x680] sm:$0xff]  ;;  %v7149_v26 = vld [vmem:[#allocation8 + $0x688] sm:$0xff]  ;;  %v6260_v28 = vld [vmem:[#allocation8 + $0x190] sm:$0xff] }
 0x777   : > { %v5985_v19 = vsel %vm5973_vm6, %v5967_v2, %v5979_v25  ;;  %v16177_v2 = vpack.c.bf16 %v6971_v10, %v6970_v11  ;;  %v15964_v25 = vpack.c.bf16 %v6172_v61, %v6171_v17  ;;  %v6261_v54 = vld [vmem:[#allocation8 + $0x198] sm:$0xff]  ;;  %v7150_v56 = vld [vmem:[#allocation8 + $0x690] sm:$0xff]  ;;  %v6262_v11 = vld [vmem:[#allocation8 + $0x1a0] sm:$0xff] }
 0x778   : > { %5991 = vst [vmem:[#allocation2 + $0x28] sm:$0xff] %v5985_v19  ;;  %v5984_v33 = vsel %vm5972_vm7, %v5966_v40, %v5978_v41  ;;  %v6009_v43 = vld [vmem:[#allocation2 + $0x1] sm:$0x1]  ;;  %v6612_v57 = vld [vmem:[#allocation2 + $0x7] sm:$0x1]  ;;  %v16180_v41 = vpack.c.bf16 %v6973_v21, %v6972_v6  ;;  %v7151_v34 = vld [vmem:[#allocation8 + $0x698] sm:$0xff]  ;;  %v15988_v50 = vpack.c.bf16 %v6261_v54, %v6260_v28 }
 0x779   : > { %5990 = vst [vmem:[#allocation2 + $0x20] sm:$0xff] %v5984_v33  ;;  %13444 = vmatmul.mubr.f32.vlgmr.msra.gmra.mrb[34].mxu0 %v6009_v43  ;;  %13689 = vmatmul.mubr.f32.vlgmr.msra.gmra.mrb[22].mxu1 %v6612_v57  ;;  %v5992_v7 = vld [vmem:[#allocation2] sm:$0x1]  ;;  %v6790_v40 = vld [vmem:[#allocation2 + $0x9] sm:$0x1]  ;;  %v6176_v33 = vld [vmem:[#allocation8 + $0x138] sm:$0xff]  ;;  %v16228_v32 = vpack.c.bf16 %v7151_v34, %v7150_v56 }
 0x77a   : > { %15938 = vmatpush3.bf16.msra.mxu0 %v15937_v36  ;;  %16130 = vmatpush3.bf16.msra.mxu1 %v16129_v35  ;;  %v6173_v36 = vld [vmem:[#allocation8 + $0x120] sm:$0xff]  ;;  %v6174_v35 = vld [vmem:[#allocation8 + $0x128] sm:$0xff]  ;;  %v6976_v43 = vld [vmem:[#allocation8 + $0x5b0] sm:$0xff] }
 0x77b   : > { %15939 = vmatprep.subr.bf16.mxu0 %v20858_v0  ;;  %16131 = vmatprep.subr.bf16.mxu1 %v20858_v0  ;;  %v6975_v19 = vld [vmem:[#allocation8 + $0x5a8] sm:$0xff]  ;;  %v15967_v39 = vpack.c.bf16 %v6174_v35, %v6173_v36  ;;  %v6977_v57 = vld [vmem:[#allocation8 + $0x5b8] sm:$0xff]  ;;  %v6264_v6 = vld [vmem:[#allocation8 + $0x1b0] sm:$0xff] }
 0x77c   : > { %13478 = vmatprep.mubr.msk.f32.mxu0 %vm17721_vm0, %v20860_v46  ;;  %13758 = vmatprep.mubr.msk.f32.mxu1 %vm17721_vm0, %v20860_v46  ;;  %v16183_v62 = vpack.c.bf16 %v6975_v19, %v6974_v44  ;;  %v6263_v10 = vld [vmem:[#allocation8 + $0x1a8] sm:$0xff]  ;;  %v6265_v21 = vld [vmem:[#allocation8 + $0x1b8] sm:$0xff]  ;;  %v6266_v36 = vld [vmem:[#allocation8 + $0x1c0] sm:$0xff] }
 0x77d   : > { %v15991_v17 = vpack.c.bf16 %v6263_v10, %v6262_v11  ;;  %v6267_v35 = vld [vmem:[#allocation8 + $0x1c8] sm:$0xff]  ;;  %v7156_v44 = vld [vmem:[#allocation8 + $0x6c0] sm:$0xff]  ;;  %v6353_v56 = vld [vmem:[#allocation8 + $0x230] sm:$0xff] }
 0x77e   : > { %15941 = vmatpush3.bf16.msra.mxu0 %v15940_v24  ;;  %16133 = vmatpush3.bf16.msra.mxu1 %v16132_v45  ;;  %v15970_v24 = vpack.c.bf16 %v6176_v33, %v6175_v53  ;;  %v16186_v45 = vpack.c.bf16 %v6977_v57, %v6976_v43  ;;  %v7157_v19 = vld [vmem:[#allocation8 + $0x6c8] sm:$0xff]  ;;  %v6268_v53 = vld [vmem:[#allocation8 + $0x1d0] sm:$0xff]  ;;  %v6269_v33 = vld [vmem:[#allocation8 + $0x1d8] sm:$0xff] }
 0x77f   : > { %15942 = vmatprep.subr.bf16.mxu0 %v20858_v0  ;;  %16134 = vmatprep.subr.bf16.mxu1 %v20858_v0  ;;  %v7158_v43 = vld [vmem:[#allocation8 + $0x6d0] sm:$0xff]  ;;  %v7159_v57 = vld [vmem:[#allocation8 + $0x6d8] sm:$0xff]  ;;  %v6355_v11 = vld [vmem:[#allocation8 + $0x240] sm:$0xff] }
 0x780   : > { %v6354_v34 = vld [vmem:[#allocation8 + $0x238] sm:$0xff]  ;;  %v6356_v10 = vld [vmem:[#allocation8 + $0x248] sm:$0xff] }
 0x782   : > { %15944 = vmatpush3.bf16.msra.mxu0 %v15943_v37  ;;  %16136 = vmatpush3.bf16.msra.mxu1 %v16135_v23  ;;  %v15973_v37 = vpack.c.bf16 %v6178_v16, %v6177_v51  ;;  %v16189_v23 = vpack.c.bf16 %v6979_v55, %v6978_v27  ;;  %v6270_v51 = vld [vmem:[#allocation8 + $0x1e0] sm:$0xff]  ;;  %v6271_v16 = vld [vmem:[#allocation8 + $0x1e8] sm:$0xff] }
 0x783   : > { %15945 = vmatprep.subr.bf16.mxu0 %v20858_v0  ;;  %16137 = vmatprep.subr.bf16.mxu1 %v20858_v0  ;;  %v7160_v27 = vld [vmem:[#allocation8 + $0x6e0] sm:$0xff]  ;;  %v7161_v55 = vld [vmem:[#allocation8 + $0x6e8] sm:$0xff] }
 0x786   : > { %15947 = vmatpush3.bf16.msra.mxu0 %v15946_v3  ;;  %16139 = vmatpush3.bf16.msra.mxu1 %v16138_v18  ;;  %v15976_v3 = vpack.c.bf16 %v6180_v9, %v6179_v1  ;;  %v16192_v18 = vpack.c.bf16 %v6981_v12, %v6980_v14  ;;  %v6272_v1 = vld [vmem:[#allocation8 + $0x1f0] sm:$0xff]  ;;  %v6273_v9 = vld [vmem:[#allocation8 + $0x1f8] sm:$0xff] }
 0x787   : > { %15948 = vmatprep.subr.bf16.mxu0 %v20858_v0  ;;  %16140 = vmatprep.subr.bf16.mxu1 %v20858_v0  ;;  %v7162_v14 = vld [vmem:[#allocation8 + $0x6f0] sm:$0xff]  ;;  %v7163_v12 = vld [vmem:[#allocation8 + $0x6f8] sm:$0xff] }
 0x78a   : > { %15950 = vmatpush3.bf16.msra.mxu0 %v15949_v58  ;;  %16142 = vmatpush3.bf16.msra.mxu1 %v16141_v42  ;;  %v15979_v58 = vpack.c.bf16 %v6182_v59, %v6181_v63  ;;  %v16195_v42 = vpack.c.bf16 %v6983_v52, %v6982_v47  ;;  %v6347_v63 = vld [vmem:[#allocation8 + $0x200] sm:$0xff]  ;;  %v6348_v59 = vld [vmem:[#allocation8 + $0x208] sm:$0xff] }
 0x78b   : > { %15951 = vmatprep.subr.bf16.mxu0 %v20858_v0  ;;  %16143 = vmatprep.subr.bf16.mxu1 %v20858_v0  ;;  %v7326_v47 = vld [vmem:[#allocation8 + $0x780] sm:$0xff]  ;;  %v7327_v52 = vld [vmem:[#allocation8 + $0x788] sm:$0xff] }
 0x78e   : > { %15953 = vmatpush3.bf16.msra.mxu0 %v15952_v5  ;;  %16145 = vmatpush3.bf16.msra.mxu1 %v16144_v20  ;;  %v15982_v5 = vpack.c.bf16 %v6184_v60, %v6183_v15  ;;  %v16198_v20 = vpack.c.bf16 %v6985_v31, %v6984_v8  ;;  %v6349_v15 = vld [vmem:[#allocation8 + $0x210] sm:$0xff]  ;;  %v6350_v60 = vld [vmem:[#allocation8 + $0x218] sm:$0xff] }
 0x78f   : > { %15954 = vmatprep.subr.bf16.mxu0 %v20858_v0  ;;  %16146 = vmatprep.subr.bf16.mxu1 %v20858_v0  ;;  %v7328_v8 = vld [vmem:[#allocation8 + $0x790] sm:$0xff]  ;;  %v7329_v31 = vld [vmem:[#allocation8 + $0x798] sm:$0xff] }
 0x792   : > { %15956 = vmatpush3.bf16.msra.mxu0 %v15955_v4  ;;  %16148 = vmatpush3.bf16.msra.mxu1 %v16147_v48  ;;  %v15985_v4 = vpack.c.bf16 %v6259_v30, %v6258_v38  ;;  %v16225_v48 = vpack.c.bf16 %v7149_v26, %v7148_v29  ;;  %v16012_v38 = vpack.c.bf16 %v6350_v60, %v6349_v15  ;;  %v6351_v29 = vld [vmem:[#allocation8 + $0x220] sm:$0xff]  ;;  %v6352_v26 = vld [vmem:[#allocation8 + $0x228] sm:$0xff] }
 0x793   : > { %15957 = vmatprep.subr.bf16.mxu0 %v20858_v0  ;;  %16149 = vmatprep.subr.bf16.mxu1 %v20858_v0  ;;  %v16276_v30 = vpack.c.bf16 %v7329_v31, %v7328_v8  ;;  %v16015_v28 = vpack.c.bf16 %v6352_v26, %v6351_v29  ;;  %v6442_v8 = vld [vmem:[#allocation8 + $0x2b0] sm:$0xff]  ;;  %v6443_v31 = vld [vmem:[#allocation8 + $0x2b8] sm:$0xff]  ;;  %v6444_v29 = vld [vmem:[#allocation8 + $0x2c0] sm:$0xff] }
 0x794   : > { %v6445_v26 = vld [vmem:[#allocation8 + $0x2c8] sm:$0xff] }
 0x796   : > { %15959 = vmatpush3.bf16.msra.mxu0 %v15958_v22  ;;  %16151 = vmatpush3.bf16.msra.mxu1 %v16150_v13  ;;  %v6167_v22 = vld [vmem:[#allocation2 + $0x2] sm:$0x1]  ;;  %v6968_v13 = vld [vmem:[#allocation2 + $0xb] sm:$0x1] }
 0x797   : > { %15960 = vmatprep.subr.bf16.mxu0 %v20858_v0  ;;  %16176 = vmatprep.subr.bf16.mxu1 %v20858_v0 }
 0x799   : > { %13479 = vmatmul.mubr.f32.vlgmr.msra.gmra.mrb[36].mxu0 %v5992_v7  ;;  %13759 = vmatmul.mubr.f32.vlgmr.msra.gmra.mrb[24].mxu1 %v6790_v40  ;;  %v7154_v7 = vld [vmem:[#allocation8 + $0x6b0] sm:$0xff]  ;;  %v7155_v40 = vld [vmem:[#allocation8 + $0x6b8] sm:$0xff] }
 0x79a   : > { %15962 = vmatpush3.bf16.msra.mxu0 %v15961_v49  ;;  %16178 = vmatpush3.bf16.msra.mxu1 %v16177_v2  ;;  %v7152_v49 = vld [vmem:[#allocation8 + $0x6a0] sm:$0xff]  ;;  %v7153_v2 = vld [vmem:[#allocation8 + $0x6a8] sm:$0xff] }
 0x79b   : > { %15963 = vmatprep.subr.bf16.mxu0 %v20858_v0  ;;  %16179 = vmatprep.subr.bf16.mxu1 %v20858_v0  ;;  %v16231_v61 = vpack.c.bf16 %v7153_v2, %v7152_v49  ;;  %v7334_v49 = vld [vmem:[#allocation8 + $0x7c0] sm:$0xff]  ;;  %v7335_v2 = vld [vmem:[#allocation8 + $0x7c8] sm:$0xff] }
 0x79c   : > { %13513 = vmatprep.mubr.msk.f32.mxu0 %vm17721_vm0, %v20860_v46  ;;  %13828 = vmatprep.mubr.msk.f32.mxu1 %vm17721_vm0, %v20860_v46 }
 0x79e   : > { %15965 = vmatpush3.bf16.msra.mxu0 %v15964_v25  ;;  %16181 = vmatpush3.bf16.msra.mxu1 %v16180_v41  ;;  %v15994_v25 = vpack.c.bf16 %v6265_v21, %v6264_v6  ;;  %v16234_v41 = vpack.c.bf16 %v7155_v40, %v7154_v7  ;;  %v6357_v6 = vld [vmem:[#allocation8 + $0x250] sm:$0xff]  ;;  %v6358_v21 = vld [vmem:[#allocation8 + $0x258] sm:$0xff] }
 0x79f   : > { %15966 = vmatprep.subr.bf16.mxu0 %v20858_v0  ;;  %16182 = vmatprep.subr.bf16.mxu1 %v20858_v0  ;;  %v7336_v7 = vld [vmem:[#allocation8 + $0x7d0] sm:$0xff]  ;;  %v7337_v40 = vld [vmem:[#allocation8 + $0x7d8] sm:$0xff] }
 0x7a2   : > { %15968 = vmatpush3.bf16.msra.mxu0 %v15967_v39  ;;  %16184 = vmatpush3.bf16.msra.mxu1 %v16183_v62  ;;  %v15997_v39 = vpack.c.bf16 %v6267_v35, %v6266_v36  ;;  %v16237_v62 = vpack.c.bf16 %v7157_v19, %v7156_v44  ;;  %v6359_v36 = vld [vmem:[#allocation8 + $0x260] sm:$0xff]  ;;  %v6360_v35 = vld [vmem:[#allocation8 + $0x268] sm:$0xff] }
 0x7a3   : > { %15969 = vmatprep.subr.bf16.mxu0 %v20858_v0  ;;  %16185 = vmatprep.subr.bf16.mxu1 %v20858_v0  ;;  %v7338_v44 = vld [vmem:[#allocation8 + $0x7e0] sm:$0xff]  ;;  %v7339_v19 = vld [vmem:[#allocation8 + $0x7e8] sm:$0xff] }
 0x7a6   : > { %15971 = vmatpush3.bf16.msra.mxu0 %v15970_v24  ;;  %16187 = vmatpush3.bf16.msra.mxu1 %v16186_v45  ;;  %v16000_v24 = vpack.c.bf16 %v6269_v33, %v6268_v53  ;;  %v16240_v45 = vpack.c.bf16 %v7159_v57, %v7158_v43  ;;  %v6361_v53 = vld [vmem:[#allocation8 + $0x270] sm:$0xff]  ;;  %v6362_v33 = vld [vmem:[#allocation8 + $0x278] sm:$0xff] }
 0x7a7   : > { %15972 = vmatprep.subr.bf16.mxu0 %v20858_v0  ;;  %16188 = vmatprep.subr.bf16.mxu1 %v20858_v0  ;;  %v7340_v43 = vld [vmem:[#allocation8 + $0x7f0] sm:$0xff]  ;;  %v7341_v57 = vld [vmem:[#allocation8 + $0x7f8] sm:$0xff] }
 0x7aa   : > { %15974 = vmatpush3.bf16.msra.mxu0 %v15973_v37  ;;  %16190 = vmatpush3.bf16.msra.mxu1 %v16189_v23  ;;  %v16003_v37 = vpack.c.bf16 %v6271_v16, %v6270_v51  ;;  %v16243_v23 = vpack.c.bf16 %v7161_v55, %v7160_v27  ;;  %v6436_v51 = vld [vmem:[#allocation8 + $0x280] sm:$0xff]  ;;  %v6437_v16 = vld [vmem:[#allocation8 + $0x288] sm:$0xff] }
 0x7ab   : > { %15975 = vmatprep.subr.bf16.mxu0 %v20858_v0  ;;  %16191 = vmatprep.subr.bf16.mxu1 %v20858_v0  ;;  %v7504_v27 = vld [vmem:[#allocation8 + $0x880] sm:$0xff]  ;;  %v7505_v55 = vld [vmem:[#allocation8 + $0x888] sm:$0xff] }
 0x7ae   : > { %15977 = vmatpush3.bf16.msra.mxu0 %v15976_v3  ;;  %16193 = vmatpush3.bf16.msra.mxu1 %v16192_v18  ;;  %v16006_v3 = vpack.c.bf16 %v6273_v9, %v6272_v1  ;;  %v16246_v18 = vpack.c.bf16 %v7163_v12, %v7162_v14  ;;  %v6438_v1 = vld [vmem:[#allocation8 + $0x290] sm:$0xff]  ;;  %v6439_v9 = vld [vmem:[#allocation8 + $0x298] sm:$0xff] }
 0x7af   : > { %15978 = vmatprep.subr.bf16.mxu0 %v20858_v0  ;;  %16194 = vmatprep.subr.bf16.mxu1 %v20858_v0  ;;  %v7506_v14 = vld [vmem:[#allocation8 + $0x890] sm:$0xff]  ;;  %v7507_v12 = vld [vmem:[#allocation8 + $0x898] sm:$0xff] }
 0x7b2   : > { %15980 = vmatpush3.bf16.msra.mxu0 %v15979_v58  ;;  %16196 = vmatpush3.bf16.msra.mxu1 %v16195_v42  ;;  %v16009_v58 = vpack.c.bf16 %v6348_v59, %v6347_v63  ;;  %v16273_v42 = vpack.c.bf16 %v7327_v52, %v7326_v47  ;;  %v16036_v63 = vpack.c.bf16 %v6439_v9, %v6438_v1  ;;  %v6440_v47 = vld [vmem:[#allocation8 + $0x2a0] sm:$0xff]  ;;  %v6441_v52 = vld [vmem:[#allocation8 + $0x2a8] sm:$0xff] }
 0x7b3   : > { %15981 = vmatprep.subr.bf16.mxu0 %v20858_v0  ;;  %16197 = vmatprep.subr.bf16.mxu1 %v20858_v0  ;;  %v16324_v59 = vpack.c.bf16 %v7507_v12, %v7506_v14  ;;  %v16039_v15 = vpack.c.bf16 %v6441_v52, %v6440_v47  ;;  %v6531_v14 = vld [vmem:[#allocation8 + $0x330] sm:$0xff]  ;;  %v6532_v12 = vld [vmem:[#allocation8 + $0x338] sm:$0xff]  ;;  %v6533_v47 = vld [vmem:[#allocation8 + $0x340] sm:$0xff] }
 0x7b4   : > { %v6534_v52 = vld [vmem:[#allocation8 + $0x348] sm:$0xff] }
 0x7b6   : > { %15983 = vmatpush3.bf16.msra.mxu0 %v15982_v5  ;;  %16199 = vmatpush3.bf16.msra.mxu1 %v16198_v20  ;;  %v6256_v5 = vld [vmem:[#allocation2 + $0x3] sm:$0x1]  ;;  %v7146_v20 = vld [vmem:[#allocation2 + $0xd] sm:$0x1] }
 0x7b7   : > { %15984 = vmatprep.subr.bf16.mxu0 %v20858_v0  ;;  %16224 = vmatprep.subr.bf16.mxu1 %v20858_v0 }
 0x7b9   : > { %13514 = vmatmul.mubr.f32.vlgmr.msra.gmra.mrb[38].mxu0 %v6167_v22  ;;  %13829 = vmatmul.mubr.f32.vlgmr.msra.gmra.mrb[26].mxu1 %v6968_v13  ;;  %v7332_v22 = vld [vmem:[#allocation8 + $0x7b0] sm:$0xff]  ;;  %v7333_v13 = vld [vmem:[#allocation8 + $0x7b8] sm:$0xff] }
 0x7ba   : > { %15986 = vmatpush3.bf16.msra.mxu0 %v15985_v4  ;;  %16226 = vmatpush3.bf16.msra.mxu1 %v16225_v48  ;;  %v7330_v4 = vld [vmem:[#allocation8 + $0x7a0] sm:$0xff]  ;;  %v7331_v48 = vld [vmem:[#allocation8 + $0x7a8] sm:$0xff] }
 0x7bb   : > { %15987 = vmatprep.subr.bf16.mxu0 %v20858_v0  ;;  %16227 = vmatprep.subr.bf16.mxu1 %v20858_v0  ;;  %v16279_v54 = vpack.c.bf16 %v7331_v48, %v7330_v4  ;;  %v7512_v4 = vld [vmem:[#allocation8 + $0x8c0] sm:$0xff]  ;;  %v7513_v48 = vld [vmem:[#allocation8 + $0x8c8] sm:$0xff] }
 0x7bc   : > { %13548 = vmatprep.mubr.msk.f32.mxu0 %vm17721_vm0, %v20860_v46  ;;  %13898 = vmatprep.mubr.msk.f32.mxu1 %vm17721_vm0, %v20860_v46 }
 0x7be   : > { %15989 = vmatpush3.bf16.msra.mxu0 %v15988_v50  ;;  %16229 = vmatpush3.bf16.msra.mxu1 %v16228_v32  ;;  %v16018_v50 = vpack.c.bf16 %v6354_v34, %v6353_v56  ;;  %v16282_v32 = vpack.c.bf16 %v7333_v13, %v7332_v22  ;;  %v6446_v56 = vld [vmem:[#allocation8 + $0x2d0] sm:$0xff]  ;;  %v6447_v34 = vld [vmem:[#allocation8 + $0x2d8] sm:$0xff] }
 0x7bf   : > { %15990 = vmatprep.subr.bf16.mxu0 %v20858_v0  ;;  %16230 = vmatprep.subr.bf16.mxu1 %v20858_v0  ;;  %v7514_v22 = vld [vmem:[#allocation8 + $0x8d0] sm:$0xff]  ;;  %v7515_v13 = vld [vmem:[#allocation8 + $0x8d8] sm:$0xff] }
 0x7c2   : > { %15992 = vmatpush3.bf16.msra.mxu0 %v15991_v17  ;;  %16232 = vmatpush3.bf16.msra.mxu1 %v16231_v61  ;;  %v16021_v17 = vpack.c.bf16 %v6356_v10, %v6355_v11  ;;  %v16285_v61 = vpack.c.bf16 %v7335_v2, %v7334_v49  ;;  %v6448_v11 = vld [vmem:[#allocation8 + $0x2e0] sm:$0xff]  ;;  %v6449_v10 = vld [vmem:[#allocation8 + $0x2e8] sm:$0xff] }
 0x7c3   : > { %15993 = vmatprep.subr.bf16.mxu0 %v20858_v0  ;;  %16233 = vmatprep.subr.bf16.mxu1 %v20858_v0  ;;  %v7516_v49 = vld [vmem:[#allocation8 + $0x8e0] sm:$0xff]  ;;  %v7517_v2 = vld [vmem:[#allocation8 + $0x8e8] sm:$0xff] }
 0x7c6   : > { %15995 = vmatpush3.bf16.msra.mxu0 %v15994_v25  ;;  %16235 = vmatpush3.bf16.msra.mxu1 %v16234_v41  ;;  %v16024_v25 = vpack.c.bf16 %v6358_v21, %v6357_v6  ;;  %v16288_v41 = vpack.c.bf16 %v7337_v40, %v7336_v7  ;;  %v6450_v6 = vld [vmem:[#allocation8 + $0x2f0] sm:$0xff]  ;;  %v6451_v21 = vld [vmem:[#allocation8 + $0x2f8] sm:$0xff] }
 0x7c7   : > { %15996 = vmatprep.subr.bf16.mxu0 %v20858_v0  ;;  %16236 = vmatprep.subr.bf16.mxu1 %v20858_v0  ;;  %v7518_v7 = vld [vmem:[#allocation8 + $0x8f0] sm:$0xff]  ;;  %v7519_v40 = vld [vmem:[#allocation8 + $0x8f8] sm:$0xff] }
 0x7ca   : > { %15998 = vmatpush3.bf16.msra.mxu0 %v15997_v39  ;;  %16238 = vmatpush3.bf16.msra.mxu1 %v16237_v62  ;;  %v16027_v39 = vpack.c.bf16 %v6360_v35, %v6359_v36  ;;  %v16291_v62 = vpack.c.bf16 %v7339_v19, %v7338_v44  ;;  %v6525_v36 = vld [vmem:[#allocation8 + $0x300] sm:$0xff]  ;;  %v6526_v35 = vld [vmem:[#allocation8 + $0x308] sm:$0xff] }
 0x7cb   : > { %15999 = vmatprep.subr.bf16.mxu0 %v20858_v0  ;;  %16239 = vmatprep.subr.bf16.mxu1 %v20858_v0  ;;  %v7682_v44 = vld [vmem:[#allocation8 + $0x980] sm:$0xff]  ;;  %v7683_v19 = vld [vmem:[#allocation8 + $0x988] sm:$0xff] }
 0x7ce   : > { %16001 = vmatpush3.bf16.msra.mxu0 %v16000_v24  ;;  %16241 = vmatpush3.bf16.msra.mxu1 %v16240_v45  ;;  %v16030_v24 = vpack.c.bf16 %v6362_v33, %v6361_v53  ;;  %v16294_v45 = vpack.c.bf16 %v7341_v57, %v7340_v43  ;;  %v6527_v53 = vld [vmem:[#allocation8 + $0x310] sm:$0xff]  ;;  %v6528_v33 = vld [vmem:[#allocation8 + $0x318] sm:$0xff] }
 0x7cf   : > { %16002 = vmatprep.subr.bf16.mxu0 %v20858_v0  ;;  %16242 = vmatprep.subr.bf16.mxu1 %v20858_v0  ;;  %v7684_v43 = vld [vmem:[#allocation8 + $0x990] sm:$0xff]  ;;  %v7685_v57 = vld [vmem:[#allocation8 + $0x998] sm:$0xff] }
 0x7d2   : > { %16004 = vmatpush3.bf16.msra.mxu0 %v16003_v37  ;;  %16244 = vmatpush3.bf16.msra.mxu1 %v16243_v23  ;;  %v16033_v37 = vpack.c.bf16 %v6437_v16, %v6436_v51  ;;  %v16321_v23 = vpack.c.bf16 %v7505_v55, %v7504_v27  ;;  %v16060_v51 = vpack.c.bf16 %v6528_v33, %v6527_v53  ;;  %v6529_v27 = vld [vmem:[#allocation8 + $0x320] sm:$0xff]  ;;  %v6530_v55 = vld [vmem:[#allocation8 + $0x328] sm:$0xff] }
 0x7d3   : > { %16005 = vmatprep.subr.bf16.mxu0 %v20858_v0  ;;  %16245 = vmatprep.subr.bf16.mxu1 %v20858_v0  ;;  %v16372_v16 = vpack.c.bf16 %v7685_v57, %v7684_v43  ;;  %v16063_v1 = vpack.c.bf16 %v6530_v55, %v6529_v27  ;;  %v6709_v43 = vld [vmem:[#allocation8 + $0x430] sm:$0xff]  ;;  %v6710_v57 = vld [vmem:[#allocation8 + $0x438] sm:$0xff]  ;;  %v6711_v27 = vld [vmem:[#allocation8 + $0x440] sm:$0xff] }
 0x7d4   : > { %v6712_v55 = vld [vmem:[#allocation8 + $0x448] sm:$0xff] }
 0x7d6   : > { %16007 = vmatpush3.bf16.msra.mxu0 %v16006_v3  ;;  %16247 = vmatpush3.bf16.msra.mxu1 %v16246_v18  ;;  %v6345_v3 = vld [vmem:[#allocation2 + $0x4] sm:$0x1]  ;;  %v7324_v18 = vld [vmem:[#allocation2 + $0xf] sm:$0x1] }
 0x7d7   : > { %16008 = vmatprep.subr.bf16.mxu0 %v20858_v0  ;;  %16272 = vmatprep.subr.bf16.mxu1 %v20858_v0 }
 0x7d9   : > { %13549 = vmatmul.mubr.f32.vlgmr.msra.gmra.mrb[40].mxu0 %v6256_v5  ;;  %13899 = vmatmul.mubr.f32.vlgmr.msra.gmra.mrb[28].mxu1 %v7146_v20  ;;  %v7510_v5 = vld [vmem:[#allocation8 + $0x8b0] sm:$0xff]  ;;  %v7511_v20 = vld [vmem:[#allocation8 + $0x8b8] sm:$0xff] }
 0x7da   : > { %16010 = vmatpush3.bf16.msra.mxu0 %v16009_v58  ;;  %16274 = vmatpush3.bf16.msra.mxu1 %v16273_v42  ;;  %v7508_v58 = vld [vmem:[#allocation8 + $0x8a0] sm:$0xff]  ;;  %v7509_v42 = vld [vmem:[#allocation8 + $0x8a8] sm:$0xff] }
 0x7db   : > { %16011 = vmatprep.subr.bf16.mxu0 %v20858_v0  ;;  %16275 = vmatprep.subr.bf16.mxu1 %v20858_v0  ;;  %v16327_v60 = vpack.c.bf16 %v7509_v42, %v7508_v58  ;;  %v7690_v58 = vld [vmem:[#allocation8 + $0x9c0] sm:$0xff]  ;;  %v7691_v42 = vld [vmem:[#allocation8 + $0x9c8] sm:$0xff] }
 0x7dc   : > { %13583 = vmatprep.mubr.msk.f32.mxu0 %vm17721_vm0, %v20860_v46  ;;  %13968 = vmatprep.mubr.msk.f32.mxu1 %vm17721_vm0, %v20860_v46 }
 0x7de   : > { %16013 = vmatpush3.bf16.msra.mxu0 %v16012_v38  ;;  %16277 = vmatpush3.bf16.msra.mxu1 %v16276_v30  ;;  %v16042_v38 = vpack.c.bf16 %v6443_v31, %v6442_v8  ;;  %v16330_v30 = vpack.c.bf16 %v7511_v20, %v7510_v5  ;;  %v6535_v8 = vld [vmem:[#allocation8 + $0x350] sm:$0xff]  ;;  %v6536_v31 = vld [vmem:[#allocation8 + $0x358] sm:$0xff] }
 0x7df   : > { %16014 = vmatprep.subr.bf16.mxu0 %v20858_v0  ;;  %16278 = vmatprep.subr.bf16.mxu1 %v20858_v0  ;;  %v7692_v5 = vld [vmem:[#allocation8 + $0x9d0] sm:$0xff]  ;;  %v7693_v20 = vld [vmem:[#allocation8 + $0x9d8] sm:$0xff] }
 0x7e2   : > { %16016 = vmatpush3.bf16.msra.mxu0 %v16015_v28  ;;  %16280 = vmatpush3.bf16.msra.mxu1 %v16279_v54  ;;  %v16045_v28 = vpack.c.bf16 %v6445_v26, %v6444_v29  ;;  %v16333_v54 = vpack.c.bf16 %v7513_v48, %v7512_v4  ;;  %v6537_v29 = vld [vmem:[#allocation8 + $0x360] sm:$0xff]  ;;  %v6538_v26 = vld [vmem:[#allocation8 + $0x368] sm:$0xff] }
 0x7e3   : > { %16017 = vmatprep.subr.bf16.mxu0 %v20858_v0  ;;  %16281 = vmatprep.subr.bf16.mxu1 %v20858_v0  ;;  %v7694_v4 = vld [vmem:[#allocation8 + $0x9e0] sm:$0xff]  ;;  %v7695_v48 = vld [vmem:[#allocation8 + $0x9e8] sm:$0xff] }
 0x7e6   : > { %16019 = vmatpush3.bf16.msra.mxu0 %v16018_v50  ;;  %16283 = vmatpush3.bf16.msra.mxu1 %v16282_v32  ;;  %v16048_v50 = vpack.c.bf16 %v6447_v34, %v6446_v56  ;;  %v16336_v32 = vpack.c.bf16 %v7515_v13, %v7514_v22  ;;  %v6539_v56 = vld [vmem:[#allocation8 + $0x370] sm:$0xff]  ;;  %v6540_v34 = vld [vmem:[#allocation8 + $0x378] sm:$0xff] }
 0x7e7   : > { %16020 = vmatprep.subr.bf16.mxu0 %v20858_v0  ;;  %16284 = vmatprep.subr.bf16.mxu1 %v20858_v0  ;;  %v7696_v22 = vld [vmem:[#allocation8 + $0x9f0] sm:$0xff]  ;;  %v7697_v13 = vld [vmem:[#allocation8 + $0x9f8] sm:$0xff] }
 0x7ea   : > { %16022 = vmatpush3.bf16.msra.mxu0 %v16021_v17  ;;  %16286 = vmatpush3.bf16.msra.mxu1 %v16285_v61  ;;  %v16051_v17 = vpack.c.bf16 %v6449_v10, %v6448_v11  ;;  %v16339_v61 = vpack.c.bf16 %v7517_v2, %v7516_v49  ;;  %v6703_v11 = vld [vmem:[#allocation8 + $0x400] sm:$0xff]  ;;  %v6704_v10 = vld [vmem:[#allocation8 + $0x408] sm:$0xff] }
 0x7eb   : > { %16023 = vmatprep.subr.bf16.mxu0 %v20858_v0  ;;  %16287 = vmatprep.subr.bf16.mxu1 %v20858_v0  ;;  %v7860_v49 = vld [vmem:[#allocation8 + $0xa80] sm:$0xff]  ;;  %v7861_v2 = vld [vmem:[#allocation8 + $0xa88] sm:$0xff] }
 0x7ee   : > { %16025 = vmatpush3.bf16.msra.mxu0 %v16024_v25  ;;  %16289 = vmatpush3.bf16.msra.mxu1 %v16288_v41  ;;  %v16054_v25 = vpack.c.bf16 %v6451_v21, %v6450_v6  ;;  %v16342_v41 = vpack.c.bf16 %v7519_v40, %v7518_v7  ;;  %v6705_v6 = vld [vmem:[#allocation8 + $0x410] sm:$0xff]  ;;  %v6706_v21 = vld [vmem:[#allocation8 + $0x418] sm:$0xff] }
 0x7ef   : > { %16026 = vmatprep.subr.bf16.mxu0 %v20858_v0  ;;  %16290 = vmatprep.subr.bf16.mxu1 %v20858_v0  ;;  %v7862_v7 = vld [vmem:[#allocation8 + $0xa90] sm:$0xff]  ;;  %v7863_v40 = vld [vmem:[#allocation8 + $0xa98] sm:$0xff] }
 0x7f2   : > { %16028 = vmatpush3.bf16.msra.mxu0 %v16027_v39  ;;  %16292 = vmatpush3.bf16.msra.mxu1 %v16291_v62  ;;  %v16057_v39 = vpack.c.bf16 %v6526_v35, %v6525_v36  ;;  %v16369_v62 = vpack.c.bf16 %v7683_v19, %v7682_v44  ;;  %v16108_v36 = vpack.c.bf16 %v6706_v21, %v6705_v6  ;;  %v6707_v44 = vld [vmem:[#allocation8 + $0x420] sm:$0xff]  ;;  %v6708_v19 = vld [vmem:[#allocation8 + $0x428] sm:$0xff] }
 0x7f3   : > { %16029 = vmatprep.subr.bf16.mxu0 %v20858_v0  ;;  %16293 = vmatprep.subr.bf16.mxu1 %v20858_v0  ;;  %v16420_v35 = vpack.c.bf16 %v7863_v40, %v7862_v7  ;;  %v16111_v53 = vpack.c.bf16 %v6708_v19, %v6707_v44  ;;  %v6885_v6 = vld [vmem:[#allocation8 + $0x520] sm:$0xff]  ;;  %v6886_v21 = vld [vmem:[#allocation8 + $0x528] sm:$0xff]  ;;  %v8044_v44 = vld [vmem:[#allocation8 + $0xbb0] sm:$0xff] }
 0x7f4   : > { %v8042_v7 = vld [vmem:[#allocation8 + $0xba0] sm:$0xff]  ;;  %v8043_v40 = vld [vmem:[#allocation8 + $0xba8] sm:$0xff]  ;;  %v8045_v19 = vld [vmem:[#allocation8 + $0xbb8] sm:$0xff] }
 0x7f6   : > { %16031 = vmatpush3.bf16.msra.mxu0 %v16030_v24  ;;  %16295 = vmatpush3.bf16.msra.mxu1 %v16294_v45  ;;  %v6434_v24 = vld [vmem:[#allocation2 + $0x5] sm:$0x1]  ;;  %v7502_v45 = vld [vmem:[#allocation2 + $0x11] sm:$0x1] }
 0x7f7   : > { %16032 = vmatprep.subr.bf16.mxu0 %v20858_v0  ;;  %16320 = vmatprep.subr.bf16.mxu1 %v20858_v0 }
 0x7f9   : > { %13584 = vmatmul.mubr.f32.vlgmr.msra.gmra.mrb[42].mxu0 %v6345_v3  ;;  %13969 = vmatmul.mubr.f32.vlgmr.msra.gmra.mrb[30].mxu1 %v7324_v18  ;;  %v7688_v3 = vld [vmem:[#allocation8 + $0x9b0] sm:$0xff]  ;;  %v7689_v18 = vld [vmem:[#allocation8 + $0x9b8] sm:$0xff] }
 0x7fa   : > { %16034 = vmatpush3.bf16.msra.mxu0 %v16033_v37  ;;  %16322 = vmatpush3.bf16.msra.mxu1 %v16321_v23  ;;  %v7686_v37 = vld [vmem:[#allocation8 + $0x9a0] sm:$0xff]  ;;  %v7687_v23 = vld [vmem:[#allocation8 + $0x9a8] sm:$0xff] }
 0x7fb   : > { %16035 = vmatprep.subr.bf16.mxu0 %v20858_v0  ;;  %16323 = vmatprep.subr.bf16.mxu1 %v20858_v0  ;;  %v16375_v9 = vpack.c.bf16 %v7687_v23, %v7686_v37  ;;  %v7868_v37 = vld [vmem:[#allocation8 + $0xac0] sm:$0xff]  ;;  %v7869_v23 = vld [vmem:[#allocation8 + $0xac8] sm:$0xff] }
 0x7fc   : > { %13618 = vmatprep.mubr.msk.f32.mxu0 %vm17721_vm0, %v20860_v46  ;;  %14038 = vmatprep.mubr.msk.f32.mxu1 %vm17721_vm0, %v20860_v46 }
 0x7fe   : > { %16037 = vmatpush3.bf16.msra.mxu0 %v16036_v63  ;;  %16325 = vmatpush3.bf16.msra.mxu1 %v16324_v59  ;;  %v16066_v63 = vpack.c.bf16 %v6532_v12, %v6531_v14  ;;  %v16378_v59 = vpack.c.bf16 %v7689_v18, %v7688_v3  ;;  %v6713_v14 = vld [vmem:[#allocation8 + $0x450] sm:$0xff]  ;;  %v6714_v12 = vld [vmem:[#allocation8 + $0x458] sm:$0xff] }
 0x7ff   : > { %16038 = vmatprep.subr.bf16.mxu0 %v20858_v0  ;;  %16326 = vmatprep.subr.bf16.mxu1 %v20858_v0  ;;  %v7870_v3 = vld [vmem:[#allocation8 + $0xad0] sm:$0xff]  ;;  %v7871_v18 = vld [vmem:[#allocation8 + $0xad8] sm:$0xff] }
 0x802   : > { %16040 = vmatpush3.bf16.msra.mxu0 %v16039_v15  ;;  %16328 = vmatpush3.bf16.msra.mxu1 %v16327_v60  ;;  %v16069_v15 = vpack.c.bf16 %v6534_v52, %v6533_v47  ;;  %v16381_v60 = vpack.c.bf16 %v7691_v42, %v7690_v58  ;;  %v6715_v47 = vld [vmem:[#allocation8 + $0x460] sm:$0xff]  ;;  %v6716_v52 = vld [vmem:[#allocation8 + $0x468] sm:$0xff] }
 0x803   : > { %16041 = vmatprep.subr.bf16.mxu0 %v20858_v0  ;;  %16329 = vmatprep.subr.bf16.mxu1 %v20858_v0  ;;  %v7872_v58 = vld [vmem:[#allocation8 + $0xae0] sm:$0xff]  ;;  %v7873_v42 = vld [vmem:[#allocation8 + $0xae8] sm:$0xff] }
 0x806   : > { %16043 = vmatpush3.bf16.msra.mxu0 %v16042_v38  ;;  %16331 = vmatpush3.bf16.msra.mxu1 %v16330_v30  ;;  %v16072_v38 = vpack.c.bf16 %v6536_v31, %v6535_v8  ;;  %v16384_v30 = vpack.c.bf16 %v7693_v20, %v7692_v5  ;;  %v16123_v5 = vpack.c.bf16 %v6716_v52, %v6715_v47 }
 0x807   : > { %16044 = vmatprep.subr.bf16.mxu0 %v20858_v0  ;;  %16332 = vmatprep.subr.bf16.mxu1 %v20858_v0  ;;  %v16435_v20 = vpack.c.bf16 %v7873_v42, %v7872_v58  ;;  %v6895_v42 = vld [vmem:[#allocation8 + $0x570] sm:$0xff] }
 0x80a   : > { %16046 = vmatpush3.bf16.msra.mxu0 %v16045_v28  ;;  %16334 = vmatpush3.bf16.msra.mxu1 %v16333_v54  ;;  %v16075_v28 = vpack.c.bf16 %v6538_v26, %v6537_v29  ;;  %v16387_v54 = vpack.c.bf16 %v7695_v48, %v7694_v4  ;;  %v7874_v29 = vld [vmem:[#allocation8 + $0xaf0] sm:$0xff]  ;;  %v7875_v26 = vld [vmem:[#allocation8 + $0xaf8] sm:$0xff] }
 0x80b   : > { %16047 = vmatprep.subr.bf16.mxu0 %v20858_v0  ;;  %16335 = vmatprep.subr.bf16.mxu1 %v20858_v0  ;;  %v16438_v48 = vpack.c.bf16 %v7875_v26, %v7874_v29  ;;  %v8216_v29 = vld [vmem:[#allocation8 + $0xc80] sm:$0xff]  ;;  %v8217_v26 = vld [vmem:[#allocation8 + $0xc88] sm:$0xff] }
 0x80e   : > { %16049 = vmatpush3.bf16.msra.mxu0 %v16048_v50  ;;  %16337 = vmatpush3.bf16.msra.mxu1 %v16336_v32  ;;  %v16078_v50 = vpack.c.bf16 %v6540_v34, %v6539_v56  ;;  %v16390_v32 = vpack.c.bf16 %v7697_v13, %v7696_v22  ;;  %v8038_v56 = vld [vmem:[#allocation8 + $0xb80] sm:$0xff]  ;;  %v8039_v34 = vld [vmem:[#allocation8 + $0xb88] sm:$0xff] }
 0x80f   : > { %16050 = vmatprep.subr.bf16.mxu0 %v20858_v0  ;;  %16338 = vmatprep.subr.bf16.mxu1 %v20858_v0  ;;  %v16465_v13 = vpack.c.bf16 %v8039_v34, %v8038_v56  ;;  %v8218_v56 = vld [vmem:[#allocation8 + $0xc90] sm:$0xff]  ;;  %v8219_v34 = vld [vmem:[#allocation8 + $0xc98] sm:$0xff] }
 0x812   : > { %16052 = vmatpush3.bf16.msra.mxu0 %v16051_v17  ;;  %16340 = vmatpush3.bf16.msra.mxu1 %v16339_v61  ;;  %v16105_v17 = vpack.c.bf16 %v6704_v10, %v6703_v11  ;;  %v16417_v61 = vpack.c.bf16 %v7861_v2, %v7860_v49  ;;  %v8040_v11 = vld [vmem:[#allocation8 + $0xb90] sm:$0xff]  ;;  %v8041_v10 = vld [vmem:[#allocation8 + $0xb98] sm:$0xff] }
 0x813   : > { %16053 = vmatprep.subr.bf16.mxu0 %v20858_v0  ;;  %16341 = vmatprep.subr.bf16.mxu1 %v20858_v0  ;;  %v6701_v49 = vld [vmem:[#allocation2 + $0x8] sm:$0x1]  ;;  %v7858_v2 = vld [vmem:[#allocation2 + $0x15] sm:$0x1] }
 0x816   : > { %16055 = vmatpush3.bf16.msra.mxu0 %v16054_v25  ;;  %16343 = vmatpush3.bf16.msra.mxu1 %v16342_v41  ;;  %v6523_v25 = vld [vmem:[#allocation2 + $0x6] sm:$0x1]  ;;  %v7680_v41 = vld [vmem:[#allocation2 + $0x13] sm:$0x1] }
 0x817   : > { %16056 = vmatprep.subr.bf16.mxu0 %v20858_v0  ;;  %16368 = vmatprep.subr.bf16.mxu1 %v20858_v0 }
 0x819   : > { %13619 = vmatmul.mubr.f32.vlgmr.msra.gmra.mrb[44].mxu0 %v6434_v24  ;;  %14039 = vmatmul.mubr.f32.vlgmr.msra.gmra.mrb[32].mxu1 %v7502_v45  ;;  %v7866_v24 = vld [vmem:[#allocation8 + $0xab0] sm:$0xff]  ;;  %v7867_v45 = vld [vmem:[#allocation8 + $0xab8] sm:$0xff] }
 0x81a   : > { %16058 = vmatpush3.bf16.msra.mxu0 %v16057_v39  ;;  %16370 = vmatpush3.bf16.msra.mxu1 %v16369_v62  ;;  %v7864_v39 = vld [vmem:[#allocation8 + $0xaa0] sm:$0xff]  ;;  %v7865_v62 = vld [vmem:[#allocation8 + $0xaa8] sm:$0xff] }
 0x81b   : > { %16059 = vmatprep.subr.bf16.mxu0 %v20858_v0  ;;  %16371 = vmatprep.subr.bf16.mxu1 %v20858_v0  ;;  %v16423_v33 = vpack.c.bf16 %v7865_v62, %v7864_v39  ;;  %v16474_v62 = vpack.c.bf16 %v8045_v19, %v8044_v44  ;;  %v8224_v44 = vld [vmem:[#allocation8 + $0xcc0] sm:$0xff]  ;;  %v8225_v19 = vld [vmem:[#allocation8 + $0xcc8] sm:$0xff] }
 0x81c   : > { %13653 = vmatprep.mubr.msk.f32.mxu0 %vm17721_vm0, %v20860_v46  ;;  %14108 = vmatprep.mubr.msk.f32.mxu1 %vm17721_vm0, %v20860_v46 }
 0x81e   : > { %16061 = vmatpush3.bf16.msra.mxu0 %v16060_v51  ;;  %16373 = vmatpush3.bf16.msra.mxu1 %v16372_v16  ;;  %v16114_v51 = vpack.c.bf16 %v6710_v57, %v6709_v43  ;;  %v16426_v16 = vpack.c.bf16 %v7867_v45, %v7866_v24  ;;  %v8046_v43 = vld [vmem:[#allocation8 + $0xbc0] sm:$0xff]  ;;  %v8047_v57 = vld [vmem:[#allocation8 + $0xbc8] sm:$0xff] }
 0x81f   : > { %16062 = vmatprep.subr.bf16.mxu0 %v20858_v0  ;;  %16374 = vmatprep.subr.bf16.mxu1 %v20858_v0  ;;  %v16477_v45 = vpack.c.bf16 %v8047_v57, %v8046_v43  ;;  %v8226_v43 = vld [vmem:[#allocation8 + $0xcd0] sm:$0xff]  ;;  %v8227_v57 = vld [vmem:[#allocation8 + $0xcd8] sm:$0xff] }
 0x822   : > { %16064 = vmatpush3.bf16.msra.mxu0 %v16063_v1  ;;  %16376 = vmatpush3.bf16.msra.mxu1 %v16375_v9  ;;  %v16117_v1 = vpack.c.bf16 %v6712_v55, %v6711_v27  ;;  %v16429_v9 = vpack.c.bf16 %v7869_v23, %v7868_v37  ;;  %v8048_v27 = vld [vmem:[#allocation8 + $0xbd0] sm:$0xff]  ;;  %v8049_v55 = vld [vmem:[#allocation8 + $0xbd8] sm:$0xff] }
 0x823   : > { %16065 = vmatprep.subr.bf16.mxu0 %v20858_v0  ;;  %16377 = vmatprep.subr.bf16.mxu1 %v20858_v0  ;;  %v16480_v23 = vpack.c.bf16 %v8049_v55, %v8048_v27  ;;  %v8228_v27 = vld [vmem:[#allocation8 + $0xce0] sm:$0xff]  ;;  %v8229_v55 = vld [vmem:[#allocation8 + $0xce8] sm:$0xff] }
 0x826   : > { %16067 = vmatpush3.bf16.msra.mxu0 %v16066_v63  ;;  %16379 = vmatpush3.bf16.msra.mxu1 %v16378_v59  ;;  %v16120_v63 = vpack.c.bf16 %v6714_v12, %v6713_v14  ;;  %v16432_v59 = vpack.c.bf16 %v7871_v18, %v7870_v3  ;;  %v8050_v14 = vld [vmem:[#allocation8 + $0xbe0] sm:$0xff]  ;;  %v8051_v12 = vld [vmem:[#allocation8 + $0xbe8] sm:$0xff] }
 0x827   : > { %16068 = vmatprep.subr.bf16.mxu0 %v20858_v0  ;;  %16380 = vmatprep.subr.bf16.mxu1 %v20858_v0  ;;  %v16483_v58 = vpack.c.bf16 %v8051_v12, %v8050_v14 }
 0x82a   : > { %16070 = vmatpush3.bf16.msra.mxu0 %v16069_v15  ;;  %16382 = vmatpush3.bf16.msra.mxu1 %v16381_v60 }
 0x82b   : > { %16071 = vmatprep.subr.bf16.mxu0 %v20858_v0  ;;  %16383 = vmatprep.subr.bf16.mxu1 %v20858_v0 }
 0x82e   : > { %16073 = vmatpush3.bf16.msra.mxu0 %v16072_v38  ;;  %16385 = vmatpush3.bf16.msra.mxu1 %v16384_v30  ;;  %v6717_v38 = vld [vmem:[#allocation8 + $0x470] sm:$0xff]  ;;  %v6718_v30 = vld [vmem:[#allocation8 + $0x478] sm:$0xff] }
 0x82f   : > { %16074 = vmatprep.subr.bf16.mxu0 %v20858_v0  ;;  %16386 = vmatprep.subr.bf16.mxu1 %v20858_v0  ;;  %v16126_v4 = vpack.c.bf16 %v6718_v30, %v6717_v38  ;;  %v7060_v30 = vld [vmem:[#allocation8 + $0x608] sm:$0xff] }
 0x832   : > { %16076 = vmatpush3.bf16.msra.mxu0 %v16075_v28  ;;  %16388 = vmatpush3.bf16.msra.mxu1 %v16387_v54  ;;  %v6881_v28 = vld [vmem:[#allocation8 + $0x500] sm:$0xff]  ;;  %v6882_v54 = vld [vmem:[#allocation8 + $0x508] sm:$0xff] }
 0x833   : > { %16077 = vmatprep.subr.bf16.mxu0 %v20858_v0  ;;  %16389 = vmatprep.subr.bf16.mxu1 %v20858_v0  ;;  %v16153_v22 = vpack.c.bf16 %v6882_v54, %v6881_v28  ;;  %v7061_v28 = vld [vmem:[#allocation8 + $0x610] sm:$0xff]  ;;  %v7062_v54 = vld [vmem:[#allocation8 + $0x618] sm:$0xff] }
 0x836   : > { %16079 = vmatpush3.bf16.msra.mxu0 %v16078_v50  ;;  %16391 = vmatpush3.bf16.msra.mxu1 %v16390_v32  ;;  %v6883_v50 = vld [vmem:[#allocation8 + $0x510] sm:$0xff]  ;;  %v6884_v32 = vld [vmem:[#allocation8 + $0x518] sm:$0xff] }
 0x837   : > { %16104 = vmatprep.subr.bf16.mxu0 %v20858_v0  ;;  %16416 = vmatprep.subr.bf16.mxu1 %v20858_v0 }
 0x839   : > { %13654 = vmatmul.mubr.f32.vlgmr.msra.gmra.mrb[46].mxu0 %v6523_v25  ;;  %14109 = vmatmul.mubr.f32.vlgmr.msra.gmra.mrb[34].mxu1 %v7680_v41  ;;  %v16159_v25 = vpack.c.bf16 %v6886_v21, %v6885_v6  ;;  %v16471_v41 = vpack.c.bf16 %v8043_v40, %v8042_v7  ;;  %v7065_v6 = vld [vmem:[#allocation8 + $0x630] sm:$0xff]  ;;  %v7066_v21 = vld [vmem:[#allocation8 + $0x638] sm:$0xff] }
 0x83a   : > { %16106 = vmatpush3.bf16.msra.mxu0 %v16105_v17  ;;  %16418 = vmatpush3.bf16.msra.mxu1 %v16417_v61  ;;  %v16156_v17 = vpack.c.bf16 %v6884_v32, %v6883_v50  ;;  %v16468_v61 = vpack.c.bf16 %v8041_v10, %v8040_v11  ;;  %v16204_v50 = vpack.c.bf16 %v7062_v54, %v7061_v28  ;;  %v7063_v11 = vld [vmem:[#allocation8 + $0x620] sm:$0xff]  ;;  %v7064_v10 = vld [vmem:[#allocation8 + $0x628] sm:$0xff]  ;;  %v8222_v7 = vld [vmem:[#allocation8 + $0xcb0] sm:$0xff] }
 0x83b   : > { %16107 = vmatprep.subr.bf16.mxu0 %v20858_v0  ;;  %16419 = vmatprep.subr.bf16.mxu1 %v20858_v0  ;;  %v16516_v32 = vpack.c.bf16 %v8219_v34, %v8218_v56  ;;  %v8223_v40 = vld [vmem:[#allocation8 + $0xcb8] sm:$0xff]  ;;  %v8214_v28 = vld [vmem:[#allocation2 + $0x19] sm:$0x1] }
 0x83c   : > { %13723 = vmatprep.mubr.msk.f32.mxu0 %vm17721_vm0, %v20860_v46  ;;  %14178 = vmatprep.mubr.msk.f32.mxu1 %vm17721_vm0, %v20860_v46  ;;  %v7241_v34 = vld [vmem:[#allocation8 + $0x720] sm:$0xff] }
 0x83e   : > { %16109 = vmatpush3.bf16.msra.mxu0 %v16108_v36  ;;  %16421 = vmatpush3.bf16.msra.mxu1 %v16420_v35  ;;  %v6887_v36 = vld [vmem:[#allocation8 + $0x530] sm:$0xff]  ;;  %v6888_v35 = vld [vmem:[#allocation8 + $0x538] sm:$0xff] }
 0x83f   : > { %16110 = vmatprep.subr.bf16.mxu0 %v20858_v0  ;;  %16422 = vmatprep.subr.bf16.mxu1 %v20858_v0  ;;  %v16162_v39 = vpack.c.bf16 %v6888_v35, %v6887_v36  ;;  %v7067_v36 = vld [vmem:[#allocation8 + $0x640] sm:$0xff]  ;;  %v7068_v35 = vld [vmem:[#allocation8 + $0x648] sm:$0xff] }
 0x842   : > { %16112 = vmatpush3.bf16.msra.mxu0 %v16111_v53  ;;  %16424 = vmatpush3.bf16.msra.mxu1 %v16423_v33  ;;  %v6889_v53 = vld [vmem:[#allocation8 + $0x540] sm:$0xff]  ;;  %v6890_v33 = vld [vmem:[#allocation8 + $0x548] sm:$0xff] }
 0x843   : > { %16113 = vmatprep.subr.bf16.mxu0 %v20858_v0  ;;  %16425 = vmatprep.subr.bf16.mxu1 %v20858_v0  ;;  %v16165_v24 = vpack.c.bf16 %v6890_v33, %v6889_v53  ;;  %v7069_v53 = vld [vmem:[#allocation8 + $0x650] sm:$0xff]  ;;  %v7070_v33 = vld [vmem:[#allocation8 + $0x658] sm:$0xff] }
 0x846   : > { %16115 = vmatpush3.bf16.msra.mxu0 %v16114_v51  ;;  %16427 = vmatpush3.bf16.msra.mxu1 %v16426_v16  ;;  %v6891_v51 = vld [vmem:[#allocation8 + $0x550] sm:$0xff]  ;;  %v6892_v16 = vld [vmem:[#allocation8 + $0x558] sm:$0xff] }
 0x847   : > { %16116 = vmatprep.subr.bf16.mxu0 %v20858_v0  ;;  %16428 = vmatprep.subr.bf16.mxu1 %v20858_v0  ;;  %v16168_v37 = vpack.c.bf16 %v6892_v16, %v6891_v51  ;;  %v7071_v51 = vld [vmem:[#allocation8 + $0x660] sm:$0xff]  ;;  %v7072_v16 = vld [vmem:[#allocation8 + $0x668] sm:$0xff] }
 0x848   : > { %v16219_v12 = vpack.c.bf16 %v7072_v16, %v7071_v51 }
 0x84a   : > { %16118 = vmatpush3.bf16.msra.mxu0 %v16117_v1  ;;  %16430 = vmatpush3.bf16.msra.mxu1 %v16429_v9  ;;  %v6893_v1 = vld [vmem:[#allocation8 + $0x560] sm:$0xff]  ;;  %v6894_v9 = vld [vmem:[#allocation8 + $0x568] sm:$0xff] }
 0x84b   : > { %16119 = vmatprep.subr.bf16.mxu0 %v20858_v0  ;;  %16431 = vmatprep.subr.bf16.mxu1 %v20858_v0  ;;  %v16171_v52 = vpack.c.bf16 %v6894_v9, %v6893_v1 }
 0x84c   : > { %v20253_v15 = vpop.f32.mrb[34].mxu0  ;;  %v20255_v60 = vpop.f32.mrb[22].mxu1 }
 0x84d   : > { %v13445_v8 = vpop.f32.mrb[35].mxu0  ;;  %v13690_v31 = vpop.f32.mrb[23].mxu1 }
 0x84e   : > { %16121 = vmatpush3.bf16.msra.mxu0 %v16120_v63  ;;  %16433 = vmatpush3.bf16.msra.mxu1 %v16432_v59  ;;  %v6896_v8 = vld [vmem:[#allocation8 + $0x578] sm:$0xff]  ;;  %v8052_v31 = vld [vmem:[#allocation8 + $0xbf0] sm:$0xff] }
 0x84f   : > { %16122 = vmatprep.subr.bf16.mxu0 %v20858_v0  ;;  %16434 = vmatprep.subr.bf16.mxu1 %v20858_v0 }
 0x852   : > { %16124 = vmatpush3.bf16.msra.mxu0 %v16123_v5  ;;  %16436 = vmatpush3.bf16.msra.mxu1 %v16435_v20  ;;  %v8053_v5 = vld [vmem:[#allocation8 + $0xbf8] sm:$0xff]  ;;  %v16174_v20 = vpack.c.bf16 %v6896_v8, %v6895_v42 }
 0x853   : > { %16125 = vmatprep.subr.bf16.mxu0 %v20858_v0  ;;  %16437 = vmatprep.subr.bf16.mxu1 %v20858_v0  ;;  %v16486_v38 = vpack.c.bf16 %v8053_v5, %v8052_v31  ;;  %v7238_v31 = vld [vmem:[#allocation8 + $0x708] sm:$0xff]  ;;  %v8394_v5 = vld [vmem:[#allocation8 + $0xd80] sm:$0xff] }
 0x856   : > { %16127 = vmatpush3.bf16.msra.mxu0 %v16126_v4  ;;  %16439 = vmatpush3.bf16.msra.mxu1 %v16438_v48  ;;  %v16513_v48 = vpack.c.bf16 %v8217_v26, %v8216_v29  ;;  %v7240_v29 = vld [vmem:[#allocation8 + $0x718] sm:$0xff]  ;;  %v8396_v26 = vld [vmem:[#allocation8 + $0xd90] sm:$0xff] }
 0x857   : > { %16152 = vmatprep.subr.bf16.mxu0 %v20858_v0  ;;  %16464 = vmatprep.subr.bf16.mxu1 %v20858_v0 }
 0x859   : > { %13724 = vmatmul.mubr.f32.vlgmr.msra.gmra.mrb[48].mxu0 %v6701_v49  ;;  %14179 = vmatmul.mubr.f32.vlgmr.msra.gmra.mrb[36].mxu1 %v7858_v2  ;;  %v8220_v49 = vld [vmem:[#allocation8 + $0xca0] sm:$0xff]  ;;  %v8221_v2 = vld [vmem:[#allocation8 + $0xca8] sm:$0xff] }
 0x85a   : > { %16154 = vmatpush3.bf16.msra.mxu0 %v16153_v22  ;;  %16466 = vmatpush3.bf16.msra.mxu1 %v16465_v13  ;;  %v6879_v22 = vld [vmem:[#allocation2 + $0xa] sm:$0x1]  ;;  %v8036_v13 = vld [vmem:[#allocation2 + $0x17] sm:$0x1] }
 0x85b   : > { %16155 = vmatprep.subr.bf16.mxu0 %v20858_v0  ;;  %16467 = vmatprep.subr.bf16.mxu1 %v20858_v0 }
 0x85c   : > { %13793 = vmatprep.mubr.msk.f32.mxu0 %vm17721_vm0, %v20860_v46  ;;  %14248 = vmatprep.mubr.msk.f32.mxu1 %vm17721_vm0, %v20860_v46 }
 0x85e   : > { %16157 = vmatpush3.bf16.msra.mxu0 %v16156_v17  ;;  %16469 = vmatpush3.bf16.msra.mxu1 %v16468_v61  ;;  %v16207_v17 = vpack.c.bf16 %v7064_v10, %v7063_v11  ;;  %v16519_v61 = vpack.c.bf16 %v8221_v2, %v8220_v49  ;;  %v7243_v10 = vld [vmem:[#allocation8 + $0x730] sm:$0xff]  ;;  %v7244_v49 = vld [vmem:[#allocation8 + $0x738] sm:$0xff] }
 0x85f   : > { %16158 = vmatprep.subr.bf16.mxu0 %v20858_v0  ;;  %16470 = vmatprep.subr.bf16.mxu1 %v20858_v0  ;;  %v8400_v2 = vld [vmem:[#allocation8 + $0xdb0] sm:$0xff] }
 0x862   : > { %16160 = vmatpush3.bf16.msra.mxu0 %v16159_v25  ;;  %16472 = vmatpush3.bf16.msra.mxu1 %v16471_v41  ;;  %v16210_v25 = vpack.c.bf16 %v7066_v21, %v7065_v6  ;;  %v16522_v41 = vpack.c.bf16 %v8223_v40, %v8222_v7  ;;  %v7245_v21 = vld [vmem:[#allocation8 + $0x740] sm:$0xff]  ;;  %v7246_v7 = vld [vmem:[#allocation8 + $0x748] sm:$0xff] }
 0x863   : > { %16161 = vmatprep.subr.bf16.mxu0 %v20858_v0  ;;  %16473 = vmatprep.subr.bf16.mxu1 %v20858_v0  ;;  %v8402_v40 = vld [vmem:[#allocation8 + $0xdc0] sm:$0xff] }
 0x866   : > { %16163 = vmatpush3.bf16.msra.mxu0 %v16162_v39  ;;  %16475 = vmatpush3.bf16.msra.mxu1 %v16474_v62  ;;  %v16213_v39 = vpack.c.bf16 %v7068_v35, %v7067_v36  ;;  %v16525_v62 = vpack.c.bf16 %v8225_v19, %v8224_v44  ;;  %v7247_v35 = vld [vmem:[#allocation8 + $0x750] sm:$0xff]  ;;  %v7248_v44 = vld [vmem:[#allocation8 + $0x758] sm:$0xff] }
 0x867   : > { %16164 = vmatprep.subr.bf16.mxu0 %v20858_v0  ;;  %16476 = vmatprep.subr.bf16.mxu1 %v20858_v0  ;;  %v8404_v19 = vld [vmem:[#allocation8 + $0xdd0] sm:$0xff] }
 0x86a   : > { %16166 = vmatpush3.bf16.msra.mxu0 %v16165_v24  ;;  %16478 = vmatpush3.bf16.msra.mxu1 %v16477_v45  ;;  %v16216_v24 = vpack.c.bf16 %v7070_v33, %v7069_v53  ;;  %v16528_v45 = vpack.c.bf16 %v8227_v57, %v8226_v43  ;;  %v7249_v33 = vld [vmem:[#allocation8 + $0x760] sm:$0xff]  ;;  %v7250_v43 = vld [vmem:[#allocation8 + $0x768] sm:$0xff] }
 0x86b   : > { %16167 = vmatprep.subr.bf16.mxu0 %v20858_v0  ;;  %16479 = vmatprep.subr.bf16.mxu1 %v20858_v0  ;;  %v8406_v57 = vld [vmem:[#allocation8 + $0xde0] sm:$0xff] }
 0x86c   : > { %v6163_v3 = vpop.f32.mrb[36].mxu0  ;;  %v20277_v18 = vpop.f32.mrb[24].mxu1 }
 0x86d   : > { %v20280_v63 = vadd.f32 %v6163_v3, %v20253_v15  ;;  %v13480_v59 = vpop.f32.mrb[37].mxu0  ;;  %v13760_v47 = vpop.f32.mrb[25].mxu1  ;;  %v7059_v15 = vld [vmem:[#allocation8 + $0x600] sm:$0xff]  ;;  %v16531_v3 = vpack.c.bf16 %v8229_v55, %v8228_v27 }
 0x86e   : > { %16169 = vmatpush3.bf16.msra.mxu0 %v16168_v37  ;;  %16481 = vmatpush3.bf16.msra.mxu1 %v16480_v23  ;;  %v16201_v4 = vpack.c.bf16 %v7060_v30, %v7059_v15  ;;  %v7073_v59 = vld [vmem:[#allocation8 + $0x670] sm:$0xff]  ;;  %v7074_v47 = vld [vmem:[#allocation8 + $0x678] sm:$0xff] }
 0x86f   : > { %16170 = vmatprep.subr.bf16.mxu0 %v20858_v0  ;;  %16482 = vmatprep.subr.bf16.mxu1 %v20858_v0  ;;  %v16222_v42 = vpack.c.bf16 %v7074_v47, %v7073_v59  ;;  %v7239_v30 = vld [vmem:[#allocation8 + $0x710] sm:$0xff]  ;;  %v8409_v59 = vld [vmem:[#allocation8 + $0xdf8] sm:$0xff] }
 0x870   : > { %v16252_v54 = vpack.c.bf16 %v7240_v29, %v7239_v30  ;;  %v7235_v30 = vld [vmem:[#allocation2 + $0xe] sm:$0x1]  ;;  %v8392_v29 = vld [vmem:[#allocation2 + $0x1b] sm:$0x1] }
 0x872   : > { %16172 = vmatpush3.bf16.msra.mxu0 %v16171_v52  ;;  %16484 = vmatpush3.bf16.msra.mxu1 %v16483_v58  ;;  %v8230_v52 = vld [vmem:[#allocation8 + $0xcf0] sm:$0xff]  ;;  %v8231_v58 = vld [vmem:[#allocation8 + $0xcf8] sm:$0xff] }
 0x873   : > { %16173 = vmatprep.subr.bf16.mxu0 %v20858_v0  ;;  %16485 = vmatprep.subr.bf16.mxu1 %v20858_v0  ;;  %v16534_v8 = vpack.c.bf16 %v8231_v58, %v8230_v52  ;;  %v7416_v58 = vld [vmem:[#allocation8 + $0x808] sm:$0xff] }
 0x876   : > { %16175 = vmatpush3.bf16.msra.mxu0 %v16174_v20  ;;  %16487 = vmatpush3.bf16.msra.mxu1 %v16486_v38  ;;  %v8395_v20 = vld [vmem:[#allocation8 + $0xd88] sm:$0xff] }
 0x877   : > { %16200 = vmatprep.subr.bf16.mxu0 %v20858_v0  ;;  %16512 = vmatprep.subr.bf16.mxu1 %v20858_v0  ;;  %v16561_v15 = vpack.c.bf16 %v8395_v20, %v8394_v5  ;;  %v7417_v5 = vld [vmem:[#allocation8 + $0x810] sm:$0xff]  ;;  %v7418_v20 = vld [vmem:[#allocation8 + $0x818] sm:$0xff] }
 0x879   : > { %13794 = vmatmul.mubr.f32.vlgmr.msra.gmra.mrb[50].mxu0 %v6879_v22  ;;  %14249 = vmatmul.mubr.f32.vlgmr.msra.gmra.mrb[38].mxu1 %v8036_v13  ;;  %v7242_v22 = vld [vmem:[#allocation8 + $0x728] sm:$0xff]  ;;  %v8398_v13 = vld [vmem:[#allocation8 + $0xda0] sm:$0xff] }
 0x87a   : > { %16202 = vmatpush3.bf16.msra.mxu0 %v16201_v4  ;;  %16514 = vmatpush3.bf16.msra.mxu1 %v16513_v48  ;;  %v8397_v4 = vld [vmem:[#allocation8 + $0xd98] sm:$0xff]  ;;  %v7057_v48 = vld [vmem:[#allocation2 + $0xc] sm:$0x1] }
 0x87b   : > { %16203 = vmatprep.subr.bf16.mxu0 %v20858_v0  ;;  %16515 = vmatprep.subr.bf16.mxu1 %v20858_v0  ;;  %v16564_v56 = vpack.c.bf16 %v8397_v4, %v8396_v26  ;;  %v16300_v26 = vpack.c.bf16 %v7418_v20, %v7417_v5  ;;  %v8753_v5 = vld [vmem:[#allocation8 + $0xf98] sm:$0xff] }
 0x87c   : > { %13863 = vmatprep.mubr.msk.f32.mxu0 %vm17721_vm0, %v20860_v46  ;;  %14318 = vmatprep.mubr.msk.f32.mxu1 %vm17721_vm0, %v20860_v46  ;;  %v7413_v20 = vld [vmem:[#allocation2 + $0x10] sm:$0x1] }
 0x87e   : > { %16205 = vmatpush3.bf16.msra.mxu0 %v16204_v50  ;;  %16517 = vmatpush3.bf16.msra.mxu1 %v16516_v32  ;;  %v8399_v50 = vld [vmem:[#allocation8 + $0xda8] sm:$0xff]  ;;  %v16255_v32 = vpack.c.bf16 %v7242_v22, %v7241_v34 }
 0x87f   : > { %16206 = vmatprep.subr.bf16.mxu0 %v20858_v0  ;;  %16518 = vmatprep.subr.bf16.mxu1 %v20858_v0  ;;  %v16567_v11 = vpack.c.bf16 %v8399_v50, %v8398_v13  ;;  %v7421_v13 = vld [vmem:[#allocation8 + $0x830] sm:$0xff]  ;;  %v7422_v50 = vld [vmem:[#allocation8 + $0x838] sm:$0xff] }
 0x882   : > { %16208 = vmatpush3.bf16.msra.mxu0 %v16207_v17  ;;  %16520 = vmatpush3.bf16.msra.mxu1 %v16519_v61  ;;  %v8401_v17 = vld [vmem:[#allocation8 + $0xdb8] sm:$0xff]  ;;  %v16258_v61 = vpack.c.bf16 %v7244_v49, %v7243_v10  ;;  %v16306_v10 = vpack.c.bf16 %v7422_v50, %v7421_v13 }
 0x883   : > { %16209 = vmatprep.subr.bf16.mxu0 %v20858_v0  ;;  %16521 = vmatprep.subr.bf16.mxu1 %v20858_v0  ;;  %v16570_v6 = vpack.c.bf16 %v8401_v17, %v8400_v2  ;;  %v7423_v2 = vld [vmem:[#allocation8 + $0x840] sm:$0xff]  ;;  %v7424_v17 = vld [vmem:[#allocation8 + $0x848] sm:$0xff]  ;;  %v8757_v13 = vld [vmem:[#allocation8 + $0xfb8] sm:$0xff] }
 0x886   : > { %16211 = vmatpush3.bf16.msra.mxu0 %v16210_v25  ;;  %16523 = vmatpush3.bf16.msra.mxu1 %v16522_v41  ;;  %v8403_v25 = vld [vmem:[#allocation8 + $0xdc8] sm:$0xff]  ;;  %v16261_v41 = vpack.c.bf16 %v7246_v7, %v7245_v21  ;;  %v16309_v21 = vpack.c.bf16 %v7424_v17, %v7423_v2 }
 0x887   : > { %16212 = vmatprep.subr.bf16.mxu0 %v20858_v0  ;;  %16524 = vmatprep.subr.bf16.mxu1 %v20858_v0  ;;  %v16573_v36 = vpack.c.bf16 %v8403_v25, %v8402_v40  ;;  %v7425_v40 = vld [vmem:[#allocation8 + $0x850] sm:$0xff]  ;;  %v7426_v25 = vld [vmem:[#allocation8 + $0x858] sm:$0xff]  ;;  %v8759_v2 = vld [vmem:[#allocation8 + $0xfc8] sm:$0xff] }
 0x88a   : > { %16214 = vmatpush3.bf16.msra.mxu0 %v16213_v39  ;;  %16526 = vmatpush3.bf16.msra.mxu1 %v16525_v62  ;;  %v8405_v39 = vld [vmem:[#allocation8 + $0xdd8] sm:$0xff]  ;;  %v16264_v62 = vpack.c.bf16 %v7248_v44, %v7247_v35  ;;  %v16312_v35 = vpack.c.bf16 %v7426_v25, %v7425_v40 }
 0x88b   : > { %16215 = vmatprep.subr.bf16.mxu0 %v20858_v0  ;;  %16527 = vmatprep.subr.bf16.mxu1 %v20858_v0  ;;  %v16576_v53 = vpack.c.bf16 %v8405_v39, %v8404_v19  ;;  %v7427_v19 = vld [vmem:[#allocation8 + $0x860] sm:$0xff]  ;;  %v7428_v39 = vld [vmem:[#allocation8 + $0x868] sm:$0xff]  ;;  %v8761_v40 = vld [vmem:[#allocation8 + $0xfd8] sm:$0xff] }
 0x88c   : > { %v6251_v37 = vpop.f32.mrb[38].mxu0  ;;  %v20302_v23 = vpop.f32.mrb[26].mxu1 }
 0x88d   : > { %v20305_v1 = vadd.f32 %v6251_v37, %v20280_v63  ;;  %v13515_v9 = vpop.f32.mrb[39].mxu0  ;;  %v13830_v14 = vpop.f32.mrb[27].mxu1  ;;  %v7237_v63 = vld [vmem:[#allocation8 + $0x700] sm:$0xff]  ;;  %v16267_v37 = vpack.c.bf16 %v7250_v43, %v7249_v33 }
 0x88e   : > { %16217 = vmatpush3.bf16.msra.mxu0 %v16216_v24  ;;  %16529 = vmatpush3.bf16.msra.mxu1 %v16528_v45  ;;  %v16249_v38 = vpack.c.bf16 %v7238_v31, %v7237_v63  ;;  %v8407_v24 = vld [vmem:[#allocation8 + $0xde8] sm:$0xff]  ;;  %v7251_v14 = vld [vmem:[#allocation8 + $0x770] sm:$0xff] }
 0x88f   : > { %16218 = vmatprep.subr.bf16.mxu0 %v20858_v0  ;;  %16530 = vmatprep.subr.bf16.mxu1 %v20858_v0  ;;  %v16579_v9 = vpack.c.bf16 %v8407_v24, %v8406_v57 }
 0x892   : > { %16220 = vmatpush3.bf16.msra.mxu0 %v16219_v12  ;;  %16532 = vmatpush3.bf16.msra.mxu1 %v16531_v3  ;;  %v7252_v12 = vld [vmem:[#allocation8 + $0x778] sm:$0xff]  ;;  %v8408_v3 = vld [vmem:[#allocation8 + $0xdf0] sm:$0xff] }
 0x893   : > { %16221 = vmatprep.subr.bf16.mxu0 %v20858_v0  ;;  %16533 = vmatprep.subr.bf16.mxu1 %v20858_v0  ;;  %v16270_v47 = vpack.c.bf16 %v7252_v12, %v7251_v14  ;;  %v16582_v52 = vpack.c.bf16 %v8409_v59, %v8408_v3  ;;  %v8586_v14 = vld [vmem:[#allocation8 + $0xef0] sm:$0xff]  ;;  %v8587_v12 = vld [vmem:[#allocation8 + $0xef8] sm:$0xff] }
 0x894   : > { %v16630_v59 = vpack.c.bf16 %v8587_v12, %v8586_v14  ;;  %v8765_v14 = vld [vmem:[#allocation8 + $0xff8] sm:$0xff] }
 0x896   : > { %16223 = vmatpush3.bf16.msra.mxu0 %v16222_v42  ;;  %16535 = vmatpush3.bf16.msra.mxu1 %v16534_v8  ;;  %v8572_v42 = vld [vmem:[#allocation8 + $0xe80] sm:$0xff]  ;;  %v8573_v8 = vld [vmem:[#allocation8 + $0xe88] sm:$0xff] }
 0x897   : > { %16248 = vmatprep.subr.bf16.mxu0 %v20858_v0  ;;  %16560 = vmatprep.subr.bf16.mxu1 %v20858_v0  ;;  %v16609_v31 = vpack.c.bf16 %v8573_v8, %v8572_v42  ;;  %v7595_v8 = vld [vmem:[#allocation8 + $0x910] sm:$0xff] }
 0x899   : > { %13864 = vmatmul.mubr.f32.vlgmr.msra.gmra.mrb[52].mxu0 %v7057_v48  ;;  %14319 = vmatmul.mubr.f32.vlgmr.msra.gmra.mrb[40].mxu1 %v8214_v28  ;;  %v7419_v48 = vld [vmem:[#allocation8 + $0x820] sm:$0xff]  ;;  %v7420_v28 = vld [vmem:[#allocation8 + $0x828] sm:$0xff] }
 0x89a   : > { %16250 = vmatpush3.bf16.msra.mxu0 %v16249_v38  ;;  %16562 = vmatpush3.bf16.msra.mxu1 %v16561_v15  ;;  %v8574_v38 = vld [vmem:[#allocation8 + $0xe90] sm:$0xff]  ;;  %v8575_v15 = vld [vmem:[#allocation8 + $0xe98] sm:$0xff]  ;;  %v16303_v34 = vpack.c.bf16 %v7420_v28, %v7419_v48  ;;  %v8755_v48 = vld [vmem:[#allocation8 + $0xfa8] sm:$0xff] }
 0x89b   : > { %16251 = vmatprep.subr.bf16.mxu0 %v20858_v0  ;;  %16563 = vmatprep.subr.bf16.mxu1 %v20858_v0  ;;  %v16612_v4 = vpack.c.bf16 %v8575_v15, %v8574_v38  ;;  %v8570_v38 = vld [vmem:[#allocation2 + $0x1d] sm:$0x1] }
 0x89c   : > { %13933 = vmatprep.mubr.msk.f32.mxu0 %vm17721_vm0, %v20860_v46  ;;  %14388 = vmatprep.mubr.msk.f32.mxu1 %vm17721_vm0, %v20860_v46 }
 0x89e   : > { %16253 = vmatpush3.bf16.msra.mxu0 %v16252_v54  ;;  %16565 = vmatpush3.bf16.msra.mxu1 %v16564_v56  ;;  %v8576_v54 = vld [vmem:[#allocation8 + $0xea0] sm:$0xff]  ;;  %v8577_v56 = vld [vmem:[#allocation8 + $0xea8] sm:$0xff] }
 0x89f   : > { %16254 = vmatprep.subr.bf16.mxu0 %v20858_v0  ;;  %16566 = vmatprep.subr.bf16.mxu1 %v20858_v0  ;;  %v16615_v22 = vpack.c.bf16 %v8577_v56, %v8576_v54  ;;  %v7599_v56 = vld [vmem:[#allocation8 + $0x930] sm:$0xff] }
 0x8a2   : > { %16256 = vmatpush3.bf16.msra.mxu0 %v16255_v32  ;;  %16568 = vmatpush3.bf16.msra.mxu1 %v16567_v11  ;;  %v8578_v32 = vld [vmem:[#allocation8 + $0xeb0] sm:$0xff]  ;;  %v8579_v11 = vld [vmem:[#allocation8 + $0xeb8] sm:$0xff] }
 0x8a3   : > { %16257 = vmatprep.subr.bf16.mxu0 %v20858_v0  ;;  %16569 = vmatprep.subr.bf16.mxu1 %v20858_v0  ;;  %v16618_v49 = vpack.c.bf16 %v8579_v11, %v8578_v32  ;;  %v7601_v11 = vld [vmem:[#allocation8 + $0x940] sm:$0xff] }
 0x8a6   : > { %16259 = vmatpush3.bf16.msra.mxu0 %v16258_v61  ;;  %16571 = vmatpush3.bf16.msra.mxu1 %v16570_v6  ;;  %v8580_v61 = vld [vmem:[#allocation8 + $0xec0] sm:$0xff]  ;;  %v8581_v6 = vld [vmem:[#allocation8 + $0xec8] sm:$0xff] }
 0x8a7   : > { %16260 = vmatprep.subr.bf16.mxu0 %v20858_v0  ;;  %16572 = vmatprep.subr.bf16.mxu1 %v20858_v0  ;;  %v16621_v7 = vpack.c.bf16 %v8581_v6, %v8580_v61  ;;  %v7603_v6 = vld [vmem:[#allocation8 + $0x950] sm:$0xff] }
 0x8aa   : > { %16262 = vmatpush3.bf16.msra.mxu0 %v16261_v41  ;;  %16574 = vmatpush3.bf16.msra.mxu1 %v16573_v36  ;;  %v8582_v41 = vld [vmem:[#allocation8 + $0xed0] sm:$0xff]  ;;  %v8583_v36 = vld [vmem:[#allocation8 + $0xed8] sm:$0xff] }
 0x8ab   : > { %16263 = vmatprep.subr.bf16.mxu0 %v20858_v0  ;;  %16575 = vmatprep.subr.bf16.mxu1 %v20858_v0  ;;  %v16624_v44 = vpack.c.bf16 %v8583_v36, %v8582_v41  ;;  %v7605_v36 = vld [vmem:[#allocation8 + $0x960] sm:$0xff] }
 0x8ac   : > { %v6340_v45 = vpop.f32.mrb[40].mxu0  ;;  %v20327_v51 = vpop.f32.mrb[28].mxu1 }
 0x8ad   : > { %v20330_v16 = vadd.f32 %v6340_v45, %v20305_v1  ;;  %v13550_v27 = vpop.f32.mrb[41].mxu0  ;;  %v13900_v55 = vpop.f32.mrb[29].mxu1  ;;  %v7415_v1 = vld [vmem:[#allocation8 + $0x800] sm:$0xff] }
 0x8ae   : > { %16265 = vmatpush3.bf16.msra.mxu0 %v16264_v62  ;;  %16577 = vmatpush3.bf16.msra.mxu1 %v16576_v53  ;;  %v16297_v63 = vpack.c.bf16 %v7416_v58, %v7415_v1  ;;  %v8584_v62 = vld [vmem:[#allocation8 + $0xee0] sm:$0xff]  ;;  %v8585_v53 = vld [vmem:[#allocation8 + $0xee8] sm:$0xff]  ;;  %v16315_v27 = vpack.c.bf16 %v7428_v39, %v7427_v19 }
 0x8af   : > { %16266 = vmatprep.subr.bf16.mxu0 %v20858_v0  ;;  %16578 = vmatprep.subr.bf16.mxu1 %v20858_v0  ;;  %v16627_v55 = vpack.c.bf16 %v8585_v53, %v8584_v62  ;;  %v8751_v1 = vld [vmem:[#allocation8 + $0xf88] sm:$0xff] }
 0x8b0   : > { %v8763_v19 = vld [vmem:[#allocation8 + $0xfe8] sm:$0xff] }
 0x8b2   : > { %16268 = vmatpush3.bf16.msra.mxu0 %v16267_v37  ;;  %16580 = vmatpush3.bf16.msra.mxu1 %v16579_v9  ;;  %v7429_v37 = vld [vmem:[#allocation8 + $0x870] sm:$0xff]  ;;  %v7430_v9 = vld [vmem:[#allocation8 + $0x878] sm:$0xff] }
 0x8b3   : > { %16269 = vmatprep.subr.bf16.mxu0 %v20858_v0  ;;  %16581 = vmatprep.subr.bf16.mxu1 %v20858_v0  ;;  %v16318_v3 = vpack.c.bf16 %v7430_v9, %v7429_v37  ;;  %v7608_v37 = vld [vmem:[#allocation8 + $0x978] sm:$0xff]  ;;  %v8764_v9 = vld [vmem:[#allocation8 + $0xff0] sm:$0xff] }
 0x8b6   : > { %16271 = vmatpush3.bf16.msra.mxu0 %v16270_v47  ;;  %16583 = vmatpush3.bf16.msra.mxu1 %v16582_v52  ;;  %v7594_v47 = vld [vmem:[#allocation8 + $0x908] sm:$0xff]  ;;  %v8750_v52 = vld [vmem:[#allocation8 + $0xf80] sm:$0xff] }
 0x8b7   : > { %16296 = vmatprep.subr.bf16.mxu0 %v20858_v0  ;;  %16608 = vmatprep.subr.bf16.mxu1 %v20858_v0  ;;  %v16657_v42 = vpack.c.bf16 %v8751_v1, %v8750_v52 }
 0x8b9   : > { %13934 = vmatmul.mubr.f32.vlgmr.msra.gmra.mrb[54].mxu0 %v7235_v30  ;;  %14389 = vmatmul.mubr.f32.vlgmr.msra.gmra.mrb[42].mxu1 %v8392_v29  ;;  %v7597_v29 = vld [vmem:[#allocation8 + $0x920] sm:$0xff] }
 0x8ba   : > { %16298 = vmatpush3.bf16.msra.mxu0 %v16297_v63  ;;  %16610 = vmatpush3.bf16.msra.mxu1 %v16609_v31  ;;  %v7596_v63 = vld [vmem:[#allocation8 + $0x918] sm:$0xff]  ;;  %v8752_v31 = vld [vmem:[#allocation8 + $0xf90] sm:$0xff] }
 0x8bb   : > { %16299 = vmatprep.subr.bf16.mxu0 %v20858_v0  ;;  %16611 = vmatprep.subr.bf16.mxu1 %v20858_v0  ;;  %v16348_v15 = vpack.c.bf16 %v7596_v63, %v7595_v8  ;;  %v16660_v30 = vpack.c.bf16 %v8753_v5, %v8752_v31  ;;  %v8930_v8 = vld [vmem:[#allocation8 + $0x1090] sm:$0xff]  ;;  %v8931_v63 = vld [vmem:[#allocation8 + $0x1098] sm:$0xff]  ;;  %v8748_v5 = vld [vmem:[#allocation2 + $0x1f] sm:$0x1] }
 0x8bc   : > { %14003 = vmatprep.mubr.msk.f32.mxu0 %vm17721_vm0, %v20860_v46  ;;  %14458 = vmatprep.mubr.msk.f32.mxu1 %vm17721_vm0, %v20860_v46  ;;  %v7591_v31 = vld [vmem:[#allocation2 + $0x12] sm:$0x1] }
 0x8be   : > { %16301 = vmatpush3.bf16.msra.mxu0 %v16300_v26  ;;  %16613 = vmatpush3.bf16.msra.mxu1 %v16612_v4  ;;  %v7598_v26 = vld [vmem:[#allocation8 + $0x928] sm:$0xff]  ;;  %v8754_v4 = vld [vmem:[#allocation8 + $0xfa0] sm:$0xff] }
 0x8bf   : > { %16302 = vmatprep.subr.bf16.mxu0 %v20858_v0  ;;  %16614 = vmatprep.subr.bf16.mxu1 %v20858_v0  ;;  %v16351_v28 = vpack.c.bf16 %v7598_v26, %v7597_v29  ;;  %v16663_v54 = vpack.c.bf16 %v8755_v48, %v8754_v4  ;;  %v8932_v29 = vld [vmem:[#allocation8 + $0x10a0] sm:$0xff]  ;;  %v8933_v26 = vld [vmem:[#allocation8 + $0x10a8] sm:$0xff] }
 0x8c0   : > { %v16711_v48 = vpack.c.bf16 %v8933_v26, %v8932_v29  ;;  %v9111_v29 = vld [vmem:[#allocation8 + $0x11a8] sm:$0xff] }
 0x8c2   : > { %16304 = vmatpush3.bf16.msra.mxu0 %v16303_v34  ;;  %16616 = vmatpush3.bf16.msra.mxu1 %v16615_v22  ;;  %v7600_v34 = vld [vmem:[#allocation8 + $0x938] sm:$0xff]  ;;  %v8756_v22 = vld [vmem:[#allocation8 + $0xfb0] sm:$0xff] }
 0x8c3   : > { %16305 = vmatprep.subr.bf16.mxu0 %v20858_v0  ;;  %16617 = vmatprep.subr.bf16.mxu1 %v20858_v0  ;;  %v16354_v50 = vpack.c.bf16 %v7600_v34, %v7599_v56  ;;  %v16666_v32 = vpack.c.bf16 %v8757_v13, %v8756_v22  ;;  %v8934_v56 = vld [vmem:[#allocation8 + $0x10b0] sm:$0xff]  ;;  %v8935_v34 = vld [vmem:[#allocation8 + $0x10b8] sm:$0xff] }
 0x8c4   : > { %v16714_v13 = vpack.c.bf16 %v8935_v34, %v8934_v56  ;;  %v9113_v56 = vld [vmem:[#allocation8 + $0x11b8] sm:$0xff] }
 0x8c6   : > { %16307 = vmatpush3.bf16.msra.mxu0 %v16306_v10  ;;  %16619 = vmatpush3.bf16.msra.mxu1 %v16618_v49  ;;  %v7602_v10 = vld [vmem:[#allocation8 + $0x948] sm:$0xff]  ;;  %v8758_v49 = vld [vmem:[#allocation8 + $0xfc0] sm:$0xff] }
 0x8c7   : > { %16308 = vmatprep.subr.bf16.mxu0 %v20858_v0  ;;  %16620 = vmatprep.subr.bf16.mxu1 %v20858_v0  ;;  %v16357_v17 = vpack.c.bf16 %v7602_v10, %v7601_v11  ;;  %v16669_v61 = vpack.c.bf16 %v8759_v2, %v8758_v49  ;;  %v8936_v11 = vld [vmem:[#allocation8 + $0x10c0] sm:$0xff]  ;;  %v8937_v10 = vld [vmem:[#allocation8 + $0x10c8] sm:$0xff] }
 0x8c8   : > { %v16717_v2 = vpack.c.bf16 %v8937_v10, %v8936_v11  ;;  %v9115_v11 = vld [vmem:[#allocation8 + $0x11c8] sm:$0xff] }
 0x8ca   : > { %16310 = vmatpush3.bf16.msra.mxu0 %v16309_v21  ;;  %16622 = vmatpush3.bf16.msra.mxu1 %v16621_v7  ;;  %v7604_v21 = vld [vmem:[#allocation8 + $0x958] sm:$0xff]  ;;  %v8760_v7 = vld [vmem:[#allocation8 + $0xfd0] sm:$0xff] }
 0x8cb   : > { %16311 = vmatprep.subr.bf16.mxu0 %v20858_v0  ;;  %16623 = vmatprep.subr.bf16.mxu1 %v20858_v0  ;;  %v16360_v25 = vpack.c.bf16 %v7604_v21, %v7603_v6  ;;  %v16672_v41 = vpack.c.bf16 %v8761_v40, %v8760_v7  ;;  %v8938_v6 = vld [vmem:[#allocation8 + $0x10d0] sm:$0xff]  ;;  %v8939_v21 = vld [vmem:[#allocation8 + $0x10d8] sm:$0xff] }
 0x8cc   : > { %v6429_v33 = vpop.f32.mrb[42].mxu0  ;;  %v20352_v43 = vpop.f32.mrb[30].mxu1  ;;  %v16720_v40 = vpack.c.bf16 %v8939_v21, %v8938_v6  ;;  %v9117_v6 = vld [vmem:[#allocation8 + $0x11d8] sm:$0xff] }
 0x8cd   : > { %v20355_v57 = vadd.f32 %v6429_v33, %v20330_v16  ;;  %v13585_v24 = vpop.f32.mrb[43].mxu0  ;;  %v13970_v45 = vpop.f32.mrb[31].mxu1  ;;  %v7593_v16 = vld [vmem:[#allocation8 + $0x900] sm:$0xff] }
 0x8ce   : > { %16313 = vmatpush3.bf16.msra.mxu0 %v16312_v35  ;;  %16625 = vmatpush3.bf16.msra.mxu1 %v16624_v44  ;;  %v16345_v58 = vpack.c.bf16 %v7594_v47, %v7593_v16  ;;  %v7606_v35 = vld [vmem:[#allocation8 + $0x968] sm:$0xff]  ;;  %v8762_v44 = vld [vmem:[#allocation8 + $0xfe0] sm:$0xff] }
 0x8cf   : > { %16314 = vmatprep.subr.bf16.mxu0 %v20858_v0  ;;  %16626 = vmatprep.subr.bf16.mxu1 %v20858_v0  ;;  %v16363_v45 = vpack.c.bf16 %v7606_v35, %v7605_v36  ;;  %v8928_v16 = vld [vmem:[#allocation8 + $0x1080] sm:$0xff]  ;;  %v8929_v47 = vld [vmem:[#allocation8 + $0x1088] sm:$0xff] }
 0x8d0   : > { %v16705_v1 = vpack.c.bf16 %v8929_v47, %v8928_v16  ;;  %v8940_v36 = vld [vmem:[#allocation8 + $0x10e0] sm:$0xff]  ;;  %v8941_v35 = vld [vmem:[#allocation8 + $0x10e8] sm:$0xff] }
 0x8d1   : > { %v9106_v16 = vld [vmem:[#allocation8 + $0x1180] sm:$0xff]  ;;  %v9107_v47 = vld [vmem:[#allocation8 + $0x1188] sm:$0xff] }
 0x8d2   : > { %16316 = vmatpush3.bf16.msra.mxu0 %v16315_v27  ;;  %16628 = vmatpush3.bf16.msra.mxu1 %v16627_v55  ;;  %v16675_v27 = vpack.c.bf16 %v8763_v19, %v8762_v44  ;;  %v7607_v55 = vld [vmem:[#allocation8 + $0x970] sm:$0xff] }
 0x8d3   : > { %16317 = vmatprep.subr.bf16.mxu0 %v20858_v0  ;;  %16629 = vmatprep.subr.bf16.mxu1 %v20858_v0  ;;  %v16366_v12 = vpack.c.bf16 %v7608_v37, %v7607_v55  ;;  %v7785_v55 = vld [vmem:[#allocation8 + $0xa70] sm:$0xff]  ;;  %v7786_v37 = vld [vmem:[#allocation8 + $0xa78] sm:$0xff] }
 0x8d6   : > { %16319 = vmatpush3.bf16.msra.mxu0 %v16318_v3  ;;  %16631 = vmatpush3.bf16.msra.mxu1 %v16630_v59  ;;  %v16678_v3 = vpack.c.bf16 %v8765_v14, %v8764_v9  ;;  %v7772_v59 = vld [vmem:[#allocation8 + $0xa08] sm:$0xff]  ;;  %v8942_v9 = vld [vmem:[#allocation8 + $0x10f0] sm:$0xff]  ;;  %v8943_v14 = vld [vmem:[#allocation8 + $0x10f8] sm:$0xff] }
 0x8d7   : > { %16344 = vmatprep.subr.bf16.mxu0 %v20858_v0  ;;  %16656 = vmatprep.subr.bf16.mxu1 %v20858_v0 }
 0x8d9   : > { %14004 = vmatmul.mubr.f32.vlgmr.msra.gmra.mrb[56].mxu0 %v7413_v20  ;;  %14459 = vmatmul.mubr.f32.vlgmr.msra.gmra.mrb[44].mxu1 %v8570_v38  ;;  %v16708_v38 = vpack.c.bf16 %v8931_v63, %v8930_v8  ;;  %v9109_v8 = vld [vmem:[#allocation8 + $0x1198] sm:$0xff] }
 0x8da   : > { %16346 = vmatpush3.bf16.msra.mxu0 %v16345_v58  ;;  %16658 = vmatpush3.bf16.msra.mxu1 %v16657_v42  ;;  %v7773_v58 = vld [vmem:[#allocation8 + $0xa10] sm:$0xff]  ;;  %v7774_v42 = vld [vmem:[#allocation8 + $0xa18] sm:$0xff] }
 0x8db   : > { %16347 = vmatprep.subr.bf16.mxu0 %v20858_v0  ;;  %16659 = vmatprep.subr.bf16.mxu1 %v20858_v0  ;;  %v16396_v20 = vpack.c.bf16 %v7774_v42, %v7773_v58  ;;  %v7951_v58 = vld [vmem:[#allocation8 + $0xb10] sm:$0xff]  ;;  %v7769_v63 = vld [vmem:[#allocation2 + $0x14] sm:$0x1] }
 0x8dc   : > { %14073 = vmatprep.mubr.msk.f32.mxu0 %vm17721_vm0, %v20860_v46  ;;  %14528 = vmatprep.mubr.msk.f32.mxu1 %vm17721_vm0, %v20860_v46  ;;  %v9108_v42 = vld [vmem:[#allocation8 + $0x1190] sm:$0xff] }
 0x8de   : > { %16349 = vmatpush3.bf16.msra.mxu0 %v16348_v15  ;;  %16661 = vmatpush3.bf16.msra.mxu1 %v16660_v30  ;;  %v7775_v15 = vld [vmem:[#allocation8 + $0xa20] sm:$0xff]  ;;  %v7776_v30 = vld [vmem:[#allocation8 + $0xa28] sm:$0xff] }
 0x8df   : > { %16350 = vmatprep.subr.bf16.mxu0 %v20858_v0  ;;  %16662 = vmatprep.subr.bf16.mxu1 %v20858_v0  ;;  %v16399_v4 = vpack.c.bf16 %v7776_v30, %v7775_v15  ;;  %v7954_v15 = vld [vmem:[#allocation8 + $0xb28] sm:$0xff]  ;;  %v9110_v30 = vld [vmem:[#allocation8 + $0x11a0] sm:$0xff] }
 0x8e2   : > { %16352 = vmatpush3.bf16.msra.mxu0 %v16351_v28  ;;  %16664 = vmatpush3.bf16.msra.mxu1 %v16663_v54  ;;  %v7777_v28 = vld [vmem:[#allocation8 + $0xa30] sm:$0xff]  ;;  %v7778_v54 = vld [vmem:[#allocation8 + $0xa38] sm:$0xff] }
 0x8e3   : > { %16353 = vmatprep.subr.bf16.mxu0 %v20858_v0  ;;  %16665 = vmatprep.subr.bf16.mxu1 %v20858_v0  ;;  %v16402_v22 = vpack.c.bf16 %v7778_v54, %v7777_v28  ;;  %v7956_v28 = vld [vmem:[#allocation8 + $0xb38] sm:$0xff]  ;;  %v9112_v54 = vld [vmem:[#allocation8 + $0x11b0] sm:$0xff] }
 0x8e6   : > { %16355 = vmatpush3.bf16.msra.mxu0 %v16354_v50  ;;  %16667 = vmatpush3.bf16.msra.mxu1 %v16666_v32  ;;  %v7779_v50 = vld [vmem:[#allocation8 + $0xa40] sm:$0xff]  ;;  %v7780_v32 = vld [vmem:[#allocation8 + $0xa48] sm:$0xff] }
 0x8e7   : > { %16356 = vmatprep.subr.bf16.mxu0 %v20858_v0  ;;  %16668 = vmatprep.subr.bf16.mxu1 %v20858_v0  ;;  %v16405_v49 = vpack.c.bf16 %v7780_v32, %v7779_v50  ;;  %v7958_v50 = vld [vmem:[#allocation8 + $0xb48] sm:$0xff]  ;;  %v9114_v32 = vld [vmem:[#allocation8 + $0x11c0] sm:$0xff] }
 0x8ea   : > { %16358 = vmatpush3.bf16.msra.mxu0 %v16357_v17  ;;  %16670 = vmatpush3.bf16.msra.mxu1 %v16669_v61  ;;  %v7781_v17 = vld [vmem:[#allocation8 + $0xa50] sm:$0xff]  ;;  %v7782_v61 = vld [vmem:[#allocation8 + $0xa58] sm:$0xff] }
 0x8eb   : > { %16359 = vmatprep.subr.bf16.mxu0 %v20858_v0  ;;  %16671 = vmatprep.subr.bf16.mxu1 %v20858_v0  ;;  %v16408_v7 = vpack.c.bf16 %v7782_v61, %v7781_v17  ;;  %v7960_v17 = vld [vmem:[#allocation8 + $0xb58] sm:$0xff]  ;;  %v9116_v61 = vld [vmem:[#allocation8 + $0x11d0] sm:$0xff] }
 0x8ec   : > { %v6518_v39 = vpop.f32.mrb[44].mxu0  ;;  %v20377_v62 = vpop.f32.mrb[32].mxu1 }
 0x8ed   : > { %v20380_v53 = vadd.f32 %v6518_v39, %v20355_v57  ;;  %v13620_v33 = vpop.f32.mrb[45].mxu0  ;;  %v14040_v24 = vpop.f32.mrb[33].mxu1  ;;  %v7771_v57 = vld [vmem:[#allocation8 + $0xa00] sm:$0xff] }
 0x8ee   : > { %16361 = vmatpush3.bf16.msra.mxu0 %v16360_v25  ;;  %16673 = vmatpush3.bf16.msra.mxu1 %v16672_v41  ;;  %v16393_v52 = vpack.c.bf16 %v7772_v59, %v7771_v57  ;;  %v7783_v25 = vld [vmem:[#allocation8 + $0xa60] sm:$0xff]  ;;  %v7784_v41 = vld [vmem:[#allocation8 + $0xa68] sm:$0xff] }
 0x8ef   : > { %16362 = vmatprep.subr.bf16.mxu0 %v20858_v0  ;;  %16674 = vmatprep.subr.bf16.mxu1 %v20858_v0  ;;  %v7949_v57 = vld [vmem:[#allocation8 + $0xb00] sm:$0xff]  ;;  %v7950_v59 = vld [vmem:[#allocation8 + $0xb08] sm:$0xff] }
 0x8f2   : > { %16364 = vmatpush3.bf16.msra.mxu0 %v16363_v45  ;;  %16676 = vmatpush3.bf16.msra.mxu1 %v16675_v27  ;;  %v16411_v45 = vpack.c.bf16 %v7784_v41, %v7783_v25  ;;  %v16723_v27 = vpack.c.bf16 %v8941_v35, %v8940_v36  ;;  %v7962_v25 = vld [vmem:[#allocation8 + $0xb68] sm:$0xff]  ;;  %v9118_v41 = vld [vmem:[#allocation8 + $0x11e0] sm:$0xff] }
 0x8f3   : > { %16365 = vmatprep.subr.bf16.mxu0 %v20858_v0  ;;  %16677 = vmatprep.subr.bf16.mxu1 %v20858_v0  ;;  %v9119_v36 = vld [vmem:[#allocation8 + $0x11e8] sm:$0xff] }
 0x8f6   : > { %16367 = vmatpush3.bf16.msra.mxu0 %v16366_v12  ;;  %16679 = vmatpush3.bf16.msra.mxu1 %v16678_v3  ;;  %v16726_v3 = vpack.c.bf16 %v8943_v14, %v8942_v9  ;;  %v9120_v9 = vld [vmem:[#allocation8 + $0x11f0] sm:$0xff]  ;;  %v9121_v14 = vld [vmem:[#allocation8 + $0x11f8] sm:$0xff] }
 0x8f7   : > { %16392 = vmatprep.subr.bf16.mxu0 %v20858_v0  ;;  %16704 = vmatprep.subr.bf16.mxu1 %v20858_v0 }
 0x8f9   : > { %14074 = vmatmul.mubr.f32.vlgmr.msra.gmra.mrb[58].mxu0 %v7591_v31  ;;  %14529 = vmatmul.mubr.f32.vlgmr.msra.gmra.mrb[46].mxu1 %v8748_v5  ;;  %v8926_v31 = vld [vmem:[#allocation2 + $0x21] sm:$0x1] }
 0x8fa   : > { %16394 = vmatpush3.bf16.msra.mxu0 %v16393_v52  ;;  %16706 = vmatpush3.bf16.msra.mxu1 %v16705_v1  ;;  %v16441_v52 = vpack.c.bf16 %v7950_v59, %v7949_v57  ;;  %v16753_v1 = vpack.c.bf16 %v9107_v47, %v9106_v16  ;;  %v8127_v57 = vld [vmem:[#allocation8 + $0xc00] sm:$0xff]  ;;  %v8128_v59 = vld [vmem:[#allocation8 + $0xc08] sm:$0xff] }
 0x8fb   : > { %16395 = vmatprep.subr.bf16.mxu0 %v20858_v0  ;;  %16707 = vmatprep.subr.bf16.mxu1 %v20858_v0  ;;  %v9284_v16 = vld [vmem:[#allocation8 + $0x1280] sm:$0xff]  ;;  %v9285_v47 = vld [vmem:[#allocation8 + $0x1288] sm:$0xff] }
 0x8fc   : > { %14143 = vmatprep.mubr.msk.f32.mxu0 %vm17721_vm0, %v20860_v46  ;;  %14598 = vmatprep.mubr.msk.f32.mxu1 %vm17721_vm0, %v20860_v46 }
 0x8fe   : > { %16397 = vmatpush3.bf16.msra.mxu0 %v16396_v20  ;;  %16709 = vmatpush3.bf16.msra.mxu1 %v16708_v38  ;;  %v16756_v20 = vpack.c.bf16 %v9109_v8, %v9108_v42  ;;  %v7953_v38 = vld [vmem:[#allocation8 + $0xb20] sm:$0xff]  ;;  %v9287_v42 = vld [vmem:[#allocation8 + $0x1298] sm:$0xff] }
 0x8ff   : > { %16398 = vmatprep.subr.bf16.mxu0 %v20858_v0  ;;  %16710 = vmatprep.subr.bf16.mxu1 %v20858_v0  ;;  %v16447_v26 = vpack.c.bf16 %v7954_v15, %v7953_v38  ;;  %v7947_v8 = vld [vmem:[#allocation2 + $0x16] sm:$0x1]  ;;  %v8132_v38 = vld [vmem:[#allocation8 + $0xc28] sm:$0xff]  ;;  %v9288_v15 = vld [vmem:[#allocation8 + $0x12a0] sm:$0xff] }
 0x902   : > { %16400 = vmatpush3.bf16.msra.mxu0 %v16399_v4  ;;  %16712 = vmatpush3.bf16.msra.mxu1 %v16711_v48  ;;  %v16759_v4 = vpack.c.bf16 %v9111_v29, %v9110_v30  ;;  %v7955_v48 = vld [vmem:[#allocation8 + $0xb30] sm:$0xff]  ;;  %v9289_v30 = vld [vmem:[#allocation8 + $0x12a8] sm:$0xff] }
 0x903   : > { %16401 = vmatprep.subr.bf16.mxu0 %v20858_v0  ;;  %16713 = vmatprep.subr.bf16.mxu1 %v20858_v0  ;;  %v16450_v34 = vpack.c.bf16 %v7956_v28, %v7955_v48  ;;  %v8134_v48 = vld [vmem:[#allocation8 + $0xc38] sm:$0xff]  ;;  %v9290_v28 = vld [vmem:[#allocation8 + $0x12b0] sm:$0xff] }
 0x906   : > { %16403 = vmatpush3.bf16.msra.mxu0 %v16402_v22  ;;  %16715 = vmatpush3.bf16.msra.mxu1 %v16714_v13  ;;  %v16762_v22 = vpack.c.bf16 %v9113_v56, %v9112_v54  ;;  %v7957_v13 = vld [vmem:[#allocation8 + $0xb40] sm:$0xff]  ;;  %v9291_v54 = vld [vmem:[#allocation8 + $0x12b8] sm:$0xff] }
 0x907   : > { %16404 = vmatprep.subr.bf16.mxu0 %v20858_v0  ;;  %16716 = vmatprep.subr.bf16.mxu1 %v20858_v0  ;;  %v16453_v10 = vpack.c.bf16 %v7958_v50, %v7957_v13  ;;  %v8136_v13 = vld [vmem:[#allocation8 + $0xc48] sm:$0xff]  ;;  %v9292_v50 = vld [vmem:[#allocation8 + $0x12c0] sm:$0xff] }
 0x90a   : > { %16406 = vmatpush3.bf16.msra.mxu0 %v16405_v49  ;;  %16718 = vmatpush3.bf16.msra.mxu1 %v16717_v2  ;;  %v16765_v49 = vpack.c.bf16 %v9115_v11, %v9114_v32  ;;  %v7959_v2 = vld [vmem:[#allocation8 + $0xb50] sm:$0xff]  ;;  %v9293_v32 = vld [vmem:[#allocation8 + $0x12c8] sm:$0xff] }
 0x90b   : > { %16407 = vmatprep.subr.bf16.mxu0 %v20858_v0  ;;  %16719 = vmatprep.subr.bf16.mxu1 %v20858_v0  ;;  %v16456_v21 = vpack.c.bf16 %v7960_v17, %v7959_v2  ;;  %v8138_v2 = vld [vmem:[#allocation8 + $0xc58] sm:$0xff]  ;;  %v9294_v17 = vld [vmem:[#allocation8 + $0x12d0] sm:$0xff] }
 0x90c   : > { %v6607_v44 = vpop.f32.mrb[46].mxu0  ;;  %v20402_v19 = vpop.f32.mrb[34].mxu1 }
 0x90d   : > { %v6611_v39 = vadd.f32 %v6607_v44, %v20380_v53  ;;  %v13655_v33 = vpop.f32.mrb[47].mxu0  ;;  %v14110_v24 = vpop.f32.mrb[35].mxu1  ;;  %v16414_v53 = vpack.c.bf16 %v7786_v37, %v7785_v55  ;;  %v7963_v55 = vld [vmem:[#allocation8 + $0xb70] sm:$0xff]  ;;  %v7964_v37 = vld [vmem:[#allocation8 + $0xb78] sm:$0xff] }
 0x90e   : > { %16409 = vmatpush3.bf16.msra.mxu0 %v16408_v7  ;;  %16721 = vmatpush3.bf16.msra.mxu1 %v16720_v40  ;;  %v16768_v7 = vpack.c.bf16 %v9117_v6, %v9116_v61  ;;  %v7961_v40 = vld [vmem:[#allocation8 + $0xb60] sm:$0xff]  ;;  %v9295_v61 = vld [vmem:[#allocation8 + $0x12d8] sm:$0xff] }
 0x90f   : > { %16410 = vmatprep.subr.bf16.mxu0 %v20858_v0  ;;  %16722 = vmatprep.subr.bf16.mxu1 %v20858_v0  ;;  %v20408_v12 = vadd.f32 %v20255_v60, %v6611_v39  ;;  %v7952_v60 = vld [vmem:[#allocation8 + $0xb18] sm:$0xff] }
 0x910   : > { %v16444_v5 = vpack.c.bf16 %v7952_v60, %v7951_v58  ;;  %v8129_v58 = vld [vmem:[#allocation8 + $0xc10] sm:$0xff] }
 0x911   : > { %v9286_v60 = vld [vmem:[#allocation8 + $0x1290] sm:$0xff] }
 0x912   : > { %16412 = vmatpush3.bf16.msra.mxu0 %v16411_v45  ;;  %16724 = vmatpush3.bf16.msra.mxu1 %v16723_v27  ;;  %v16459_v45 = vpack.c.bf16 %v7962_v25, %v7961_v40  ;;  %v16771_v27 = vpack.c.bf16 %v9119_v36, %v9118_v41  ;;  %v8140_v40 = vld [vmem:[#allocation8 + $0xc68] sm:$0xff]  ;;  %v9296_v25 = vld [vmem:[#allocation8 + $0x12e0] sm:$0xff] }
 0x913   : > { %16413 = vmatprep.subr.bf16.mxu0 %v20858_v0  ;;  %16725 = vmatprep.subr.bf16.mxu1 %v20858_v0  ;;  %v9297_v41 = vld [vmem:[#allocation8 + $0x12e8] sm:$0xff] }
 0x916   : > { %16415 = vmatpush3.bf16.msra.mxu0 %v16414_v53  ;;  %16727 = vmatpush3.bf16.msra.mxu1 %v16726_v3  ;;  %v16774_v3 = vpack.c.bf16 %v9121_v14, %v9120_v9  ;;  %v9298_v9 = vld [vmem:[#allocation8 + $0x12f0] sm:$0xff]  ;;  %v9299_v14 = vld [vmem:[#allocation8 + $0x12f8] sm:$0xff] }
 0x917   : > { %16440 = vmatprep.subr.bf16.mxu0 %v20858_v0  ;;  %16752 = vmatprep.subr.bf16.mxu1 %v20858_v0 }
 0x919   : > { %14144 = vmatmul.mubr.f32.vlgmr.msra.gmra.mrb[60].mxu0 %v7769_v63  ;;  %14599 = vmatmul.mubr.f32.vlgmr.msra.gmra.mrb[48].mxu1 %v8926_v31  ;;  %v9104_v63 = vld [vmem:[#allocation2 + $0x23] sm:$0x1] }
 0x91a   : > { %16442 = vmatpush3.bf16.msra.mxu0 %v16441_v52  ;;  %16754 = vmatpush3.bf16.msra.mxu1 %v16753_v1  ;;  %v16489_v52 = vpack.c.bf16 %v8128_v59, %v8127_v57  ;;  %v16801_v1 = vpack.c.bf16 %v9285_v47, %v9284_v16  ;;  %v8305_v57 = vld [vmem:[#allocation8 + $0xd00] sm:$0xff]  ;;  %v8306_v59 = vld [vmem:[#allocation8 + $0xd08] sm:$0xff] }
 0x91b   : > { %16443 = vmatprep.subr.bf16.mxu0 %v20858_v0  ;;  %16755 = vmatprep.subr.bf16.mxu1 %v20858_v0  ;;  %v9462_v16 = vld [vmem:[#allocation8 + $0x1380] sm:$0xff]  ;;  %v9463_v47 = vld [vmem:[#allocation8 + $0x1388] sm:$0xff] }
 0x91c   : > { %14213 = vmatprep.mubr.msk.f32.mxu0 %vm17721_vm0, %v20860_v46  ;;  %14668 = vmatprep.mubr.msk.f32.mxu1 %vm17721_vm0, %v20860_v46 }
 0x91e   : > { %16445 = vmatpush3.bf16.msra.mxu0 %v16444_v5  ;;  %16757 = vmatpush3.bf16.msra.mxu1 %v16756_v20  ;;  %v16804_v5 = vpack.c.bf16 %v9287_v42, %v9286_v60  ;;  %v8131_v20 = vld [vmem:[#allocation8 + $0xc20] sm:$0xff]  ;;  %v9465_v60 = vld [vmem:[#allocation8 + $0x1398] sm:$0xff] }
 0x91f   : > { %16446 = vmatprep.subr.bf16.mxu0 %v20858_v0  ;;  %16758 = vmatprep.subr.bf16.mxu1 %v20858_v0  ;;  %v16495_v29 = vpack.c.bf16 %v8132_v38, %v8131_v20  ;;  %v8125_v42 = vld [vmem:[#allocation2 + $0x18] sm:$0x1]  ;;  %v8310_v20 = vld [vmem:[#allocation8 + $0xd28] sm:$0xff] }
 0x920   : > { %v9466_v38 = vld [vmem:[#allocation8 + $0x13a0] sm:$0xff] }
 0x922   : > { %16448 = vmatpush3.bf16.msra.mxu0 %v16447_v26  ;;  %16760 = vmatpush3.bf16.msra.mxu1 %v16759_v4  ;;  %v16807_v26 = vpack.c.bf16 %v9289_v30, %v9288_v15  ;;  %v8133_v4 = vld [vmem:[#allocation8 + $0xc30] sm:$0xff]  ;;  %v9467_v15 = vld [vmem:[#allocation8 + $0x13a8] sm:$0xff] }
 0x923   : > { %16449 = vmatprep.subr.bf16.mxu0 %v20858_v0  ;;  %16761 = vmatprep.subr.bf16.mxu1 %v20858_v0  ;;  %v16498_v56 = vpack.c.bf16 %v8134_v48, %v8133_v4  ;;  %v8312_v4 = vld [vmem:[#allocation8 + $0xd38] sm:$0xff]  ;;  %v9468_v48 = vld [vmem:[#allocation8 + $0x13b0] sm:$0xff] }
 0x926   : > { %16451 = vmatpush3.bf16.msra.mxu0 %v16450_v34  ;;  %16763 = vmatpush3.bf16.msra.mxu1 %v16762_v22  ;;  %v16810_v34 = vpack.c.bf16 %v9291_v54, %v9290_v28  ;;  %v8135_v22 = vld [vmem:[#allocation8 + $0xc40] sm:$0xff]  ;;  %v9469_v28 = vld [vmem:[#allocation8 + $0x13b8] sm:$0xff] }
 0x927   : > { %16452 = vmatprep.subr.bf16.mxu0 %v20858_v0  ;;  %16764 = vmatprep.subr.bf16.mxu1 %v20858_v0  ;;  %v16501_v11 = vpack.c.bf16 %v8136_v13, %v8135_v22  ;;  %v8314_v22 = vld [vmem:[#allocation8 + $0xd48] sm:$0xff]  ;;  %v9470_v13 = vld [vmem:[#allocation8 + $0x13c0] sm:$0xff] }
 0x92a   : > { %16454 = vmatpush3.bf16.msra.mxu0 %v16453_v10  ;;  %16766 = vmatpush3.bf16.msra.mxu1 %v16765_v49  ;;  %v16813_v10 = vpack.c.bf16 %v9293_v32, %v9292_v50  ;;  %v8137_v49 = vld [vmem:[#allocation8 + $0xc50] sm:$0xff]  ;;  %v9471_v50 = vld [vmem:[#allocation8 + $0x13c8] sm:$0xff] }
 0x92b   : > { %16455 = vmatprep.subr.bf16.mxu0 %v20858_v0  ;;  %16767 = vmatprep.subr.bf16.mxu1 %v20858_v0  ;;  %v16504_v6 = vpack.c.bf16 %v8138_v2, %v8137_v49  ;;  %v8316_v49 = vld [vmem:[#allocation8 + $0xd58] sm:$0xff]  ;;  %v9472_v2 = vld [vmem:[#allocation8 + $0x13d0] sm:$0xff] }
 0x92c   : > { %v6785_v35 = vpop.f32.mrb[48].mxu0  ;;  %v20428_v44 = vpop.f32.mrb[36].mxu1 }
 0x92d   : > { %v6789_v39 = vadd.f32 %v6785_v35, %v20408_v12  ;;  %v13725_v33 = vpop.f32.mrb[49].mxu0  ;;  %v14180_v24 = vpop.f32.mrb[37].mxu1  ;;  %v16462_v12 = vpack.c.bf16 %v7964_v37, %v7963_v55  ;;  %v8141_v55 = vld [vmem:[#allocation8 + $0xc70] sm:$0xff]  ;;  %v8142_v37 = vld [vmem:[#allocation8 + $0xc78] sm:$0xff] }
 0x92e   : > { %16457 = vmatpush3.bf16.msra.mxu0 %v16456_v21  ;;  %16769 = vmatpush3.bf16.msra.mxu1 %v16768_v7  ;;  %v16816_v21 = vpack.c.bf16 %v9295_v61, %v9294_v17  ;;  %v8139_v7 = vld [vmem:[#allocation8 + $0xc60] sm:$0xff]  ;;  %v9473_v17 = vld [vmem:[#allocation8 + $0x13d8] sm:$0xff] }
 0x92f   : > { %16458 = vmatprep.subr.bf16.mxu0 %v20858_v0  ;;  %16770 = vmatprep.subr.bf16.mxu1 %v20858_v0  ;;  %v20434_v53 = vadd.f32 %v20277_v18, %v6789_v39  ;;  %v8130_v18 = vld [vmem:[#allocation8 + $0xc18] sm:$0xff] }
 0x930   : > { %v16492_v31 = vpack.c.bf16 %v8130_v18, %v8129_v58  ;;  %v8307_v58 = vld [vmem:[#allocation8 + $0xd10] sm:$0xff] }
 0x931   : > { %v9464_v18 = vld [vmem:[#allocation8 + $0x1390] sm:$0xff] }
 0x932   : > { %16460 = vmatpush3.bf16.msra.mxu0 %v16459_v45  ;;  %16772 = vmatpush3.bf16.msra.mxu1 %v16771_v27  ;;  %v16507_v45 = vpack.c.bf16 %v8140_v40, %v8139_v7  ;;  %v16819_v27 = vpack.c.bf16 %v9297_v41, %v9296_v25  ;;  %v8318_v7 = vld [vmem:[#allocation8 + $0xd68] sm:$0xff]  ;;  %v9474_v40 = vld [vmem:[#allocation8 + $0x13e0] sm:$0xff] }
 0x933   : > { %16461 = vmatprep.subr.bf16.mxu0 %v20858_v0  ;;  %16773 = vmatprep.subr.bf16.mxu1 %v20858_v0  ;;  %v9475_v25 = vld [vmem:[#allocation8 + $0x13e8] sm:$0xff] }
 0x936   : > { %16463 = vmatpush3.bf16.msra.mxu0 %v16462_v12  ;;  %16775 = vmatpush3.bf16.msra.mxu1 %v16774_v3  ;;  %v16822_v3 = vpack.c.bf16 %v9299_v14, %v9298_v9  ;;  %v9476_v9 = vld [vmem:[#allocation8 + $0x13f0] sm:$0xff]  ;;  %v9477_v14 = vld [vmem:[#allocation8 + $0x13f8] sm:$0xff] }
 0x937   : > { %16488 = vmatprep.subr.bf16.mxu0 %v20858_v0  ;;  %16800 = vmatprep.subr.bf16.mxu1 %v20858_v0 }
 0x939   : > { %14214 = vmatmul.mubr.f32.vlgmr.msra.gmra.mrb[62].mxu0 %v7947_v8  ;;  %14669 = vmatmul.mubr.f32.vlgmr.msra.gmra.mrb[50].mxu1 %v9104_v63  ;;  %v9282_v8 = vld [vmem:[#allocation2 + $0x25] sm:$0x1] }
 0x93a   : > { %16490 = vmatpush3.bf16.msra.mxu0 %v16489_v52  ;;  %16802 = vmatpush3.bf16.msra.mxu1 %v16801_v1  ;;  %v16537_v52 = vpack.c.bf16 %v8306_v59, %v8305_v57  ;;  %v16849_v1 = vpack.c.bf16 %v9463_v47, %v9462_v16  ;;  %v8483_v57 = vld [vmem:[#allocation8 + $0xe00] sm:$0xff]  ;;  %v8484_v59 = vld [vmem:[#allocation8 + $0xe08] sm:$0xff] }
 0x93b   : > { %16491 = vmatprep.subr.bf16.mxu0 %v20858_v0  ;;  %16803 = vmatprep.subr.bf16.mxu1 %v20858_v0  ;;  %v9640_v16 = vld [vmem:[#allocation8 + $0x1480] sm:$0xff]  ;;  %v9641_v47 = vld [vmem:[#allocation8 + $0x1488] sm:$0xff] }
 0x93c   : > { %14283 = vmatprep.mubr.msk.f32.mxu0 %vm17721_vm0, %v20860_v46  ;;  %14738 = vmatprep.mubr.msk.f32.mxu1 %vm17721_vm0, %v20860_v46 }
 0x93e   : > { %16493 = vmatpush3.bf16.msra.mxu0 %v16492_v31  ;;  %16805 = vmatpush3.bf16.msra.mxu1 %v16804_v5  ;;  %v16852_v31 = vpack.c.bf16 %v9465_v60, %v9464_v18  ;;  %v8309_v5 = vld [vmem:[#allocation8 + $0xd20] sm:$0xff]  ;;  %v9643_v18 = vld [vmem:[#allocation8 + $0x1498] sm:$0xff] }
 0x93f   : > { %16494 = vmatprep.subr.bf16.mxu0 %v20858_v0  ;;  %16806 = vmatprep.subr.bf16.mxu1 %v20858_v0  ;;  %v16543_v30 = vpack.c.bf16 %v8310_v20, %v8309_v5  ;;  %v8303_v60 = vld [vmem:[#allocation2 + $0x1a] sm:$0x1]  ;;  %v8488_v5 = vld [vmem:[#allocation8 + $0xe28] sm:$0xff] }
 0x940   : > { %v9644_v20 = vld [vmem:[#allocation8 + $0x14a0] sm:$0xff] }
 0x942   : > { %16496 = vmatpush3.bf16.msra.mxu0 %v16495_v29  ;;  %16808 = vmatpush3.bf16.msra.mxu1 %v16807_v26  ;;  %v16855_v29 = vpack.c.bf16 %v9467_v15, %v9466_v38  ;;  %v8311_v26 = vld [vmem:[#allocation8 + $0xd30] sm:$0xff]  ;;  %v9645_v38 = vld [vmem:[#allocation8 + $0x14a8] sm:$0xff] }
 0x943   : > { %16497 = vmatprep.subr.bf16.mxu0 %v20858_v0  ;;  %16809 = vmatprep.subr.bf16.mxu1 %v20858_v0  ;;  %v16546_v54 = vpack.c.bf16 %v8312_v4, %v8311_v26  ;;  %v8490_v26 = vld [vmem:[#allocation8 + $0xe38] sm:$0xff]  ;;  %v9646_v4 = vld [vmem:[#allocation8 + $0x14b0] sm:$0xff] }
 0x946   : > { %16499 = vmatpush3.bf16.msra.mxu0 %v16498_v56  ;;  %16811 = vmatpush3.bf16.msra.mxu1 %v16810_v34  ;;  %v16858_v56 = vpack.c.bf16 %v9469_v28, %v9468_v48  ;;  %v8313_v34 = vld [vmem:[#allocation8 + $0xd40] sm:$0xff]  ;;  %v9647_v48 = vld [vmem:[#allocation8 + $0x14b8] sm:$0xff] }
 0x947   : > { %16500 = vmatprep.subr.bf16.mxu0 %v20858_v0  ;;  %16812 = vmatprep.subr.bf16.mxu1 %v20858_v0  ;;  %v16549_v32 = vpack.c.bf16 %v8314_v22, %v8313_v34  ;;  %v8492_v34 = vld [vmem:[#allocation8 + $0xe48] sm:$0xff]  ;;  %v9648_v22 = vld [vmem:[#allocation8 + $0x14c0] sm:$0xff] }
 0x94a   : > { %16502 = vmatpush3.bf16.msra.mxu0 %v16501_v11  ;;  %16814 = vmatpush3.bf16.msra.mxu1 %v16813_v10  ;;  %v16861_v11 = vpack.c.bf16 %v9471_v50, %v9470_v13  ;;  %v8315_v10 = vld [vmem:[#allocation8 + $0xd50] sm:$0xff]  ;;  %v9649_v13 = vld [vmem:[#allocation8 + $0x14c8] sm:$0xff] }
 0x94b   : > { %16503 = vmatprep.subr.bf16.mxu0 %v20858_v0  ;;  %16815 = vmatprep.subr.bf16.mxu1 %v20858_v0  ;;  %v16552_v61 = vpack.c.bf16 %v8316_v49, %v8315_v10  ;;  %v8494_v10 = vld [vmem:[#allocation8 + $0xe58] sm:$0xff]  ;;  %v9650_v49 = vld [vmem:[#allocation8 + $0x14d0] sm:$0xff] }
 0x94c   : > { %v6963_v36 = vpop.f32.mrb[50].mxu0  ;;  %v20454_v35 = vpop.f32.mrb[38].mxu1 }
 0x94d   : > { %v6967_v39 = vadd.f32 %v6963_v36, %v20434_v53  ;;  %v13795_v33 = vpop.f32.mrb[51].mxu0  ;;  %v14250_v24 = vpop.f32.mrb[39].mxu1  ;;  %v16510_v53 = vpack.c.bf16 %v8142_v37, %v8141_v55  ;;  %v8319_v55 = vld [vmem:[#allocation8 + $0xd70] sm:$0xff]  ;;  %v8320_v37 = vld [vmem:[#allocation8 + $0xd78] sm:$0xff] }
 0x94e   : > { %16505 = vmatpush3.bf16.msra.mxu0 %v16504_v6  ;;  %16817 = vmatpush3.bf16.msra.mxu1 %v16816_v21  ;;  %v16864_v6 = vpack.c.bf16 %v9473_v17, %v9472_v2  ;;  %v8317_v21 = vld [vmem:[#allocation8 + $0xd60] sm:$0xff]  ;;  %v9651_v2 = vld [vmem:[#allocation8 + $0x14d8] sm:$0xff] }
 0x94f   : > { %16506 = vmatprep.subr.bf16.mxu0 %v20858_v0  ;;  %16818 = vmatprep.subr.bf16.mxu1 %v20858_v0  ;;  %v20460_v12 = vadd.f32 %v20302_v23, %v6967_v39  ;;  %v8308_v23 = vld [vmem:[#allocation8 + $0xd18] sm:$0xff] }
 0x950   : > { %v16540_v63 = vpack.c.bf16 %v8308_v23, %v8307_v58  ;;  %v8485_v58 = vld [vmem:[#allocation8 + $0xe10] sm:$0xff] }
 0x951   : > { %v9642_v23 = vld [vmem:[#allocation8 + $0x1490] sm:$0xff] }
 0x952   : > { %16508 = vmatpush3.bf16.msra.mxu0 %v16507_v45  ;;  %16820 = vmatpush3.bf16.msra.mxu1 %v16819_v27  ;;  %v16555_v45 = vpack.c.bf16 %v8318_v7, %v8317_v21  ;;  %v16867_v27 = vpack.c.bf16 %v9475_v25, %v9474_v40  ;;  %v8496_v21 = vld [vmem:[#allocation8 + $0xe68] sm:$0xff]  ;;  %v9652_v7 = vld [vmem:[#allocation8 + $0x14e0] sm:$0xff] }
 0x953   : > { %16509 = vmatprep.subr.bf16.mxu0 %v20858_v0  ;;  %16821 = vmatprep.subr.bf16.mxu1 %v20858_v0  ;;  %v9653_v40 = vld [vmem:[#allocation8 + $0x14e8] sm:$0xff] }
 0x956   : > { %16511 = vmatpush3.bf16.msra.mxu0 %v16510_v53  ;;  %16823 = vmatpush3.bf16.msra.mxu1 %v16822_v3  ;;  %v16870_v3 = vpack.c.bf16 %v9477_v14, %v9476_v9  ;;  %v9654_v9 = vld [vmem:[#allocation8 + $0x14f0] sm:$0xff]  ;;  %v9655_v14 = vld [vmem:[#allocation8 + $0x14f8] sm:$0xff] }
 0x957   : > { %16536 = vmatprep.subr.bf16.mxu0 %v20858_v0  ;;  %16848 = vmatprep.subr.bf16.mxu1 %v20858_v0 }
 0x959   : > { %14284 = vmatmul.mubr.f32.vlgmr.msra.gmra.mrb[64].mxu0 %v8125_v42  ;;  %14739 = vmatmul.mubr.f32.vlgmr.msra.gmra.mrb[52].mxu1 %v9282_v8  ;;  %v9460_v42 = vld [vmem:[#allocation2 + $0x27] sm:$0x1] }
 0x95a   : > { %16538 = vmatpush3.bf16.msra.mxu0 %v16537_v52  ;;  %16850 = vmatpush3.bf16.msra.mxu1 %v16849_v1  ;;  %v16585_v52 = vpack.c.bf16 %v8484_v59, %v8483_v57  ;;  %v16897_v1 = vpack.c.bf16 %v9641_v47, %v9640_v16  ;;  %v8661_v57 = vld [vmem:[#allocation8 + $0xf00] sm:$0xff]  ;;  %v8662_v59 = vld [vmem:[#allocation8 + $0xf08] sm:$0xff] }
 0x95b   : > { %16539 = vmatprep.subr.bf16.mxu0 %v20858_v0  ;;  %16851 = vmatprep.subr.bf16.mxu1 %v20858_v0  ;;  %v9818_v16 = vld [vmem:[#allocation8 + $0x1580] sm:$0xff]  ;;  %v9819_v47 = vld [vmem:[#allocation8 + $0x1588] sm:$0xff] }
 0x95c   : > { %14353 = vmatprep.mubr.msk.f32.mxu0 %vm17721_vm0, %v20860_v46  ;;  %14808 = vmatprep.mubr.msk.f32.mxu1 %vm17721_vm0, %v20860_v46 }
 0x95e   : > { %16541 = vmatpush3.bf16.msra.mxu0 %v16540_v63  ;;  %16853 = vmatpush3.bf16.msra.mxu1 %v16852_v31  ;;  %v16900_v63 = vpack.c.bf16 %v9643_v18, %v9642_v23  ;;  %v8487_v31 = vld [vmem:[#allocation8 + $0xe20] sm:$0xff]  ;;  %v9821_v23 = vld [vmem:[#allocation8 + $0x1598] sm:$0xff] }
 0x95f   : > { %16542 = vmatprep.subr.bf16.mxu0 %v20858_v0  ;;  %16854 = vmatprep.subr.bf16.mxu1 %v20858_v0  ;;  %v16591_v15 = vpack.c.bf16 %v8488_v5, %v8487_v31  ;;  %v8481_v18 = vld [vmem:[#allocation2 + $0x1c] sm:$0x1]  ;;  %v8666_v31 = vld [vmem:[#allocation8 + $0xf28] sm:$0xff] }
 0x960   : > { %v9822_v5 = vld [vmem:[#allocation8 + $0x15a0] sm:$0xff] }
 0x962   : > { %16544 = vmatpush3.bf16.msra.mxu0 %v16543_v30  ;;  %16856 = vmatpush3.bf16.msra.mxu1 %v16855_v29  ;;  %v16903_v30 = vpack.c.bf16 %v9645_v38, %v9644_v20  ;;  %v8489_v29 = vld [vmem:[#allocation8 + $0xe30] sm:$0xff]  ;;  %v9823_v20 = vld [vmem:[#allocation8 + $0x15a8] sm:$0xff] }
 0x963   : > { %16545 = vmatprep.subr.bf16.mxu0 %v20858_v0  ;;  %16857 = vmatprep.subr.bf16.mxu1 %v20858_v0  ;;  %v16594_v28 = vpack.c.bf16 %v8490_v26, %v8489_v29  ;;  %v8668_v29 = vld [vmem:[#allocation8 + $0xf38] sm:$0xff]  ;;  %v9824_v26 = vld [vmem:[#allocation8 + $0x15b0] sm:$0xff] }
 0x966   : > { %16547 = vmatpush3.bf16.msra.mxu0 %v16546_v54  ;;  %16859 = vmatpush3.bf16.msra.mxu1 %v16858_v56  ;;  %v16906_v54 = vpack.c.bf16 %v9647_v48, %v9646_v4  ;;  %v8491_v56 = vld [vmem:[#allocation8 + $0xe40] sm:$0xff]  ;;  %v9825_v4 = vld [vmem:[#allocation8 + $0x15b8] sm:$0xff] }
 0x967   : > { %16548 = vmatprep.subr.bf16.mxu0 %v20858_v0  ;;  %16860 = vmatprep.subr.bf16.mxu1 %v20858_v0  ;;  %v16597_v50 = vpack.c.bf16 %v8492_v34, %v8491_v56  ;;  %v8670_v56 = vld [vmem:[#allocation8 + $0xf48] sm:$0xff]  ;;  %v9826_v34 = vld [vmem:[#allocation8 + $0x15c0] sm:$0xff] }
 0x96a   : > { %16550 = vmatpush3.bf16.msra.mxu0 %v16549_v32  ;;  %16862 = vmatpush3.bf16.msra.mxu1 %v16861_v11  ;;  %v16909_v32 = vpack.c.bf16 %v9649_v13, %v9648_v22  ;;  %v8493_v11 = vld [vmem:[#allocation8 + $0xe50] sm:$0xff]  ;;  %v9827_v22 = vld [vmem:[#allocation8 + $0x15c8] sm:$0xff] }
 0x96b   : > { %16551 = vmatprep.subr.bf16.mxu0 %v20858_v0  ;;  %16863 = vmatprep.subr.bf16.mxu1 %v20858_v0  ;;  %v16600_v17 = vpack.c.bf16 %v8494_v10, %v8493_v11  ;;  %v8672_v11 = vld [vmem:[#allocation8 + $0xf58] sm:$0xff]  ;;  %v9828_v10 = vld [vmem:[#allocation8 + $0x15d0] sm:$0xff] }
 0x96c   : > { %v7141_v41 = vpop.f32.mrb[52].mxu0  ;;  %v20480_v36 = vpop.f32.mrb[40].mxu1 }
 0x96d   : > { %v7145_v39 = vadd.f32 %v7141_v41, %v20460_v12  ;;  %v13865_v33 = vpop.f32.mrb[53].mxu0  ;;  %v14320_v24 = vpop.f32.mrb[41].mxu1  ;;  %v16558_v12 = vpack.c.bf16 %v8320_v37, %v8319_v55  ;;  %v8497_v55 = vld [vmem:[#allocation8 + $0xe70] sm:$0xff]  ;;  %v8498_v37 = vld [vmem:[#allocation8 + $0xe78] sm:$0xff] }
 0x96e   : > { %16553 = vmatpush3.bf16.msra.mxu0 %v16552_v61  ;;  %16865 = vmatpush3.bf16.msra.mxu1 %v16864_v6  ;;  %v16912_v61 = vpack.c.bf16 %v9651_v2, %v9650_v49  ;;  %v8495_v6 = vld [vmem:[#allocation8 + $0xe60] sm:$0xff]  ;;  %v9829_v49 = vld [vmem:[#allocation8 + $0x15d8] sm:$0xff] }
 0x96f   : > { %16554 = vmatprep.subr.bf16.mxu0 %v20858_v0  ;;  %16866 = vmatprep.subr.bf16.mxu1 %v20858_v0  ;;  %v20486_v53 = vadd.f32 %v20327_v51, %v7145_v39  ;;  %v8486_v51 = vld [vmem:[#allocation8 + $0xe18] sm:$0xff] }
 0x970   : > { %v16588_v8 = vpack.c.bf16 %v8486_v51, %v8485_v58  ;;  %v8663_v58 = vld [vmem:[#allocation8 + $0xf10] sm:$0xff] }
 0x971   : > { %v9820_v51 = vld [vmem:[#allocation8 + $0x1590] sm:$0xff] }
 0x972   : > { %16556 = vmatpush3.bf16.msra.mxu0 %v16555_v45  ;;  %16868 = vmatpush3.bf16.msra.mxu1 %v16867_v27  ;;  %v16603_v45 = vpack.c.bf16 %v8496_v21, %v8495_v6  ;;  %v16915_v27 = vpack.c.bf16 %v9653_v40, %v9652_v7  ;;  %v8674_v6 = vld [vmem:[#allocation8 + $0xf68] sm:$0xff]  ;;  %v9830_v21 = vld [vmem:[#allocation8 + $0x15e0] sm:$0xff] }
 0x973   : > { %16557 = vmatprep.subr.bf16.mxu0 %v20858_v0  ;;  %16869 = vmatprep.subr.bf16.mxu1 %v20858_v0  ;;  %v9831_v7 = vld [vmem:[#allocation8 + $0x15e8] sm:$0xff] }
 0x976   : > { %16559 = vmatpush3.bf16.msra.mxu0 %v16558_v12  ;;  %16871 = vmatpush3.bf16.msra.mxu1 %v16870_v3  ;;  %v16918_v3 = vpack.c.bf16 %v9655_v14, %v9654_v9  ;;  %v9832_v9 = vld [vmem:[#allocation8 + $0x15f0] sm:$0xff]  ;;  %v9833_v14 = vld [vmem:[#allocation8 + $0x15f8] sm:$0xff] }
 0x977   : > { %16584 = vmatprep.subr.bf16.mxu0 %v20858_v0  ;;  %16896 = vmatprep.subr.bf16.mxu1 %v20858_v0 }
 0x979   : > { %14354 = vmatmul.mubr.f32.vlgmr.msra.gmra.mrb[66].mxu0 %v8303_v60  ;;  %14809 = vmatmul.mubr.f32.vlgmr.msra.gmra.mrb[54].mxu1 %v9460_v42  ;;  %v9638_v60 = vld [vmem:[#allocation2 + $0x29] sm:$0x1] }
 0x97a   : > { %16586 = vmatpush3.bf16.msra.mxu0 %v16585_v52  ;;  %16898 = vmatpush3.bf16.msra.mxu1 %v16897_v1  ;;  %v16633_v52 = vpack.c.bf16 %v8662_v59, %v8661_v57  ;;  %v16945_v1 = vpack.c.bf16 %v9819_v47, %v9818_v16  ;;  %v8839_v57 = vld [vmem:[#allocation8 + $0x1000] sm:$0xff]  ;;  %v8840_v59 = vld [vmem:[#allocation8 + $0x1008] sm:$0xff] }
 0x97b   : > { %16587 = vmatprep.subr.bf16.mxu0 %v20858_v0  ;;  %16899 = vmatprep.subr.bf16.mxu1 %v20858_v0  ;;  %v9996_v16 = vld [vmem:[#allocation8 + $0x1680] sm:$0xff]  ;;  %v9997_v47 = vld [vmem:[#allocation8 + $0x1688] sm:$0xff] }
 0x97c   : > { %14423 = vmatprep.mubr.msk.f32.mxu0 %vm17721_vm0, %v20860_v46  ;;  %14878 = vmatprep.mubr.msk.f32.mxu1 %vm17721_vm0, %v20860_v46 }
 0x97e   : > { %16589 = vmatpush3.bf16.msra.mxu0 %v16588_v8  ;;  %16901 = vmatpush3.bf16.msra.mxu1 %v16900_v63  ;;  %v16948_v8 = vpack.c.bf16 %v9821_v23, %v9820_v51  ;;  %v8665_v63 = vld [vmem:[#allocation8 + $0xf20] sm:$0xff]  ;;  %v9999_v51 = vld [vmem:[#allocation8 + $0x1698] sm:$0xff] }
 0x97f   : > { %16590 = vmatprep.subr.bf16.mxu0 %v20858_v0  ;;  %16902 = vmatprep.subr.bf16.mxu1 %v20858_v0  ;;  %v16639_v38 = vpack.c.bf16 %v8666_v31, %v8665_v63  ;;  %v8659_v23 = vld [vmem:[#allocation2 + $0x1e] sm:$0x1]  ;;  %v8844_v63 = vld [vmem:[#allocation8 + $0x1028] sm:$0xff] }
 0x980   : > { %v10000_v31 = vld [vmem:[#allocation8 + $0x16a0] sm:$0xff] }
 0x982   : > { %16592 = vmatpush3.bf16.msra.mxu0 %v16591_v15  ;;  %16904 = vmatpush3.bf16.msra.mxu1 %v16903_v30  ;;  %v16951_v15 = vpack.c.bf16 %v9823_v20, %v9822_v5  ;;  %v8667_v30 = vld [vmem:[#allocation8 + $0xf30] sm:$0xff]  ;;  %v10001_v5 = vld [vmem:[#allocation8 + $0x16a8] sm:$0xff] }
 0x983   : > { %16593 = vmatprep.subr.bf16.mxu0 %v20858_v0  ;;  %16905 = vmatprep.subr.bf16.mxu1 %v20858_v0  ;;  %v16642_v48 = vpack.c.bf16 %v8668_v29, %v8667_v30  ;;  %v8846_v30 = vld [vmem:[#allocation8 + $0x1038] sm:$0xff]  ;;  %v10002_v29 = vld [vmem:[#allocation8 + $0x16b0] sm:$0xff] }
 0x986   : > { %16595 = vmatpush3.bf16.msra.mxu0 %v16594_v28  ;;  %16907 = vmatpush3.bf16.msra.mxu1 %v16906_v54  ;;  %v16954_v28 = vpack.c.bf16 %v9825_v4, %v9824_v26  ;;  %v8669_v54 = vld [vmem:[#allocation8 + $0xf40] sm:$0xff]  ;;  %v10003_v26 = vld [vmem:[#allocation8 + $0x16b8] sm:$0xff] }
 0x987   : > { %16596 = vmatprep.subr.bf16.mxu0 %v20858_v0  ;;  %16908 = vmatprep.subr.bf16.mxu1 %v20858_v0  ;;  %v16645_v13 = vpack.c.bf16 %v8670_v56, %v8669_v54  ;;  %v8848_v54 = vld [vmem:[#allocation8 + $0x1048] sm:$0xff]  ;;  %v10004_v56 = vld [vmem:[#allocation8 + $0x16c0] sm:$0xff] }
 0x98a   : > { %16598 = vmatpush3.bf16.msra.mxu0 %v16597_v50  ;;  %16910 = vmatpush3.bf16.msra.mxu1 %v16909_v32  ;;  %v16957_v50 = vpack.c.bf16 %v9827_v22, %v9826_v34  ;;  %v8671_v32 = vld [vmem:[#allocation8 + $0xf50] sm:$0xff]  ;;  %v10005_v34 = vld [vmem:[#allocation8 + $0x16c8] sm:$0xff] }
 0x98b   : > { %16599 = vmatprep.subr.bf16.mxu0 %v20858_v0  ;;  %16911 = vmatprep.subr.bf16.mxu1 %v20858_v0  ;;  %v16648_v2 = vpack.c.bf16 %v8672_v11, %v8671_v32  ;;  %v8850_v32 = vld [vmem:[#allocation8 + $0x1058] sm:$0xff]  ;;  %v10006_v11 = vld [vmem:[#allocation8 + $0x16d0] sm:$0xff] }
 0x98c   : > { %v7319_v25 = vpop.f32.mrb[54].mxu0  ;;  %v20506_v41 = vpop.f32.mrb[42].mxu1 }
 0x98d   : > { %v7323_v39 = vadd.f32 %v7319_v25, %v20486_v53  ;;  %v13935_v33 = vpop.f32.mrb[55].mxu0  ;;  %v14390_v24 = vpop.f32.mrb[43].mxu1  ;;  %v16606_v53 = vpack.c.bf16 %v8498_v37, %v8497_v55  ;;  %v8675_v55 = vld [vmem:[#allocation8 + $0xf70] sm:$0xff]  ;;  %v8676_v37 = vld [vmem:[#allocation8 + $0xf78] sm:$0xff] }
 0x98e   : > { %16601 = vmatpush3.bf16.msra.mxu0 %v16600_v17  ;;  %16913 = vmatpush3.bf16.msra.mxu1 %v16912_v61  ;;  %v16960_v17 = vpack.c.bf16 %v9829_v49, %v9828_v10  ;;  %v8673_v61 = vld [vmem:[#allocation8 + $0xf60] sm:$0xff]  ;;  %v10007_v10 = vld [vmem:[#allocation8 + $0x16d8] sm:$0xff] }
 0x98f   : > { %16602 = vmatprep.subr.bf16.mxu0 %v20858_v0  ;;  %16914 = vmatprep.subr.bf16.mxu1 %v20858_v0  ;;  %v20512_v12 = vadd.f32 %v20352_v43, %v7323_v39  ;;  %v8664_v43 = vld [vmem:[#allocation8 + $0xf18] sm:$0xff] }
 0x990   : > { %v16636_v42 = vpack.c.bf16 %v8664_v43, %v8663_v58  ;;  %v8841_v58 = vld [vmem:[#allocation8 + $0x1010] sm:$0xff] }
 0x991   : > { %v9998_v43 = vld [vmem:[#allocation8 + $0x1690] sm:$0xff] }
 0x992   : > { %16604 = vmatpush3.bf16.msra.mxu0 %v16603_v45  ;;  %16916 = vmatpush3.bf16.msra.mxu1 %v16915_v27  ;;  %v16651_v45 = vpack.c.bf16 %v8674_v6, %v8673_v61  ;;  %v16963_v27 = vpack.c.bf16 %v9831_v7, %v9830_v21  ;;  %v8852_v61 = vld [vmem:[#allocation8 + $0x1068] sm:$0xff]  ;;  %v10008_v6 = vld [vmem:[#allocation8 + $0x16e0] sm:$0xff] }
 0x993   : > { %16605 = vmatprep.subr.bf16.mxu0 %v20858_v0  ;;  %16917 = vmatprep.subr.bf16.mxu1 %v20858_v0  ;;  %v10009_v21 = vld [vmem:[#allocation8 + $0x16e8] sm:$0xff] }
 0x996   : > { %16607 = vmatpush3.bf16.msra.mxu0 %v16606_v53  ;;  %16919 = vmatpush3.bf16.msra.mxu1 %v16918_v3  ;;  %v16966_v3 = vpack.c.bf16 %v9833_v14, %v9832_v9  ;;  %v10010_v9 = vld [vmem:[#allocation8 + $0x16f0] sm:$0xff]  ;;  %v10011_v14 = vld [vmem:[#allocation8 + $0x16f8] sm:$0xff] }
 0x997   : > { %16632 = vmatprep.subr.bf16.mxu0 %v20858_v0  ;;  %16944 = vmatprep.subr.bf16.mxu1 %v20858_v0 }
 0x999   : > { %14424 = vmatmul.mubr.f32.vlgmr.msra.gmra.mrb[68].mxu0 %v8481_v18  ;;  %14879 = vmatmul.mubr.f32.vlgmr.msra.gmra.mrb[56].mxu1 %v9638_v60  ;;  %v9816_v18 = vld [vmem:[#allocation2 + $0x2b] sm:$0x1] }
 0x99a   : > { %16634 = vmatpush3.bf16.msra.mxu0 %v16633_v52  ;;  %16946 = vmatpush3.bf16.msra.mxu1 %v16945_v1  ;;  %v16681_v52 = vpack.c.bf16 %v8840_v59, %v8839_v57  ;;  %v16993_v1 = vpack.c.bf16 %v9997_v47, %v9996_v16  ;;  %v9017_v57 = vld [vmem:[#allocation8 + $0x1100] sm:$0xff]  ;;  %v9018_v59 = vld [vmem:[#allocation8 + $0x1108] sm:$0xff] }
 0x99b   : > { %16635 = vmatprep.subr.bf16.mxu0 %v20858_v0  ;;  %16947 = vmatprep.subr.bf16.mxu1 %v20858_v0  ;;  %v10174_v16 = vld [vmem:[#allocation8 + $0x1780] sm:$0xff]  ;;  %v10175_v47 = vld [vmem:[#allocation8 + $0x1788] sm:$0xff] }
 0x99c   : > { %14493 = vmatprep.mubr.msk.f32.mxu0 %vm17721_vm0, %v20860_v46  ;;  %14948 = vmatprep.mubr.msk.f32.mxu1 %vm17721_vm0, %v20860_v46 }
 0x99e   : > { %16637 = vmatpush3.bf16.msra.mxu0 %v16636_v42  ;;  %16949 = vmatpush3.bf16.msra.mxu1 %v16948_v8  ;;  %v16996_v42 = vpack.c.bf16 %v9999_v51, %v9998_v43  ;;  %v8843_v8 = vld [vmem:[#allocation8 + $0x1020] sm:$0xff]  ;;  %v10177_v43 = vld [vmem:[#allocation8 + $0x1798] sm:$0xff]  ;;  %v8837_v51 = vld [vmem:[#allocation2 + $0x20] sm:$0x1] }
 0x99f   : > { %16638 = vmatprep.subr.bf16.mxu0 %v20858_v0  ;;  %16950 = vmatprep.subr.bf16.mxu1 %v20858_v0  ;;  %v16687_v20 = vpack.c.bf16 %v8844_v63, %v8843_v8  ;;  %v9022_v8 = vld [vmem:[#allocation8 + $0x1128] sm:$0xff]  ;;  %v10178_v63 = vld [vmem:[#allocation8 + $0x17a0] sm:$0xff] }
 0x9a2   : > { %16640 = vmatpush3.bf16.msra.mxu0 %v16639_v38  ;;  %16952 = vmatpush3.bf16.msra.mxu1 %v16951_v15  ;;  %v16999_v38 = vpack.c.bf16 %v10001_v5, %v10000_v31  ;;  %v8845_v15 = vld [vmem:[#allocation8 + $0x1030] sm:$0xff]  ;;  %v10179_v31 = vld [vmem:[#allocation8 + $0x17a8] sm:$0xff] }
 0x9a3   : > { %16641 = vmatprep.subr.bf16.mxu0 %v20858_v0  ;;  %16953 = vmatprep.subr.bf16.mxu1 %v20858_v0  ;;  %v16690_v4 = vpack.c.bf16 %v8846_v30, %v8845_v15  ;;  %v9024_v15 = vld [vmem:[#allocation8 + $0x1138] sm:$0xff]  ;;  %v10180_v30 = vld [vmem:[#allocation8 + $0x17b0] sm:$0xff] }
 0x9a6   : > { %16643 = vmatpush3.bf16.msra.mxu0 %v16642_v48  ;;  %16955 = vmatpush3.bf16.msra.mxu1 %v16954_v28  ;;  %v17002_v48 = vpack.c.bf16 %v10003_v26, %v10002_v29  ;;  %v8847_v28 = vld [vmem:[#allocation8 + $0x1040] sm:$0xff]  ;;  %v10181_v29 = vld [vmem:[#allocation8 + $0x17b8] sm:$0xff] }
 0x9a7   : > { %16644 = vmatprep.subr.bf16.mxu0 %v20858_v0  ;;  %16956 = vmatprep.subr.bf16.mxu1 %v20858_v0  ;;  %v16693_v22 = vpack.c.bf16 %v8848_v54, %v8847_v28  ;;  %v9026_v28 = vld [vmem:[#allocation8 + $0x1148] sm:$0xff]  ;;  %v10182_v54 = vld [vmem:[#allocation8 + $0x17c0] sm:$0xff] }
 0x9aa   : > { %16646 = vmatpush3.bf16.msra.mxu0 %v16645_v13  ;;  %16958 = vmatpush3.bf16.msra.mxu1 %v16957_v50  ;;  %v17005_v13 = vpack.c.bf16 %v10005_v34, %v10004_v56  ;;  %v8849_v50 = vld [vmem:[#allocation8 + $0x1050] sm:$0xff]  ;;  %v10183_v56 = vld [vmem:[#allocation8 + $0x17c8] sm:$0xff] }
 0x9ab   : > { %16647 = vmatprep.subr.bf16.mxu0 %v20858_v0  ;;  %16959 = vmatprep.subr.bf16.mxu1 %v20858_v0  ;;  %v16696_v49 = vpack.c.bf16 %v8850_v32, %v8849_v50  ;;  %v9028_v50 = vld [vmem:[#allocation8 + $0x1158] sm:$0xff]  ;;  %v10184_v32 = vld [vmem:[#allocation8 + $0x17d0] sm:$0xff] }
 0x9ac   : > { %v7497_v40 = vpop.f32.mrb[56].mxu0  ;;  %v20532_v25 = vpop.f32.mrb[44].mxu1 }
 0x9ad   : > { %v7501_v39 = vadd.f32 %v7497_v40, %v20512_v12  ;;  %v14005_v33 = vpop.f32.mrb[57].mxu0  ;;  %v14460_v24 = vpop.f32.mrb[45].mxu1  ;;  %v16654_v12 = vpack.c.bf16 %v8676_v37, %v8675_v55  ;;  %v8853_v55 = vld [vmem:[#allocation8 + $0x1070] sm:$0xff]  ;;  %v8854_v37 = vld [vmem:[#allocation8 + $0x1078] sm:$0xff] }
 0x9ae   : > { %16649 = vmatpush3.bf16.msra.mxu0 %v16648_v2  ;;  %16961 = vmatpush3.bf16.msra.mxu1 %v16960_v17  ;;  %v17008_v2 = vpack.c.bf16 %v10007_v10, %v10006_v11  ;;  %v8851_v17 = vld [vmem:[#allocation8 + $0x1060] sm:$0xff]  ;;  %v10185_v11 = vld [vmem:[#allocation8 + $0x17d8] sm:$0xff] }
 0x9af   : > { %16650 = vmatprep.subr.bf16.mxu0 %v20858_v0  ;;  %16962 = vmatprep.subr.bf16.mxu1 %v20858_v0  ;;  %v20538_v53 = vadd.f32 %v20377_v62, %v7501_v39  ;;  %v8842_v62 = vld [vmem:[#allocation8 + $0x1018] sm:$0xff] }
 0x9b0   : > { %v16684_v60 = vpack.c.bf16 %v8842_v62, %v8841_v58  ;;  %v9019_v58 = vld [vmem:[#allocation8 + $0x1110] sm:$0xff] }
 0x9b1   : > { %v10176_v62 = vld [vmem:[#allocation8 + $0x1790] sm:$0xff] }
 0x9b2   : > { %16652 = vmatpush3.bf16.msra.mxu0 %v16651_v45  ;;  %16964 = vmatpush3.bf16.msra.mxu1 %v16963_v27  ;;  %v16699_v45 = vpack.c.bf16 %v8852_v61, %v8851_v17  ;;  %v17011_v27 = vpack.c.bf16 %v10009_v21, %v10008_v6  ;;  %v9030_v17 = vld [vmem:[#allocation8 + $0x1168] sm:$0xff]  ;;  %v10186_v61 = vld [vmem:[#allocation8 + $0x17e0] sm:$0xff] }
 0x9b3   : > { %16653 = vmatprep.subr.bf16.mxu0 %v20858_v0  ;;  %16965 = vmatprep.subr.bf16.mxu1 %v20858_v0  ;;  %v10187_v6 = vld [vmem:[#allocation8 + $0x17e8] sm:$0xff] }
 0x9b6   : > { %16655 = vmatpush3.bf16.msra.mxu0 %v16654_v12  ;;  %16967 = vmatpush3.bf16.msra.mxu1 %v16966_v3  ;;  %v17014_v3 = vpack.c.bf16 %v10011_v14, %v10010_v9  ;;  %v10188_v9 = vld [vmem:[#allocation8 + $0x17f0] sm:$0xff]  ;;  %v10189_v14 = vld [vmem:[#allocation8 + $0x17f8] sm:$0xff] }
 0x9b7   : > { %16680 = vmatprep.subr.bf16.mxu0 %v20858_v0  ;;  %16992 = vmatprep.subr.bf16.mxu1 %v20858_v0 }
 0x9b9   : > { %14494 = vmatmul.mubr.f32.vlgmr.msra.gmra.mrb[70].mxu0 %v8659_v23  ;;  %14949 = vmatmul.mubr.f32.vlgmr.msra.gmra.mrb[58].mxu1 %v9816_v18  ;;  %v9994_v23 = vld [vmem:[#allocation2 + $0x2d] sm:$0x1] }
 0x9ba   : > { %16682 = vmatpush3.bf16.msra.mxu0 %v16681_v52  ;;  %16994 = vmatpush3.bf16.msra.mxu1 %v16993_v1  ;;  %v16729_v52 = vpack.c.bf16 %v9018_v59, %v9017_v57  ;;  %v17041_v1 = vpack.c.bf16 %v10175_v47, %v10174_v16  ;;  %v9195_v57 = vld [vmem:[#allocation8 + $0x1200] sm:$0xff]  ;;  %v9196_v59 = vld [vmem:[#allocation8 + $0x1208] sm:$0xff]  ;;  %v9197_v47 = vld [vmem:[#allocation8 + $0x1210] sm:$0xff] }
 0x9bb   : > { %16683 = vmatprep.subr.bf16.mxu0 %v20858_v0  ;;  %16995 = vmatprep.subr.bf16.mxu1 %v20858_v0  ;;  %v16777_v16 = vpack.c.bf16 %v9196_v59, %v9195_v57 }
 0x9bc   : > { %14563 = vmatprep.mubr.msk.f32.mxu0 %vm17721_vm0, %v20860_v46  ;;  %15018 = vmatprep.mubr.msk.f32.mxu1 %vm17721_vm0, %v20860_v46 }
 0x9be   : > { %16685 = vmatpush3.bf16.msra.mxu0 %v16684_v60  ;;  %16997 = vmatpush3.bf16.msra.mxu1 %v16996_v42  ;;  %v17044_v60 = vpack.c.bf16 %v10177_v43, %v10176_v62  ;;  %v9021_v42 = vld [vmem:[#allocation8 + $0x1120] sm:$0xff]  ;;  %v9200_v62 = vld [vmem:[#allocation8 + $0x1228] sm:$0xff] }
 0x9bf   : > { %16686 = vmatprep.subr.bf16.mxu0 %v20858_v0  ;;  %16998 = vmatprep.subr.bf16.mxu1 %v20858_v0  ;;  %v16735_v5 = vpack.c.bf16 %v9022_v8, %v9021_v42  ;;  %v9204_v42 = vld [vmem:[#allocation8 + $0x1248] sm:$0xff] }
 0x9c2   : > { %16688 = vmatpush3.bf16.msra.mxu0 %v16687_v20  ;;  %17000 = vmatpush3.bf16.msra.mxu1 %v16999_v38  ;;  %v17047_v20 = vpack.c.bf16 %v10179_v31, %v10178_v63  ;;  %v9023_v38 = vld [vmem:[#allocation8 + $0x1130] sm:$0xff]  ;;  %v9206_v31 = vld [vmem:[#allocation8 + $0x1258] sm:$0xff] }
 0x9c3   : > { %16689 = vmatprep.subr.bf16.mxu0 %v20858_v0  ;;  %17001 = vmatprep.subr.bf16.mxu1 %v20858_v0  ;;  %v16738_v26 = vpack.c.bf16 %v9024_v15, %v9023_v38  ;;  %v9205_v63 = vld [vmem:[#allocation8 + $0x1250] sm:$0xff]  ;;  %v9208_v38 = vld [vmem:[#allocation8 + $0x1268] sm:$0xff] }
 0x9c6   : > { %16691 = vmatpush3.bf16.msra.mxu0 %v16690_v4  ;;  %17003 = vmatpush3.bf16.msra.mxu1 %v17002_v48  ;;  %v17050_v4 = vpack.c.bf16 %v10181_v29, %v10180_v30  ;;  %v9025_v48 = vld [vmem:[#allocation8 + $0x1140] sm:$0xff] }
 0x9c7   : > { %16692 = vmatprep.subr.bf16.mxu0 %v20858_v0  ;;  %17004 = vmatprep.subr.bf16.mxu1 %v20858_v0  ;;  %v16741_v34 = vpack.c.bf16 %v9026_v28, %v9025_v48  ;;  %v9209_v28 = vld [vmem:[#allocation8 + $0x1270] sm:$0xff] }
 0x9ca   : > { %16694 = vmatpush3.bf16.msra.mxu0 %v16693_v22  ;;  %17006 = vmatpush3.bf16.msra.mxu1 %v17005_v13  ;;  %v17053_v22 = vpack.c.bf16 %v10183_v56, %v10182_v54  ;;  %v9027_v13 = vld [vmem:[#allocation8 + $0x1150] sm:$0xff]  ;;  %v9210_v54 = vld [vmem:[#allocation8 + $0x1278] sm:$0xff] }
 0x9cb   : > { %16695 = vmatprep.subr.bf16.mxu0 %v20858_v0  ;;  %17007 = vmatprep.subr.bf16.mxu1 %v20858_v0  ;;  %v16744_v10 = vpack.c.bf16 %v9028_v50, %v9027_v13  ;;  %v9374_v13 = vld [vmem:[#allocation8 + $0x1308] sm:$0xff] }
 0x9cc   : > { %v7675_v7 = vpop.f32.mrb[58].mxu0  ;;  %v20558_v40 = vpop.f32.mrb[46].mxu1 }
 0x9cd   : > { %v7679_v39 = vadd.f32 %v7675_v7, %v20538_v53  ;;  %v14075_v33 = vpop.f32.mrb[59].mxu0  ;;  %v14530_v24 = vpop.f32.mrb[47].mxu1  ;;  %v16702_v53 = vpack.c.bf16 %v8854_v37, %v8853_v55  ;;  %v9031_v55 = vld [vmem:[#allocation8 + $0x1170] sm:$0xff]  ;;  %v9032_v37 = vld [vmem:[#allocation8 + $0x1178] sm:$0xff] }
 0x9ce   : > { %16697 = vmatpush3.bf16.msra.mxu0 %v16696_v49  ;;  %17009 = vmatpush3.bf16.msra.mxu1 %v17008_v2  ;;  %v17056_v49 = vpack.c.bf16 %v10185_v11, %v10184_v32  ;;  %v9029_v2 = vld [vmem:[#allocation8 + $0x1160] sm:$0xff]  ;;  %v9375_v32 = vld [vmem:[#allocation8 + $0x1310] sm:$0xff]  ;;  %v9376_v11 = vld [vmem:[#allocation8 + $0x1318] sm:$0xff] }
 0x9cf   : > { %16698 = vmatprep.subr.bf16.mxu0 %v20858_v0  ;;  %17010 = vmatprep.subr.bf16.mxu1 %v20858_v0  ;;  %v20564_v12 = vadd.f32 %v20402_v19, %v7679_v39  ;;  %v9020_v19 = vld [vmem:[#allocation8 + $0x1118] sm:$0xff] }
 0x9d0   : > { %v16732_v18 = vpack.c.bf16 %v9020_v19, %v9019_v58  ;;  %v9199_v19 = vld [vmem:[#allocation8 + $0x1220] sm:$0xff] }
 0x9d1   : > { %v16783_v43 = vpack.c.bf16 %v9200_v62, %v9199_v19  ;;  %v9553_v62 = vld [vmem:[#allocation8 + $0x1410] sm:$0xff] }
 0x9d2   : > { %16700 = vmatpush3.bf16.msra.mxu0 %v16699_v45  ;;  %17012 = vmatpush3.bf16.msra.mxu1 %v17011_v27  ;;  %v16747_v45 = vpack.c.bf16 %v9030_v17, %v9029_v2  ;;  %v17059_v27 = vpack.c.bf16 %v10187_v6, %v10186_v61  ;;  %v9378_v2 = vld [vmem:[#allocation8 + $0x1328] sm:$0xff]  ;;  %v9379_v61 = vld [vmem:[#allocation8 + $0x1330] sm:$0xff]  ;;  %v9380_v6 = vld [vmem:[#allocation8 + $0x1338] sm:$0xff] }
 0x9d3   : > { %16701 = vmatprep.subr.bf16.mxu0 %v20858_v0  ;;  %17013 = vmatprep.subr.bf16.mxu1 %v20858_v0 }
 0x9d6   : > { %16703 = vmatpush3.bf16.msra.mxu0 %v16702_v53  ;;  %17015 = vmatpush3.bf16.msra.mxu1 %v17014_v3  ;;  %v16750_v3 = vpack.c.bf16 %v9032_v37, %v9031_v55  ;;  %v9385_v37 = vld [vmem:[#allocation8 + $0x1360] sm:$0xff] }
 0x9d7   : > { %16728 = vmatprep.subr.bf16.mxu0 %v20858_v0  ;;  %17040 = vmatprep.subr.bf16.mxu1 %v20858_v0 }
 0x9d9   : > { %14564 = vmatmul.mubr.f32.vlgmr.msra.gmra.mrb[72].mxu0 %v8837_v51  ;;  %15019 = vmatmul.mubr.f32.vlgmr.msra.gmra.mrb[60].mxu1 %v9994_v23  ;;  %v9201_v51 = vld [vmem:[#allocation8 + $0x1230] sm:$0xff]  ;;  %v9202_v23 = vld [vmem:[#allocation8 + $0x1238] sm:$0xff] }
 0x9da   : > { %16730 = vmatpush3.bf16.msra.mxu0 %v16729_v52  ;;  %17042 = vmatpush3.bf16.msra.mxu1 %v17041_v1  ;;  %v9198_v52 = vld [vmem:[#allocation8 + $0x1218] sm:$0xff]  ;;  %v10172_v1 = vld [vmem:[#allocation2 + $0x2f] sm:$0x1] }
 0x9db   : > { %16731 = vmatprep.subr.bf16.mxu0 %v20858_v0  ;;  %17043 = vmatprep.subr.bf16.mxu1 %v20858_v0  ;;  %v16780_v58 = vpack.c.bf16 %v9198_v52, %v9197_v47  ;;  %v9388_v47 = vld [vmem:[#allocation8 + $0x1378] sm:$0xff] }
 0x9dc   : > { %14633 = vmatprep.mubr.msk.f32.mxu0 %vm17721_vm0, %v20860_v46  ;;  %15088 = vmatprep.mubr.msk.f32.mxu1 %vm17721_vm0, %v20860_v46 }
 0x9de   : > { %16733 = vmatpush3.bf16.msra.mxu0 %v16732_v18  ;;  %17045 = vmatpush3.bf16.msra.mxu1 %v17044_v60  ;;  %v16786_v18 = vpack.c.bf16 %v9202_v23, %v9201_v51  ;;  %v9203_v60 = vld [vmem:[#allocation8 + $0x1240] sm:$0xff]  ;;  %v9371_v51 = vld [vmem:[#allocation2 + $0x26] sm:$0x1] }
 0x9df   : > { %16734 = vmatprep.subr.bf16.mxu0 %v20858_v0  ;;  %17046 = vmatprep.subr.bf16.mxu1 %v20858_v0  ;;  %v16789_v8 = vpack.c.bf16 %v9204_v42, %v9203_v60  ;;  %v9557_v42 = vld [vmem:[#allocation8 + $0x1430] sm:$0xff] }
 0x9e2   : > { %16736 = vmatpush3.bf16.msra.mxu0 %v16735_v5  ;;  %17048 = vmatpush3.bf16.msra.mxu1 %v17047_v20  ;;  %v16792_v5 = vpack.c.bf16 %v9206_v31, %v9205_v63  ;;  %v9207_v20 = vld [vmem:[#allocation8 + $0x1260] sm:$0xff] }
 0x9e3   : > { %16737 = vmatprep.subr.bf16.mxu0 %v20858_v0  ;;  %17049 = vmatprep.subr.bf16.mxu1 %v20858_v0  ;;  %v16795_v48 = vpack.c.bf16 %v9208_v38, %v9207_v20  ;;  %v9559_v31 = vld [vmem:[#allocation8 + $0x1440] sm:$0xff]  ;;  %v9561_v38 = vld [vmem:[#allocation8 + $0x1450] sm:$0xff] }
 0x9e6   : > { %16739 = vmatpush3.bf16.msra.mxu0 %v16738_v26  ;;  %17051 = vmatpush3.bf16.msra.mxu1 %v17050_v4 }
 0x9e7   : > { %16740 = vmatprep.subr.bf16.mxu0 %v20858_v0  ;;  %17052 = vmatprep.subr.bf16.mxu1 %v20858_v0 }
 0x9ea   : > { %16742 = vmatpush3.bf16.msra.mxu0 %v16741_v34  ;;  %17054 = vmatpush3.bf16.msra.mxu1 %v17053_v22  ;;  %v16798_v34 = vpack.c.bf16 %v9210_v54, %v9209_v28  ;;  %v9373_v22 = vld [vmem:[#allocation8 + $0x1300] sm:$0xff] }
 0x9eb   : > { %16743 = vmatprep.subr.bf16.mxu0 %v20858_v0  ;;  %17055 = vmatprep.subr.bf16.mxu1 %v20858_v0  ;;  %v16825_v50 = vpack.c.bf16 %v9374_v13, %v9373_v22  ;;  %v9565_v13 = vld [vmem:[#allocation8 + $0x1470] sm:$0xff] }
 0x9ec   : > { %v7853_v21 = vpop.f32.mrb[60].mxu0  ;;  %v20584_v7 = vpop.f32.mrb[48].mxu1 }
 0x9ed   : > { %v7857_v39 = vadd.f32 %v7853_v21, %v20564_v12  ;;  %v14145_v33 = vpop.f32.mrb[61].mxu0  ;;  %v14600_v24 = vpop.f32.mrb[49].mxu1  ;;  %v17062_v12 = vpack.c.bf16 %v10189_v14, %v10188_v9  ;;  %v16834_v21 = vpack.c.bf16 %v9380_v6, %v9379_v61  ;;  %v9386_v9 = vld [vmem:[#allocation8 + $0x1368] sm:$0xff]  ;;  %v9549_v61 = vld [vmem:[#allocation2 + $0x28] sm:$0x1] }
 0x9ee   : > { %16745 = vmatpush3.bf16.msra.mxu0 %v16744_v10  ;;  %17057 = vmatpush3.bf16.msra.mxu1 %v17056_v49  ;;  %v9193_v10 = vld [vmem:[#allocation2 + $0x24] sm:$0x1]  ;;  %v16828_v49 = vpack.c.bf16 %v9376_v11, %v9375_v32  ;;  %v16843_v59 = vpack.c.bf16 %v9386_v9, %v9385_v37  ;;  %v9739_v9 = vld [vmem:[#allocation8 + $0x1550] sm:$0xff] }
 0x9ef   : > { %16746 = vmatprep.subr.bf16.mxu0 %v20858_v0  ;;  %17058 = vmatprep.subr.bf16.mxu1 %v20858_v0  ;;  %v7946_v53 = vadd.f32 %v20428_v44, %v7857_v39  ;;  %v9015_v44 = vld [vmem:[#allocation2 + $0x22] sm:$0x1]  ;;  %v9381_v39 = vld [vmem:[#allocation8 + $0x1340] sm:$0xff] }
 0x9f0   : > { %v9382_v33 = vld [vmem:[#allocation8 + $0x1348] sm:$0xff] }
 0x9f1   : > { %v16837_v24 = vpack.c.bf16 %v9382_v33, %v9381_v39  ;;  %v9735_v33 = vld [vmem:[#allocation8 + $0x1530] sm:$0xff] }
 0x9f2   : > { %16748 = vmatpush3.bf16.msra.mxu0 %v16747_v45  ;;  %17060 = vmatpush3.bf16.msra.mxu1 %v17059_v27  ;;  %v9383_v45 = vld [vmem:[#allocation8 + $0x1350] sm:$0xff]  ;;  %v9384_v27 = vld [vmem:[#allocation8 + $0x1358] sm:$0xff] }
 0x9f3   : > { %16749 = vmatprep.subr.bf16.mxu0 %v20858_v0  ;;  %17061 = vmatprep.subr.bf16.mxu1 %v20858_v0  ;;  %v16840_v55 = vpack.c.bf16 %v9384_v27, %v9383_v45  ;;  %v9737_v27 = vld [vmem:[#allocation8 + $0x1540] sm:$0xff] }
 0x9f6   : > { %16751 = vmatpush3.bf16.msra.mxu0 %v16750_v3  ;;  %17063 = vmatpush3.bf16.msra.mxu1 %v17062_v12 }
 0x9f7   : > { %16776 = vmatprep.subr.bf16.mxu0 %v20858_v0  ;;  %17088 = vmatprep.subr.bf16.mxu1 %v20858_v0 }
 0x9f9   : > { %14634 = vmatmul.mubr.f32.vlgmr.msra.gmra.mrb[74].mxu0 %v9015_v44  ;;  %15089 = vmatmul.mubr.f32.vlgmr.msra.gmra.mrb[62].mxu1 %v10172_v1  ;;  %v9551_v1 = vld [vmem:[#allocation8 + $0x1400] sm:$0xff] }
 0x9fa   : > { %16778 = vmatpush3.bf16.msra.mxu0 %v16777_v16  ;;  %14703 = vmatprep.mubr.msk.f32.mxu0 %vm17721_vm0, %v20860_v46  ;;  %v9387_v16 = vld [vmem:[#allocation8 + $0x1370] sm:$0xff] }
 0x9fb   : > { %16779 = vmatprep.subr.bf16.mxu0 %v20858_v0  ;;  %15142 = vmatprep.mubr.msk.f32.mxu1 %vm17721_vm0, %v20860_v46  ;;  %v16846_v44 = vpack.c.bf16 %v9388_v47, %v9387_v16 }
 0x9fe   : > { %16781 = vmatpush3.bf16.msra.mxu0 %v16780_v58  ;;  %v9552_v58 = vld [vmem:[#allocation8 + $0x1408] sm:$0xff] }
 0x9ff   : > { %16782 = vmatprep.subr.bf16.mxu0 %v20858_v0  ;;  %v16873_v19 = vpack.c.bf16 %v9552_v58, %v9551_v1  ;;  %v9743_v58 = vld [vmem:[#allocation8 + $0x1570] sm:$0xff] }
 0xa02   : > { %16784 = vmatpush3.bf16.msra.mxu0 %v16783_v43  ;;  %v9554_v43 = vld [vmem:[#allocation8 + $0x1418] sm:$0xff] }
 0xa03   : > { %16785 = vmatprep.subr.bf16.mxu0 %v20858_v0  ;;  %v16876_v23 = vpack.c.bf16 %v9554_v43, %v9553_v62 }
 0xa06   : > { %16787 = vmatpush3.bf16.msra.mxu0 %v16786_v18  ;;  %v9556_v18 = vld [vmem:[#allocation8 + $0x1428] sm:$0xff] }
 0xa07   : > { %16788 = vmatprep.subr.bf16.mxu0 %v20858_v0 }
 0xa0a   : > { %16790 = vmatpush3.bf16.msra.mxu0 %v16789_v8  ;;  %v9558_v8 = vld [vmem:[#allocation8 + $0x1438] sm:$0xff] }
 0xa0b   : > { %16791 = vmatprep.subr.bf16.mxu0 %v20858_v0  ;;  %v16882_v63 = vpack.c.bf16 %v9558_v8, %v9557_v42  ;;  %v9727_v42 = vld [vmem:[#allocation2 + $0x2a] sm:$0x1] }
 0xa0c   : > { %v8031_v15 = vpop.f32.mrb[62].mxu0  ;;  %v20603_v30 = vpop.f32.mrb[50].mxu1 }
 0xa0d   : > { %v8035_v29 = vadd.f32 %v8031_v15, %v7946_v53  ;;  %v14215_v26 = vpop.f32.mrb[63].mxu0  ;;  %v14670_v4 = vpop.f32.mrb[51].mxu1  ;;  %v9562_v15 = vld [vmem:[#allocation8 + $0x1458] sm:$0xff] }
 0xa0e   : > { %16793 = vmatpush3.bf16.msra.mxu0 %v16792_v5  ;;  %v9560_v5 = vld [vmem:[#allocation8 + $0x1448] sm:$0xff]  ;;  %v9563_v26 = vld [vmem:[#allocation8 + $0x1460] sm:$0xff] }
 0xa0f   : > { %16794 = vmatprep.subr.bf16.mxu0 %v20858_v0  ;;  %v8124_v56 = vadd.f32 %v20454_v35, %v8035_v29  ;;  %v9377_v35 = vld [vmem:[#allocation8 + $0x1320] sm:$0xff]  ;;  %v16885_v20 = vpack.c.bf16 %v9560_v5, %v9559_v31  ;;  %v16888_v29 = vpack.c.bf16 %v9562_v15, %v9561_v38  ;;  %v9564_v4 = vld [vmem:[#allocation8 + $0x1468] sm:$0xff]  ;;  %v9913_v5 = vld [vmem:[#allocation8 + $0x1630] sm:$0xff] }
 0xa10   : > { %v16831_v17 = vpack.c.bf16 %v9378_v2, %v9377_v35  ;;  %v16891_v22 = vpack.c.bf16 %v9564_v4, %v9563_v26  ;;  %v9731_v2 = vld [vmem:[#allocation8 + $0x1510] sm:$0xff]  ;;  %v9915_v15 = vld [vmem:[#allocation8 + $0x1640] sm:$0xff] }
 0xa11   : > { %v9917_v4 = vld [vmem:[#allocation8 + $0x1650] sm:$0xff] }
 0xa12   : > { %16796 = vmatpush3.bf16.msra.mxu0 %v16795_v48 }
 0xa13   : > { %16797 = vmatprep.subr.bf16.mxu0 %v20858_v0 }
 0xa16   : > { %16799 = vmatpush3.bf16.msra.mxu0 %v16798_v34 }
 0xa17   : > { %16824 = vmatprep.subr.bf16.mxu0 %v20858_v0 }
 0xa19   : > { %14704 = vmatmul.mubr.f32.vlgmr.msra.gmra.mrb[76].mxu0 %v9193_v10  ;;  %v9729_v10 = vld [vmem:[#allocation8 + $0x1500] sm:$0xff] }
 0xa1a   : > { %16826 = vmatpush3.bf16.msra.mxu0 %v16825_v50  ;;  %14773 = vmatprep.mubr.msk.f32.mxu0 %vm17721_vm0, %v20860_v46  ;;  %v9566_v50 = vld [vmem:[#allocation8 + $0x1478] sm:$0xff] }
 0xa1b   : > { %16827 = vmatprep.subr.bf16.mxu0 %v20858_v0  ;;  %v16894_v11 = vpack.c.bf16 %v9566_v50, %v9565_v13 }
 0xa1e   : > { %16829 = vmatpush3.bf16.msra.mxu0 %v16828_v49  ;;  %v9730_v49 = vld [vmem:[#allocation8 + $0x1508] sm:$0xff] }
 0xa1f   : > { %16830 = vmatprep.subr.bf16.mxu0 %v20858_v0  ;;  %v16921_v35 = vpack.c.bf16 %v9730_v49, %v9729_v10  ;;  %v9921_v49 = vld [vmem:[#allocation8 + $0x1670] sm:$0xff] }
 0xa22   : > { %16832 = vmatpush3.bf16.msra.mxu0 %v16831_v17  ;;  %v9732_v17 = vld [vmem:[#allocation8 + $0x1518] sm:$0xff] }
 0xa23   : > { %16833 = vmatprep.subr.bf16.mxu0 %v20858_v0  ;;  %v16924_v6 = vpack.c.bf16 %v9732_v17, %v9731_v2 }
 0xa26   : > { %16835 = vmatpush3.bf16.msra.mxu0 %v16834_v21  ;;  %v9734_v21 = vld [vmem:[#allocation8 + $0x1528] sm:$0xff] }
 0xa27   : > { %16836 = vmatprep.subr.bf16.mxu0 %v20858_v0 }
 0xa2a   : > { %16838 = vmatpush3.bf16.msra.mxu0 %v16837_v24  ;;  %v9736_v24 = vld [vmem:[#allocation8 + $0x1538] sm:$0xff] }
 0xa2b   : > { %16839 = vmatprep.subr.bf16.mxu0 %v20858_v0  ;;  %v16930_v45 = vpack.c.bf16 %v9736_v24, %v9735_v33  ;;  %v9905_v33 = vld [vmem:[#allocation2 + $0x2c] sm:$0x1] }
 0xa2c   : > { %v8209_v14 = vpop.f32.mrb[64].mxu0  ;;  %v20616_v53 = vpop.f32.mrb[52].mxu1 }
 0xa2d   : > { %v8213_v3 = vadd.f32 %v8209_v14, %v8124_v56  ;;  %v14285_v12 = vpop.f32.mrb[65].mxu0  ;;  %v14740_v57 = vpop.f32.mrb[53].mxu1  ;;  %v9740_v14 = vld [vmem:[#allocation8 + $0x1558] sm:$0xff] }
 0xa2e   : > { %16841 = vmatpush3.bf16.msra.mxu0 %v16840_v55  ;;  %v9738_v55 = vld [vmem:[#allocation8 + $0x1548] sm:$0xff]  ;;  %v9741_v12 = vld [vmem:[#allocation8 + $0x1560] sm:$0xff] }
 0xa2f   : > { %16842 = vmatprep.subr.bf16.mxu0 %v20858_v0  ;;  %v8302_v52 = vadd.f32 %v20480_v36, %v8213_v3  ;;  %v9555_v36 = vld [vmem:[#allocation8 + $0x1420] sm:$0xff]  ;;  %v16933_v37 = vpack.c.bf16 %v9738_v55, %v9737_v27  ;;  %v16936_v3 = vpack.c.bf16 %v9740_v14, %v9739_v9  ;;  %v9742_v57 = vld [vmem:[#allocation8 + $0x1568] sm:$0xff]  ;;  %v10091_v55 = vld [vmem:[#allocation8 + $0x1730] sm:$0xff] }
 0xa30   : > { %v16879_v60 = vpack.c.bf16 %v9556_v18, %v9555_v36  ;;  %v16939_v1 = vpack.c.bf16 %v9742_v57, %v9741_v12  ;;  %v9909_v18 = vld [vmem:[#allocation8 + $0x1610] sm:$0xff]  ;;  %v10093_v14 = vld [vmem:[#allocation8 + $0x1740] sm:$0xff] }
 0xa31   : > { %v10095_v57 = vld [vmem:[#allocation8 + $0x1750] sm:$0xff] }
 0xa32   : > { %16844 = vmatpush3.bf16.msra.mxu0 %v16843_v59 }
 0xa33   : > { %16845 = vmatprep.subr.bf16.mxu0 %v20858_v0 }
 0xa36   : > { %16847 = vmatpush3.bf16.msra.mxu0 %v16846_v44 }
 0xa37   : > { %16872 = vmatprep.subr.bf16.mxu0 %v20858_v0 }
 0xa39   : > { %14774 = vmatmul.mubr.f32.vlgmr.msra.gmra.mrb[78].mxu0 %v9371_v51  ;;  %v9907_v51 = vld [vmem:[#allocation8 + $0x1600] sm:$0xff] }
 0xa3a   : > { %16874 = vmatpush3.bf16.msra.mxu0 %v16873_v19  ;;  %14843 = vmatprep.mubr.msk.f32.mxu0 %vm17721_vm0, %v20860_v46  ;;  %v9744_v19 = vld [vmem:[#allocation8 + $0x1578] sm:$0xff] }
 0xa3b   : > { %16875 = vmatprep.subr.bf16.mxu0 %v20858_v0  ;;  %v16942_v43 = vpack.c.bf16 %v9744_v19, %v9743_v58 }
 0xa3e   : > { %16877 = vmatpush3.bf16.msra.mxu0 %v16876_v23  ;;  %v9908_v23 = vld [vmem:[#allocation8 + $0x1608] sm:$0xff] }
 0xa3f   : > { %16878 = vmatprep.subr.bf16.mxu0 %v20858_v0  ;;  %v16969_v36 = vpack.c.bf16 %v9908_v23, %v9907_v51  ;;  %v10099_v23 = vld [vmem:[#allocation8 + $0x1770] sm:$0xff] }
 0xa42   : > { %16880 = vmatpush3.bf16.msra.mxu0 %v16879_v60  ;;  %v9910_v60 = vld [vmem:[#allocation8 + $0x1618] sm:$0xff] }
 0xa43   : > { %16881 = vmatprep.subr.bf16.mxu0 %v20858_v0  ;;  %v16972_v8 = vpack.c.bf16 %v9910_v60, %v9909_v18 }
 0xa46   : > { %16883 = vmatpush3.bf16.msra.mxu0 %v16882_v63  ;;  %v9912_v63 = vld [vmem:[#allocation8 + $0x1628] sm:$0xff] }
 0xa47   : > { %16884 = vmatprep.subr.bf16.mxu0 %v20858_v0 }
 0xa4a   : > { %16886 = vmatpush3.bf16.msra.mxu0 %v16885_v20  ;;  %v9914_v20 = vld [vmem:[#allocation8 + $0x1638] sm:$0xff] }
 0xa4b   : > { %16887 = vmatprep.subr.bf16.mxu0 %v20858_v0  ;;  %v16978_v38 = vpack.c.bf16 %v9914_v20, %v9913_v5 }
 0xa4c   : > { %v8387_v48 = vpop.f32.mrb[66].mxu0  ;;  %v20629_v28 = vpop.f32.mrb[54].mxu1 }
 0xa4d   : > { %v8391_v54 = vadd.f32 %v8387_v48, %v8302_v52  ;;  %v14355_v56 = vpop.f32.mrb[67].mxu0  ;;  %v14810_v34 = vpop.f32.mrb[55].mxu1  ;;  %v9918_v48 = vld [vmem:[#allocation8 + $0x1658] sm:$0xff] }
 0xa4e   : > { %16889 = vmatpush3.bf16.msra.mxu0 %v16888_v29  ;;  %v9916_v29 = vld [vmem:[#allocation8 + $0x1648] sm:$0xff]  ;;  %v9919_v56 = vld [vmem:[#allocation8 + $0x1660] sm:$0xff] }
 0xa4f   : > { %16890 = vmatprep.subr.bf16.mxu0 %v20858_v0  ;;  %v8480_v32 = vadd.f32 %v20506_v41, %v8391_v54  ;;  %v9733_v41 = vld [vmem:[#allocation8 + $0x1520] sm:$0xff]  ;;  %v16981_v26 = vpack.c.bf16 %v9916_v29, %v9915_v15  ;;  %v16984_v54 = vpack.c.bf16 %v9918_v48, %v9917_v4  ;;  %v9920_v34 = vld [vmem:[#allocation8 + $0x1668] sm:$0xff]  ;;  %v10268_v4 = vld [vmem:[%s20879_s26 + $0x10] sm:$0xff] }
 0xa50   : > { %v16927_v39 = vpack.c.bf16 %v9734_v21, %v9733_v41  ;;  %v16987_v10 = vpack.c.bf16 %v9920_v34, %v9919_v56  ;;  %v10087_v21 = vld [vmem:[#allocation8 + $0x1710] sm:$0xff]  ;;  %v10266_v29 = vld [vmem:[%s20879_s26] sm:$0xff] }
 0xa51   : > { %v10270_v34 = vld [vmem:[%s20879_s26 + $0x20] sm:$0xff] }
 0xa52   : > { %16892 = vmatpush3.bf16.msra.mxu0 %v16891_v22 }
 0xa53   : > { %16893 = vmatprep.subr.bf16.mxu0 %v20858_v0 }
 0xa56   : > { %16895 = vmatpush3.bf16.msra.mxu0 %v16894_v11 }
 0xa57   : > { %16920 = vmatprep.subr.bf16.mxu0 %v20858_v0 }
 0xa59   : > { %14844 = vmatmul.mubr.f32.vlgmr.msra.gmra.mrb[80].mxu0 %v9549_v61  ;;  %v10085_v61 = vld [vmem:[#allocation8 + $0x1700] sm:$0xff] }
 0xa5a   : > { %16922 = vmatpush3.bf16.msra.mxu0 %v16921_v35  ;;  %14913 = vmatprep.mubr.msk.f32.mxu0 %vm17721_vm0, %v20860_v46  ;;  %v9922_v35 = vld [vmem:[#allocation8 + $0x1678] sm:$0xff] }
 0xa5b   : > { %16923 = vmatprep.subr.bf16.mxu0 %v20858_v0  ;;  %v16990_v17 = vpack.c.bf16 %v9922_v35, %v9921_v49  ;;  %v10275_v49 = vld [vmem:[%s20879_s26 + $0x48] sm:$0xff] }
 0xa5e   : > { %16925 = vmatpush3.bf16.msra.mxu0 %v16924_v6  ;;  %v10086_v6 = vld [vmem:[#allocation8 + $0x1708] sm:$0xff] }
 0xa5f   : > { %16926 = vmatprep.subr.bf16.mxu0 %v20858_v0  ;;  %v17017_v41 = vpack.c.bf16 %v10086_v6, %v10085_v61 }
 0xa62   : > { %16928 = vmatpush3.bf16.msra.mxu0 %v16927_v39  ;;  %v10088_v39 = vld [vmem:[#allocation8 + $0x1718] sm:$0xff] }
 0xa63   : > { %16929 = vmatprep.subr.bf16.mxu0 %v20858_v0  ;;  %v17020_v24 = vpack.c.bf16 %v10088_v39, %v10087_v21 }
 0xa66   : > { %16931 = vmatpush3.bf16.msra.mxu0 %v16930_v45  ;;  %v10090_v45 = vld [vmem:[#allocation8 + $0x1728] sm:$0xff] }
 0xa67   : > { %16932 = vmatprep.subr.bf16.mxu0 %v20858_v0 }
 0xa6a   : > { %16934 = vmatpush3.bf16.msra.mxu0 %v16933_v37  ;;  %v10092_v37 = vld [vmem:[#allocation8 + $0x1738] sm:$0xff] }
 0xa6b   : > { %16935 = vmatprep.subr.bf16.mxu0 %v20858_v0  ;;  %v17026_v9 = vpack.c.bf16 %v10092_v37, %v10091_v55  ;;  %v10357_v37 = vld [vmem:[%s20880_s18 + $0x8] sm:$0xff] }
 0xa6c   : > { %v8565_v59 = vpop.f32.mrb[68].mxu0  ;;  %v20642_v16 = vpop.f32.mrb[56].mxu1 }
 0xa6d   : > { %v8569_v47 = vadd.f32 %v8565_v59, %v8480_v32  ;;  %v14425_v52 = vpop.f32.mrb[69].mxu0  ;;  %v14880_v44 = vpop.f32.mrb[57].mxu1  ;;  %v10096_v59 = vld [vmem:[#allocation8 + $0x1758] sm:$0xff] }
 0xa6e   : > { %16937 = vmatpush3.bf16.msra.mxu0 %v16936_v3  ;;  %v10094_v3 = vld [vmem:[#allocation8 + $0x1748] sm:$0xff]  ;;  %v10097_v52 = vld [vmem:[#allocation8 + $0x1760] sm:$0xff] }
 0xa6f   : > { %16938 = vmatprep.subr.bf16.mxu0 %v20858_v0  ;;  %v8658_v62 = vadd.f32 %v20532_v25, %v8569_v47  ;;  %v9911_v25 = vld [vmem:[#allocation8 + $0x1620] sm:$0xff]  ;;  %v17029_v12 = vpack.c.bf16 %v10094_v3, %v10093_v14  ;;  %v17032_v47 = vpack.c.bf16 %v10096_v59, %v10095_v57  ;;  %v10098_v44 = vld [vmem:[#allocation8 + $0x1768] sm:$0xff]  ;;  %v10361_v59 = vld [vmem:[%s20880_s18 + $0x28] sm:$0xff] }
 0xa70   : > { %v16975_v31 = vpack.c.bf16 %v9912_v63, %v9911_v25  ;;  %v17035_v51 = vpack.c.bf16 %v10098_v44, %v10097_v52  ;;  %v10359_v3 = vld [vmem:[%s20880_s18 + $0x18] sm:$0xff]  ;;  %v10360_v57 = vld [vmem:[%s20880_s18 + $0x20] sm:$0xff] }
 0xa72   : > { %16940 = vmatpush3.bf16.msra.mxu0 %v16939_v1 }
 0xa73   : > { %16941 = vmatprep.subr.bf16.mxu0 %v20858_v0 }
 0xa76   : > { %16943 = vmatpush3.bf16.msra.mxu0 %v16942_v43 }
 0xa77   : > { %16968 = vmatprep.subr.bf16.mxu0 %v20858_v0 }
 0xa79   : > { %14914 = vmatmul.mubr.f32.vlgmr.msra.gmra.mrb[82].mxu0 %v9727_v42  ;;  %v10083_v42 = vld [vmem:[#allocation2 + $0x2e] sm:$0x1] }
 0xa7a   : > { %16970 = vmatpush3.bf16.msra.mxu0 %v16969_v36  ;;  %14983 = vmatprep.mubr.msk.f32.mxu0 %vm17721_vm0, %v20860_v46  ;;  %v10100_v36 = vld [vmem:[#allocation8 + $0x1778] sm:$0xff] }
 0xa7b   : > { %16971 = vmatprep.subr.bf16.mxu0 %v20858_v0  ;;  %v17038_v60 = vpack.c.bf16 %v10100_v36, %v10099_v23 }
 0xa7e   : > { %16973 = vmatpush3.bf16.msra.mxu0 %v16972_v8 }
 0xa7f   : > { %16974 = vmatprep.subr.bf16.mxu0 %v20858_v0 }
 0xa82   : > { %16976 = vmatpush3.bf16.msra.mxu0 %v16975_v31 }
 0xa83   : > { %16977 = vmatprep.subr.bf16.mxu0 %v20858_v0 }
 0xa86   : > { %16979 = vmatpush3.bf16.msra.mxu0 %v16978_v38 }
 0xa87   : > { %16980 = vmatprep.subr.bf16.mxu0 %v20858_v0 }
 0xa8a   : > { %16982 = vmatpush3.bf16.msra.mxu0 %v16981_v26  ;;  %v10267_v26 = vld [vmem:[%s20879_s26 + $0x8] sm:$0xff] }
 0xa8b   : > { %16983 = vmatprep.subr.bf16.mxu0 %v20858_v0  ;;  %v17065_v48 = vpack.c.bf16 %v10267_v26, %v10266_v29  ;;  %v10282_v29 = vld [vmem:[#allocation11] sm:$0x1] }
 0xa8c   : > { %v8743_v22 = vpop.f32.mrb[70].mxu0  ;;  %v20655_v13 = vpop.f32.mrb[58].mxu1 }
 0xa8d   : > { %v8747_v50 = vadd.f32 %v8743_v22, %v8658_v62  ;;  %v14495_v32 = vpop.f32.mrb[71].mxu0  ;;  %v14950_v11 = vpop.f32.mrb[59].mxu1  ;;  %v10271_v22 = vld [vmem:[%s20879_s26 + $0x28] sm:$0xff] }
 0xa8e   : > { %16985 = vmatpush3.bf16.msra.mxu0 %v16984_v54  ;;  %v10273_v32 = vld [vmem:[%s20879_s26 + $0x38] sm:$0xff] }
 0xa8f   : > { %16986 = vmatprep.subr.bf16.mxu0 %v20858_v0  ;;  %v8836_v2 = vadd.f32 %v20558_v40, %v8747_v50  ;;  %v10089_v40 = vld [vmem:[#allocation8 + $0x1720] sm:$0xff]  ;;  %v17071_v50 = vpack.c.bf16 %v10271_v22, %v10270_v34 }
 0xa90   : > { %v17023_v27 = vpack.c.bf16 %v10090_v45, %v10089_v40  ;;  %v10280_v40 = vld [vmem:[%s20879_s26 + $0x70] sm:$0xff] }
 0xa92   : > { %16988 = vmatpush3.bf16.msra.mxu0 %v16987_v10  ;;  %v10274_v10 = vld [vmem:[%s20879_s26 + $0x40] sm:$0xff] }
 0xa93   : > { %16989 = vmatprep.subr.bf16.mxu0 %v20858_v0  ;;  %v17077_v35 = vpack.c.bf16 %v10275_v49, %v10274_v10  ;;  %v10444_v10 = vld [vmem:[#allocation16] sm:$0x1] }
 0xa96   : > { %16991 = vmatpush3.bf16.msra.mxu0 %v16990_v17  ;;  %v10277_v17 = vld [vmem:[%s20879_s26 + $0x58] sm:$0xff] }
 0xa97   : > { %17016 = vmatprep.subr.bf16.mxu0 %v20858_v0 }
 0xa99   : > { %14984 = vmatmul.mubr.f32.vlgmr.msra.gmra.mrb[84].mxu0 %v9905_v33  ;;  %v10278_v33 = vld [vmem:[%s20879_s26 + $0x60] sm:$0xff] }
 0xa9a   : > { %17018 = vmatpush3.bf16.msra.mxu0 %v17017_v41  ;;  %15053 = vmatprep.mubr.msk.f32.mxu0 %vm17721_vm0, %v20860_v46 }
 0xa9b   : > { %17019 = vmatprep.subr.bf16.mxu0 %v20858_v0 }
 0xa9e   : > { %17021 = vmatpush3.bf16.msra.mxu0 %v17020_v24  ;;  %v10279_v24 = vld [vmem:[%s20879_s26 + $0x68] sm:$0xff] }
 0xa9f   : > { %17022 = vmatprep.subr.bf16.mxu0 %v20858_v0  ;;  %v17083_v45 = vpack.c.bf16 %v10279_v24, %v10278_v33 }
 0xaa2   : > { %17024 = vmatpush3.bf16.msra.mxu0 %v17023_v27  ;;  %v10281_v27 = vld [vmem:[%s20879_s26 + $0x78] sm:$0xff] }
 0xaa3   : > { %17025 = vmatprep.subr.bf16.mxu0 %v20858_v0  ;;  %v17086_v55 = vpack.c.bf16 %v10281_v27, %v10280_v40 }
 0xaa6   : > { %17027 = vmatpush3.bf16.msra.mxu0 %v17026_v9  ;;  %v10358_v9 = vld [vmem:[%s20880_s18 + $0x10] sm:$0xff] }
 0xaa7   : > { %17028 = vmatprep.subr.bf16.mxu0 %v20858_v0 }
 0xaaa   : > { %17030 = vmatpush3.bf16.msra.mxu0 %v17029_v12  ;;  %v17092_v12 = vpack.c.bf16 %v10359_v3, %v10358_v9 }
 0xaab   : > { %17031 = vmatprep.subr.bf16.mxu0 %v20858_v0 }
 0xaac   : > { %v8921_v1 = vpop.f32.mrb[72].mxu0  ;;  %v20668_v58 = vpop.f32.mrb[60].mxu1 }
 0xaad   : > { %v8925_v19 = vadd.f32 %v8921_v1, %v8836_v2  ;;  %v14565_v62 = vpop.f32.mrb[73].mxu0  ;;  %v15020_v43 = vpop.f32.mrb[61].mxu1  ;;  %v10276_v2 = vld [vmem:[%s20879_s26 + $0x50] sm:$0xff] }
 0xaae   : > { %17033 = vmatpush3.bf16.msra.mxu0 %v17032_v47  ;;  %v17080_v61 = vpack.c.bf16 %v10277_v17, %v10276_v2  ;;  %v17095_v47 = vpack.c.bf16 %v10361_v59, %v10360_v57 }
 0xaaf   : > { %17034 = vmatprep.subr.bf16.mxu0 %v20858_v0  ;;  %v9014_v18 = vadd.f32 %v20584_v7, %v8925_v19 }
 0xab2   : > { %17036 = vmatpush3.bf16.msra.mxu0 %v17035_v51 }
 0xab3   : > { %17037 = vmatprep.subr.bf16.mxu0 %v20858_v0 }
 0xab6   : > { %17039 = vmatpush3.bf16.msra.mxu0 %v17038_v60 }
 0xab7   : > { %17064 = vmatprep.subr.bf16.mxu0 %v20858_v0 }
 0xab9   : > { %15054 = vmatmul.mubr.f32.vlgmr.msra.gmra.mrb[86].mxu0 %v10083_v42 }
 0xaba   : > { %15123 = vmatprep.mubr.msk.f32.mxu0 %vm17721_vm0, %v20860_v46  ;;  %17066 = vmatpush3.bf16.msra.mxu0 %v17065_v48 }
 0xabb   : > { %17067 = vmatprep.subr.bf16.mxu0 %v20858_v0 }
 0xacc   : > { %v9099_v8 = vpop.f32.mrb[74].mxu0  ;;  %v20676_v25 = vpop.f32.mrb[62].mxu1 }
 0xacd   : > { %v9103_v63 = vadd.f32 %v9099_v8, %v9014_v18  ;;  %v14635_v31 = vpop.f32.mrb[75].mxu0  ;;  %v15090_v5 = vpop.f32.mrb[63].mxu1 }
 0xace   : > { %v10261_v5 = vld [vmem:[#allocation10] sm:$0x1] }
 0xacf   : > { %v9192_v7 = vadd.f32 %v20603_v30, %v9103_v63  ;;  %v10269_v30 = vld [vmem:[%s20879_s26 + $0x18] sm:$0xff] }
 0xad0   : > { %v17068_v56 = vpack.c.bf16 %v10269_v30, %v10268_v4 }
 0xad2   : > { %17069 = vmatpush3.bf16.msra.mxu0 %v17068_v56  ;;  %v10443_v56 = vld [vmem:[#allocation14 + $0x8] sm:$0x3] }
 0xad3   : > { %17070 = vmatprep.subr.bf16.mxu0 %v20858_v0 }
 0xad6   : > { %17072 = vmatpush3.bf16.msra.mxu0 %v17071_v50 }
 0xad7   : > { %17073 = vmatprep.subr.bf16.mxu0 %v20858_v0 }
 0xaec   : > { %v9277_v20 = vpop.f32.mrb[76].mxu0 }
 0xaed   : > { %v9281_v38 = vadd.f32 %v9277_v20, %v9192_v7  ;;  %v14705_v15 = vpop.f32.mrb[77].mxu0 }
 0xaee   : > { %v10363_v15 = vld [vmem:[%s20880_s18 + $0x38] sm:$0xff] }
 0xaef   : > { %v9370_v54 = vadd.f32 %v20616_v53, %v9281_v38  ;;  %v10272_v53 = vld [vmem:[%s20879_s26 + $0x30] sm:$0xff] }
 0xaf0   : > { %v17074_v11 = vpack.c.bf16 %v10273_v32, %v10272_v53 }
 0xaf2   : > { %17075 = vmatpush3.bf16.msra.mxu0 %v17074_v11 }
 0xaf3   : > { %17076 = vmatprep.subr.bf16.mxu0 %v20858_v0 }
 0xaf6   : > { %17078 = vmatpush3.bf16.msra.mxu0 %v17077_v35 }
 0xaf7   : > { %17079 = vmatprep.subr.bf16.mxu0 %v20858_v0 }
 0xafa   : > { %17081 = vmatpush3.bf16.msra.mxu0 %v17080_v61 }
 0xafb   : > { %17082 = vmatprep.subr.bf16.mxu0 %v20858_v0 }
 0xafe   : > { %17084 = vmatpush3.bf16.msra.mxu0 %v17083_v45 }
 0xaff   : > { %17085 = vmatprep.subr.bf16.mxu0 %v20858_v0 }
 0xb02   : > { %17087 = vmatpush3.bf16.msra.mxu0 %v17086_v55 }
 0xb0c   : > { %v9455_v6 = vpop.f32.mrb[78].mxu0 }
 0xb0d   : > { %v9459_v41 = vadd.f32 %v9455_v6, %v9370_v54  ;;  %v14775_v21 = vpop.f32.mrb[79].mxu0  ;;  %v10442_v54 = vld [vmem:[#allocation14] sm:$0xff] }
 0xb0e   : > { %v17101_v34 = vpack.c.bf16 %v10443_v56, %v10442_v54 }
 0xb0f   : > { %v9548_v39 = vadd.f32 %v20629_v28, %v9459_v41  ;;  %v10356_v28 = vld [vmem:[%s20880_s18] sm:$0xff] }
 0xb10   : > { %v17089_v14 = vpack.c.bf16 %v10357_v37, %v10356_v28 }
 0xb12   : > { %17090 = vmatpush3.bf16.msra.mxu1 %v17089_v14 }
 0xb13   : > { %17091 = vmatprep.subr.bf16.mxu1 %v20858_v0 }
 0xb16   : > { %17093 = vmatpush3.bf16.msra.mxu1 %v17092_v12 }
 0xb17   : > { %17094 = vmatprep.subr.bf16.mxu1 %v20858_v0 }
 0xb1a   : > { %17096 = vmatpush3.bf16.msra.mxu1 %v17095_v47 }
 0xb1b   : > { %17097 = vmatprep.subr.bf16.mxu1 %v20858_v0 }
 0xb2c   : > { %v9633_v52 = vpop.f32.mrb[80].mxu0 }
 0xb2d   : > { %v9637_v44 = vadd.f32 %v9633_v52, %v9548_v39  ;;  %v14845_v1 = vpop.f32.mrb[81].mxu0 }
 0xb2f   : > { %v9726_v19 = vadd.f32 %v20642_v16, %v9637_v44 }
 0xb4c   : > { %v9811_v62 = vpop.f32.mrb[82].mxu0 }
 0xb4d   : > { %v9815_v43 = vadd.f32 %v9811_v62, %v9726_v19  ;;  %v14915_v51 = vpop.f32.mrb[83].mxu0 }
 0xb4f   : > { %v9904_v23 = vadd.f32 %v20655_v13, %v9815_v43  ;;  %v10362_v13 = vld [vmem:[%s20880_s18 + $0x30] sm:$0xff] }
 0xb6c   : > { %v9989_v36 = vpop.f32.mrb[84].mxu0 }
 0xb6d   : > { %v9993_v18 = vadd.f32 %v9989_v36, %v9904_v23  ;;  %v14985_v60 = vpop.f32.mrb[85].mxu0 }
 0xb6f   : > { %v10082_v42 = vadd.f32 %v20668_v58, %v9993_v18  ;;  %v17098_v58 = vpack.c.bf16 %v10363_v15, %v10362_v13 }
 0xb71   : > { %17099 = vmatpush3.bf16.msra.mxu1 %v17098_v58 }
 0xb72   : > { %17100 = vmatprep.subr.bf16.mxu1 %v20858_v0  ;;  %v10364_v0 = vld [vmem:[#allocation13] sm:$0x1] }
 0xb8c   : > { %v10167_v8 = vpop.f32.mrb[86].mxu0 }
 0xb8d   : > { %v10171_v63 = vadd.f32 %v10167_v8, %v10082_v42  ;;  %v15055_v31 = vpop.f32.mrb[87].mxu0 }
 0xb8f   : > { %v10260_v7 = vadd.f32 %v20676_v25, %v10171_v63 }
 0xb91   : > { %v10262_v20 = vadd.f32 %v10261_v5, %v10260_v7 }
 0xb93   : > { %vm10263_vm8 = vcmp.ge.f32.partialorder %v10262_v20, 0.0  ;;  %v10264_v38 = vmul.f32 0.33, %v10262_v20 }
 0xb95   : > { %v10265_v16 = vsel %vm10263_vm8, %v10262_v20, %v10264_v38 }
 0xb96   : > { %15124 = vmatmul.mubr.f32.vlgmr.msra.gmra.mrb[88].mxu0 %v10265_v16 }
 0xc69   : > { %v10349_v26 = vpop.f32.mrb[88].mxu0 }
 0xc6a   : > { %v10350_v25 = vadd.f32 %v10349_v26, %v10282_v29  ;;  %v15125_v4 = vpop.f32.mrb[89].mxu0 }
 0xc6c   : > { %vm10353_vm9 = vcmp.ge.f32.partialorder %v10350_v25, 0.0  ;;  %v10354_v48 = vmul.f32 0.33, %v10350_v25 }
 0xc6e   : > { %v10355_v30 = vsel %vm10353_vm9, %v10350_v25, %v10354_v48 }
 0xc6f   : > { %15143 = vmatmul.mubr.msk.f32.vlgmr.msra.gmra.mrb[64].mxu1 %vm10365_vm10, %v10355_v30 }
 0xc70   : > { %15149 = vmatprep.mubr.msk.f32.mxu1 %vm17721_vm0, %v20860_v46  ;;  %17103 = vmatpush3.bf16.msk.msra.mxu1 %vm17102_vm13, %v17101_v34 }
 0xd42   : > { %v10435_v22 = vpop.f32.mrb[64].mxu1 }
 0xd43   : > { %v10436_v50 = vadd.f32 %v10435_v22, %v10364_v0  ;;  %v15144_v53 = vpop.f32.mrb[65].mxu1 }
 0xd45   : > { %vm10439_vm14 = vcmp.ge.f32.partialorder %v10436_v50, 0.0  ;;  %v10440_v32 = vmul.f32 0.33, %v10436_v50 }
 0xd47   : > { %v10441_v11 = vsel %vm10439_vm14, %v10436_v50, %v10440_v32 }
 0xd48   : > { %15150 = vmatmul.mubr.msk.f32.vlgmr.msra.gmra.mrb[66].mxu1 %vm10445_vm15, %v10441_v11 }
 0xe1b   : > { %v10519_v46 = vpop.f32.mrb[66].mxu1 }
 0xe1c   : > { %v10520_v49 = vadd.f32 %v10519_v46, %v10444_v10  ;;  %v15151_v35 = vpop.f32.mrb[67].mxu1 }
 0xe1e   : > { %10523 = vst [vmem:[%s665_s19] sm:$0x1] %v10520_v49 }
 0xe1f PF: > { %s20882_s8 = sld [smem:[#allocation22_spill]] }
 0xe25   : > { %s32_s24 = sadd.s32 1, %s20882_s8  }
 0xe26   : > { %p29_p11 = scmp.ge.s32.totalorder %s32_s24, 4  }
 0xe28   :  { %31 = sbr.rel (!%p29_p11) target bundleno = 12 (0xc), region = 223 }
 0xe2f   :  { %10541 = vsyncpa [#allocation4], 1 }
 0xe30   :  { %10543 = vsyncpa [#allocation4 + $0x1], 1 }
 0xe31   :  { %10544 = vsyncpa [#allocation6], 1 }
 0xe32   :  { %10545 = vsyncpa [#allocation9], 1 }
 0xe33   :  { %10546 = vsyncpa [#allocation12], 1 }
 0xe34   :  { %10547 = vsyncpa [#allocation15], 1 }

</bundles_post_ra>
